<compile_context>
chip_gen: v6e
topology: v6e:2x2x1
jax: 0.10.0
libtpu: 0.0.40
codegen_flags: <defaults>
</compile_context>

<pallas_src>
import functools

import jax
import jax.numpy as jnp
from jax.experimental import pallas as pl
from jax.experimental.pallas import tpu as pltpu

_EPS = 1e-5


# --------------------------------------------------------------------------- #
# small helpers
# --------------------------------------------------------------------------- #
def _round_up(v, m):
    return ((v + m - 1) // m) * m


def _vmem_limit(block_bytes):
    # double-buffered blocks + slack, clamped well below v7x's 64 MiB VMEM
    return int(min(max(2 * block_bytes + (4 << 20), 16 << 20), 48 << 20))


def _moments(a):
    a = a.astype(jnp.float32)
    m = jnp.mean(a, axis=0)
    v = jnp.mean(jnp.square(a - m), axis=0)   # biased variance (BN training mode)
    return m, v


# --------------------------------------------------------------------------- #
# kernel 1: (BN folded into W/b) -> Linear -> optional LeakyReLU, row-tiled.
# Also emits per-tile partial sum / sum-of-squares of the output so the next
# layer's BN statistics need no extra HBM pass over the activation.
# --------------------------------------------------------------------------- #
def _mlp_epilogue(h, out_ref, st_ref, *, rows, tr, apply_act, leakiness):
    if apply_act:
        h = jnp.where(h >= 0.0, h, leakiness * h)
    out_ref[...] = h.astype(out_ref.dtype)
    # mask rows past the true row count (partial last tile holds garbage rows)
    rid = pl.program_id(0) * tr + jax.lax.broadcasted_iota(jnp.int32, (tr, 1), 0)
    hm = jnp.where(rid < rows, h, 0.0)
    st_ref[...] = jnp.concatenate(
        [jnp.sum(hm, axis=0, keepdims=True),
         jnp.sum(hm * hm, axis=0, keepdims=True)], axis=0)[None]


def _mlp1_kernel(x_ref, w_ref, b_ref, out_ref, st_ref,
                 *, rows, tr, apply_act, leakiness):
    h = jnp.dot(x_ref[...], w_ref[...],
                preferred_element_type=jnp.float32) + b_ref[...]
    _mlp_epilogue(h, out_ref, st_ref, rows=rows, tr=tr,
                  apply_act=apply_act, leakiness=leakiness)


def _mlp2_kernel(xa_ref, xb_ref, wa_ref, wb_ref, b_ref, out_ref, st_ref,
                 *, rows, tr, apply_act, leakiness):
    h = jnp.dot(xa_ref[...], wa_ref[...], preferred_element_type=jnp.float32)
    h = h + jnp.dot(xb_ref[...], wb_ref[...], preferred_element_type=jnp.float32)
    h = h + b_ref[...]
    _mlp_epilogue(h, out_ref, st_ref, rows=rows, tr=tr,
                  apply_act=apply_act, leakiness=leakiness)


def _bn_linear_act(pieces, bias, *, apply_act, leakiness, out_dtype):
    """Training-mode BatchNorm1d -> Linear -> optional LeakyReLU.

    pieces: list (len 1 or 2) of (x_bf16 [R, fin_i], mean_i, var_i, gamma_i,
    beta_i, W_i [fin_i, fout]); the feature-concatenation of the pieces is the
    layer input, with BN folded into W/b in the wrapper.
    Returns (out [R, fout] out_dtype, mean [fout], var [fout]) where mean/var are
    the batch statistics of the layer OUTPUT (for the next layer's BN).
    """
    rows = pieces[0][0].shape[0]
    fout = bias.shape[0]

    xs, ws = [], []
    b_tot = bias.astype(jnp.float32)
    for (xp, m, v, g, be, w) in pieces:
        scale = g * jax.lax.rsqrt(v + _EPS)
        shift = be - m * scale
        ws.append((scale[:, None] * w).astype(jnp.bfloat16))
        b_tot = b_tot + shift @ w
        xs.append(xp)
    b2 = b_tot.reshape(1, fout)

    tr = min(2048, _round_up(rows, 8))
    nt = -(-rows // tr)

    in_specs = [pl.BlockSpec((tr, xp.shape[1]), lambda i: (i, 0)) for xp in xs]
    in_specs += [pl.BlockSpec(w.shape, lambda i: (0, 0)) for w in ws]
    in_specs += [pl.BlockSpec((1, fout), lambda i: (0, 0))]
    out_specs = (pl.BlockSpec((tr, fout), lambda i: (i, 0)),
                 pl.BlockSpec((1, 2, fout), lambda i: (i, 0, 0)))
    out_shape = (jax.ShapeDtypeStruct((rows, fout), out_dtype),
                 jax.ShapeDtypeStruct((nt, 2, fout), jnp.float32))

    kern = _mlp1_kernel if len(pieces) == 1 else _mlp2_kernel
    kernel = functools.partial(kern, rows=rows, tr=tr,
                               apply_act=apply_act, leakiness=leakiness)

    blk_bytes = (sum(tr * xp.shape[1] * 2 for xp in xs)
                 + sum(int(w.size) * 2 for w in ws)
                 + tr * fout * jnp.dtype(out_dtype).itemsize
                 + 3 * fout * 4)

    out, stats = pl.pallas_call(
        kernel,
        out_shape=out_shape,
        grid=(nt,),
        in_specs=in_specs,
        out_specs=out_specs,
        compiler_params=pltpu.CompilerParams(
            dimension_semantics=("parallel",),
            vmem_limit_bytes=_vmem_limit(blk_bytes),
        ),
    )(*xs, *ws, b2)

    s = jnp.sum(stats, axis=0)                       # [2, fout]
    mean = s[0] / rows
    var = jnp.maximum(s[1] / rows - mean * mean, 0.0)
    return out, mean, var


# --------------------------------------------------------------------------- #
# kernel 2: CSR-style scatter-sum (edges pre-sorted by destination node).
# Grid is a flat list of (node_tile, edge_block) work items built in the
# wrapper; each node tile only visits its own edge blocks.  Mean = sum / count,
# with exact counts computed in the wrapper (no approximate reciprocal).
# --------------------------------------------------------------------------- #
def _scatter_sum_kernel(tiles_ref, blks_ref, valid_ref, col_ref, h_ref, out_ref,
                        *, tn):
    g = pl.program_id(0)
    tile = tiles_ref[g]

    @pl.when((g == 0) | (tile != tiles_ref[jnp.maximum(g - 1, 0)]))
    def _init():
        out_ref[...] = jnp.zeros_like(out_ref)

    @pl.when(valid_ref[g] == 1)
    def _accumulate():
        te = col_ref.shape[1]
        nid = tile * tn + jax.lax.broadcasted_iota(jnp.int32, (tn, te), 0)
        # -1 sentinel cols (padding) never match; cols owned by other node tiles
        # fall outside [tile*tn, tile*tn+tn) and never match either.
        onehot = (nid == col_ref[...]).astype(jnp.bfloat16)
        out_ref[...] += jnp.dot(onehot, h_ref[...],
                                preferred_element_type=jnp.float32)


def _scatter_mean(h, col, n_nodes, *, tn=256, te=256):
    """scatter_mean(h, col, dim=0, dim_size=n_nodes); h: [E, F] (bf16)."""
    n_edges, feat = h.shape
    tn = min(tn, _round_up(n_nodes, 8))

    # sort edges by destination node (XLA sort + gather, O(E log E + E*F))
    order = jnp.argsort(col)
    col_s = col[order].astype(jnp.int32)
    e_pad = _round_up(max(n_edges, 1), te)
    h_s = jnp.pad(h[order].astype(jnp.bfloat16), ((0, e_pad - n_edges), (0, 0)))
    col_pad = jnp.full((1, e_pad), -1, jnp.int32).at[0, :n_edges].set(col_s)

    nt = -(-n_nodes // tn)
    eb = e_pad // te

    # per node tile: range of edge blocks holding its (sorted) edges
    tids = jnp.arange(nt, dtype=jnp.int32)
    starts = jnp.searchsorted(col_s, tids * tn, side="left").astype(jnp.int32)
    ends = jnp.searchsorted(col_s, (tids + 1) * tn, side="left").astype(jnp.int32)
    first_blk = jnp.minimum(starts // te, eb - 1)
    last_blk = jnp.minimum(jnp.maximum(ends - 1, starts) // te, eb - 1)
    nblk = last_blk - first_blk + 1                                   # >= 1
    offs = jnp.concatenate([jnp.zeros((1,), jnp.int32), jnp.cumsum(nblk)])
    total = offs[nt]

    # flat work list: static upper bound (block shared by adjacent tiles at most)
    num_work = eb + nt - 1
    g = jnp.arange(num_work, dtype=jnp.int32)
    tile_g = jnp.clip(jnp.searchsorted(offs, g, side="right").astype(jnp.int32) - 1,
                      0, nt - 1)
    blk_g = first_blk[tile_g] + (g - offs[tile_g])
    valid = (g < total).astype(jnp.int32)
    # padding repeats the last real (tile, block) so its DMAs are elided and the
    # valid flag skips the (would-be double-counting) accumulation.
    tile_g = jnp.where(valid == 1, tile_g, nt - 1)
    blk_g = jnp.where(valid == 1, blk_g, last_blk[nt - 1])

    kernel = functools.partial(_scatter_sum_kernel, tn=tn)
    blk_bytes = te * 4 + te * feat * 2 + tn * feat * 4

    out_sum = pl.pallas_call(
        kernel,
        out_shape=jax.ShapeDtypeStruct((n_nodes, feat), jnp.float32),
        grid_spec=pltpu.PrefetchScalarGridSpec(
            num_scalar_prefetch=3,
            grid=(num_work,),
            in_specs=[
                pl.BlockSpec((1, te), lambda i, t, b, v: (0, b[i])),
                pl.BlockSpec((te, feat), lambda i, t, b, v: (b[i], 0)),
            ],
            out_specs=pl.BlockSpec((tn, feat), lambda i, t, b, v: (t[i], 0)),
        ),
        compiler_params=pltpu.CompilerParams(
            dimension_semantics=("arbitrary",),
            vmem_limit_bytes=_vmem_limit(blk_bytes),
        ),
    )(tile_g, blk_g, valid, col_pad, h_s)

    cnt = jax.ops.segment_sum(jnp.ones((n_edges,), jnp.float32),
                              col.astype(jnp.int32), num_segments=n_nodes)
    return out_sum / jnp.maximum(cnt, 1.0)[:, None]


# --------------------------------------------------------------------------- #
# parameters (PyTorch-default init; Linear weights stored transposed [in, out])
# --------------------------------------------------------------------------- #
def init_node_layer_params(key, node_in, node_out, edge_in):
    def linear(k, fin, fout):
        k1, k2 = jax.random.split(k)
        bound = 1.0 / (fin ** 0.5)
        w = jax.random.uniform(k1, (fin, fout), jnp.float32, -bound, bound)
        b = jax.random.uniform(k2, (fout,), jnp.float32, -bound, bound)
        return w, b

    def bn(f):
        return jnp.ones((f,), jnp.float32), jnp.zeros((f,), jnp.float32)

    keys = jax.random.split(key, 6)
    p = {}
    p["g1"], p["be1"] = bn(node_in + edge_in)
    p["w1"], p["b1"] = linear(keys[0], node_in + edge_in, node_out)
    p["g2"], p["be2"] = bn(node_out)
    p["w2"], p["b2"] = linear(keys[1], node_out, node_out)
    p["g3"], p["be3"] = bn(node_out)
    p["w3"], p["b3"] = linear(keys[2], node_out, node_out)
    p["g4"], p["be4"] = bn(node_in + node_out)
    p["w4"], p["b4"] = linear(keys[3], node_in + node_out, node_out)
    p["g5"], p["be5"] = bn(node_out)
    p["w5"], p["b5"] = linear(keys[4], node_out, node_out)
    p["g6"], p["be6"] = bn(node_out)
    p["w6"], p["b6"] = linear(keys[5], node_out, node_out)
    return p


# --------------------------------------------------------------------------- #
# forward
# --------------------------------------------------------------------------- #
def node_layer_forward(x, edge_index, edge_attr, u, batch, params, leakiness=0.0):
    """Pallas-backed NodeLayer forward (training-mode BatchNorm batch stats).

    `u` and `batch` are accepted for signature fidelity but, as in the PyTorch
    forward, unused."""
    del u, batch
    x = x.astype(jnp.float32)
    edge_attr = edge_attr.astype(jnp.float32)
    n_nodes, node_in = x.shape

    row = edge_index[0].astype(jnp.int32)
    col = edge_index[1].astype(jnp.int32)

    # ---- node_mlp_1 over edges ------------------------------------------- #
    # TODO(synk): x[row] stays on XLA's native gather; a per-row DMA gather inside
    #             the kernel is slower at these feature widths.
    xr = jnp.take(x, row, axis=0)                                   # [E, Fx] f32
    m_xr, v_xr = _moments(xr)
    m_ea, v_ea = _moments(edge_attr)
    h, m, v = _bn_linear_act(
        [(xr.astype(jnp.bfloat16), m_xr, v_xr,
          params["g1"][:node_in], params["be1"][:node_in], params["w1"][:node_in]),
         (edge_attr.astype(jnp.bfloat16), m_ea, v_ea,
          params["g1"][node_in:], params["be1"][node_in:], params["w1"][node_in:])],
        params["b1"], apply_act=True, leakiness=leakiness, out_dtype=jnp.bfloat16)
    h, m, v = _bn_linear_act(
        [(h, m, v, params["g2"], params["be2"], params["w2"])],
        params["b2"], apply_act=True, leakiness=leakiness, out_dtype=jnp.bfloat16)
    h, _, _ = _bn_linear_act(
        [(h, m, v, params["g3"], params["be3"], params["w3"])],
        params["b3"], apply_act=False, leakiness=leakiness, out_dtype=jnp.bfloat16)

    # ---- scatter_mean(h, col, dim_size=N) (CSR Pallas accumulation) ------- #
    agg = _scatter_mean(h, col, n_nodes)                            # [N, F_o] f32

    # ---- node_mlp_2 over nodes -------------------------------------------- #
    m_x, v_x = _moments(x)
    m_a, v_a = _moments(agg)
    h2, m, v = _bn_linear_act(
        [(x.astype(jnp.bfloat16), m_x, v_x,
          params["g4"][:node_in], params["be4"][:node_in], params["w4"][:node_in]),
         (agg.astype(jnp.bfloat16), m_a, v_a,
          params["g4"][node_in:], params["be4"][node_in:], params["w4"][node_in:])],
        params["b4"], apply_act=True, leakiness=leakiness, out_dtype=jnp.bfloat16)
    h2, m, v = _bn_linear_act(
        [(h2, m, v, params["g5"], params["be5"], params["w5"])],
        params["b5"], apply_act=True, leakiness=leakiness, out_dtype=jnp.bfloat16)
    h2, _, _ = _bn_linear_act(
        [(h2, m, v, params["g6"], params["be6"], params["w6"])],
        params["b6"], apply_act=False, leakiness=leakiness, out_dtype=jnp.float32)
    return h2


# --------------------------------------------------------------------------- #
# pure-JAX f32 reference (mirrors the PyTorch module in training mode)
# --------------------------------------------------------------------------- #
def _reference_forward(x, edge_index, edge_attr, params, leakiness=0.0):
    def bn(h, g, b):
        m = jnp.mean(h, axis=0)
        v = jnp.mean(jnp.square(h - m), axis=0)
        return (h - m) * jax.lax.rsqrt(v + _EPS) * g + b

    def lrelu(h):
        return jnp.where(h >= 0, h, leakiness * h)

    row, col = edge_index[0], edge_index[1]
    h = jnp.concatenate([x[row], edge_attr], axis=1)
    h = lrelu(bn(h, params["g1"], params["be1"]) @ params["w1"] + params["b1"])
    h = lrelu(bn(h, params["g2"], params["be2"]) @ params["w2"] + params["b2"])
    h = bn(h, params["g3"], params["be3"]) @ params["w3"] + params["b3"]
    num = jax.ops.segment_sum(h, col, num_segments=x.shape[0])
    cnt = jax.ops.segment_sum(jnp.ones((h.shape[0],), h.dtype), col,
                              num_segments=x.shape[0])
    agg = num / jnp.maximum(cnt, 1.0)[:, None]
    h2 = jnp.concatenate([x, agg], axis=1)
    h2 = lrelu(bn(h2, params["g4"], params["be4"]) @ params["w4"] + params["b4"])
    h2 = lrelu(bn(h2, params["g5"], params["be5"]) @ params["w5"] + params["b5"])
    h2 = bn(h2, params["g6"], params["be6"]) @ params["w6"] + params["b6"]
    return h2


if __name__ == "__main__":
    # Small deterministic example: exercises multiple node tiles, shared boundary
    # edge blocks, and nodes with zero incoming edges.
    N, E, B = 300, 800, 2
    node_in, edge_in, node_out, global_in = 16, 8, 32, 4

    key = jax.random.PRNGKey(0)
    k_x, k_ei, k_ea, k_u, k_b, k_p = jax.random.split(key, 6)

    x = jax.random.normal(k_x, (N, node_in), jnp.float32)
    edge_index = jax.random.randint(k_ei, (2, E), 0, N, jnp.int32)
    edge_attr = jax.random.normal(k_ea, (E, edge_in), jnp.float32)
    u = jax.random.normal(k_u, (B, global_in), jnp.float32)          # unused
    batch = jax.random.randint(k_b, (E,), 0, B, jnp.int32)           # unused

    params = init_node_layer_params(k_p, node_in, node_out, edge_in)

    fwd = jax.jit(functools.partial(node_layer_forward, leakiness=0.0))
    out = jax.block_until_ready(fwd(x, edge_index, edge_attr, u, batch, params))
    assert out.shape == (N, node_out) and out.dtype == jnp.float32

    # Loose tolerance: bf16 MXU operands + bf16 intermediate activations.
    ref = _reference_forward(x, edge_index, edge_attr, params, leakiness=0.0)
    err = float(jnp.max(jnp.abs(out - ref)))
    assert err < 0.25, f"max |pallas - reference| = {err}"
    print("KERNEL_OK")
</pallas_src>

<mosaic_0001>
module attributes {stable_mosaic.version = 11 : i64} {
  func.func private @main(%arg0: i32) attributes {dimension_semantics = [#tpu.dimension_semantics<core_parallel>], iteration_bounds = array<i64: 2>, tpu.core_type = #tpu.core_type<sc_scalar_subcore>, window_params = []} {
    return
  }
}

module attributes {stable_mosaic.version = 11 : i64} {
  func.func private @main(%arg0: i32) attributes {dimension_semantics = [#tpu.dimension_semantics<core_parallel>], iteration_bounds = array<i64: 2>, tpu.core_type = #tpu.core_type<sc_scalar_subcore>, window_params = []} {
    return
  }
}

module attributes {stable_mosaic.version = 11 : i64} {
  func.func @_mlp2_kernel(%arg0: i32, %arg1: memref<800x16xbf16, #tpu.memory_space<vmem>>, %arg2: memref<800x8xbf16, #tpu.memory_space<vmem>>, %arg3: memref<16x32xbf16, #tpu.memory_space<vmem>>, %arg4: memref<8x32xbf16, #tpu.memory_space<vmem>>, %arg5: memref<1x32xf32, #tpu.memory_space<vmem>>, %arg6: memref<800x32xbf16, #tpu.memory_space<vmem>>, %arg7: memref<1x2x32xf32, #tpu.memory_space<vmem>>) attributes {dimension_semantics = [#tpu.dimension_semantics<parallel>], iteration_bounds = array<i64: 1>, scalar_prefetch = 0 : i64, scratch_operands = 0 : i64, tpu.core_type = #tpu.core_type<tc>, window_params = [{transform_indices = @transform_0, window_bounds = array<i64: 800, 16>}, {transform_indices = @transform_1, window_bounds = array<i64: 800, 8>}, {pipeline_mode = #tpu.pipeline_mode<synchronous>, transform_indices = @transform_2, window_bounds = array<i64: 16, 32>}, {pipeline_mode = #tpu.pipeline_mode<synchronous>, transform_indices = @transform_3, window_bounds = array<i64: 8, 32>}, {pipeline_mode = #tpu.pipeline_mode<synchronous>, transform_indices = @transform_4, window_bounds = array<i64: 1, 32>}, {transform_indices = @transform_5, window_bounds = array<i64: 800, 32>}, {transform_indices = @transform_6, window_bounds = array<i64: 1, 2, 32>}]} {
    %c0 = arith.constant 0 : index
    %c0_0 = arith.constant 0 : index
    %0 = vector.load %arg1[%c0, %c0_0] : memref<800x16xbf16, #tpu.memory_space<vmem>>, vector<800x16xbf16>
    %c0_1 = arith.constant 0 : index
    %c0_2 = arith.constant 0 : index
    %1 = vector.load %arg3[%c0_1, %c0_2] : memref<16x32xbf16, #tpu.memory_space<vmem>>, vector<16x32xbf16>
    %cst = arith.constant dense<0.000000e+00> : vector<800x32xf32>
    %2 = tpu.matmul %0, %1, %cst {dimension_numbers = #tpu.dot_dimension_numbers<[1], [0], [0], [1], [0, 0, 1, 1], [], []>} : vector<800x16xbf16>, vector<16x32xbf16>, vector<800x32xf32> -> vector<800x32xf32>
    %c0_3 = arith.constant 0 : index
    %c0_4 = arith.constant 0 : index
    %3 = vector.load %arg2[%c0_3, %c0_4] : memref<800x8xbf16, #tpu.memory_space<vmem>>, vector<800x8xbf16>
    %c0_5 = arith.constant 0 : index
    %c0_6 = arith.constant 0 : index
    %4 = vector.load %arg4[%c0_5, %c0_6] : memref<8x32xbf16, #tpu.memory_space<vmem>>, vector<8x32xbf16>
    %cst_7 = arith.constant dense<0.000000e+00> : vector<800x32xf32>
    %5 = tpu.matmul %3, %4, %cst_7 {dimension_numbers = #tpu.dot_dimension_numbers<[1], [0], [0], [1], [0, 0, 1, 1], [], []>} : vector<800x8xbf16>, vector<8x32xbf16>, vector<800x32xf32> -> vector<800x32xf32>
    %6 = arith.addf %2, %5 : vector<800x32xf32>
    %c0_8 = arith.constant 0 : index
    %c0_9 = arith.constant 0 : index
    %7 = vector.load %arg5[%c0_8, %c0_9] : memref<1x32xf32, #tpu.memory_space<vmem>>, vector<1x32xf32>
    %8 = vector.broadcast %7 : vector<1x32xf32> to vector<800x32xf32>
    %9 = arith.addf %6, %8 : vector<800x32xf32>
    %cst_10 = arith.constant 0.000000e+00 : f32
    %10 = vector.broadcast %cst_10 : f32 to vector<800x32xf32>
    %11 = arith.cmpf oge, %9, %10 : vector<800x32xf32>
    %cst_11 = arith.constant 0.000000e+00 : f32
    %12 = vector.broadcast %cst_11 : f32 to vector<800x32xf32>
    %13 = arith.mulf %12, %9 : vector<800x32xf32>
    %14 = arith.select %11, %9, %13 : vector<800x32xi1>, vector<800x32xf32>
    %15 = arith.truncf %14 : vector<800x32xf32> to vector<800x32xbf16>
    %c0_12 = arith.constant 0 : index
    %c0_13 = arith.constant 0 : index
    %16 = vector.load %arg6[%c0_12, %c0_13] : memref<800x32xbf16, #tpu.memory_space<vmem>>, vector<800x32xbf16>
    tpu.vector_store %arg6[%c0_12, %c0_13], %15 {strides = array<i32>} : memref<800x32xbf16, #tpu.memory_space<vmem>>, vector<800x32xbf16>,
    %c800_i32 = arith.constant 800 : i32
    %17 = arith.muli %arg0, %c800_i32 : i32
    %18 = tpu.iota {dimensions = array<i32: 0>} : vector<800x1xi32>
    %19 = vector.broadcast %17 : i32 to vector<800x1xi32>
    %20 = arith.addi %19, %18 : vector<800x1xi32>
    %c800_i32_14 = arith.constant 800 : i32
    %21 = vector.broadcast %c800_i32_14 : i32 to vector<800x1xi32>
    %22 = arith.cmpi slt, %20, %21 : vector<800x1xi32>
    %cst_15 = arith.constant 0.000000e+00 : f32
    %23 = vector.shape_cast %22 : vector<800x1xi1> to vector<800x1xi1>
    %24 = vector.broadcast %23 : vector<800x1xi1> to vector<800x32xi1>
    %25 = vector.broadcast %cst_15 : f32 to vector<800x32xf32>
    %26 = arith.select %24, %14, %25 : vector<800x32xi1>, vector<800x32xf32>
    %cst_16 = arith.constant dense<0.000000e+00> : vector<32xf32>
    %27 = vector.multi_reduction <add>, %26, %cst_16 [0] : vector<800x32xf32> to vector<32xf32>
    %28 = vector.shape_cast %27 : vector<32xf32> to vector<1x32xf32>
    %29 = arith.mulf %26, %26 : vector<800x32xf32>
    %cst_17 = arith.constant dense<0.000000e+00> : vector<32xf32>
    %30 = vector.multi_reduction <add>, %29, %cst_17 [0] : vector<800x32xf32> to vector<32xf32>
    %31 = vector.shape_cast %30 : vector<32xf32> to vector<1x32xf32>
    %32 = tpu.concatenate %28, %31 in 0 : vector<1x32xf32>, vector<1x32xf32> -> vector<2x32xf32>
    %33 = vector.shape_cast %32 : vector<2x32xf32> to vector<1x2x32xf32>
    %c0_18 = arith.constant 0 : index
    %c0_19 = arith.constant 0 : index
    %c0_20 = arith.constant 0 : index
    %34 = vector.load %arg7[%c0_18, %c0_19, %c0_20] : memref<1x2x32xf32, #tpu.memory_space<vmem>>, vector<1x2x32xf32>
    tpu.vector_store %arg7[%c0_18, %c0_19, %c0_20], %33 {strides = array<i32>} : memref<1x2x32xf32, #tpu.memory_space<vmem>>, vector<1x2x32xf32>,
    return
  }
  func.func @transform_0(%arg0: i32) -> (i32, i32) {
    %c0_i32 = arith.constant 0 : i32
    %c0_i32_0 = arith.constant 0 : i32
    return %arg0, %c0_i32 : i32, i32
  }
  func.func @transform_1(%arg0: i32) -> (i32, i32) {
    %c0_i32 = arith.constant 0 : i32
    %c0_i32_0 = arith.constant 0 : i32
    return %arg0, %c0_i32 : i32, i32
  }
  func.func @transform_2(%arg0: i32) -> (i32, i32) {
    %c0_i32 = arith.constant 0 : i32
    %c0_i32_0 = arith.constant 0 : i32
    %c0_i32_1 = arith.constant 0 : i32
    return %c0_i32, %c0_i32_0 : i32, i32
  }
  func.func @transform_3(%arg0: i32) -> (i32, i32) {
    %c0_i32 = arith.constant 0 : i32
    %c0_i32_0 = arith.constant 0 : i32
    %c0_i32_1 = arith.constant 0 : i32
    return %c0_i32, %c0_i32_0 : i32, i32
  }
  func.func @transform_4(%arg0: i32) -> (i32, i32) {
    %c0_i32 = arith.constant 0 : i32
    %c0_i32_0 = arith.constant 0 : i32
    %c0_i32_1 = arith.constant 0 : i32
    return %c0_i32, %c0_i32_0 : i32, i32
  }
  func.func @transform_5(%arg0: i32) -> (i32, i32) {
    %c0_i32 = arith.constant 0 : i32
    %c0_i32_0 = arith.constant 0 : i32
    return %arg0, %c0_i32 : i32, i32
  }
  func.func @transform_6(%arg0: i32) -> (i32, i32, i32) {
    %c0_i32 = arith.constant 0 : i32
    %c0_i32_0 = arith.constant 0 : i32
    %c0_i32_1 = arith.constant 0 : i32
    return %arg0, %c0_i32, %c0_i32_0 : i32, i32, i32
  }
}

module attributes {stable_mosaic.version = 11 : i64} {
  func.func @_mlp1_kernel(%arg0: i32, %arg1: memref<800x32xbf16, #tpu.memory_space<vmem>>, %arg2: memref<32x32xbf16, #tpu.memory_space<vmem>>, %arg3: memref<1x32xf32, #tpu.memory_space<vmem>>, %arg4: memref<800x32xbf16, #tpu.memory_space<vmem>>, %arg5: memref<1x2x32xf32, #tpu.memory_space<vmem>>) attributes {dimension_semantics = [#tpu.dimension_semantics<parallel>], iteration_bounds = array<i64: 1>, scalar_prefetch = 0 : i64, scratch_operands = 0 : i64, tpu.core_type = #tpu.core_type<tc>, window_params = [{transform_indices = @transform_0, window_bounds = array<i64: 800, 32>}, {pipeline_mode = #tpu.pipeline_mode<synchronous>, transform_indices = @transform_1, window_bounds = array<i64: 32, 32>}, {pipeline_mode = #tpu.pipeline_mode<synchronous>, transform_indices = @transform_2, window_bounds = array<i64: 1, 32>}, {transform_indices = @transform_3, window_bounds = array<i64: 800, 32>}, {transform_indices = @transform_4, window_bounds = array<i64: 1, 2, 32>}]} {
    %c0 = arith.constant 0 : index
    %c0_0 = arith.constant 0 : index
    %0 = vector.load %arg1[%c0, %c0_0] : memref<800x32xbf16, #tpu.memory_space<vmem>>, vector<800x32xbf16>
    %c0_1 = arith.constant 0 : index
    %c0_2 = arith.constant 0 : index
    %1 = vector.load %arg2[%c0_1, %c0_2] : memref<32x32xbf16, #tpu.memory_space<vmem>>, vector<32x32xbf16>
    %cst = arith.constant dense<0.000000e+00> : vector<800x32xf32>
    %2 = tpu.matmul %0, %1, %cst {dimension_numbers = #tpu.dot_dimension_numbers<[1], [0], [0], [1], [0, 0, 1, 1], [], []>} : vector<800x32xbf16>, vector<32x32xbf16>, vector<800x32xf32> -> vector<800x32xf32>
    %c0_3 = arith.constant 0 : index
    %c0_4 = arith.constant 0 : index
    %3 = vector.load %arg3[%c0_3, %c0_4] : memref<1x32xf32, #tpu.memory_space<vmem>>, vector<1x32xf32>
    %4 = vector.broadcast %3 : vector<1x32xf32> to vector<800x32xf32>
    %5 = arith.addf %2, %4 : vector<800x32xf32>
    %cst_5 = arith.constant 0.000000e+00 : f32
    %6 = vector.broadcast %cst_5 : f32 to vector<800x32xf32>
    %7 = arith.cmpf oge, %5, %6 : vector<800x32xf32>
    %cst_6 = arith.constant 0.000000e+00 : f32
    %8 = vector.broadcast %cst_6 : f32 to vector<800x32xf32>
    %9 = arith.mulf %8, %5 : vector<800x32xf32>
    %10 = arith.select %7, %5, %9 : vector<800x32xi1>, vector<800x32xf32>
    %11 = arith.truncf %10 : vector<800x32xf32> to vector<800x32xbf16>
    %c0_7 = arith.constant 0 : index
    %c0_8 = arith.constant 0 : index
    %12 = vector.load %arg4[%c0_7, %c0_8] : memref<800x32xbf16, #tpu.memory_space<vmem>>, vector<800x32xbf16>
    tpu.vector_store %arg4[%c0_7, %c0_8], %11 {strides = array<i32>} : memref<800x32xbf16, #tpu.memory_space<vmem>>, vector<800x32xbf16>,
    %c800_i32 = arith.constant 800 : i32
    %13 = arith.muli %arg0, %c800_i32 : i32
    %14 = tpu.iota {dimensions = array<i32: 0>} : vector<800x1xi32>
    %15 = vector.broadcast %13 : i32 to vector<800x1xi32>
    %16 = arith.addi %15, %14 : vector<800x1xi32>
    %c800_i32_9 = arith.constant 800 : i32
    %17 = vector.broadcast %c800_i32_9 : i32 to vector<800x1xi32>
    %18 = arith.cmpi slt, %16, %17 : vector<800x1xi32>
    %cst_10 = arith.constant 0.000000e+00 : f32
    %19 = vector.shape_cast %18 : vector<800x1xi1> to vector<800x1xi1>
    %20 = vector.broadcast %19 : vector<800x1xi1> to vector<800x32xi1>
    %21 = vector.broadcast %cst_10 : f32 to vector<800x32xf32>
    %22 = arith.select %20, %10, %21 : vector<800x32xi1>, vector<800x32xf32>
    %cst_11 = arith.constant dense<0.000000e+00> : vector<32xf32>
    %23 = vector.multi_reduction <add>, %22, %cst_11 [0] : vector<800x32xf32> to vector<32xf32>
    %24 = vector.shape_cast %23 : vector<32xf32> to vector<1x32xf32>
    %25 = arith.mulf %22, %22 : vector<800x32xf32>
    %cst_12 = arith.constant dense<0.000000e+00> : vector<32xf32>
    %26 = vector.multi_reduction <add>, %25, %cst_12 [0] : vector<800x32xf32> to vector<32xf32>
    %27 = vector.shape_cast %26 : vector<32xf32> to vector<1x32xf32>
    %28 = tpu.concatenate %24, %27 in 0 : vector<1x32xf32>, vector<1x32xf32> -> vector<2x32xf32>
    %29 = vector.shape_cast %28 : vector<2x32xf32> to vector<1x2x32xf32>
    %c0_13 = arith.constant 0 : index
    %c0_14 = arith.constant 0 : index
    %c0_15 = arith.constant 0 : index
    %30 = vector.load %arg5[%c0_13, %c0_14, %c0_15] : memref<1x2x32xf32, #tpu.memory_space<vmem>>, vector<1x2x32xf32>
    tpu.vector_store %arg5[%c0_13, %c0_14, %c0_15], %29 {strides = array<i32>} : memref<1x2x32xf32, #tpu.memory_space<vmem>>, vector<1x2x32xf32>,
    return
  }
  func.func @transform_0(%arg0: i32) -> (i32, i32) {
    %c0_i32 = arith.constant 0 : i32
    %c0_i32_0 = arith.constant 0 : i32
    return %arg0, %c0_i32 : i32, i32
  }
  func.func @transform_1(%arg0: i32) -> (i32, i32) {
    %c0_i32 = arith.constant 0 : i32
    %c0_i32_0 = arith.constant 0 : i32
    %c0_i32_1 = arith.constant 0 : i32
    return %c0_i32, %c0_i32_0 : i32, i32
  }
  func.func @transform_2(%arg0: i32) -> (i32, i32) {
    %c0_i32 = arith.constant 0 : i32
    %c0_i32_0 = arith.constant 0 : i32
    %c0_i32_1 = arith.constant 0 : i32
    return %c0_i32, %c0_i32_0 : i32, i32
  }
  func.func @transform_3(%arg0: i32) -> (i32, i32) {
    %c0_i32 = arith.constant 0 : i32
    %c0_i32_0 = arith.constant 0 : i32
    return %arg0, %c0_i32 : i32, i32
  }
  func.func @transform_4(%arg0: i32) -> (i32, i32, i32) {
    %c0_i32 = arith.constant 0 : i32
    %c0_i32_0 = arith.constant 0 : i32
    %c0_i32_1 = arith.constant 0 : i32
    return %arg0, %c0_i32, %c0_i32_0 : i32, i32, i32
  }
}

module attributes {stable_mosaic.version = 11 : i64} {
  func.func @_mlp1_kernel(%arg0: i32, %arg1: memref<800x32xbf16, #tpu.memory_space<vmem>>, %arg2: memref<32x32xbf16, #tpu.memory_space<vmem>>, %arg3: memref<1x32xf32, #tpu.memory_space<vmem>>, %arg4: memref<800x32xbf16, #tpu.memory_space<vmem>>, %arg5: memref<1x2x32xf32, #tpu.memory_space<vmem>>) attributes {dimension_semantics = [#tpu.dimension_semantics<parallel>], iteration_bounds = array<i64: 1>, scalar_prefetch = 0 : i64, scratch_operands = 0 : i64, tpu.core_type = #tpu.core_type<tc>, window_params = [{transform_indices = @transform_0, window_bounds = array<i64: 800, 32>}, {pipeline_mode = #tpu.pipeline_mode<synchronous>, transform_indices = @transform_1, window_bounds = array<i64: 32, 32>}, {pipeline_mode = #tpu.pipeline_mode<synchronous>, transform_indices = @transform_2, window_bounds = array<i64: 1, 32>}, {transform_indices = @transform_3, window_bounds = array<i64: 800, 32>}, {transform_indices = @transform_4, window_bounds = array<i64: 1, 2, 32>}]} {
    %c0 = arith.constant 0 : index
    %c0_0 = arith.constant 0 : index
    %0 = vector.load %arg1[%c0, %c0_0] : memref<800x32xbf16, #tpu.memory_space<vmem>>, vector<800x32xbf16>
    %c0_1 = arith.constant 0 : index
    %c0_2 = arith.constant 0 : index
    %1 = vector.load %arg2[%c0_1, %c0_2] : memref<32x32xbf16, #tpu.memory_space<vmem>>, vector<32x32xbf16>
    %cst = arith.constant dense<0.000000e+00> : vector<800x32xf32>
    %2 = tpu.matmul %0, %1, %cst {dimension_numbers = #tpu.dot_dimension_numbers<[1], [0], [0], [1], [0, 0, 1, 1], [], []>} : vector<800x32xbf16>, vector<32x32xbf16>, vector<800x32xf32> -> vector<800x32xf32>
    %c0_3 = arith.constant 0 : index
    %c0_4 = arith.constant 0 : index
    %3 = vector.load %arg3[%c0_3, %c0_4] : memref<1x32xf32, #tpu.memory_space<vmem>>, vector<1x32xf32>
    %4 = vector.broadcast %3 : vector<1x32xf32> to vector<800x32xf32>
    %5 = arith.addf %2, %4 : vector<800x32xf32>
    %6 = arith.truncf %5 : vector<800x32xf32> to vector<800x32xbf16>
    %c0_5 = arith.constant 0 : index
    %c0_6 = arith.constant 0 : index
    %7 = vector.load %arg4[%c0_5, %c0_6] : memref<800x32xbf16, #tpu.memory_space<vmem>>, vector<800x32xbf16>
    tpu.vector_store %arg4[%c0_5, %c0_6], %6 {strides = array<i32>} : memref<800x32xbf16, #tpu.memory_space<vmem>>, vector<800x32xbf16>,
    %c800_i32 = arith.constant 800 : i32
    %8 = arith.muli %arg0, %c800_i32 : i32
    %9 = tpu.iota {dimensions = array<i32: 0>} : vector<800x1xi32>
    %10 = vector.broadcast %8 : i32 to vector<800x1xi32>
    %11 = arith.addi %10, %9 : vector<800x1xi32>
    %c800_i32_7 = arith.constant 800 : i32
    %12 = vector.broadcast %c800_i32_7 : i32 to vector<800x1xi32>
    %13 = arith.cmpi slt, %11, %12 : vector<800x1xi32>
    %cst_8 = arith.constant 0.000000e+00 : f32
    %14 = vector.shape_cast %13 : vector<800x1xi1> to vector<800x1xi1>
    %15 = vector.broadcast %14 : vector<800x1xi1> to vector<800x32xi1>
    %16 = vector.broadcast %cst_8 : f32 to vector<800x32xf32>
    %17 = arith.select %15, %5, %16 : vector<800x32xi1>, vector<800x32xf32>
    %cst_9 = arith.constant dense<0.000000e+00> : vector<32xf32>
    %18 = vector.multi_reduction <add>, %17, %cst_9 [0] : vector<800x32xf32> to vector<32xf32>
    %19 = vector.shape_cast %18 : vector<32xf32> to vector<1x32xf32>
    %20 = arith.mulf %17, %17 : vector<800x32xf32>
    %cst_10 = arith.constant dense<0.000000e+00> : vector<32xf32>
    %21 = vector.multi_reduction <add>, %20, %cst_10 [0] : vector<800x32xf32> to vector<32xf32>
    %22 = vector.shape_cast %21 : vector<32xf32> to vector<1x32xf32>
    %23 = tpu.concatenate %19, %22 in 0 : vector<1x32xf32>, vector<1x32xf32> -> vector<2x32xf32>
    %24 = vector.shape_cast %23 : vector<2x32xf32> to vector<1x2x32xf32>
    %c0_11 = arith.constant 0 : index
    %c0_12 = arith.constant 0 : index
    %c0_13 = arith.constant 0 : index
    %25 = vector.load %arg5[%c0_11, %c0_12, %c0_13] : memref<1x2x32xf32, #tpu.memory_space<vmem>>, vector<1x2x32xf32>
    tpu.vector_store %arg5[%c0_11, %c0_12, %c0_13], %24 {strides = array<i32>} : memref<1x2x32xf32, #tpu.memory_space<vmem>>, vector<1x2x32xf32>,
    return
  }
  func.func @transform_0(%arg0: i32) -> (i32, i32) {
    %c0_i32 = arith.constant 0 : i32
    %c0_i32_0 = arith.constant 0 : i32
    return %arg0, %c0_i32 : i32, i32
  }
  func.func @transform_1(%arg0: i32) -> (i32, i32) {
    %c0_i32 = arith.constant 0 : i32
    %c0_i32_0 = arith.constant 0 : i32
    %c0_i32_1 = arith.constant 0 : i32
    return %c0_i32, %c0_i32_0 : i32, i32
  }
  func.func @transform_2(%arg0: i32) -> (i32, i32) {
    %c0_i32 = arith.constant 0 : i32
    %c0_i32_0 = arith.constant 0 : i32
    %c0_i32_1 = arith.constant 0 : i32
    return %c0_i32, %c0_i32_0 : i32, i32
  }
  func.func @transform_3(%arg0: i32) -> (i32, i32) {
    %c0_i32 = arith.constant 0 : i32
    %c0_i32_0 = arith.constant 0 : i32
    return %arg0, %c0_i32 : i32, i32
  }
  func.func @transform_4(%arg0: i32) -> (i32, i32, i32) {
    %c0_i32 = arith.constant 0 : i32
    %c0_i32_0 = arith.constant 0 : i32
    %c0_i32_1 = arith.constant 0 : i32
    return %arg0, %c0_i32, %c0_i32_0 : i32, i32, i32
  }
}

module attributes {stable_mosaic.version = 11 : i64} {
  func.func @_scatter_sum_kernel(%arg0: i32, %arg1: memref<5xi32, #tpu.memory_space<smem>>, %arg2: memref<5xi32, #tpu.memory_space<smem>>, %arg3: memref<5xi32, #tpu.memory_space<smem>>, %arg4: memref<1x256xi32, #tpu.memory_space<vmem>>, %arg5: memref<256x32xbf16, #tpu.memory_space<vmem>>, %arg6: memref<256x32xf32, #tpu.memory_space<vmem>>) attributes {dimension_semantics = [#tpu.dimension_semantics<arbitrary>], iteration_bounds = array<i64: 5>, scalar_prefetch = 3 : i64, scratch_operands = 0 : i64, tpu.core_type = #tpu.core_type<tc>, window_params = [{transform_indices = @transform_0, window_bounds = array<i64: 1, 256>}, {transform_indices = @transform_1, window_bounds = array<i64: 256, 32>}, {transform_indices = @transform_2, window_bounds = array<i64: 256, 32>}]} {
    %0 = arith.index_cast %arg0 : i32 to index
    %1 = memref.load %arg1[%0] : memref<5xi32, #tpu.memory_space<smem>>
    %c0_i32 = arith.constant 0 : i32
    %2 = arith.cmpi eq, %arg0, %c0_i32 : i32
    %c1_i32 = arith.constant 1 : i32
    %3 = arith.subi %arg0, %c1_i32 : i32
    %c0_i32_0 = arith.constant 0 : i32
    %4 = arith.maxsi %3, %c0_i32_0 : i32
    %5 = arith.index_cast %4 : i32 to index
    %6 = memref.load %arg1[%5] : memref<5xi32, #tpu.memory_space<smem>>
    %7 = arith.cmpi ne, %1, %6 : i32
    %8 = arith.ori %2, %7 : i1
    %9 = arith.extui %8 : i1 to i32
    %c0_i32_1 = arith.constant 0 : i32
    %10 = arith.cmpi ne, %9, %c0_i32_1 : i32
    scf.if %10 {
      %cst = arith.constant 0.000000e+00 : f32
      %16 = vector.broadcast %cst : f32 to vector<256x32xf32>
      %c0 = arith.constant 0 : index
      %c0_4 = arith.constant 0 : index
      %17 = vector.load %arg6[%c0, %c0_4] : memref<256x32xf32, #tpu.memory_space<vmem>>, vector<256x32xf32>
      tpu.vector_store %arg6[%c0, %c0_4], %16 {strides = array<i32>} : memref<256x32xf32, #tpu.memory_space<vmem>>, vector<256x32xf32>,
    } else {
    }
    %11 = arith.index_cast %arg0 : i32 to index
    %12 = memref.load %arg3[%11] : memref<5xi32, #tpu.memory_space<smem>>
    %c1_i32_2 = arith.constant 1 : i32
    %13 = arith.cmpi eq, %12, %c1_i32_2 : i32
    %14 = arith.extui %13 : i1 to i32
    %c0_i32_3 = arith.constant 0 : i32
    %15 = arith.cmpi ne, %14, %c0_i32_3 : i32
    scf.if %15 {
      %c256_i32 = arith.constant 256 : i32
      %16 = arith.muli %1, %c256_i32 : i32
      %17 = tpu.iota {dimensions = array<i32: 0>} : vector<256x256xi32>
      %18 = vector.broadcast %16 : i32 to vector<256x256xi32>
      %19 = arith.addi %18, %17 : vector<256x256xi32>
      %c0 = arith.constant 0 : index
      %c0_4 = arith.constant 0 : index
      %20 = vector.load %arg4[%c0, %c0_4] : memref<1x256xi32, #tpu.memory_space<vmem>>, vector<1x256xi32>
      %21 = vector.broadcast %20 : vector<1x256xi32> to vector<256x256xi32>
      %22 = arith.cmpi eq, %19, %21 : vector<256x256xi32>
      %23 = arith.extui %22 : vector<256x256xi1> to vector<256x256xi32>
      %24 = arith.sitofp %23 : vector<256x256xi32> to vector<256x256xf32>
      %25 = arith.truncf %24 : vector<256x256xf32> to vector<256x256xbf16>
      %c0_5 = arith.constant 0 : index
      %c0_6 = arith.constant 0 : index
      %26 = vector.load %arg6[%c0_5, %c0_6] : memref<256x32xf32, #tpu.memory_space<vmem>>, vector<256x32xf32>
      %c0_7 = arith.constant 0 : index
      %c0_8 = arith.constant 0 : index
      %27 = vector.load %arg5[%c0_7, %c0_8] : memref<256x32xbf16, #tpu.memory_space<vmem>>, vector<256x32xbf16>
      %cst = arith.constant dense<0.000000e+00> : vector<256x32xf32>
      %28 = tpu.matmul %25, %27, %cst {dimension_numbers = #tpu.dot_dimension_numbers<[1], [0], [0], [1], [0, 0, 1, 1], [], []>} : vector<256x256xbf16>, vector<256x32xbf16>, vector<256x32xf32> -> vector<256x32xf32>
      %29 = arith.addf %26, %28 : vector<256x32xf32>
      %c0_9 = arith.constant 0 : index
      %c0_10 = arith.constant 0 : index
      %30 = vector.load %arg6[%c0_9, %c0_10] : memref<256x32xf32, #tpu.memory_space<vmem>>, vector<256x32xf32>
      tpu.vector_store %arg6[%c0_9, %c0_10], %29 {strides = array<i32>} : memref<256x32xf32, #tpu.memory_space<vmem>>, vector<256x32xf32>,
    } else {
    }
    return
  }
  func.func @transform_0(%arg0: i32, %arg1: memref<5xi32, #tpu.memory_space<smem>>, %arg2: memref<5xi32, #tpu.memory_space<smem>>, %arg3: memref<5xi32, #tpu.memory_space<smem>>) -> (i32, i32) {
    %0 = arith.index_cast %arg0 : i32 to index
    %1 = memref.load %arg2[%0] : memref<5xi32, #tpu.memory_space<smem>>
    %c0_i32 = arith.constant 0 : i32
    %c0_i32_0 = arith.constant 0 : i32
    return %c0_i32, %1 : i32, i32
  }
  func.func @transform_1(%arg0: i32, %arg1: memref<5xi32, #tpu.memory_space<smem>>, %arg2: memref<5xi32, #tpu.memory_space<smem>>, %arg3: memref<5xi32, #tpu.memory_space<smem>>) -> (i32, i32) {
    %0 = arith.index_cast %arg0 : i32 to index
    %1 = memref.load %arg2[%0] : memref<5xi32, #tpu.memory_space<smem>>
    %c0_i32 = arith.constant 0 : i32
    %c0_i32_0 = arith.constant 0 : i32
    return %1, %c0_i32 : i32, i32
  }
  func.func @transform_2(%arg0: i32, %arg1: memref<5xi32, #tpu.memory_space<smem>>, %arg2: memref<5xi32, #tpu.memory_space<smem>>, %arg3: memref<5xi32, #tpu.memory_space<smem>>) -> (i32, i32) {
    %0 = arith.index_cast %arg0 : i32 to index
    %1 = memref.load %arg1[%0] : memref<5xi32, #tpu.memory_space<smem>>
    %c0_i32 = arith.constant 0 : i32
    %c0_i32_0 = arith.constant 0 : i32
    return %1, %c0_i32 : i32, i32
  }
}

module attributes {stable_mosaic.version = 11 : i64} {
  func.func @_mlp1_kernel(%arg0: i32, %arg1: memref<304x32xbf16, #tpu.memory_space<vmem>>, %arg2: memref<32x32xbf16, #tpu.memory_space<vmem>>, %arg3: memref<1x32xf32, #tpu.memory_space<vmem>>, %arg4: memref<304x32xf32, #tpu.memory_space<vmem>>, %arg5: memref<1x2x32xf32, #tpu.memory_space<vmem>>) attributes {dimension_semantics = [#tpu.dimension_semantics<parallel>], iteration_bounds = array<i64: 1>, scalar_prefetch = 0 : i64, scratch_operands = 0 : i64, tpu.core_type = #tpu.core_type<tc>, window_params = [{transform_indices = @transform_0, window_bounds = array<i64: 304, 32>}, {pipeline_mode = #tpu.pipeline_mode<synchronous>, transform_indices = @transform_1, window_bounds = array<i64: 32, 32>}, {pipeline_mode = #tpu.pipeline_mode<synchronous>, transform_indices = @transform_2, window_bounds = array<i64: 1, 32>}, {transform_indices = @transform_3, window_bounds = array<i64: 304, 32>}, {transform_indices = @transform_4, window_bounds = array<i64: 1, 2, 32>}]} {
    %c0 = arith.constant 0 : index
    %c0_0 = arith.constant 0 : index
    %0 = vector.load %arg1[%c0, %c0_0] : memref<304x32xbf16, #tpu.memory_space<vmem>>, vector<304x32xbf16>
    %c0_1 = arith.constant 0 : index
    %c0_2 = arith.constant 0 : index
    %1 = vector.load %arg2[%c0_1, %c0_2] : memref<32x32xbf16, #tpu.memory_space<vmem>>, vector<32x32xbf16>
    %cst = arith.constant dense<0.000000e+00> : vector<304x32xf32>
    %2 = tpu.matmul %0, %1, %cst {dimension_numbers = #tpu.dot_dimension_numbers<[1], [0], [0], [1], [0, 0, 1, 1], [], []>} : vector<304x32xbf16>, vector<32x32xbf16>, vector<304x32xf32> -> vector<304x32xf32>
    %c0_3 = arith.constant 0 : index
    %c0_4 = arith.constant 0 : index
    %3 = vector.load %arg3[%c0_3, %c0_4] : memref<1x32xf32, #tpu.memory_space<vmem>>, vector<1x32xf32>
    %4 = vector.broadcast %3 : vector<1x32xf32> to vector<304x32xf32>
    %5 = arith.addf %2, %4 : vector<304x32xf32>
    %c0_5 = arith.constant 0 : index
    %c0_6 = arith.constant 0 : index
    %6 = vector.load %arg4[%c0_5, %c0_6] : memref<304x32xf32, #tpu.memory_space<vmem>>, vector<304x32xf32>
    tpu.vector_store %arg4[%c0_5, %c0_6], %5 {strides = array<i32>} : memref<304x32xf32, #tpu.memory_space<vmem>>, vector<304x32xf32>,
    %c304_i32 = arith.constant 304 : i32
    %7 = arith.muli %arg0, %c304_i32 : i32
    %8 = tpu.iota {dimensions = array<i32: 0>} : vector<304x1xi32>
    %9 = vector.broadcast %7 : i32 to vector<304x1xi32>
    %10 = arith.addi %9, %8 : vector<304x1xi32>
    %c300_i32 = arith.constant 300 : i32
    %11 = vector.broadcast %c300_i32 : i32 to vector<304x1xi32>
    %12 = arith.cmpi slt, %10, %11 : vector<304x1xi32>
    %cst_7 = arith.constant 0.000000e+00 : f32
    %13 = vector.shape_cast %12 : vector<304x1xi1> to vector<304x1xi1>
    %14 = vector.broadcast %13 : vector<304x1xi1> to vector<304x32xi1>
    %15 = vector.broadcast %cst_7 : f32 to vector<304x32xf32>
    %16 = arith.select %14, %5, %15 : vector<304x32xi1>, vector<304x32xf32>
    %cst_8 = arith.constant dense<0.000000e+00> : vector<32xf32>
    %17 = vector.multi_reduction <add>, %16, %cst_8 [0] : vector<304x32xf32> to vector<32xf32>
    %18 = vector.shape_cast %17 : vector<32xf32> to vector<1x32xf32>
    %19 = arith.mulf %16, %16 : vector<304x32xf32>
    %cst_9 = arith.constant dense<0.000000e+00> : vector<32xf32>
    %20 = vector.multi_reduction <add>, %19, %cst_9 [0] : vector<304x32xf32> to vector<32xf32>
    %21 = vector.shape_cast %20 : vector<32xf32> to vector<1x32xf32>
    %22 = tpu.concatenate %18, %21 in 0 : vector<1x32xf32>, vector<1x32xf32> -> vector<2x32xf32>
    %23 = vector.shape_cast %22 : vector<2x32xf32> to vector<1x2x32xf32>
    %c0_10 = arith.constant 0 : index
    %c0_11 = arith.constant 0 : index
    %c0_12 = arith.constant 0 : index
    %24 = vector.load %arg5[%c0_10, %c0_11, %c0_12] : memref<1x2x32xf32, #tpu.memory_space<vmem>>, vector<1x2x32xf32>
    tpu.vector_store %arg5[%c0_10, %c0_11, %c0_12], %23 {strides = array<i32>} : memref<1x2x32xf32, #tpu.memory_space<vmem>>, vector<1x2x32xf32>,
    return
  }
  func.func @transform_0(%arg0: i32) -> (i32, i32) {
    %c0_i32 = arith.constant 0 : i32
    %c0_i32_0 = arith.constant 0 : i32
    return %arg0, %c0_i32 : i32, i32
  }
  func.func @transform_1(%arg0: i32) -> (i32, i32) {
    %c0_i32 = arith.constant 0 : i32
    %c0_i32_0 = arith.constant 0 : i32
    %c0_i32_1 = arith.constant 0 : i32
    return %c0_i32, %c0_i32_0 : i32, i32
  }
  func.func @transform_2(%arg0: i32) -> (i32, i32) {
    %c0_i32 = arith.constant 0 : i32
    %c0_i32_0 = arith.constant 0 : i32
    %c0_i32_1 = arith.constant 0 : i32
    return %c0_i32, %c0_i32_0 : i32, i32
  }
  func.func @transform_3(%arg0: i32) -> (i32, i32) {
    %c0_i32 = arith.constant 0 : i32
    %c0_i32_0 = arith.constant 0 : i32
    return %arg0, %c0_i32 : i32, i32
  }
  func.func @transform_4(%arg0: i32) -> (i32, i32, i32) {
    %c0_i32 = arith.constant 0 : i32
    %c0_i32_0 = arith.constant 0 : i32
    %c0_i32_1 = arith.constant 0 : i32
    return %arg0, %c0_i32, %c0_i32_0 : i32, i32, i32
  }
}

module attributes {stable_mosaic.version = 11 : i64} {
  func.func @_mlp1_kernel(%arg0: i32, %arg1: memref<304x32xbf16, #tpu.memory_space<vmem>>, %arg2: memref<32x32xbf16, #tpu.memory_space<vmem>>, %arg3: memref<1x32xf32, #tpu.memory_space<vmem>>, %arg4: memref<304x32xbf16, #tpu.memory_space<vmem>>, %arg5: memref<1x2x32xf32, #tpu.memory_space<vmem>>) attributes {dimension_semantics = [#tpu.dimension_semantics<parallel>], iteration_bounds = array<i64: 1>, scalar_prefetch = 0 : i64, scratch_operands = 0 : i64, tpu.core_type = #tpu.core_type<tc>, window_params = [{transform_indices = @transform_0, window_bounds = array<i64: 304, 32>}, {pipeline_mode = #tpu.pipeline_mode<synchronous>, transform_indices = @transform_1, window_bounds = array<i64: 32, 32>}, {pipeline_mode = #tpu.pipeline_mode<synchronous>, transform_indices = @transform_2, window_bounds = array<i64: 1, 32>}, {transform_indices = @transform_3, window_bounds = array<i64: 304, 32>}, {transform_indices = @transform_4, window_bounds = array<i64: 1, 2, 32>}]} {
    %c0 = arith.constant 0 : index
    %c0_0 = arith.constant 0 : index
    %0 = vector.load %arg1[%c0, %c0_0] : memref<304x32xbf16, #tpu.memory_space<vmem>>, vector<304x32xbf16>
    %c0_1 = arith.constant 0 : index
    %c0_2 = arith.constant 0 : index
    %1 = vector.load %arg2[%c0_1, %c0_2] : memref<32x32xbf16, #tpu.memory_space<vmem>>, vector<32x32xbf16>
    %cst = arith.constant dense<0.000000e+00> : vector<304x32xf32>
    %2 = tpu.matmul %0, %1, %cst {dimension_numbers = #tpu.dot_dimension_numbers<[1], [0], [0], [1], [0, 0, 1, 1], [], []>} : vector<304x32xbf16>, vector<32x32xbf16>, vector<304x32xf32> -> vector<304x32xf32>
    %c0_3 = arith.constant 0 : index
    %c0_4 = arith.constant 0 : index
    %3 = vector.load %arg3[%c0_3, %c0_4] : memref<1x32xf32, #tpu.memory_space<vmem>>, vector<1x32xf32>
    %4 = vector.broadcast %3 : vector<1x32xf32> to vector<304x32xf32>
    %5 = arith.addf %2, %4 : vector<304x32xf32>
    %cst_5 = arith.constant 0.000000e+00 : f32
    %6 = vector.broadcast %cst_5 : f32 to vector<304x32xf32>
    %7 = arith.cmpf oge, %5, %6 : vector<304x32xf32>
    %cst_6 = arith.constant 0.000000e+00 : f32
    %8 = vector.broadcast %cst_6 : f32 to vector<304x32xf32>
    %9 = arith.mulf %8, %5 : vector<304x32xf32>
    %10 = arith.select %7, %5, %9 : vector<304x32xi1>, vector<304x32xf32>
    %11 = arith.truncf %10 : vector<304x32xf32> to vector<304x32xbf16>
    %c0_7 = arith.constant 0 : index
    %c0_8 = arith.constant 0 : index
    %12 = vector.load %arg4[%c0_7, %c0_8] : memref<304x32xbf16, #tpu.memory_space<vmem>>, vector<304x32xbf16>
    tpu.vector_store %arg4[%c0_7, %c0_8], %11 {strides = array<i32>} : memref<304x32xbf16, #tpu.memory_space<vmem>>, vector<304x32xbf16>,
    %c304_i32 = arith.constant 304 : i32
    %13 = arith.muli %arg0, %c304_i32 : i32
    %14 = tpu.iota {dimensions = array<i32: 0>} : vector<304x1xi32>
    %15 = vector.broadcast %13 : i32 to vector<304x1xi32>
    %16 = arith.addi %15, %14 : vector<304x1xi32>
    %c300_i32 = arith.constant 300 : i32
    %17 = vector.broadcast %c300_i32 : i32 to vector<304x1xi32>
    %18 = arith.cmpi slt, %16, %17 : vector<304x1xi32>
    %cst_9 = arith.constant 0.000000e+00 : f32
    %19 = vector.shape_cast %18 : vector<304x1xi1> to vector<304x1xi1>
    %20 = vector.broadcast %19 : vector<304x1xi1> to vector<304x32xi1>
    %21 = vector.broadcast %cst_9 : f32 to vector<304x32xf32>
    %22 = arith.select %20, %10, %21 : vector<304x32xi1>, vector<304x32xf32>
    %cst_10 = arith.constant dense<0.000000e+00> : vector<32xf32>
    %23 = vector.multi_reduction <add>, %22, %cst_10 [0] : vector<304x32xf32> to vector<32xf32>
    %24 = vector.shape_cast %23 : vector<32xf32> to vector<1x32xf32>
    %25 = arith.mulf %22, %22 : vector<304x32xf32>
    %cst_11 = arith.constant dense<0.000000e+00> : vector<32xf32>
    %26 = vector.multi_reduction <add>, %25, %cst_11 [0] : vector<304x32xf32> to vector<32xf32>
    %27 = vector.shape_cast %26 : vector<32xf32> to vector<1x32xf32>
    %28 = tpu.concatenate %24, %27 in 0 : vector<1x32xf32>, vector<1x32xf32> -> vector<2x32xf32>
    %29 = vector.shape_cast %28 : vector<2x32xf32> to vector<1x2x32xf32>
    %c0_12 = arith.constant 0 : index
    %c0_13 = arith.constant 0 : index
    %c0_14 = arith.constant 0 : index
    %30 = vector.load %arg5[%c0_12, %c0_13, %c0_14] : memref<1x2x32xf32, #tpu.memory_space<vmem>>, vector<1x2x32xf32>
    tpu.vector_store %arg5[%c0_12, %c0_13, %c0_14], %29 {strides = array<i32>} : memref<1x2x32xf32, #tpu.memory_space<vmem>>, vector<1x2x32xf32>,
    return
  }
  func.func @transform_0(%arg0: i32) -> (i32, i32) {
    %c0_i32 = arith.constant 0 : i32
    %c0_i32_0 = arith.constant 0 : i32
    return %arg0, %c0_i32 : i32, i32
  }
  func.func @transform_1(%arg0: i32) -> (i32, i32) {
    %c0_i32 = arith.constant 0 : i32
    %c0_i32_0 = arith.constant 0 : i32
    %c0_i32_1 = arith.constant 0 : i32
    return %c0_i32, %c0_i32_0 : i32, i32
  }
  func.func @transform_2(%arg0: i32) -> (i32, i32) {
    %c0_i32 = arith.constant 0 : i32
    %c0_i32_0 = arith.constant 0 : i32
    %c0_i32_1 = arith.constant 0 : i32
    return %c0_i32, %c0_i32_0 : i32, i32
  }
  func.func @transform_3(%arg0: i32) -> (i32, i32) {
    %c0_i32 = arith.constant 0 : i32
    %c0_i32_0 = arith.constant 0 : i32
    return %arg0, %c0_i32 : i32, i32
  }
  func.func @transform_4(%arg0: i32) -> (i32, i32, i32) {
    %c0_i32 = arith.constant 0 : i32
    %c0_i32_0 = arith.constant 0 : i32
    %c0_i32_1 = arith.constant 0 : i32
    return %arg0, %c0_i32, %c0_i32_0 : i32, i32, i32
  }
}

module attributes {stable_mosaic.version = 11 : i64} {
  func.func @_mlp2_kernel(%arg0: i32, %arg1: memref<304x16xbf16, #tpu.memory_space<vmem>>, %arg2: memref<304x32xbf16, #tpu.memory_space<vmem>>, %arg3: memref<16x32xbf16, #tpu.memory_space<vmem>>, %arg4: memref<32x32xbf16, #tpu.memory_space<vmem>>, %arg5: memref<1x32xf32, #tpu.memory_space<vmem>>, %arg6: memref<304x32xbf16, #tpu.memory_space<vmem>>, %arg7: memref<1x2x32xf32, #tpu.memory_space<vmem>>) attributes {dimension_semantics = [#tpu.dimension_semantics<parallel>], iteration_bounds = array<i64: 1>, scalar_prefetch = 0 : i64, scratch_operands = 0 : i64, tpu.core_type = #tpu.core_type<tc>, window_params = [{transform_indices = @transform_0, window_bounds = array<i64: 304, 16>}, {transform_indices = @transform_1, window_bounds = array<i64: 304, 32>}, {pipeline_mode = #tpu.pipeline_mode<synchronous>, transform_indices = @transform_2, window_bounds = array<i64: 16, 32>}, {pipeline_mode = #tpu.pipeline_mode<synchronous>, transform_indices = @transform_3, window_bounds = array<i64: 32, 32>}, {pipeline_mode = #tpu.pipeline_mode<synchronous>, transform_indices = @transform_4, window_bounds = array<i64: 1, 32>}, {transform_indices = @transform_5, window_bounds = array<i64: 304, 32>}, {transform_indices = @transform_6, window_bounds = array<i64: 1, 2, 32>}]} {
    %c0 = arith.constant 0 : index
    %c0_0 = arith.constant 0 : index
    %0 = vector.load %arg1[%c0, %c0_0] : memref<304x16xbf16, #tpu.memory_space<vmem>>, vector<304x16xbf16>
    %c0_1 = arith.constant 0 : index
    %c0_2 = arith.constant 0 : index
    %1 = vector.load %arg3[%c0_1, %c0_2] : memref<16x32xbf16, #tpu.memory_space<vmem>>, vector<16x32xbf16>
    %cst = arith.constant dense<0.000000e+00> : vector<304x32xf32>
    %2 = tpu.matmul %0, %1, %cst {dimension_numbers = #tpu.dot_dimension_numbers<[1], [0], [0], [1], [0, 0, 1, 1], [], []>} : vector<304x16xbf16>, vector<16x32xbf16>, vector<304x32xf32> -> vector<304x32xf32>
    %c0_3 = arith.constant 0 : index
    %c0_4 = arith.constant 0 : index
    %3 = vector.load %arg2[%c0_3, %c0_4] : memref<304x32xbf16, #tpu.memory_space<vmem>>, vector<304x32xbf16>
    %c0_5 = arith.constant 0 : index
    %c0_6 = arith.constant 0 : index
    %4 = vector.load %arg4[%c0_5, %c0_6] : memref<32x32xbf16, #tpu.memory_space<vmem>>, vector<32x32xbf16>
    %cst_7 = arith.constant dense<0.000000e+00> : vector<304x32xf32>
    %5 = tpu.matmul %3, %4, %cst_7 {dimension_numbers = #tpu.dot_dimension_numbers<[1], [0], [0], [1], [0, 0, 1, 1], [], []>} : vector<304x32xbf16>, vector<32x32xbf16>, vector<304x32xf32> -> vector<304x32xf32>
    %6 = arith.addf %2, %5 : vector<304x32xf32>
    %c0_8 = arith.constant 0 : index
    %c0_9 = arith.constant 0 : index
    %7 = vector.load %arg5[%c0_8, %c0_9] : memref<1x32xf32, #tpu.memory_space<vmem>>, vector<1x32xf32>
    %8 = vector.broadcast %7 : vector<1x32xf32> to vector<304x32xf32>
    %9 = arith.addf %6, %8 : vector<304x32xf32>
    %cst_10 = arith.constant 0.000000e+00 : f32
    %10 = vector.broadcast %cst_10 : f32 to vector<304x32xf32>
    %11 = arith.cmpf oge, %9, %10 : vector<304x32xf32>
    %cst_11 = arith.constant 0.000000e+00 : f32
    %12 = vector.broadcast %cst_11 : f32 to vector<304x32xf32>
    %13 = arith.mulf %12, %9 : vector<304x32xf32>
    %14 = arith.select %11, %9, %13 : vector<304x32xi1>, vector<304x32xf32>
    %15 = arith.truncf %14 : vector<304x32xf32> to vector<304x32xbf16>
    %c0_12 = arith.constant 0 : index
    %c0_13 = arith.constant 0 : index
    %16 = vector.load %arg6[%c0_12, %c0_13] : memref<304x32xbf16, #tpu.memory_space<vmem>>, vector<304x32xbf16>
    tpu.vector_store %arg6[%c0_12, %c0_13], %15 {strides = array<i32>} : memref<304x32xbf16, #tpu.memory_space<vmem>>, vector<304x32xbf16>,
    %c304_i32 = arith.constant 304 : i32
    %17 = arith.muli %arg0, %c304_i32 : i32
    %18 = tpu.iota {dimensions = array<i32: 0>} : vector<304x1xi32>
    %19 = vector.broadcast %17 : i32 to vector<304x1xi32>
    %20 = arith.addi %19, %18 : vector<304x1xi32>
    %c300_i32 = arith.constant 300 : i32
    %21 = vector.broadcast %c300_i32 : i32 to vector<304x1xi32>
    %22 = arith.cmpi slt, %20, %21 : vector<304x1xi32>
    %cst_14 = arith.constant 0.000000e+00 : f32
    %23 = vector.shape_cast %22 : vector<304x1xi1> to vector<304x1xi1>
    %24 = vector.broadcast %23 : vector<304x1xi1> to vector<304x32xi1>
    %25 = vector.broadcast %cst_14 : f32 to vector<304x32xf32>
    %26 = arith.select %24, %14, %25 : vector<304x32xi1>, vector<304x32xf32>
    %cst_15 = arith.constant dense<0.000000e+00> : vector<32xf32>
    %27 = vector.multi_reduction <add>, %26, %cst_15 [0] : vector<304x32xf32> to vector<32xf32>
    %28 = vector.shape_cast %27 : vector<32xf32> to vector<1x32xf32>
    %29 = arith.mulf %26, %26 : vector<304x32xf32>
    %cst_16 = arith.constant dense<0.000000e+00> : vector<32xf32>
    %30 = vector.multi_reduction <add>, %29, %cst_16 [0] : vector<304x32xf32> to vector<32xf32>
    %31 = vector.shape_cast %30 : vector<32xf32> to vector<1x32xf32>
    %32 = tpu.concatenate %28, %31 in 0 : vector<1x32xf32>, vector<1x32xf32> -> vector<2x32xf32>
    %33 = vector.shape_cast %32 : vector<2x32xf32> to vector<1x2x32xf32>
    %c0_17 = arith.constant 0 : index
    %c0_18 = arith.constant 0 : index
    %c0_19 = arith.constant 0 : index
    %34 = vector.load %arg7[%c0_17, %c0_18, %c0_19] : memref<1x2x32xf32, #tpu.memory_space<vmem>>, vector<1x2x32xf32>
    tpu.vector_store %arg7[%c0_17, %c0_18, %c0_19], %33 {strides = array<i32>} : memref<1x2x32xf32, #tpu.memory_space<vmem>>, vector<1x2x32xf32>,
    return
  }
  func.func @transform_0(%arg0: i32) -> (i32, i32) {
    %c0_i32 = arith.constant 0 : i32
    %c0_i32_0 = arith.constant 0 : i32
    return %arg0, %c0_i32 : i32, i32
  }
  func.func @transform_1(%arg0: i32) -> (i32, i32) {
    %c0_i32 = arith.constant 0 : i32
    %c0_i32_0 = arith.constant 0 : i32
    return %arg0, %c0_i32 : i32, i32
  }
  func.func @transform_2(%arg0: i32) -> (i32, i32) {
    %c0_i32 = arith.constant 0 : i32
    %c0_i32_0 = arith.constant 0 : i32
    %c0_i32_1 = arith.constant 0 : i32
    return %c0_i32, %c0_i32_0 : i32, i32
  }
  func.func @transform_3(%arg0: i32) -> (i32, i32) {
    %c0_i32 = arith.constant 0 : i32
    %c0_i32_0 = arith.constant 0 : i32
    %c0_i32_1 = arith.constant 0 : i32
    return %c0_i32, %c0_i32_0 : i32, i32
  }
  func.func @transform_4(%arg0: i32) -> (i32, i32) {
    %c0_i32 = arith.constant 0 : i32
    %c0_i32_0 = arith.constant 0 : i32
    %c0_i32_1 = arith.constant 0 : i32
    return %c0_i32, %c0_i32_0 : i32, i32
  }
  func.func @transform_5(%arg0: i32) -> (i32, i32) {
    %c0_i32 = arith.constant 0 : i32
    %c0_i32_0 = arith.constant 0 : i32
    return %arg0, %c0_i32 : i32, i32
  }
  func.func @transform_6(%arg0: i32) -> (i32, i32, i32) {
    %c0_i32 = arith.constant 0 : i32
    %c0_i32_0 = arith.constant 0 : i32
    %c0_i32_1 = arith.constant 0 : i32
    return %arg0, %c0_i32, %c0_i32_0 : i32, i32, i32
  }
}

</mosaic_0001>

<bundles_post_ra>
// kernel: custom-call
= control target key start
LH: loop header
LB: loop body
LE: loop exit
PB: predicated region body
PF: predicated region fallthrough
CT: control target
= control target key end

     0   :  { %s6_s0 = inlined_call_operand.vmem [shape: u32[2], index: 0, kind: output, shape index: {}]  }

// kernel: custom-call.4
= control target key start
LH: loop header
LB: loop body
LE: loop exit
PB: predicated region body
PF: predicated region fallthrough
CT: control target
= control target key end

     0   :  { %s6_s0 = inlined_call_operand.vmem [shape: u32[5], index: 0, kind: output, shape index: {}]  }

// kernel: node_layer_forward.7
= control target key start
LH: loop header
LB: loop body
LE: loop exit
PB: predicated region body
PF: predicated region fallthrough
CT: control target
= control target key end

     0   :  { %vm627_vm0 = vcmask 1043456   ;;  %vm476_vm1 = vcmask 64512   ;;  %vm1320_vm2 = vcmask 130048   ;;  %vm2711_vm4 = vcmask 257024   ;;  %s6355_s3 = inlined_call_operand.vmem [shape: bf16[8,32], index: 3, kind: input, shape index: {}]   ;;  %s6356_s2 = inlined_call_operand.vmem [shape: bf16[16,32], index: 2, kind: input, shape index: {}]   ;;  %s6357_s1 = inlined_call_operand.vmem [shape: bf16[800,8], index: 1, kind: input, shape index: {}]   ;;  %s6358_s0 = inlined_call_operand.vmem [shape: bf16[800,16], index: 0, kind: input, shape index: {}]   ;;  %s6359_s4 = inlined_call_operand.vmem [shape: f32[1,32], index: 4, kind: input, shape index: {}]   ;;  %s6360_s5 = inlined_call_operand.vmem [shape: bf16[800,32], index: 5, kind: output, shape index: {0}]   ;;  %s6361_s6 = inlined_call_operand.vmem [shape: f32[1,2,32], index: 6, kind: output, shape index: {1}]  }
   0x1   :  { %v225_v0 = vld [vmem:[%s6355_s3] sm:$0xf]  ;;  %v4649_v4 = vld [vmem:[%s6357_s1 + $0x8] sm:$0xff]   ;;  %v4652_v7 = vld [vmem:[%s6357_s1 + $0x10] sm:$0xff]   ;;  %vm3415_vm6 = vcmask 261120  }
   0x2   :  { %4646 = vmatprep.subr.msk.bf16.mxu0 %vm627_vm0, %v225_v0  ;;  %v629_v1 = vsel %vm627_vm0, %v225_v0, 0  ;;  %v4647_v2 = vld [vmem:[%s6356_s2] sm:$0xff]   ;;  %v4651_v6 = vld [vmem:[%s6358_s0 + $0x8] sm:$0xff]   ;;  %v4654_v8 = vld [vmem:[%s6358_s0 + $0x10] sm:$0xff]  }
   0x3   :  { %4443 = vmatpush3.bf16.msra.mxu0 %v629_v1  ;;  %v4648_v3 = vld [vmem:[%s6357_s1] sm:$0xff]   ;;  %4544 = vmatprep.subr.bf16.mxu1 %v4647_v2  ;;  %v4653_v9 = vld [vmem:[%s6357_s1 + $0x18] sm:$0xff]   ;;  %v4657_v13 = vld [vmem:[%s6357_s1 + $0x28] sm:$0xff]  }
   0x4   :  { %4444 = vmatprep.mubr.msk.bf16.mxu0 %vm476_vm1, %v4648_v3  ;;  %4545 = vmatpush3.bf16.msra.mxu1 %v4647_v2  ;;  %v4650_v5 = vld [vmem:[%s6358_s0] sm:$0xff]   ;;  %v4655_v11 = vld [vmem:[%s6358_s0 + $0x18] sm:$0xff]   ;;  %v4660_v14 = vld [vmem:[%s6357_s1 + $0x30] sm:$0xff]  }
   0x5   :  { %4546 = vmatprep.mubr.msk.bf16.mxu1 %vm1320_vm2, %v4650_v5  ;;  %v4656_v10 = vld [vmem:[%s6357_s1 + $0x20] sm:$0xff]   ;;  %v4659_v15 = vld [vmem:[%s6358_s0 + $0x28] sm:$0xff]   ;;  %v4662_v16 = vld [vmem:[%s6358_s0 + $0x30] sm:$0xff]  }
   0x6   :  { %4445 = vmatmul.mubr.msk.bf16.vlgmr.msra.gmra.mxu0 %vm476_vm1, %v4649_v4  ;;  %v4658_v12 = vld [vmem:[%s6358_s0 + $0x20] sm:$0xff]   ;;  %v4661_v17 = vld [vmem:[%s6357_s1 + $0x38] sm:$0xff]   ;;  %v4665_v21 = vld [vmem:[%s6357_s1 + $0x48] sm:$0xff]  }
   0x7   :  { %4547 = vmatmul.mubr.msk.bf16.vlgmr.msra.gmra.mxu1 %vm1320_vm2, %v4651_v6  ;;  %4448 = vmatprep.mubr.msk.bf16.mxu0 %vm476_vm1, %v4652_v7  ;;  %v4664_v18 = vld [vmem:[%s6357_s1 + $0x40] sm:$0xff]   ;;  %v4663_v19 = vld [vmem:[%s6358_s0 + $0x38] sm:$0xff]   ;;  %v4668_v22 = vld [vmem:[%s6357_s1 + $0x50] sm:$0xff]  }
   0x8   :  { %4550 = vmatprep.mubr.msk.bf16.mxu1 %vm1320_vm2, %v4654_v8  ;;  %v4666_v20 = vld [vmem:[%s6358_s0 + $0x40] sm:$0xff]   ;;  %v4667_v23 = vld [vmem:[%s6358_s0 + $0x48] sm:$0xff]   ;;  %v4670_v24 = vld [vmem:[%s6358_s0 + $0x50] sm:$0xff]  }
   0x9   :  { %v4669_v25 = vld [vmem:[%s6357_s1 + $0x58] sm:$0xff]   ;;  %v4672_v26 = vld [vmem:[%s6357_s1 + $0x60] sm:$0xff]   ;;  %v4673_v29 = vld [vmem:[%s6357_s1 + $0x68] sm:$0xff]  }
   0xa   :  { %v4671_v27 = vld [vmem:[%s6358_s0 + $0x58] sm:$0xff]   ;;  %v4674_v28 = vld [vmem:[%s6358_s0 + $0x60] sm:$0xff]   ;;  %v4676_v30 = vld [vmem:[%s6357_s1 + $0x70] sm:$0xff]  }
   0xb   :  { %v4675_v31 = vld [vmem:[%s6358_s0 + $0x68] sm:$0xff]   ;;  %v4678_v32 = vld [vmem:[%s6358_s0 + $0x70] sm:$0xff]   ;;  %v4677_v33 = vld [vmem:[%s6357_s1 + $0x78] sm:$0xff]  }
   0xc   :  { %v4680_v34 = vld [vmem:[%s6357_s1 + $0x80] sm:$0xff]   ;;  %v4679_v35 = vld [vmem:[%s6358_s0 + $0x78] sm:$0xff]   ;;  %v4681_v37 = vld [vmem:[%s6357_s1 + $0x88] sm:$0xff]  }
   0xd   :  { %v4682_v36 = vld [vmem:[%s6358_s0 + $0x80] sm:$0xff]   ;;  %v4684_v38 = vld [vmem:[%s6357_s1 + $0x90] sm:$0xff]   ;;  %v4683_v39 = vld [vmem:[%s6358_s0 + $0x88] sm:$0xff]  }
   0xe   :  { %4449 = vmatmul.mubr.msk.bf16.gmra.mxu0 %vm476_vm1, %v4653_v9  ;;  %v4686_v40 = vld [vmem:[%s6358_s0 + $0x90] sm:$0xff]   ;;  %v4685_v41 = vld [vmem:[%s6357_s1 + $0x98] sm:$0xff]   ;;  %v4688_v42 = vld [vmem:[%s6357_s1 + $0xa0] sm:$0xff]  }
   0xf   :  { %4452 = vmatprep.mubr.msk.bf16.mxu0 %vm476_vm1, %v4656_v10  ;;  %4551 = vmatmul.mubr.msk.bf16.gmra.mxu1 %vm1320_vm2, %v4655_v11  ;;  %v4687_v43 = vld [vmem:[%s6358_s0 + $0x98] sm:$0xff]   ;;  %v4690_v44 = vld [vmem:[%s6358_s0 + $0xa0] sm:$0xff]   ;;  %v4689_v45 = vld [vmem:[%s6357_s1 + $0xa8] sm:$0xff]  }
  0x10   :  { %4554 = vmatprep.mubr.msk.bf16.mxu1 %vm1320_vm2, %v4658_v12  ;;  %v4692_v46 = vld [vmem:[%s6357_s1 + $0xb0] sm:$0xff]   ;;  %v4691_v47 = vld [vmem:[%s6358_s0 + $0xa8] sm:$0xff]   ;;  %v4693_v49 = vld [vmem:[%s6357_s1 + $0xb8] sm:$0xff]  }
  0x11   :  { %v4694_v48 = vld [vmem:[%s6358_s0 + $0xb0] sm:$0xff]   ;;  %v4696_v50 = vld [vmem:[%s6357_s1 + $0xc0] sm:$0xff]   ;;  %v4695_v51 = vld [vmem:[%s6358_s0 + $0xb8] sm:$0xff]  }
  0x12   :  { %v4698_v52 = vld [vmem:[%s6358_s0 + $0xc0] sm:$0xff]   ;;  %v4697_v53 = vld [vmem:[%s6357_s1 + $0xc8] sm:$0xff]   ;;  %v4700_v54 = vld [vmem:[%s6357_s1 + $0xd0] sm:$0xff]  }
  0x13   :  { %v4699_v55 = vld [vmem:[%s6358_s0 + $0xc8] sm:$0xff]   ;;  %v4702_v56 = vld [vmem:[%s6358_s0 + $0xd0] sm:$0xff]   ;;  %v4701_v57 = vld [vmem:[%s6357_s1 + $0xd8] sm:$0xff]  }
  0x14   :  { %v4704_v58 = vld [vmem:[%s6357_s1 + $0xe0] sm:$0xff]   ;;  %v4703_v59 = vld [vmem:[%s6358_s0 + $0xd8] sm:$0xff]   ;;  %v4705_v61 = vld [vmem:[%s6357_s1 + $0xe8] sm:$0xff]  }
  0x15   :  { %v4706_v60 = vld [vmem:[%s6358_s0 + $0xe0] sm:$0xff]   ;;  %v4708_v62 = vld [vmem:[%s6357_s1 + $0xf0] sm:$0xff]   ;;  %v4707_v63 = vld [vmem:[%s6358_s0 + $0xe8] sm:$0xff]  }
  0x16   :  { %4453 = vmatmul.mubr.msk.bf16.gmra.mxu0 %vm476_vm1, %v4657_v13  ;;  %v4710_v0 = vld [vmem:[%s6358_s0 + $0xf0] sm:$0xff]   ;;  %v4709_v1 = vld [vmem:[%s6357_s1 + $0xf8] sm:$0xff]   ;;  %v4712_v2 = vld [vmem:[%s6357_s1 + $0x100] sm:$0xff]  }
  0x17   :  { %4456 = vmatprep.mubr.msk.bf16.mxu0 %vm476_vm1, %v4660_v14  ;;  %4555 = vmatmul.mubr.msk.bf16.gmra.mxu1 %vm1320_vm2, %v4659_v15  ;;  %v4711_v3 = vld [vmem:[%s6358_s0 + $0xf8] sm:$0xff]   ;;  %v4714_v4 = vld [vmem:[%s6358_s0 + $0x100] sm:$0xff]   ;;  %v4713_v5 = vld [vmem:[%s6357_s1 + $0x108] sm:$0xff]  }
  0x18   :  { %4558 = vmatprep.mubr.msk.bf16.mxu1 %vm1320_vm2, %v4662_v16  ;;  %v4716_v6 = vld [vmem:[%s6357_s1 + $0x110] sm:$0xff]   ;;  %v4715_v7 = vld [vmem:[%s6358_s0 + $0x108] sm:$0xff]   ;;  %v4717_v9 = vld [vmem:[%s6357_s1 + $0x118] sm:$0xff]  }
  0x19   :  { %v4718_v8 = vld [vmem:[%s6358_s0 + $0x110] sm:$0xff]   ;;  %v4720_v10 = vld [vmem:[%s6357_s1 + $0x120] sm:$0xff]   ;;  %v4719_v11 = vld [vmem:[%s6358_s0 + $0x118] sm:$0xff]  }
  0x1a   :  { %v4722_v12 = vld [vmem:[%s6358_s0 + $0x120] sm:$0xff]   ;;  %v4721_v13 = vld [vmem:[%s6357_s1 + $0x128] sm:$0xff]   ;;  %v4724_v14 = vld [vmem:[%s6357_s1 + $0x130] sm:$0xff]  }
  0x1b   :  { %v4723_v15 = vld [vmem:[%s6358_s0 + $0x128] sm:$0xff]   ;;  %v4726_v16 = vld [vmem:[%s6358_s0 + $0x130] sm:$0xff]  }
  0x1e   :  { %4457 = vmatmul.mubr.msk.bf16.gmra.mxu0 %vm476_vm1, %v4661_v17  ;;  %v4725_v17 = vld [vmem:[%s6357_s1 + $0x138] sm:$0xff]  }
  0x1f   :  { %4460 = vmatprep.mubr.msk.bf16.mxu0 %vm476_vm1, %v4664_v18  ;;  %4559 = vmatmul.mubr.msk.bf16.gmra.mxu1 %vm1320_vm2, %v4663_v19  ;;  %v4728_v18 = vld [vmem:[%s6357_s1 + $0x140] sm:$0xff]   ;;  %v4727_v19 = vld [vmem:[%s6358_s0 + $0x138] sm:$0xff]  }
  0x20   :  { %4562 = vmatprep.mubr.msk.bf16.mxu1 %vm1320_vm2, %v4666_v20  ;;  %v4730_v20 = vld [vmem:[%s6358_s0 + $0x140] sm:$0xff]  }
  0x26   :  { %4461 = vmatmul.mubr.msk.bf16.gmra.mxu0 %vm476_vm1, %v4665_v21  ;;  %v4729_v21 = vld [vmem:[%s6357_s1 + $0x148] sm:$0xff]  }
  0x27   :  { %4464 = vmatprep.mubr.msk.bf16.mxu0 %vm476_vm1, %v4668_v22  ;;  %4563 = vmatmul.mubr.msk.bf16.gmra.mxu1 %vm1320_vm2, %v4667_v23  ;;  %v4732_v22 = vld [vmem:[%s6357_s1 + $0x150] sm:$0xff]   ;;  %v4731_v23 = vld [vmem:[%s6358_s0 + $0x148] sm:$0xff]  }
  0x28   :  { %4566 = vmatprep.mubr.msk.bf16.mxu1 %vm1320_vm2, %v4670_v24  ;;  %v4734_v24 = vld [vmem:[%s6358_s0 + $0x150] sm:$0xff]  }
  0x2e   :  { %4465 = vmatmul.mubr.msk.bf16.gmra.mxu0 %vm476_vm1, %v4669_v25  ;;  %v4733_v25 = vld [vmem:[%s6357_s1 + $0x158] sm:$0xff]  }
  0x2f   :  { %4468 = vmatprep.mubr.msk.bf16.mxu0 %vm476_vm1, %v4672_v26  ;;  %4567 = vmatmul.mubr.msk.bf16.gmra.mxu1 %vm1320_vm2, %v4671_v27  ;;  %v4736_v26 = vld [vmem:[%s6357_s1 + $0x160] sm:$0xff]   ;;  %v4735_v27 = vld [vmem:[%s6358_s0 + $0x158] sm:$0xff]  }
  0x30   :  { %4570 = vmatprep.mubr.msk.bf16.mxu1 %vm1320_vm2, %v4674_v28  ;;  %v4738_v28 = vld [vmem:[%s6358_s0 + $0x160] sm:$0xff]  }
  0x36   :  { %4469 = vmatmul.mubr.msk.bf16.gmra.mxu0 %vm476_vm1, %v4673_v29  ;;  %v4737_v29 = vld [vmem:[%s6357_s1 + $0x168] sm:$0xff]  }
  0x37   :  { %4472 = vmatprep.mubr.msk.bf16.mxu0 %vm476_vm1, %v4676_v30  ;;  %4571 = vmatmul.mubr.msk.bf16.gmra.mxu1 %vm1320_vm2, %v4675_v31  ;;  %v4740_v30 = vld [vmem:[%s6357_s1 + $0x170] sm:$0xff]   ;;  %v4739_v31 = vld [vmem:[%s6358_s0 + $0x168] sm:$0xff]  }
  0x38   :  { %4574 = vmatprep.mubr.msk.bf16.mxu1 %vm1320_vm2, %v4678_v32  ;;  %v4742_v32 = vld [vmem:[%s6358_s0 + $0x170] sm:$0xff]  }
  0x3e   :  { %4473 = vmatmul.mubr.msk.bf16.gmra.mxu0 %vm476_vm1, %v4677_v33  ;;  %v4741_v33 = vld [vmem:[%s6357_s1 + $0x178] sm:$0xff]  }
  0x3f   :  { %4476 = vmatprep.mubr.msk.bf16.mxu0 %vm476_vm1, %v4680_v34  ;;  %4575 = vmatmul.mubr.msk.bf16.gmra.mxu1 %vm1320_vm2, %v4679_v35  ;;  %v4744_v34 = vld [vmem:[%s6357_s1 + $0x180] sm:$0xff]   ;;  %v4743_v35 = vld [vmem:[%s6358_s0 + $0x178] sm:$0xff]  }
  0x40   :  { %4578 = vmatprep.mubr.msk.bf16.mxu1 %vm1320_vm2, %v4682_v36  ;;  %v4746_v36 = vld [vmem:[%s6358_s0 + $0x180] sm:$0xff]  }
  0x46   :  { %4477 = vmatmul.mubr.msk.bf16.gmra.mxu0 %vm476_vm1, %v4681_v37  ;;  %v4745_v37 = vld [vmem:[%s6357_s1 + $0x188] sm:$0xff]  }
  0x47   :  { %4480 = vmatprep.mubr.msk.bf16.mxu0 %vm476_vm1, %v4684_v38  ;;  %4579 = vmatmul.mubr.msk.bf16.gmra.mxu1 %vm1320_vm2, %v4683_v39  ;;  %v4747_v38 = vld [vmem:[%s6358_s0 + $0x188] sm:$0xff]  }
  0x48   :  { %4582 = vmatprep.mubr.msk.bf16.mxu1 %vm1320_vm2, %v4686_v40 }
  0x4e   :  { %4481 = vmatmul.mubr.msk.bf16.gmra.mxu0 %vm476_vm1, %v4685_v41 }
  0x4f   :  { %4484 = vmatprep.mubr.msk.bf16.mxu0 %vm476_vm1, %v4688_v42  ;;  %4583 = vmatmul.mubr.msk.bf16.gmra.mxu1 %vm1320_vm2, %v4687_v43  ;;  %v5193_v42 = vld [vmem:[%s6359_s4] ss:$0 sm:$0xff] }
  0x50   :  { %4586 = vmatprep.mubr.msk.bf16.mxu1 %vm1320_vm2, %v4690_v44 }
  0x56   :  { %4485 = vmatmul.mubr.msk.bf16.gmra.mxu0 %vm476_vm1, %v4689_v45 }
  0x57   :  { %4488 = vmatprep.mubr.msk.bf16.mxu0 %vm476_vm1, %v4692_v46  ;;  %4587 = vmatmul.mubr.msk.bf16.gmra.mxu1 %vm1320_vm2, %v4691_v47 }
  0x58   :  { %4590 = vmatprep.mubr.msk.bf16.mxu1 %vm1320_vm2, %v4694_v48 }
  0x5e   :  { %4489 = vmatmul.mubr.msk.bf16.gmra.mxu0 %vm476_vm1, %v4693_v49 }
  0x5f   :  { %4492 = vmatprep.mubr.msk.bf16.mxu0 %vm476_vm1, %v4696_v50  ;;  %4591 = vmatmul.mubr.msk.bf16.gmra.mxu1 %vm1320_vm2, %v4695_v51 }
  0x60   :  { %4594 = vmatprep.mubr.msk.bf16.mxu1 %vm1320_vm2, %v4698_v52 }
  0x66   :  { %4493 = vmatmul.mubr.msk.bf16.gmra.mxu0 %vm476_vm1, %v4697_v53 }
  0x67   :  { %4496 = vmatprep.mubr.msk.bf16.mxu0 %vm476_vm1, %v4700_v54  ;;  %4595 = vmatmul.mubr.msk.bf16.gmra.mxu1 %vm1320_vm2, %v4699_v55 }
  0x68   :  { %4598 = vmatprep.mubr.msk.bf16.mxu1 %vm1320_vm2, %v4702_v56 }
  0x6e   :  { %4497 = vmatmul.mubr.msk.bf16.gmra.mxu0 %vm476_vm1, %v4701_v57 }
  0x6f   :  { %4500 = vmatprep.mubr.msk.bf16.mxu0 %vm476_vm1, %v4704_v58  ;;  %4599 = vmatmul.mubr.msk.bf16.gmra.mxu1 %vm1320_vm2, %v4703_v59 }
  0x70   :  { %4602 = vmatprep.mubr.msk.bf16.mxu1 %vm1320_vm2, %v4706_v60 }
  0x76   :  { %4501 = vmatmul.mubr.msk.bf16.gmra.mxu0 %vm476_vm1, %v4705_v61 }
  0x77   :  { %4504 = vmatprep.mubr.msk.bf16.mxu0 %vm476_vm1, %v4708_v62  ;;  %4603 = vmatmul.mubr.msk.bf16.gmra.mxu1 %vm1320_vm2, %v4707_v63 }
  0x78   :  { %4606 = vmatprep.mubr.msk.bf16.mxu1 %vm1320_vm2, %v4710_v0 }
  0x7e   :  { %4505 = vmatmul.mubr.msk.bf16.gmra.mxu0 %vm476_vm1, %v4709_v1 }
  0x7f   :  { %4508 = vmatprep.mubr.msk.bf16.mxu0 %vm476_vm1, %v4712_v2  ;;  %4607 = vmatmul.mubr.msk.bf16.gmra.mxu1 %vm1320_vm2, %v4711_v3 }
  0x80   :  { %4610 = vmatprep.mubr.msk.bf16.mxu1 %vm1320_vm2, %v4714_v4 }
  0x86   :  { %4509 = vmatmul.mubr.msk.bf16.gmra.mxu0 %vm476_vm1, %v4713_v5 }
  0x87   :  { %4512 = vmatprep.mubr.msk.bf16.mxu0 %vm476_vm1, %v4716_v6  ;;  %4611 = vmatmul.mubr.msk.bf16.gmra.mxu1 %vm1320_vm2, %v4715_v7 }
  0x88   :  { %4614 = vmatprep.mubr.msk.bf16.mxu1 %vm1320_vm2, %v4718_v8 }
  0x8e   :  { %4513 = vmatmul.mubr.msk.bf16.gmra.mxu0 %vm476_vm1, %v4717_v9 }
  0x8f   :  { %4516 = vmatprep.mubr.msk.bf16.mxu0 %vm476_vm1, %v4720_v10  ;;  %4615 = vmatmul.mubr.msk.bf16.gmra.mxu1 %vm1320_vm2, %v4719_v11 }
  0x90   :  { %4618 = vmatprep.mubr.msk.bf16.mxu1 %vm1320_vm2, %v4722_v12 }
  0x96   :  { %4517 = vmatmul.mubr.msk.bf16.gmra.mxu0 %vm476_vm1, %v4721_v13 }
  0x97   :  { %4520 = vmatprep.mubr.msk.bf16.mxu0 %vm476_vm1, %v4724_v14  ;;  %4619 = vmatmul.mubr.msk.bf16.gmra.mxu1 %vm1320_vm2, %v4723_v15 }
  0x98   :  { %4622 = vmatprep.mubr.msk.bf16.mxu1 %vm1320_vm2, %v4726_v16 }
  0x9e   :  { %4521 = vmatmul.mubr.msk.bf16.gmra.mxu0 %vm476_vm1, %v4725_v17 }
  0x9f   :  { %4524 = vmatprep.mubr.msk.bf16.mxu0 %vm476_vm1, %v4728_v18  ;;  %4623 = vmatmul.mubr.msk.bf16.gmra.mxu1 %vm1320_vm2, %v4727_v19 }
  0xa0   :  { %4626 = vmatprep.mubr.msk.bf16.mxu1 %vm1320_vm2, %v4730_v20 }
  0xa6   :  { %4525 = vmatmul.mubr.msk.bf16.gmra.mxu0 %vm476_vm1, %v4729_v21 }
  0xa7   :  { %4528 = vmatprep.mubr.msk.bf16.mxu0 %vm476_vm1, %v4732_v22  ;;  %4627 = vmatmul.mubr.msk.bf16.gmra.mxu1 %vm1320_vm2, %v4731_v23 }
  0xa8   :  { %4630 = vmatprep.mubr.msk.bf16.mxu1 %vm1320_vm2, %v4734_v24 }
  0xae   :  { %4529 = vmatmul.mubr.msk.bf16.gmra.mxu0 %vm476_vm1, %v4733_v25 }
  0xaf   :  { %4532 = vmatprep.mubr.msk.bf16.mxu0 %vm476_vm1, %v4736_v26  ;;  %4631 = vmatmul.mubr.msk.bf16.gmra.mxu1 %vm1320_vm2, %v4735_v27 }
  0xb0   :  { %4634 = vmatprep.mubr.msk.bf16.mxu1 %vm1320_vm2, %v4738_v28 }
  0xb6   :  { %4533 = vmatmul.mubr.msk.bf16.gmra.mxu0 %vm476_vm1, %v4737_v29 }
  0xb7   :  { %4536 = vmatprep.mubr.msk.bf16.mxu0 %vm476_vm1, %v4740_v30  ;;  %4635 = vmatmul.mubr.msk.bf16.gmra.mxu1 %vm1320_vm2, %v4739_v31 }
  0xb8   :  { %4638 = vmatprep.mubr.msk.bf16.mxu1 %vm1320_vm2, %v4742_v32 }
  0xbe   :  { %4537 = vmatmul.mubr.msk.bf16.gmra.mxu0 %vm476_vm1, %v4741_v33 }
  0xbf   :  { %4540 = vmatprep.mubr.msk.bf16.mxu0 %vm476_vm1, %v4744_v34  ;;  %4639 = vmatmul.mubr.msk.bf16.gmra.mxu1 %vm1320_vm2, %v4743_v35 }
  0xc0   :  { %4642 = vmatprep.mubr.msk.bf16.mxu1 %vm1320_vm2, %v4746_v36 }
  0xc6   :  { %v4446_v39 = vpop.f32.mrf.mxu0  ;;  %4541 = vmatmul.mubr.msk.bf16.gmra.mxu0 %vm476_vm1, %v4745_v37 }
  0xc7   :  { %v4548_v41 = vpop.f32.mrf.mxu1  ;;  %4643 = vmatmul.mubr.msk.bf16.gmra.mxu1 %vm1320_vm2, %v4747_v38 }
  0xc8   :  { %v665_v40 = vpop.f32.mrf.mxu0  ;;  %v1514_v43 = vadd.f32 %v4548_v41, %v4446_v39 }
  0xc9   :  { %v1505_v45 = vpop.f32.mrf.mxu1 }
  0xca   :  { %v4447_v44 = vpop.f32.mrf.mxu0  ;;  %v1913_v46 = vadd.f32 %v5193_v42, %v1514_v43  ;;  %v1506_v47 = vadd.f32 %v1505_v45, %v665_v40 }
  0xcb   :  { %v4549_v49 = vpop.f32.mrf.mxu1 }
  0xcc   :  { %v668_v48 = vpop.f32.mrf.mxu0  ;;  %vm2013_vm3 = vcmp.ge.f32.partialorder %v1913_v46, 0.0  ;;  %v2113_v50 = vmul.f32 0.0, %v1913_v46  ;;  %v1911_v51 = vadd.f32 %v5193_v42, %v1506_v47  ;;  %v1517_v52 = vadd.f32 %v4549_v49, %v4447_v44 }
  0xcd   :  { %v1508_v54 = vpop.f32.mrf.mxu1 }
  0xce   :  { %v4450_v53 = vpop.f32.mrf.mxu0  ;;  %v2213_v55 = vsel %vm2013_vm3, %v1913_v46, %v2113_v50  ;;  %vm2011_vm5 = vcmp.ge.f32.partialorder %v1911_v51, 0.0  ;;  %v2111_v56 = vmul.f32 0.0, %v1911_v51  ;;  %v1914_v57 = vadd.f32 %v5193_v42, %v1517_v52 }
  0xcf   :  { %v4242_v58 = vpack.c.bf16 %v2213_v55, %v2213_v55  ;;  %v1509_v59 = vadd.f32 %v1508_v54, %v668_v48  ;;  %v4552_v61 = vpop.f32.mrf.mxu1  ;;  %v3623_v1 = vmul.f32 %v2213_v55, %v2213_v55  ;;  %v3419_v9 = vsel %vm3415_vm6, %v2213_v55, 0.0 }
  0xd0   :  { %v681_v60 = vpop.f32.mrf.mxu0  ;;  %v2211_v62 = vsel %vm2011_vm5, %v1911_v51, %v2111_v56  ;;  %vm2014_vm7 = vcmp.ge.f32.partialorder %v1914_v57, 0.0  ;;  %v2114_v63 = vmul.f32 0.0, %v1914_v57  ;;  %v1530_v0 = vadd.f32 %v4552_v61, %v4450_v53 }
  0xd1   :  { %2714 = vst.msk [vmem:[%s6360_s5 + $0x8] sm:$0xf] %vm2711_vm4, %v4242_v58  ;;  %v4240_v2 = vpack.c.bf16 %v2211_v62, %v2211_v62  ;;  %v1521_v4 = vpop.f32.mrf.mxu1  ;;  %v1912_v6 = vadd.f32 %v5193_v42, %v1509_v59  ;;  %v3621_v10 = vmul.f32 %v2211_v62, %v2211_v62  ;;  %v3724_v16 = vsel %vm3415_vm6, %v3623_v1, 0.0 }
  0xd2   :  { %v4451_v3 = vpop.f32.mrf.mxu0  ;;  %v2214_v5 = vsel %vm2014_vm7, %v1914_v57, %v2114_v63  ;;  %v1917_v7 = vadd.f32 %v5193_v42, %v1530_v0  ;;  %v1522_v8 = vadd.f32 %v1521_v4, %v681_v60  ;;  %v3416_v17 = vsel %vm3415_vm6, %v2211_v62, 0.0 }
  0xd3   :  { %2712 = vst.msk [vmem:[%s6360_s5] sm:$0xf] %vm2711_vm4, %v4240_v2  ;;  %v4243_v11 = vpack.c.bf16 %v2214_v5, %v2214_v5  ;;  %v4553_v13 = vpop.f32.mrf.mxu1  ;;  %vm2012_vm8 = vcmp.ge.f32.partialorder %v1912_v6, 0.0  ;;  %v2112_v14 = vmul.f32 0.0, %v1912_v6  ;;  %v3624_v22 = vmul.f32 %v2214_v5, %v2214_v5 }
  0xd4   :  { %v684_v12 = vpop.f32.mrf.mxu0  ;;  %vm2017_vm9 = vcmp.ge.f32.partialorder %v1917_v7, 0.0  ;;  %v2117_v15 = vmul.f32 0.0, %v1917_v7  ;;  %v1915_v18 = vadd.f32 %v5193_v42, %v1522_v8  ;;  %v1533_v19 = vadd.f32 %v4553_v13, %v4451_v3 }
  0xd5   :  { %2715 = vst.msk [vmem:[%s6360_s5 + $0xc] sm:$0xf] %vm2711_vm4, %v4243_v11  ;;  %v1524_v21 = vpop.f32.mrf.mxu1  ;;  %v2212_v23 = vsel %vm2012_vm8, %v1912_v6, %v2112_v14  ;;  %v3721_v32 = vsel %vm3415_vm6, %v3621_v10, 0.0  ;;  %v3421_v33 = vsel %vm3415_vm6, %v2214_v5, 0.0  ;;  %v3726_v41 = vsel %vm3415_vm6, %v3624_v22, 0.0 }
  0xd6   :  { %v4454_v20 = vpop.f32.mrf.mxu0  ;;  %v2217_v24 = vsel %vm2017_vm9, %v1917_v7, %v2117_v15  ;;  %v1525_v25 = vadd.f32 %v1524_v21, %v684_v12  ;;  %v4241_v26 = vpack.c.bf16 %v2212_v23, %v2212_v23  ;;  %v3417_v27 = vsel %vm3415_vm6, %v2212_v23, 0.0 }
  0xd7   :  { %v3622_v28 = vmul.f32 %v2212_v23, %v2212_v23  ;;  %v4246_v29 = vpack.c.bf16 %v2217_v24, %v2217_v24  ;;  %v4556_v31 = vpop.f32.mrf.mxu1  ;;  %v3418_v34 = vadd.f32 %v3417_v27, %v3416_v17  ;;  %vm2015_vm10 = vcmp.ge.f32.partialorder %v1915_v18, 0.0 }
  0xd8   :  { %v697_v30 = vpop.f32.mrf.mxu0  ;;  %2713 = vst.msk [vmem:[%s6360_s5 + $0x4] sm:$0xf] %vm2711_vm4, %v4241_v26  ;;  %v2115_v36 = vmul.f32 0.0, %v1915_v18  ;;  %v1918_v37 = vadd.f32 %v5193_v42, %v1533_v19  ;;  %v1916_v38 = vadd.f32 %v5193_v42, %v1525_v25  ;;  %v1546_v45 = vadd.f32 %v4556_v31, %v4454_v20 }
  0xd9   :  { %v3722_v35 = vsel %vm3415_vm6, %v3622_v28, 0.0  ;;  %2718 = vst.msk [vmem:[%s6360_s5 + $0x18] sm:$0xf] %vm2711_vm4, %v4246_v29  ;;  %v1537_v40 = vpop.f32.mrf.mxu1  ;;  %v3420_v43 = vadd.f32 %v3419_v9, %v3418_v34  ;;  %v3427_v61 = vsel %vm3415_vm6, %v2217_v24, 0.0  ;;  %v3627_v0 = vmul.f32 %v2217_v24, %v2217_v24 }
  0xda   :  { %v4455_v39 = vpop.f32.mrf.mxu0  ;;  %v3723_v44 = vadd.f32 %v3722_v35, %v3721_v32  ;;  %v2215_v46 = vsel %vm2015_vm10, %v1915_v18, %v2115_v36  ;;  %vm2018_vm11 = vcmp.ge.f32.partialorder %v1918_v37, 0.0  ;;  %v2118_v47 = vmul.f32 0.0, %v1918_v37 }
  0xdb   :  { %vm2016_vm12 = vcmp.ge.f32.partialorder %v1916_v38, 0.0  ;;  %v4557_v49 = vpop.f32.mrf.mxu1  ;;  %v3422_v50 = vadd.f32 %v3421_v33, %v3420_v43  ;;  %v4244_v52 = vpack.c.bf16 %v2215_v46, %v2215_v46  ;;  %v3423_v53 = vsel %vm3415_vm6, %v2215_v46, 0.0 }
  0xdc   :  { %v700_v48 = vpop.f32.mrf.mxu0  ;;  %v3725_v51 = vadd.f32 %v3724_v16, %v3723_v44  ;;  %v3625_v54 = vmul.f32 %v2215_v46, %v2215_v46  ;;  %v2218_v55 = vsel %vm2018_vm11, %v1918_v37, %v2118_v47  ;;  %v2116_v56 = vmul.f32 0.0, %v1916_v38 }
  0xdd   :  { %v1921_v57 = vadd.f32 %v5193_v42, %v1546_v45  ;;  %v1540_v59 = vpop.f32.mrf.mxu1  ;;  %2716 = vst.msk [vmem:[%s6360_s5 + $0x10] sm:$0xf] %vm2711_vm4, %v4244_v52  ;;  %v3424_v62 = vadd.f32 %v3423_v53, %v3422_v50  ;;  %v4247_v63 = vpack.c.bf16 %v2218_v55, %v2218_v55  ;;  %v3628_v9 = vmul.f32 %v2218_v55, %v2218_v55 }
  0xde   :  { %v4458_v58 = vpop.f32.mrf.mxu0  ;;  %v3727_v60 = vadd.f32 %v3726_v41, %v3725_v51  ;;  %v3728_v1 = vsel %vm3415_vm6, %v3625_v54, 0.0  ;;  %v2216_v2 = vsel %vm2016_vm12, %v1916_v38, %v2116_v56  ;;  %v1538_v12 = vadd.f32 %v1537_v40, %v697_v30 }
  0xdf   :  { %vm2021_vm13 = vcmp.ge.f32.partialorder %v1921_v57, 0.0  ;;  %v4560_v4 = vpop.f32.mrf.mxu1  ;;  %2719 = vst.msk [vmem:[%s6360_s5 + $0x1c] sm:$0xf] %vm2711_vm4, %v4247_v63  ;;  %v4245_v6 = vpack.c.bf16 %v2216_v2, %v2216_v2  ;;  %v3425_v7 = vsel %vm3415_vm6, %v2216_v2, 0.0  ;;  %v3626_v8 = vmul.f32 %v2216_v2, %v2216_v2 }
  0xe0   :  { %v713_v3 = vpop.f32.mrf.mxu0  ;;  %v3729_v5 = vadd.f32 %v3728_v1, %v3727_v60  ;;  %v3426_v10 = vadd.f32 %v3425_v7, %v3424_v62  ;;  %v2121_v11 = vmul.f32 0.0, %v1921_v57  ;;  %v1549_v16 = vadd.f32 %v4557_v49, %v4455_v39 }
  0xe1   :  { %v1553_v14 = vpop.f32.mrf.mxu1  ;;  %2717 = vst.msk [vmem:[%s6360_s5 + $0x14] sm:$0xf] %vm2711_vm4, %v4245_v6  ;;  %v3730_v15 = vsel %vm3415_vm6, %v3626_v8, 0.0  ;;  %v1541_v17 = vadd.f32 %v1540_v59, %v700_v48  ;;  %v1562_v18 = vadd.f32 %v4560_v4, %v4458_v58  ;;  %v1919_v22 = vadd.f32 %v5193_v42, %v1538_v12 }
  0xe2   :  { %v4459_v13 = vpop.f32.mrf.mxu0  ;;  %v3428_v19 = vadd.f32 %v3427_v61, %v3426_v10  ;;  %v3731_v20 = vadd.f32 %v3730_v15, %v3729_v5  ;;  %v2221_v21 = vsel %vm2021_vm13, %v1921_v57, %v2121_v11  ;;  %v3732_v25 = vsel %vm3415_vm6, %v3627_v0, 0.0 }
  0xe3   :  { %v4561_v24 = vpop.f32.mrf.mxu1  ;;  %v3429_v26 = vsel %vm3415_vm6, %v2218_v55, 0.0  ;;  %v4250_v27 = vpack.c.bf16 %v2221_v21, %v2221_v21  ;;  %v1922_v28 = vadd.f32 %v5193_v42, %v1549_v16  ;;  %vm2019_vm14 = vcmp.ge.f32.partialorder %v1919_v22, 0.0 }
  0xe4   :  { %v716_v23 = vpop.f32.mrf.mxu0  ;;  %v3430_v29 = vadd.f32 %v3429_v26, %v3428_v19  ;;  %v3733_v30 = vadd.f32 %v3732_v25, %v3731_v20  ;;  %v2119_v31 = vmul.f32 0.0, %v1919_v22  ;;  %v3734_v34 = vsel %vm3415_vm6, %v3628_v9, 0.0 }
  0xe5   :  { %v1556_v33 = vpop.f32.mrf.mxu1  ;;  %2722 = vst.msk [vmem:[%s6360_s5 + $0x28] sm:$0xf] %vm2711_vm4, %v4250_v27  ;;  %vm2022_vm15 = vcmp.ge.f32.partialorder %v1922_v28, 0.0  ;;  %v2122_v35 = vmul.f32 0.0, %v1922_v28  ;;  %v1920_v36 = vadd.f32 %v5193_v42, %v1541_v17  ;;  %v1925_v39 = vadd.f32 %v5193_v42, %v1562_v18 }
  0xe6   :  { %v4462_v32 = vpop.f32.mrf.mxu0  ;;  %v3735_v37 = vadd.f32 %v3734_v34, %v3733_v30  ;;  %v2219_v38 = vsel %vm2019_vm14, %v1919_v22, %v2119_v31  ;;  %v1554_v40 = vadd.f32 %v1553_v14, %v713_v3  ;;  %v3435_v48 = vsel %vm3415_vm6, %v2221_v21, 0.0 }
  0xe7   :  { %v4564_v43 = vpop.f32.mrf.mxu1  ;;  %v4248_v44 = vpack.c.bf16 %v2219_v38, %v2219_v38  ;;  %v3431_v45 = vsel %vm3415_vm6, %v2219_v38, 0.0  ;;  %v3629_v46 = vmul.f32 %v2219_v38, %v2219_v38  ;;  %v2222_v47 = vsel %vm2022_vm15, %v1922_v28, %v2122_v35 }
  0xe8   :  { %v5263_v41 = vpop.f32.mrf.mxu0  ;;  %v3631_v49 = vmul.f32 %v2221_v21, %v2221_v21  ;;  %v3432_v50 = vadd.f32 %v3431_v45, %v3430_v29  ;;  %v4251_v51 = vpack.c.bf16 %v2222_v47, %v2222_v47  ;;  %vm2020_vm0 = vcmp.ge.f32.partialorder %v1920_v36, 0.0 }
  0xe9   :  { %v5269_v53 = vpop.f32.mrf.mxu1  ;;  %2720 = vst.msk [vmem:[%s6360_s5 + $0x20] sm:$0xf] %vm2711_vm4, %v4248_v44  ;;  %v3736_v54 = vsel %vm3415_vm6, %v3629_v46, 0.0  ;;  %v2120_v55 = vmul.f32 0.0, %v1920_v36  ;;  %vm2025_vm1 = vcmp.ge.f32.partialorder %v1925_v39, 0.0  ;;  %v3632_v57 = vmul.f32 %v2222_v47, %v2222_v47 }
  0xea   :  { %v5267_v52 = vpop.f32.mrf.mxu0  ;;  %v3737_v56 = vadd.f32 %v3736_v54, %v3735_v37  ;;  %2723 = vst.msk [vmem:[%s6360_s5 + $0x2c] sm:$0xf] %vm2711_vm4, %v4251_v51  ;;  %v2125_v58 = vmul.f32 0.0, %v1925_v39  ;;  %v1923_v59 = vadd.f32 %v5193_v42, %v1554_v40  ;;  %v1565_v63 = vadd.f32 %v4561_v24, %v4459_v13 }
  0xeb   :  { %v5283_v61 = vpop.f32.mrf.mxu1  ;;  %v2220_v62 = vsel %vm2020_vm0, %v1920_v36, %v2120_v55  ;;  %v1557_v0 = vadd.f32 %v1556_v33, %v716_v23  ;;  %v1578_v1 = vadd.f32 %v4564_v43, %v4462_v32  ;;  %v3740_v8 = vsel %vm3415_vm6, %v3631_v49, 0.0 }
  0xec   :  { %v5281_v60 = vpop.f32.mrf.mxu0  ;;  %v4249_v2 = vpack.c.bf16 %v2220_v62, %v2220_v62  ;;  %v3433_v3 = vsel %vm3415_vm6, %v2220_v62, 0.0  ;;  %v3630_v4 = vmul.f32 %v2220_v62, %v2220_v62  ;;  %v2225_v5 = vsel %vm2025_vm1, %v1925_v39, %v2125_v58 }
  0xed   :  { %v1572_v7 = vpop.f32.mrf.mxu1  ;;  %v3437_v9 = vsel %vm3415_vm6, %v2222_v47, 0.0  ;;  %v3434_v10 = vadd.f32 %v3433_v3, %v3432_v50  ;;  %v4254_v11 = vpack.c.bf16 %v2225_v5, %v2225_v5  ;;  %vm2023_vm2 = vcmp.ge.f32.partialorder %v1923_v59, 0.0 }
  0xee   :  { %v4466_v6 = vpop.f32.mrf.mxu0  ;;  %2721 = vst.msk [vmem:[%s6360_s5 + $0x24] sm:$0xf] %vm2711_vm4, %v4249_v2  ;;  %v3738_v12 = vsel %vm3415_vm6, %v3630_v4, 0.0  ;;  %v2123_v13 = vmul.f32 0.0, %v1923_v59  ;;  %v1926_v14 = vadd.f32 %v5193_v42, %v1565_v63  ;;  %v3742_v17 = vsel %vm3415_vm6, %v3632_v57, 0.0 }
  0xef   :  { %v4568_v16 = vpop.f32.mrf.mxu1  ;;  %v3436_v18 = vadd.f32 %v3435_v48, %v3434_v10  ;;  %v3739_v19 = vadd.f32 %v3738_v12, %v3737_v56  ;;  %2726 = vst.msk [vmem:[%s6360_s5 + $0x38] sm:$0xf] %vm2711_vm4, %v4254_v11  ;;  %v1924_v20 = vadd.f32 %v5193_v42, %v1557_v0  ;;  %v1929_v23 = vadd.f32 %v5193_v42, %v1578_v1 }
  0xf0   :  { %v5294_v15 = vpop.f32.mrf.mxu0  ;;  %v2223_v21 = vsel %vm2023_vm2, %v1923_v59, %v2123_v13  ;;  %vm2026_vm3 = vcmp.ge.f32.partialorder %v1926_v14, 0.0  ;;  %v2126_v22 = vmul.f32 0.0, %v1926_v14  ;;  %v3443_v36 = vsel %vm3415_vm6, %v2225_v5, 0.0 }
  0xf1   :  { %v1585_v25 = vpop.f32.mrf.mxu1  ;;  %v3438_v26 = vadd.f32 %v3437_v9, %v3436_v18  ;;  %v3741_v27 = vadd.f32 %v3740_v8, %v3739_v19  ;;  %v4252_v28 = vpack.c.bf16 %v2223_v21, %v2223_v21  ;;  %v3439_v29 = vsel %vm3415_vm6, %v2223_v21, 0.0 }
  0xf2   :  { %v5303_v24 = vpop.f32.mrf.mxu0  ;;  %v3633_v30 = vmul.f32 %v2223_v21, %v2223_v21  ;;  %v2226_v31 = vsel %vm2026_vm3, %v1926_v14, %v2126_v22  ;;  %vm2024_vm5 = vcmp.ge.f32.partialorder %v1924_v20, 0.0  ;;  %v2124_v32 = vmul.f32 0.0, %v1924_v20 }
  0xf3   :  { %v5308_v34 = vpop.f32.mrf.mxu1  ;;  %v3743_v35 = vadd.f32 %v3742_v17, %v3741_v27  ;;  %2724 = vst.msk [vmem:[%s6360_s5 + $0x30] sm:$0xf] %vm2711_vm4, %v4252_v28  ;;  %v3440_v37 = vadd.f32 %v3439_v29, %v3438_v26  ;;  %v4255_v38 = vpack.c.bf16 %v2226_v31, %v2226_v31  ;;  %v3635_v39 = vmul.f32 %v2225_v5, %v2225_v5 }
  0xf4   :  { %v5306_v33 = vpop.f32.mrf.mxu0  ;;  %v3744_v40 = vsel %vm3415_vm6, %v3633_v30, 0.0  ;;  %v2224_v43 = vsel %vm2024_vm5, %v1924_v20, %v2124_v32  ;;  %vm2029_vm7 = vcmp.ge.f32.partialorder %v1929_v23, 0.0  ;;  %v3636_v50 = vmul.f32 %v2226_v31, %v2226_v31 }
  0xf5   :  { %v5318_v45 = vpop.f32.mrf.mxu1  ;;  %v3745_v46 = vadd.f32 %v3744_v40, %v3743_v35  ;;  %2727 = vst.msk [vmem:[%s6360_s5 + $0x3c] sm:$0xf] %vm2711_vm4, %v4255_v38  ;;  %v4253_v47 = vpack.c.bf16 %v2224_v43, %v2224_v43  ;;  %v3441_v48 = vsel %vm3415_vm6, %v2224_v43, 0.0  ;;  %v3634_v49 = vmul.f32 %v2224_v43, %v2224_v43 }
  0xf6   :  { %v5316_v44 = vpop.f32.mrf.mxu0  ;;  %v3442_v51 = vadd.f32 %v3441_v48, %v3440_v37  ;;  %v2129_v54 = vmul.f32 0.0, %v1929_v23  ;;  %v1570_v55 = vadd.f32 %v5269_v53, %v5263_v41  ;;  %v1581_v59 = vadd.f32 %v5283_v61, %v5267_v52 }
  0xf7   :  { %v4572_v57 = vpop.f32.mrf.mxu1  ;;  %2725 = vst.msk [vmem:[%s6360_s5 + $0x34] sm:$0xf] %vm2711_vm4, %v4253_v47  ;;  %v3746_v58 = vsel %vm3415_vm6, %v3634_v49, 0.0  ;;  %v1573_v62 = vadd.f32 %v1572_v7, %v5281_v60  ;;  %v1594_v63 = vadd.f32 %v4568_v16, %v4466_v6  ;;  %v3748_v4 = vsel %vm3415_vm6, %v3635_v39, 0.0 }
  0xf8   :  { %v5327_v56 = vpop.f32.mrf.mxu0  ;;  %v3444_v0 = vadd.f32 %v3443_v36, %v3442_v51  ;;  %v3747_v1 = vadd.f32 %v3746_v58, %v3745_v46  ;;  %v2229_v41 = vsel %vm2029_vm7, %v1929_v23, %v2129_v54  ;;  %v1927_v53 = vadd.f32 %v5193_v42, %v1570_v55 }
  0xf9   :  { %v5341_v3 = vpop.f32.mrf.mxu1  ;;  %v3445_v5 = vsel %vm3415_vm6, %v2226_v31, 0.0  ;;  %v4258_v8 = vpack.c.bf16 %v2229_v41, %v2229_v41  ;;  %v1930_v52 = vadd.f32 %v5193_v42, %v1581_v59  ;;  %v3750_v10 = vsel %vm3415_vm6, %v3636_v50, 0.0 }
  0xfa   :  { %v5339_v2 = vpop.f32.mrf.mxu0  ;;  %v3446_v61 = vadd.f32 %v3445_v5, %v3444_v0  ;;  %v3749_v60 = vadd.f32 %v3748_v4, %v3747_v1  ;;  %vm2027_vm8 = vcmp.ge.f32.partialorder %v1927_v53, 0.0  ;;  %v2127_v6 = vmul.f32 0.0, %v1927_v53 }
  0xfb   :  { %v5348_v9 = vpop.f32.mrf.mxu1  ;;  %2730 = vst.msk [vmem:[%s6360_s5 + $0x48] sm:$0xf] %vm2711_vm4, %v4258_v8  ;;  %vm2030_vm9 = vcmp.ge.f32.partialorder %v1930_v52, 0.0  ;;  %v2130_v11 = vmul.f32 0.0, %v1930_v52  ;;  %v1928_v12 = vadd.f32 %v5193_v42, %v1573_v62  ;;  %v1933_v16 = vadd.f32 %v5193_v42, %v1594_v63 }
  0xfc   :  { %v5346_v7 = vpop.f32.mrf.mxu0  ;;  %v3751_v13 = vadd.f32 %v3750_v10, %v3749_v60  ;;  %v2227_v14 = vsel %vm2027_vm8, %v1927_v53, %v2127_v6  ;;  %v1586_v17 = vadd.f32 %v1585_v25, %v5294_v15  ;;  %v3451_v26 = vsel %vm3415_vm6, %v2229_v41, 0.0 }
  0xfd   :  { %v5360_v19 = vpop.f32.mrf.mxu1  ;;  %v4256_v20 = vpack.c.bf16 %v2227_v14, %v2227_v14  ;;  %v3447_v21 = vsel %vm3415_vm6, %v2227_v14, 0.0  ;;  %v3637_v22 = vmul.f32 %v2227_v14, %v2227_v14  ;;  %v2230_v23 = vsel %vm2030_vm9, %v1930_v52, %v2130_v11 }
  0xfe   :  { %v5358_v18 = vpop.f32.mrf.mxu0  ;;  %v3639_v27 = vmul.f32 %v2229_v41, %v2229_v41  ;;  %v3448_v28 = vadd.f32 %v3447_v21, %v3446_v61  ;;  %v4259_v29 = vpack.c.bf16 %v2230_v23, %v2230_v23  ;;  %vm2028_vm10 = vcmp.ge.f32.partialorder %v1928_v12, 0.0 }
  0xff   :  { %v5366_v31 = vpop.f32.mrf.mxu1  ;;  %2728 = vst.msk [vmem:[%s6360_s5 + $0x40] sm:$0xf] %vm2711_vm4, %v4256_v20  ;;  %v3752_v15 = vsel %vm3415_vm6, %v3637_v22, 0.0  ;;  %v2128_v25 = vmul.f32 0.0, %v1928_v12  ;;  %vm2033_vm11 = vcmp.ge.f32.partialorder %v1933_v16, 0.0  ;;  %v3640_v35 = vmul.f32 %v2230_v23, %v2230_v23 }
 0x100   :  { %v5364_v30 = vpop.f32.mrf.mxu0  ;;  %v3753_v32 = vadd.f32 %v3752_v15, %v3751_v13  ;;  %2731 = vst.msk [vmem:[%s6360_s5 + $0x4c] sm:$0xf] %vm2711_vm4, %v4259_v29  ;;  %v2133_v36 = vmul.f32 0.0, %v1933_v16  ;;  %v1931_v37 = vadd.f32 %v5193_v42, %v1586_v17  ;;  %v1597_v43 = vadd.f32 %v5308_v34, %v5303_v24 }
 0x101   :  { %v5380_v39 = vpop.f32.mrf.mxu1  ;;  %v2228_v40 = vsel %vm2028_vm10, %v1928_v12, %v2128_v25  ;;  %v1589_v46 = vadd.f32 %v5318_v45, %v5306_v33  ;;  %v1610_v47 = vadd.f32 %v4572_v57, %v5316_v44  ;;  %v3756_v58 = vsel %vm3415_vm6, %v3639_v27, 0.0 }
 0x102   :  { %v5378_v38 = vpop.f32.mrf.mxu0  ;;  %v4257_v48 = vpack.c.bf16 %v2228_v40, %v2228_v40  ;;  %v3449_v49 = vsel %vm3415_vm6, %v2228_v40, 0.0  ;;  %v3638_v50 = vmul.f32 %v2228_v40, %v2228_v40  ;;  %v2233_v51 = vsel %vm2033_vm11, %v1933_v16, %v2133_v36 }
 0x103   :  { %v5390_v55 = vpop.f32.mrf.mxu1  ;;  %v3453_v59 = vsel %vm3415_vm6, %v2230_v23, 0.0  ;;  %v3450_v62 = vadd.f32 %v3449_v49, %v3448_v28  ;;  %v4262_v24 = vpack.c.bf16 %v2233_v51, %v2233_v51  ;;  %vm2031_vm12 = vcmp.ge.f32.partialorder %v1931_v37, 0.0 }
 0x104   :  { %v5388_v54 = vpop.f32.mrf.mxu0  ;;  %2729 = vst.msk [vmem:[%s6360_s5 + $0x44] sm:$0xf] %vm2711_vm4, %v4257_v48  ;;  %v3754_v33 = vsel %vm3415_vm6, %v3638_v50, 0.0  ;;  %v2131_v34 = vmul.f32 0.0, %v1931_v37  ;;  %v1934_v44 = vadd.f32 %v5193_v42, %v1597_v43  ;;  %v3758_v63 = vsel %vm3415_vm6, %v3640_v35, 0.0 }
 0x105   :  { %v5402_v57 = vpop.f32.mrf.mxu1  ;;  %v3452_v0 = vadd.f32 %v3451_v26, %v3450_v62  ;;  %v3755_v1 = vadd.f32 %v3754_v33, %v3753_v32  ;;  %2734 = vst.msk [vmem:[%s6360_s5 + $0x58] sm:$0xf] %vm2711_vm4, %v4262_v24  ;;  %v1932_v41 = vadd.f32 %v5193_v42, %v1589_v46  ;;  %v1937_v5 = vadd.f32 %v5193_v42, %v1610_v47 }
 0x106   :  { %v5400_v45 = vpop.f32.mrf.mxu0  ;;  %v2231_v53 = vsel %vm2031_vm12, %v1931_v37, %v2131_v34  ;;  %vm2034_vm13 = vcmp.ge.f32.partialorder %v1934_v44, 0.0  ;;  %v2134_v4 = vmul.f32 0.0, %v1934_v44  ;;  %v3459_v20 = vsel %vm3415_vm6, %v2233_v51, 0.0 }
 0x107   :  { %v5413_v52 = vpop.f32.mrf.mxu1  ;;  %v3454_v61 = vadd.f32 %v3453_v59, %v3452_v0  ;;  %v3757_v60 = vadd.f32 %v3756_v58, %v3755_v1  ;;  %v4260_v6 = vpack.c.bf16 %v2231_v53, %v2231_v53  ;;  %v3455_v10 = vsel %vm3415_vm6, %v2231_v53, 0.0 }
 0x108   :  { %v5411_v8 = vpop.f32.mrf.mxu0  ;;  %v3641_v11 = vmul.f32 %v2231_v53, %v2231_v53  ;;  %v2234_v12 = vsel %vm2034_vm13, %v1934_v44, %v2134_v4  ;;  %vm2032_vm14 = vcmp.ge.f32.partialorder %v1932_v41, 0.0  ;;  %v2132_v13 = vmul.f32 0.0, %v1932_v41 }
 0x109   :  { %v5418_v16 = vpop.f32.mrf.mxu1  ;;  %v3759_v17 = vadd.f32 %v3758_v63, %v3757_v60  ;;  %2732 = vst.msk [vmem:[%s6360_s5 + $0x50] sm:$0xf] %vm2711_vm4, %v4260_v6  ;;  %v3456_v21 = vadd.f32 %v3455_v10, %v3454_v61  ;;  %v4263_v22 = vpack.c.bf16 %v2234_v12, %v2234_v12  ;;  %v3643_v23 = vmul.f32 %v2233_v51, %v2233_v51 }
 0x10a   :  { %v5416_v14 = vpop.f32.mrf.mxu0  ;;  %v3760_v26 = vsel %vm3415_vm6, %v3641_v11, 0.0  ;;  %v2232_v27 = vsel %vm2032_vm14, %v1932_v41, %v2132_v13  ;;  %vm2037_vm15 = vcmp.ge.f32.partialorder %v1937_v5, 0.0  ;;  %v3644_v36 = vmul.f32 %v2234_v12, %v2234_v12 }
 0x10b   :  { %v5428_v29 = vpop.f32.mrf.mxu1  ;;  %v3761_v15 = vadd.f32 %v3760_v26, %v3759_v17  ;;  %2735 = vst.msk [vmem:[%s6360_s5 + $0x5c] sm:$0xf] %vm2711_vm4, %v4263_v22  ;;  %v4261_v25 = vpack.c.bf16 %v2232_v27, %v2232_v27  ;;  %v3457_v32 = vsel %vm3415_vm6, %v2232_v27, 0.0  ;;  %v3642_v35 = vmul.f32 %v2232_v27, %v2232_v27 }
 0x10c   :  { %v5426_v28 = vpop.f32.mrf.mxu0  ;;  %v3458_v37 = vadd.f32 %v3457_v32, %v3456_v21  ;;  %v2137_v40 = vmul.f32 0.0, %v1937_v5  ;;  %v1602_v43 = vadd.f32 %v5341_v3, %v5327_v56  ;;  %v1613_v49 = vadd.f32 %v5348_v9, %v5339_v2 }
 0x10d   :  { %v5439_v47 = vpop.f32.mrf.mxu1  ;;  %2733 = vst.msk [vmem:[%s6360_s5 + $0x54] sm:$0xf] %vm2711_vm4, %v4261_v25  ;;  %v3762_v48 = vsel %vm3415_vm6, %v3642_v35, 0.0  ;;  %v1605_v50 = vadd.f32 %v5360_v19, %v5346_v7  ;;  %v1626_v56 = vadd.f32 %v5366_v31, %v5358_v18  ;;  %v3764_v33 = vsel %vm3415_vm6, %v3643_v23, 0.0 }
 0x10e   :  { %v5437_v46 = vpop.f32.mrf.mxu0  ;;  %v3460_v3 = vadd.f32 %v3459_v20, %v3458_v37  ;;  %v3763_v51 = vadd.f32 %v3762_v48, %v3761_v15  ;;  %v2237_v58 = vsel %vm2037_vm15, %v1937_v5, %v2137_v40  ;;  %v1935_v59 = vadd.f32 %v5193_v42, %v1602_v43 }
 0x10f   :  { %v5456_v24 = vpop.f32.mrf.mxu1  ;;  %v3461_v2 = vsel %vm3415_vm6, %v2234_v12, 0.0  ;;  %v4266_v9 = vpack.c.bf16 %v2237_v58, %v2237_v58  ;;  %v1938_v7 = vadd.f32 %v5193_v42, %v1613_v49  ;;  %v3766_v63 = vsel %vm3415_vm6, %v3644_v36, 0.0 }
 0x110   :  { %v5454_v62 = vpop.f32.mrf.mxu0  ;;  %v3462_v19 = vadd.f32 %v3461_v2, %v3460_v3  ;;  %v3765_v34 = vadd.f32 %v3764_v33, %v3763_v51  ;;  %vm2035_vm0 = vcmp.ge.f32.partialorder %v1935_v59, 0.0  ;;  %v2135_v18 = vmul.f32 0.0, %v1935_v59 }
 0x111   :  { %v5463_v44 = vpop.f32.mrf.mxu1  ;;  %2738 = vst.msk [vmem:[%s6360_s5 + $0x68] sm:$0xf] %vm2711_vm4, %v4266_v9  ;;  %vm2038_vm1 = vcmp.ge.f32.partialorder %v1938_v7, 0.0  ;;  %v2138_v0 = vmul.f32 0.0, %v1938_v7  ;;  %v1936_v1 = vadd.f32 %v5193_v42, %v1605_v50  ;;  %v1941_v4 = vadd.f32 %v5193_v42, %v1626_v56 }
 0x112   :  { %v5461_v31 = vpop.f32.mrf.mxu0  ;;  %v3767_v41 = vadd.f32 %v3766_v63, %v3765_v34  ;;  %v2235_v53 = vsel %vm2035_vm0, %v1935_v59, %v2135_v18  ;;  %v1618_v5 = vadd.f32 %v5380_v39, %v5364_v30  ;;  %v3467_v13 = vsel %vm3415_vm6, %v2237_v58, 0.0 }
 0x113   :  { %v5476_v60 = vpop.f32.mrf.mxu1  ;;  %v4264_v6 = vpack.c.bf16 %v2235_v53, %v2235_v53  ;;  %v3463_v10 = vsel %vm3415_vm6, %v2235_v53, 0.0  ;;  %v3645_v11 = vmul.f32 %v2235_v53, %v2235_v53  ;;  %v2238_v12 = vsel %vm2038_vm1, %v1938_v7, %v2138_v0 }
 0x114   :  { %v5474_v61 = vpop.f32.mrf.mxu0  ;;  %v3647_v17 = vmul.f32 %v2237_v58, %v2237_v58  ;;  %v3464_v20 = vadd.f32 %v3463_v10, %v3462_v19  ;;  %v4267_v21 = vpack.c.bf16 %v2238_v12, %v2238_v12  ;;  %vm2036_vm2 = vcmp.ge.f32.partialorder %v1936_v1, 0.0 }
 0x115   :  { %v5482_v23 = vpop.f32.mrf.mxu1  ;;  %2736 = vst.msk [vmem:[%s6360_s5 + $0x60] sm:$0xf] %vm2711_vm4, %v4264_v6  ;;  %v3768_v30 = vsel %vm3415_vm6, %v3645_v11, 0.0  ;;  %v2136_v39 = vmul.f32 0.0, %v1936_v1  ;;  %vm2041_vm3 = vcmp.ge.f32.partialorder %v1941_v4, 0.0  ;;  %v3648_v27 = vmul.f32 %v2238_v12, %v2238_v12 }
 0x116   :  { %v5480_v22 = vpop.f32.mrf.mxu0  ;;  %v3769_v26 = vadd.f32 %v3768_v30, %v3767_v41  ;;  %2739 = vst.msk [vmem:[%s6360_s5 + $0x6c] sm:$0xf] %vm2711_vm4, %v4267_v21  ;;  %v2141_v15 = vmul.f32 0.0, %v1941_v4  ;;  %v1939_v25 = vadd.f32 %v5193_v42, %v1618_v5  ;;  %v1629_v37 = vadd.f32 %v5390_v55, %v5378_v38 }
 0x117   :  { %v5496_v35 = vpop.f32.mrf.mxu1  ;;  %v2236_v36 = vsel %vm2036_vm2, %v1936_v1, %v2136_v39  ;;  %v1621_v40 = vadd.f32 %v5402_v57, %v5388_v54  ;;  %v1642_v43 = vadd.f32 %v5413_v52, %v5400_v45  ;;  %v3772_v58 = vsel %vm3415_vm6, %v3647_v17, 0.0 }
 0x118   :  { %v5494_v32 = vpop.f32.mrf.mxu0  ;;  %v4265_v48 = vpack.c.bf16 %v2236_v36, %v2236_v36  ;;  %v3465_v49 = vsel %vm3415_vm6, %v2236_v36, 0.0  ;;  %v3646_v50 = vmul.f32 %v2236_v36, %v2236_v36  ;;  %v2241_v56 = vsel %vm2041_vm3, %v1941_v4, %v2141_v15 }
 0x119   :  { %v5507_v51 = vpop.f32.mrf.mxu1  ;;  %v3469_v59 = vsel %vm3415_vm6, %v2238_v12, 0.0  ;;  %v3466_v38 = vadd.f32 %v3465_v49, %v3464_v20  ;;  %v4270_v55 = vpack.c.bf16 %v2241_v56, %v2241_v56  ;;  %vm2039_vm5 = vcmp.ge.f32.partialorder %v1939_v25, 0.0 }
 0x11a   :  { %v5505_v3 = vpop.f32.mrf.mxu0  ;;  %2737 = vst.msk [vmem:[%s6360_s5 + $0x64] sm:$0xf] %vm2711_vm4, %v4265_v48  ;;  %v3770_v54 = vsel %vm3415_vm6, %v3646_v50, 0.0  ;;  %v2139_v45 = vmul.f32 0.0, %v1939_v25  ;;  %v1942_v57 = vadd.f32 %v5193_v42, %v1629_v37  ;;  %v3774_v2 = vsel %vm3415_vm6, %v3648_v27, 0.0 }
 0x11b   :  { %v5519_v33 = vpop.f32.mrf.mxu1  ;;  %v3468_v9 = vadd.f32 %v3467_v13, %v3466_v38  ;;  %v3771_v7 = vadd.f32 %v3770_v54, %v3769_v26  ;;  %2742 = vst.msk [vmem:[%s6360_s5 + $0x78] sm:$0xf] %vm2711_vm4, %v4270_v55  ;;  %v1940_v19 = vadd.f32 %v5193_v42, %v1621_v40  ;;  %v1945_v63 = vadd.f32 %v5193_v42, %v1642_v43 }
 0x11c   :  { %v5517_v52 = vpop.f32.mrf.mxu0  ;;  %v2239_v34 = vsel %vm2039_vm5, %v1939_v25, %v2139_v45  ;;  %vm2042_vm7 = vcmp.ge.f32.partialorder %v1942_v57, 0.0  ;;  %v2142_v18 = vmul.f32 0.0, %v1942_v57  ;;  %v3475_v20 = vsel %vm3415_vm6, %v2241_v56, 0.0 }
 0x11d   :  { %v5530_v1 = vpop.f32.mrf.mxu1  ;;  %v3470_v41 = vadd.f32 %v3469_v59, %v3468_v9  ;;  %v3773_v53 = vadd.f32 %v3772_v58, %v3771_v7  ;;  %v4268_v4 = vpack.c.bf16 %v2239_v34, %v2239_v34  ;;  %v3471_v5 = vsel %vm3415_vm6, %v2239_v34, 0.0 }
 0x11e   :  { %v5528_v0 = vpop.f32.mrf.mxu0  ;;  %v3649_v6 = vmul.f32 %v2239_v34, %v2239_v34  ;;  %v2242_v10 = vsel %vm2042_vm7, %v1942_v57, %v2142_v18  ;;  %vm2040_vm8 = vcmp.ge.f32.partialorder %v1940_v19, 0.0  ;;  %v2140_v11 = vmul.f32 0.0, %v1940_v19 }
 0x11f   :  { %v5535_v13 = vpop.f32.mrf.mxu1  ;;  %v3775_v17 = vadd.f32 %v3774_v2, %v3773_v53  ;;  %2740 = vst.msk [vmem:[%s6360_s5 + $0x70] sm:$0xf] %vm2711_vm4, %v4268_v4  ;;  %v3472_v21 = vadd.f32 %v3471_v5, %v3470_v41  ;;  %v4271_v30 = vpack.c.bf16 %v2242_v10, %v2242_v10  ;;  %v3651_v39 = vmul.f32 %v2241_v56, %v2241_v56 }
 0x120   :  { %v5533_v12 = vpop.f32.mrf.mxu0  ;;  %v3776_v26 = vsel %vm3415_vm6, %v3649_v6, 0.0  ;;  %v2240_v27 = vsel %vm2040_vm8, %v1940_v19, %v2140_v11  ;;  %vm2045_vm9 = vcmp.ge.f32.partialorder %v1945_v63, 0.0  ;;  %v3652_v48 = vmul.f32 %v2242_v10, %v2242_v10 }
 0x121   :  { %v5545_v25 = vpop.f32.mrf.mxu1  ;;  %v3777_v36 = vadd.f32 %v3776_v26, %v3775_v17  ;;  %2743 = vst.msk [vmem:[%s6360_s5 + $0x7c] sm:$0xf] %vm2711_vm4, %v4271_v30  ;;  %v4269_v37 = vpack.c.bf16 %v2240_v27, %v2240_v27  ;;  %v3473_v40 = vsel %vm3415_vm6, %v2240_v27, 0.0  ;;  %v3650_v43 = vmul.f32 %v2240_v27, %v2240_v27 }
 0x122   :  { %v5543_v15 = vpop.f32.mrf.mxu0  ;;  %v3474_v49 = vadd.f32 %v3473_v40, %v3472_v21  ;;  %v2145_v50 = vmul.f32 0.0, %v1945_v63  ;;  %v1634_v56 = vadd.f32 %v5418_v16, %v5411_v8  ;;  %v1645_v55 = vadd.f32 %v5428_v29, %v5416_v14 }
 0x123   :  { %v5556_v59 = vpop.f32.mrf.mxu1  ;;  %2741 = vst.msk [vmem:[%s6360_s5 + $0x74] sm:$0xf] %vm2711_vm4, %v4269_v37  ;;  %v3778_v38 = vsel %vm3415_vm6, %v3650_v43, 0.0  ;;  %v1637_v54 = vadd.f32 %v5439_v47, %v5426_v28  ;;  %v1658_v8 = vadd.f32 %v5456_v24, %v5437_v46  ;;  %v3780_v19 = vsel %vm3415_vm6, %v3651_v39, 0.0 }
 0x124   :  { %v5554_v58 = vpop.f32.mrf.mxu0  ;;  %v3476_v16 = vadd.f32 %v3475_v20, %v3474_v49  ;;  %v3779_v45 = vadd.f32 %v3778_v38, %v3777_v36  ;;  %v2245_v57 = vsel %vm2045_vm9, %v1945_v63, %v2145_v50  ;;  %v1943_v2 = vadd.f32 %v5193_v42, %v1634_v56  ;;  %v5613_v50 = vld [vmem:[%s6359_s4] ss:$0 sm:$0xff] }
 0x125   :  { %v5573_v7 = vpop.f32.mrf.mxu1  ;;  %v3477_v14 = vsel %vm3415_vm6, %v2242_v10, 0.0  ;;  %v4274_v29 = vpack.c.bf16 %v2245_v57, %v2245_v57  ;;  %v1946_v28 = vadd.f32 %v5193_v42, %v1645_v55  ;;  %v3782_v63 = vsel %vm3415_vm6, %v3652_v48, 0.0 }
 0x126   :  { %v5571_v9 = vpop.f32.mrf.mxu0  ;;  %v3478_v47 = vadd.f32 %v3477_v14, %v3476_v16  ;;  %v3781_v34 = vadd.f32 %v3780_v19, %v3779_v45  ;;  %vm2043_vm10 = vcmp.ge.f32.partialorder %v1943_v2, 0.0  ;;  %v2143_v46 = vmul.f32 0.0, %v1943_v2 }
 0x127   :  { %v5580_v18 = vpop.f32.mrf.mxu1  ;;  %2746 = vst.msk [vmem:[%s6360_s5 + $0x88] sm:$0xf] %vm2711_vm4, %v4274_v29  ;;  %vm2046_vm11 = vcmp.ge.f32.partialorder %v1946_v28, 0.0  ;;  %v2146_v41 = vmul.f32 0.0, %v1946_v28  ;;  %v1944_v53 = vadd.f32 %v5193_v42, %v1637_v54  ;;  %v1949_v6 = vadd.f32 %v5193_v42, %v1658_v8 }
 0x128   :  { %v5578_v24 = vpop.f32.mrf.mxu0  ;;  %v3783_v4 = vadd.f32 %v3782_v63, %v3781_v34  ;;  %v2243_v5 = vsel %vm2043_vm10, %v1943_v2, %v2143_v46  ;;  %v1650_v10 = vadd.f32 %v5463_v44, %v5454_v62  ;;  %v3483_v26 = vsel %vm3415_vm6, %v2245_v57, 0.0 }
 0x129   :  { %v5593_v17 = vpop.f32.mrf.mxu1  ;;  %v4272_v20 = vpack.c.bf16 %v2243_v5, %v2243_v5  ;;  %v3479_v21 = vsel %vm3415_vm6, %v2243_v5, 0.0  ;;  %v3653_v30 = vmul.f32 %v2243_v5, %v2243_v5  ;;  %v2246_v39 = vsel %vm2046_vm11, %v1946_v28, %v2146_v41 }
 0x12a   :  { %v5591_v11 = vpop.f32.mrf.mxu0  ;;  %v3655_v27 = vmul.f32 %v2245_v57, %v2245_v57  ;;  %v3480_v36 = vadd.f32 %v3479_v21, %v3478_v47  ;;  %v4275_v37 = vpack.c.bf16 %v2246_v39, %v2246_v39  ;;  %vm2044_vm12 = vcmp.ge.f32.partialorder %v1944_v53, 0.0 }
 0x12b   :  { %v5599_v42 = vpop.f32.mrf.mxu1  ;;  %2744 = vst.msk [vmem:[%s6360_s5 + $0x80] sm:$0xf] %vm2711_vm4, %v4272_v20  ;;  %v3784_v62 = vsel %vm3415_vm6, %v3653_v30, 0.0  ;;  %v2144_v44 = vmul.f32 0.0, %v1944_v53  ;;  %vm2049_vm13 = vcmp.ge.f32.partialorder %v1949_v6, 0.0  ;;  %v3656_v48 = vmul.f32 %v2246_v39, %v2246_v39 }
 0x12c   :  { %v5597_v40 = vpop.f32.mrf.mxu0  ;;  %v3785_v43 = vadd.f32 %v3784_v62, %v3783_v4  ;;  %2747 = vst.msk [vmem:[%s6360_s5 + $0x8c] sm:$0xf] %vm2711_vm4, %v4275_v37  ;;  %v2149_v49 = vmul.f32 0.0, %v1949_v6  ;;  %v1947_v56 = vadd.f32 %v5613_v50, %v1650_v10  ;;  %v1661_v8 = vadd.f32 %v5476_v60, %v5461_v31 }
 0x12d   :  { %v5618_v55 = vpop.f32.mrf.mxu1  ;;  %v2244_v54 = vsel %vm2044_vm12, %v1944_v53, %v2144_v44  ;;  %v1653_v16 = vadd.f32 %v5482_v23, %v5474_v61  ;;  %v1674_v45 = vadd.f32 %v5496_v35, %v5480_v22  ;;  %v3788_v47 = vsel %vm3415_vm6, %v3655_v27, 0.0 }
 0x12e   :  { %v5616_v38 = vpop.f32.mrf.mxu0  ;;  %v4273_v57 = vpack.c.bf16 %v2244_v54, %v2244_v54  ;;  %v3481_v2 = vsel %vm3415_vm6, %v2244_v54, 0.0  ;;  %v3654_v19 = vmul.f32 %v2244_v54, %v2244_v54  ;;  %v2249_v14 = vsel %vm2049_vm13, %v1949_v6, %v2149_v49 }
 0x12f   :  { %v5630_v28 = vpop.f32.mrf.mxu1  ;;  %v3485_v31 = vsel %vm3415_vm6, %v2246_v39, 0.0  ;;  %v3482_v60 = vadd.f32 %v3481_v2, %v3480_v36  ;;  %v4278_v34 = vpack.c.bf16 %v2249_v14, %v2249_v14  ;;  %vm2047_vm14 = vcmp.ge.f32.partialorder %v1947_v56, 0.0 }
 0x130   :  { %v5628_v29 = vpop.f32.mrf.mxu0  ;;  %2745 = vst.msk [vmem:[%s6360_s5 + $0x84] sm:$0xf] %vm2711_vm4, %v4273_v57  ;;  %v3786_v61 = vsel %vm3415_vm6, %v3654_v19, 0.0  ;;  %v2147_v22 = vmul.f32 0.0, %v1947_v56  ;;  %v1950_v23 = vadd.f32 %v5613_v50, %v1661_v8  ;;  %v3790_v63 = vsel %vm3415_vm6, %v3656_v48, 0.0 }
 0x131   :  { %v5642_v46 = vpop.f32.mrf.mxu1  ;;  %v3484_v41 = vadd.f32 %v3483_v26, %v3482_v60  ;;  %v3787_v53 = vadd.f32 %v3786_v61, %v3785_v43  ;;  %2750 = vst.msk [vmem:[%s6360_s5 + $0x98] sm:$0xf] %vm2711_vm4, %v4278_v34  ;;  %v1948_v4 = vadd.f32 %v5613_v50, %v1653_v16  ;;  %v1953_v10 = vadd.f32 %v5613_v50, %v1674_v45 }
 0x132   :  { %v5640_v35 = vpop.f32.mrf.mxu0  ;;  %v2247_v5 = vsel %vm2047_vm14, %v1947_v56, %v2147_v22  ;;  %vm2050_vm15 = vcmp.ge.f32.partialorder %v1950_v23, 0.0  ;;  %v2150_v6 = vmul.f32 0.0, %v1950_v23  ;;  %v3491_v49 = vsel %vm3415_vm6, %v2249_v14, 0.0 }
 0x133   :  { %v5653_v21 = vpop.f32.mrf.mxu1  ;;  %v3486_v30 = vadd.f32 %v3485_v31, %v3484_v41  ;;  %v3789_v39 = vadd.f32 %v3788_v47, %v3787_v53  ;;  %v4276_v26 = vpack.c.bf16 %v2247_v5, %v2247_v5  ;;  %v3487_v27 = vsel %vm3415_vm6, %v2247_v5, 0.0 }
 0x134   :  { %v5651_v20 = vpop.f32.mrf.mxu0  ;;  %v3657_v36 = vmul.f32 %v2247_v5, %v2247_v5  ;;  %v2250_v37 = vsel %vm2050_vm15, %v1950_v23, %v2150_v6  ;;  %vm2048_vm0 = vcmp.ge.f32.partialorder %v1948_v4, 0.0  ;;  %v2148_v62 = vmul.f32 0.0, %v1948_v4 }
 0x135   :  { %v5658_v43 = vpop.f32.mrf.mxu1  ;;  %v3791_v48 = vadd.f32 %v3790_v63, %v3789_v39  ;;  %2748 = vst.msk [vmem:[%s6360_s5 + $0x90] sm:$0xf] %vm2711_vm4, %v4276_v26  ;;  %v3488_v56 = vadd.f32 %v3487_v27, %v3486_v30  ;;  %v4279_v54 = vpack.c.bf16 %v2250_v37, %v2250_v37  ;;  %v3659_v8 = vmul.f32 %v2249_v14, %v2249_v14 }
 0x136   :  { %v5656_v44 = vpop.f32.mrf.mxu0  ;;  %v3792_v16 = vsel %vm3415_vm6, %v3657_v36, 0.0  ;;  %v2248_v45 = vsel %vm2048_vm0, %v1948_v4, %v2148_v62  ;;  %vm2053_vm1 = vcmp.ge.f32.partialorder %v1953_v10, 0.0  ;;  %v3660_v34 = vmul.f32 %v2250_v37, %v2250_v37 }
 0x137   :  { %v5668_v2 = vpop.f32.mrf.mxu1  ;;  %v3793_v19 = vadd.f32 %v3792_v16, %v3791_v48  ;;  %2751 = vst.msk [vmem:[%s6360_s5 + $0x9c] sm:$0xf] %vm2711_vm4, %v4279_v54  ;;  %v4277_v47 = vpack.c.bf16 %v2248_v45, %v2248_v45  ;;  %v3489_v31 = vsel %vm3415_vm6, %v2248_v45, 0.0  ;;  %v3658_v60 = vmul.f32 %v2248_v45, %v2248_v45 }
 0x138   :  { %v5666_v57 = vpop.f32.mrf.mxu0  ;;  %v3490_v14 = vadd.f32 %v3489_v31, %v3488_v56  ;;  %v2153_v61 = vmul.f32 0.0, %v1953_v10  ;;  %v1666_v22 = vadd.f32 %v5507_v51, %v5494_v32  ;;  %v1677_v53 = vadd.f32 %v5519_v33, %v5505_v3 }
 0x139   :  { %v5679_v63 = vpop.f32.mrf.mxu1  ;;  %2749 = vst.msk [vmem:[%s6360_s5 + $0x94] sm:$0xf] %vm2711_vm4, %v4277_v47  ;;  %v3794_v41 = vsel %vm3415_vm6, %v3658_v60, 0.0  ;;  %v1669_v4 = vadd.f32 %v5530_v1, %v5517_v52  ;;  %v1690_v32 = vadd.f32 %v5535_v13, %v5528_v0  ;;  %v3796_v27 = vsel %vm3415_vm6, %v3659_v8, 0.0 }
 0x13a   :  { %v5677_v23 = vpop.f32.mrf.mxu0  ;;  %v3492_v51 = vadd.f32 %v3491_v49, %v3490_v14  ;;  %v3795_v5 = vadd.f32 %v3794_v41, %v3793_v19  ;;  %v2253_v6 = vsel %vm2053_vm1, %v1953_v10, %v2153_v61  ;;  %v1951_v30 = vadd.f32 %v5613_v50, %v1666_v22 }
 0x13b   :  { %v5696_v26 = vpop.f32.mrf.mxu1  ;;  %v3493_v3 = vsel %vm3415_vm6, %v2250_v37, 0.0  ;;  %v4282_v33 = vpack.c.bf16 %v2253_v6, %v2253_v6  ;;  %v1954_v52 = vadd.f32 %v5613_v50, %v1677_v53  ;;  %v3798_v62 = vsel %vm3415_vm6, %v3660_v34, 0.0 }
 0x13c   :  { %v5694_v39 = vpop.f32.mrf.mxu0  ;;  %v3797_v1 = vadd.f32 %v3796_v27, %v3795_v5  ;;  %vm2051_vm2 = vcmp.ge.f32.partialorder %v1951_v30, 0.0  ;;  %v2151_v0 = vmul.f32 0.0, %v1951_v30  ;;  %v3494_v13 = vadd.f32 %v3493_v3, %v3492_v51 }
 0x13d   :  { %v5703_v10 = vpop.f32.mrf.mxu1  ;;  %2754 = vst.msk [vmem:[%s6360_s5 + $0xa8] sm:$0xf] %vm2711_vm4, %v4282_v33  ;;  %vm2054_vm3 = vcmp.ge.f32.partialorder %v1954_v52, 0.0  ;;  %v2154_v37 = vmul.f32 0.0, %v1954_v52  ;;  %v1952_v48 = vadd.f32 %v5613_v50, %v1669_v4  ;;  %v1957_v54 = vadd.f32 %v5613_v50, %v1690_v32 }
 0x13e   :  { %v5701_v36 = vpop.f32.mrf.mxu0  ;;  %v2251_v49 = vsel %vm2051_vm2, %v1951_v30, %v2151_v0  ;;  %v3799_v56 = vadd.f32 %v3798_v62, %v3797_v1  ;;  %v1682_v8 = vadd.f32 %v5545_v25, %v5533_v12  ;;  %v3499_v34 = vsel %vm3415_vm6, %v2253_v6, 0.0 }
 0x13f   :  { %v5716_v45 = vpop.f32.mrf.mxu1  ;;  %v4280_v19 = vpack.c.bf16 %v2251_v49, %v2251_v49  ;;  %v3495_v47 = vsel %vm3415_vm6, %v2251_v49, 0.0  ;;  %v3661_v31 = vmul.f32 %v2251_v49, %v2251_v49  ;;  %v2254_v60 = vsel %vm2054_vm3, %v1954_v52, %v2154_v37 }
 0x140   :  { %v5714_v16 = vpop.f32.mrf.mxu0  ;;  %v3663_v14 = vmul.f32 %v2253_v6, %v2253_v6  ;;  %v3496_v61 = vadd.f32 %v3495_v47, %v3494_v13  ;;  %v4283_v22 = vpack.c.bf16 %v2254_v60, %v2254_v60  ;;  %vm2052_vm5 = vcmp.ge.f32.partialorder %v1952_v48, 0.0 }
 0x141   :  { %v5722_v53 = vpop.f32.mrf.mxu1  ;;  %2752 = vst.msk [vmem:[%s6360_s5 + $0xa0] sm:$0xf] %vm2711_vm4, %v4280_v19  ;;  %v3800_v12 = vsel %vm3415_vm6, %v3661_v31, 0.0  ;;  %v2152_v25 = vmul.f32 0.0, %v1952_v48  ;;  %vm2057_vm7 = vcmp.ge.f32.partialorder %v1957_v54, 0.0  ;;  %v3664_v32 = vmul.f32 %v2254_v60, %v2254_v60 }
 0x142   :  { %v5720_v41 = vpop.f32.mrf.mxu0  ;;  %v3801_v4 = vadd.f32 %v3800_v12, %v3799_v56  ;;  %2755 = vst.msk [vmem:[%s6360_s5 + $0xac] sm:$0xf] %vm2711_vm4, %v4283_v22  ;;  %v2157_v51 = vmul.f32 0.0, %v1957_v54  ;;  %v1955_v5 = vadd.f32 %v5613_v50, %v1682_v8  ;;  %v1693_v3 = vadd.f32 %v5556_v59, %v5543_v15 }
 0x143   :  { %v5736_v30 = vpop.f32.mrf.mxu1  ;;  %v2252_v27 = vsel %vm2052_vm5, %v1952_v48, %v2152_v25  ;;  %v1685_v33 = vadd.f32 %v5573_v7, %v5554_v58  ;;  %v1706_v52 = vadd.f32 %v5580_v18, %v5571_v9  ;;  %v3804_v48 = vsel %vm3415_vm6, %v3663_v14, 0.0 }
 0x144   :  { %v5734_v6 = vpop.f32.mrf.mxu0  ;;  %v4281_v1 = vpack.c.bf16 %v2252_v27, %v2252_v27  ;;  %v3497_v0 = vsel %vm3415_vm6, %v2252_v27, 0.0  ;;  %v3662_v13 = vmul.f32 %v2252_v27, %v2252_v27  ;;  %v2257_v62 = vsel %vm2057_vm7, %v1957_v54, %v2157_v51 }
 0x145   :  { %v5747_v49 = vpop.f32.mrf.mxu1  ;;  %v3501_v56 = vsel %vm3415_vm6, %v2254_v60, 0.0  ;;  %v3498_v15 = vadd.f32 %v3497_v0, %v3496_v61  ;;  %v4286_v59 = vpack.c.bf16 %v2257_v62, %v2257_v62  ;;  %vm2055_vm8 = vcmp.ge.f32.partialorder %v1955_v5, 0.0 }
 0x146   :  { %v5745_v37 = vpop.f32.mrf.mxu0  ;;  %2753 = vst.msk [vmem:[%s6360_s5 + $0xa4] sm:$0xf] %vm2711_vm4, %v4281_v1  ;;  %v3802_v58 = vsel %vm3415_vm6, %v3662_v13, 0.0  ;;  %v2155_v9 = vmul.f32 0.0, %v1955_v5  ;;  %v1958_v7 = vadd.f32 %v5613_v50, %v1693_v3  ;;  %v3806_v54 = vsel %vm3415_vm6, %v3664_v32, 0.0 }
 0x147   :  { %v5757_v18 = vpop.f32.mrf.mxu1  ;;  %v3500_v8 = vadd.f32 %v3499_v34, %v3498_v15  ;;  %v3803_v19 = vadd.f32 %v3802_v58, %v3801_v4  ;;  %2758 = vst.msk [vmem:[%s6360_s5 + $0xb8] sm:$0xf] %vm2711_vm4, %v4286_v59  ;;  %v1956_v47 = vadd.f32 %v5613_v50, %v1685_v33  ;;  %v1961_v14 = vadd.f32 %v5613_v50, %v1706_v52 }
 0x148   :  { %v2255_v31 = vsel %vm2055_vm8, %v1955_v5, %v2155_v9  ;;  %vm2058_vm9 = vcmp.ge.f32.partialorder %v1958_v7, 0.0  ;;  %v2158_v60 = vmul.f32 0.0, %v1958_v7  ;;  %v5766_v61 = vpop.f32.mrf.mxu0  ;;  %v3507_v3 = vsel %vm3415_vm6, %v2257_v62, 0.0 }
 0x149   :  { %v5768_v22 = vpop.f32.mrf.mxu1  ;;  %v3805_v12 = vadd.f32 %v3804_v48, %v3803_v19  ;;  %v4284_v25 = vpack.c.bf16 %v2255_v31, %v2255_v31  ;;  %v3502_v34 = vadd.f32 %v3501_v56, %v3500_v8  ;;  %v3503_v4 = vsel %vm3415_vm6, %v2255_v31, 0.0 }
 0x14a   :  { %v3665_v32 = vmul.f32 %v2255_v31, %v2255_v31  ;;  %v2258_v51 = vsel %vm2058_vm9, %v1958_v7, %v2158_v60  ;;  %vm2056_vm10 = vcmp.ge.f32.partialorder %v1956_v47, 0.0  ;;  %v2156_v27 = vmul.f32 0.0, %v1956_v47  ;;  %v5777_v48 = vpop.f32.mrf.mxu0 }
 0x14b   :  { %2756 = vst.msk [vmem:[%s6360_s5 + $0xb0] sm:$0xf] %vm2711_vm4, %v4284_v25  ;;  %v3504_v5 = vadd.f32 %v3503_v4, %v3502_v34  ;;  %v3807_v33 = vadd.f32 %v3806_v54, %v3805_v12  ;;  %v4287_v52 = vpack.c.bf16 %v2258_v51, %v2258_v51  ;;  %v3667_v1 = vmul.f32 %v2257_v62, %v2257_v62  ;;  %v5779_v56 = vpop.f32.mrf.mxu1 }
 0x14c   :  { %v3808_v0 = vsel %vm3415_vm6, %v3665_v32, 0.0  ;;  %v2256_v13 = vsel %vm2056_vm10, %v1956_v47, %v2156_v27  ;;  %vm2061_vm11 = vcmp.ge.f32.partialorder %v1961_v14, 0.0  ;;  %v3668_v7 = vmul.f32 %v2258_v51, %v2258_v51  ;;  %v5801_v34 = vpop.f32.mrf.mxu0 }
 0x14d   :  { %v3809_v15 = vadd.f32 %v3808_v0, %v3807_v33  ;;  %2759 = vst.msk [vmem:[%s6360_s5 + $0xbc] sm:$0xf] %vm2711_vm4, %v4287_v52  ;;  %v4285_v59 = vpack.c.bf16 %v2256_v13, %v2256_v13  ;;  %v3505_v58 = vsel %vm3415_vm6, %v2256_v13, 0.0  ;;  %v3666_v9 = vmul.f32 %v2256_v13, %v2256_v13  ;;  %v5803_v4 = vpop.f32.mrf.mxu1 }
 0x14e   :  { %v3506_v62 = vadd.f32 %v3505_v58, %v3504_v5  ;;  %v2161_v54 = vmul.f32 0.0, %v1961_v14  ;;  %v1698_v8 = vadd.f32 %v5593_v17, %v5578_v24  ;;  %v1709_v47 = vadd.f32 %v5599_v42, %v5591_v11 }
 0x14f   :  { %2757 = vst.msk [vmem:[%s6360_s5 + $0xb4] sm:$0xf] %vm2711_vm4, %v4285_v59  ;;  %v3810_v19 = vsel %vm3415_vm6, %v3666_v9, 0.0  ;;  %v1701_v31 = vadd.f32 %v5618_v55, %v5597_v40  ;;  %v1722_v60 = vadd.f32 %v5630_v28, %v5616_v38  ;;  %v3812_v32 = vsel %vm3415_vm6, %v3667_v1, 0.0  ;;  %v5817_v1 = vpop.f32.mrf.mxu0  ;;  %v5819_v0 = vpop.f32.mrf.mxu1 }
 0x150   :  { %v3508_v12 = vadd.f32 %v3507_v3, %v3506_v62  ;;  %v3811_v25 = vadd.f32 %v3810_v19, %v3809_v15  ;;  %v2261_v24 = vsel %vm2061_vm11, %v1961_v14, %v2161_v54  ;;  %v1959_v17 = vadd.f32 %v5613_v50, %v1698_v8 }
 0x151   :  { %v3509_v11 = vsel %vm3415_vm6, %v2258_v51, 0.0  ;;  %v4290_v42 = vpack.c.bf16 %v2261_v24, %v2261_v24  ;;  %v1962_v40 = vadd.f32 %v5613_v50, %v1709_v47  ;;  %v3814_v27 = vsel %vm3415_vm6, %v3668_v7, 0.0 }
 0x152   :  { %v3813_v55 = vadd.f32 %v3812_v32, %v3811_v25  ;;  %vm2059_vm12 = vcmp.ge.f32.partialorder %v1959_v17, 0.0  ;;  %v2159_v38 = vmul.f32 0.0, %v1959_v17  ;;  %v3510_v28 = vadd.f32 %v3509_v11, %v3508_v12  ;;  %v5835_v12 = vpop.f32.mrf.mxu1 }
 0x153   :  { %2762 = vst.msk [vmem:[%s6360_s5 + $0xc8] sm:$0xf] %vm2711_vm4, %v4290_v42  ;;  %vm2062_vm13 = vcmp.ge.f32.partialorder %v1962_v40, 0.0  ;;  %v2162_v14 = vmul.f32 0.0, %v1962_v40  ;;  %v1960_v3 = vadd.f32 %v5613_v50, %v1701_v31  ;;  %v1965_v33 = vadd.f32 %v5613_v50, %v1722_v60  ;;  %v5833_v60 = vpop.f32.mrf.mxu0 }
 0x154   :  { %v2259_v5 = vsel %vm2059_vm12, %v1959_v17, %v2159_v38  ;;  %v3815_v51 = vadd.f32 %v3814_v27, %v3813_v55  ;;  %v1714_v52 = vadd.f32 %v5642_v46, %v5628_v29  ;;  %v3515_v9 = vsel %vm3415_vm6, %v2261_v24, 0.0 }
 0x155   :  { %v4288_v13 = vpack.c.bf16 %v2259_v5, %v2259_v5  ;;  %v3511_v15 = vsel %vm3415_vm6, %v2259_v5, 0.0  ;;  %v3669_v59 = vmul.f32 %v2259_v5, %v2259_v5  ;;  %v2262_v58 = vsel %vm2062_vm13, %v1962_v40, %v2162_v14 }
 0x156   :  { %v3671_v7 = vmul.f32 %v2261_v24, %v2261_v24  ;;  %v3512_v62 = vadd.f32 %v3511_v15, %v3510_v28  ;;  %v4291_v54 = vpack.c.bf16 %v2262_v58, %v2262_v58  ;;  %vm2060_vm14 = vcmp.ge.f32.partialorder %v1960_v3, 0.0 }
 0x157   :  { %2760 = vst.msk [vmem:[%s6360_s5 + $0xc0] sm:$0xf] %vm2711_vm4, %v4288_v13  ;;  %v3816_v29 = vsel %vm3415_vm6, %v3669_v59, 0.0  ;;  %v2160_v46 = vmul.f32 0.0, %v1960_v3  ;;  %vm2065_vm15 = vcmp.ge.f32.partialorder %v1965_v33, 0.0  ;;  %v3672_v19 = vmul.f32 %v2262_v58, %v2262_v58 }
 0x158   :  { %v3817_v8 = vadd.f32 %v3816_v29, %v3815_v51  ;;  %2763 = vst.msk [vmem:[%s6360_s5 + $0xcc] sm:$0xf] %vm2711_vm4, %v4291_v54  ;;  %v2165_v47 = vmul.f32 0.0, %v1965_v33  ;;  %v1963_v31 = vadd.f32 %v5613_v50, %v1714_v52  ;;  %v1725_v24 = vadd.f32 %v5653_v21, %v5640_v35 }
 0x159   :  { %v2260_v25 = vsel %vm2060_vm14, %v1960_v3, %v2160_v46  ;;  %v1717_v17 = vadd.f32 %v5658_v43, %v5651_v20  ;;  %v1738_v32 = vadd.f32 %v5668_v2, %v5656_v44  ;;  %v3820_v38 = vsel %vm3415_vm6, %v3671_v7, 0.0  ;;  %v5852_v44 = vpop.f32.mrf.mxu0  ;;  %v5854_v43 = vpop.f32.mrf.mxu1 }
 0x15a   :  { %v4289_v11 = vpack.c.bf16 %v2260_v25, %v2260_v25  ;;  %v3513_v42 = vsel %vm3415_vm6, %v2260_v25, 0.0  ;;  %v3670_v40 = vmul.f32 %v2260_v25, %v2260_v25  ;;  %v2265_v55 = vsel %vm2065_vm15, %v1965_v33, %v2165_v47 }
 0x15b   :  { %v3517_v28 = vsel %vm3415_vm6, %v2262_v58, 0.0  ;;  %v3514_v27 = vadd.f32 %v3513_v42, %v3512_v62  ;;  %v4294_v14 = vpack.c.bf16 %v2265_v55, %v2265_v55  ;;  %vm2063_vm0 = vcmp.ge.f32.partialorder %v1963_v31, 0.0  ;;  %v5864_v29 = vpop.f32.mrf.mxu0  ;;  %v5866_v46 = vpop.f32.mrf.mxu1 }
 0x15c   :  { %2761 = vst.msk [vmem:[%s6360_s5 + $0xc4] sm:$0xf] %vm2711_vm4, %v4289_v11  ;;  %v3818_v35 = vsel %vm3415_vm6, %v3670_v40, 0.0  ;;  %v2163_v20 = vmul.f32 0.0, %v1963_v31  ;;  %v1966_v21 = vadd.f32 %v5613_v50, %v1725_v24  ;;  %v3822_v2 = vsel %vm3415_vm6, %v3672_v19, 0.0 }
 0x15d   :  { %v3516_v3 = vadd.f32 %v3515_v9, %v3514_v27  ;;  %v3819_v5 = vadd.f32 %v3818_v35, %v3817_v8  ;;  %2766 = vst.msk [vmem:[%s6360_s5 + $0xd8] sm:$0xf] %vm2711_vm4, %v4294_v14  ;;  %v1964_v51 = vadd.f32 %v5613_v50, %v1717_v17  ;;  %v1969_v13 = vadd.f32 %v5613_v50, %v1738_v32  ;;  %v5881_v14 = vpop.f32.mrf.mxu0  ;;  %v5883_v35 = vpop.f32.mrf.mxu1 }
 0x15e   :  { %v2263_v33 = vsel %vm2063_vm0, %v1963_v31, %v2163_v20  ;;  %vm2066_vm1 = vcmp.ge.f32.partialorder %v1966_v21, 0.0  ;;  %v2166_v52 = vmul.f32 0.0, %v1966_v21  ;;  %v3523_v8 = vsel %vm3415_vm6, %v2265_v55, 0.0 }
 0x15f   :  { %v3821_v15 = vadd.f32 %v3820_v38, %v3819_v5  ;;  %v4292_v59 = vpack.c.bf16 %v2263_v33, %v2263_v33  ;;  %v3518_v58 = vadd.f32 %v3517_v28, %v3516_v3  ;;  %v3519_v7 = vsel %vm3415_vm6, %v2263_v33, 0.0 }
 0x160   :  { %v3673_v62 = vmul.f32 %v2263_v33, %v2263_v33  ;;  %v2266_v9 = vsel %vm2066_vm1, %v1966_v21, %v2166_v52  ;;  %vm2064_vm2 = vcmp.ge.f32.partialorder %v1964_v51, 0.0  ;;  %v2164_v54 = vmul.f32 0.0, %v1964_v51 }
 0x161   :  { %2764 = vst.msk [vmem:[%s6360_s5 + $0xd0] sm:$0xf] %vm2711_vm4, %v4292_v59  ;;  %v3520_v19 = vadd.f32 %v3519_v7, %v3518_v58  ;;  %v3823_v47 = vadd.f32 %v3822_v2, %v3821_v15  ;;  %v4295_v31 = vpack.c.bf16 %v2266_v9, %v2266_v9  ;;  %v3675_v25 = vmul.f32 %v2265_v55, %v2265_v55 }
 0x162   :  { %v3824_v24 = vsel %vm3415_vm6, %v3673_v62, 0.0  ;;  %v2264_v17 = vsel %vm2064_vm2, %v1964_v51, %v2164_v54  ;;  %vm2069_vm3 = vcmp.ge.f32.partialorder %v1969_v13, 0.0  ;;  %v3676_v38 = vmul.f32 %v2266_v9, %v2266_v9 }
 0x163   :  { %v3825_v32 = vadd.f32 %v3824_v24, %v3823_v47  ;;  %2767 = vst.msk [vmem:[%s6360_s5 + $0xdc] sm:$0xf] %vm2711_vm4, %v4295_v31  ;;  %v4293_v11 = vpack.c.bf16 %v2264_v17, %v2264_v17  ;;  %v3521_v42 = vsel %vm3415_vm6, %v2264_v17, 0.0  ;;  %v3674_v40 = vmul.f32 %v2264_v17, %v2264_v17 }
 0x164   :  { %v3522_v28 = vadd.f32 %v3521_v42, %v3520_v19  ;;  %v2169_v27 = vmul.f32 0.0, %v1969_v13  ;;  %v1730_v55 = vadd.f32 %v5679_v63, %v5666_v57  ;;  %v1741_v21 = vadd.f32 %v5696_v26, %v5677_v23 }
 0x165   :  { %2765 = vst.msk [vmem:[%s6360_s5 + $0xd4] sm:$0xf] %vm2711_vm4, %v4293_v11  ;;  %v3826_v20 = vsel %vm3415_vm6, %v3674_v40, 0.0  ;;  %v1733_v2 = vadd.f32 %v5703_v10, %v5694_v39  ;;  %v1754_v57 = vadd.f32 %v5716_v45, %v5701_v36  ;;  %v3828_v33 = vsel %vm3415_vm6, %v3675_v25, 0.0  ;;  %v5901_v10 = vpop.f32.mrf.mxu0  ;;  %v5903_v36 = vpop.f32.mrf.mxu1 }
 0x166   :  { %v3524_v63 = vadd.f32 %v3523_v8, %v3522_v28  ;;  %v3827_v3 = vadd.f32 %v3826_v20, %v3825_v32  ;;  %v2269_v5 = vsel %vm2069_vm3, %v1969_v13, %v2169_v27  ;;  %v1967_v51 = vadd.f32 %v5613_v50, %v1730_v55 }
 0x167   :  { %v3525_v52 = vsel %vm3415_vm6, %v2266_v9, 0.0  ;;  %v4298_v15 = vpack.c.bf16 %v2269_v5, %v2269_v5  ;;  %v1970_v59 = vadd.f32 %v5613_v50, %v1741_v21  ;;  %v3830_v45 = vsel %vm3415_vm6, %v3676_v38, 0.0  ;;  %v5916_v11 = vpop.f32.mrf.mxu0  ;;  %v5918_v42 = vpop.f32.mrf.mxu1 }
 0x168   :  { %v3829_v23 = vadd.f32 %v3828_v33, %v3827_v3  ;;  %vm2067_vm5 = vcmp.ge.f32.partialorder %v1967_v51, 0.0  ;;  %v2167_v26 = vmul.f32 0.0, %v1967_v51  ;;  %v3526_v39 = vadd.f32 %v3525_v52, %v3524_v63 }
 0x169   :  { %2770 = vst.msk [vmem:[%s6360_s5 + $0xe8] sm:$0xf] %vm2711_vm4, %v4298_v15  ;;  %vm2070_vm7 = vcmp.ge.f32.partialorder %v1970_v59, 0.0  ;;  %v2170_v13 = vmul.f32 0.0, %v1970_v59  ;;  %v1968_v58 = vadd.f32 %v5613_v50, %v1733_v2  ;;  %v1973_v9 = vadd.f32 %v5613_v50, %v1754_v57  ;;  %v5939_v33 = vpop.f32.mrf.mxu1 }
 0x16a   :  { %v2267_v7 = vsel %vm2067_vm5, %v1967_v51, %v2167_v26  ;;  %v3831_v62 = vadd.f32 %v3830_v45, %v3829_v23  ;;  %v1746_v54 = vadd.f32 %v5722_v53, %v5714_v16  ;;  %v3531_v25 = vsel %vm3415_vm6, %v2269_v5, 0.0  ;;  %v5937_v51 = vpop.f32.mrf.mxu0 }
 0x16b   :  { %v4296_v8 = vpack.c.bf16 %v2267_v7, %v2267_v7  ;;  %v3527_v19 = vsel %vm3415_vm6, %v2267_v7, 0.0  ;;  %v3677_v47 = vmul.f32 %v2267_v7, %v2267_v7  ;;  %v2270_v31 = vsel %vm2070_vm7, %v1970_v59, %v2170_v13  ;;  %v5958_v7 = vpop.f32.mrf.mxu1 }
 0x16c   :  { %v3679_v24 = vmul.f32 %v2269_v5, %v2269_v5  ;;  %v3528_v17 = vadd.f32 %v3527_v19, %v3526_v39  ;;  %v4299_v32 = vpack.c.bf16 %v2270_v31, %v2270_v31  ;;  %vm2068_vm8 = vcmp.ge.f32.partialorder %v1968_v58, 0.0 }
 0x16d   :  { %2768 = vst.msk [vmem:[%s6360_s5 + $0xe0] sm:$0xf] %vm2711_vm4, %v4296_v8  ;;  %v3832_v16 = vsel %vm3415_vm6, %v3677_v47, 0.0  ;;  %v2168_v53 = vmul.f32 0.0, %v1968_v58  ;;  %vm2073_vm9 = vcmp.ge.f32.partialorder %v1973_v9, 0.0  ;;  %v3680_v38 = vmul.f32 %v2270_v31, %v2270_v31 }
 0x16e   :  { %v3833_v40 = vadd.f32 %v3832_v16, %v3831_v62  ;;  %2771 = vst.msk [vmem:[%s6360_s5 + $0xec] sm:$0xf] %vm2711_vm4, %v4299_v32  ;;  %v2173_v28 = vmul.f32 0.0, %v1973_v9  ;;  %v1971_v27 = vadd.f32 %v5613_v50, %v1746_v54  ;;  %v1757_v20 = vadd.f32 %v5736_v30, %v5720_v41 }
 0x16f   :  { %v2268_v55 = vsel %vm2068_vm8, %v1968_v58, %v2168_v53  ;;  %v1749_v21 = vadd.f32 %v5747_v49, %v5734_v6  ;;  %v1770_v2 = vadd.f32 %v5757_v18, %v5745_v37  ;;  %v3836_v52 = vsel %vm3415_vm6, %v3679_v24, 0.0  ;;  %v5956_v58 = vpop.f32.mrf.mxu0 }
 0x170   :  { %v4297_v57 = vpack.c.bf16 %v2268_v55, %v2268_v55  ;;  %v3529_v63 = vsel %vm3415_vm6, %v2268_v55, 0.0  ;;  %v3678_v3 = vmul.f32 %v2268_v55, %v2268_v55  ;;  %v2273_v5 = vsel %vm2073_vm9, %v1973_v9, %v2173_v28  ;;  %v5969_v28 = vpop.f32.mrf.mxu1 }
 0x171   :  { %v3533_v15 = vsel %vm3415_vm6, %v2270_v31, 0.0  ;;  %v3530_v41 = vadd.f32 %v3529_v63, %v3528_v17  ;;  %v4302_v30 = vpack.c.bf16 %v2273_v5, %v2273_v5  ;;  %vm2071_vm10 = vcmp.ge.f32.partialorder %v1971_v27, 0.0 }
 0x172   :  { %2769 = vst.msk [vmem:[%s6360_s5 + $0xe4] sm:$0xf] %vm2711_vm4, %v4297_v57  ;;  %v3834_v6 = vsel %vm3415_vm6, %v3678_v3, 0.0  ;;  %v2171_v37 = vmul.f32 0.0, %v1971_v27  ;;  %v1974_v49 = vadd.f32 %v5613_v50, %v1757_v20  ;;  %v3838_v18 = vsel %vm3415_vm6, %v3680_v38, 0.0  ;;  %v5967_v38 = vpop.f32.mrf.mxu0 }
 0x173   :  { %v3532_v59 = vadd.f32 %v3531_v25, %v3530_v41  ;;  %v3835_v23 = vadd.f32 %v3834_v6, %v3833_v40  ;;  %2774 = vst.msk [vmem:[%s6360_s5 + $0xf8] sm:$0xf] %vm2711_vm4, %v4302_v30  ;;  %v1972_v26 = vadd.f32 %v5613_v50, %v1749_v21  ;;  %v1977_v13 = vadd.f32 %v5613_v50, %v1770_v2 }
 0x174   :  { %v2271_v39 = vsel %vm2071_vm10, %v1971_v27, %v2171_v37  ;;  %vm2074_vm11 = vcmp.ge.f32.partialorder %v1974_v49, 0.0  ;;  %v2174_v45 = vmul.f32 0.0, %v1974_v49  ;;  %v3539_v25 = vsel %vm3415_vm6, %v2273_v5, 0.0  ;;  %v5991_v37 = vpop.f32.mrf.mxu0 }
 0x175   :  { %v3837_v62 = vadd.f32 %v3836_v52, %v3835_v23  ;;  %v4300_v9 = vpack.c.bf16 %v2271_v39, %v2271_v39  ;;  %v3534_v54 = vadd.f32 %v3533_v15, %v3532_v59  ;;  %v3535_v8 = vsel %vm3415_vm6, %v2271_v39, 0.0 }
 0x176   :  { %v3681_v19 = vmul.f32 %v2271_v39, %v2271_v39  ;;  %v2274_v47 = vsel %vm2074_vm11, %v1974_v49, %v2174_v45  ;;  %vm2072_vm12 = vcmp.ge.f32.partialorder %v1972_v26, 0.0  ;;  %v2172_v31 = vmul.f32 0.0, %v1972_v26  ;;  %v5993_v49 = vpop.f32.mrf.mxu1 }
 0x177   :  { %2772 = vst.msk [vmem:[%s6360_s5 + $0xf0] sm:$0xf] %vm2711_vm4, %v4300_v9  ;;  %v3536_v24 = vadd.f32 %v3535_v8, %v3534_v54  ;;  %v3839_v17 = vadd.f32 %v3838_v18, %v3837_v62  ;;  %v4303_v32 = vpack.c.bf16 %v2274_v47, %v2274_v47  ;;  %v3683_v16 = vmul.f32 %v2273_v5, %v2273_v5  ;;  %v6007_v9 = vpop.f32.mrf.mxu0 }
 0x178   :  { %v3840_v53 = vsel %vm3415_vm6, %v3681_v19, 0.0  ;;  %v2272_v40 = vsel %vm2072_vm12, %v1972_v26, %v2172_v31  ;;  %vm2077_vm13 = vcmp.ge.f32.partialorder %v1977_v13, 0.0  ;;  %v3684_v2 = vmul.f32 %v2274_v47, %v2274_v47  ;;  %v6009_v54 = vpop.f32.mrf.mxu1 }
 0x179   :  { %v3841_v27 = vadd.f32 %v3840_v53, %v3839_v17  ;;  %2775 = vst.msk [vmem:[%s6360_s5 + $0xfc] sm:$0xf] %vm2711_vm4, %v4303_v32  ;;  %v4301_v55 = vpack.c.bf16 %v2272_v40, %v2272_v40  ;;  %v3537_v20 = vsel %vm3415_vm6, %v2272_v40, 0.0  ;;  %v3682_v21 = vmul.f32 %v2272_v40, %v2272_v40 }
 0x17a   :  { %v3538_v57 = vadd.f32 %v3537_v20, %v3536_v24  ;;  %v2177_v63 = vmul.f32 0.0, %v1977_v13  ;;  %v1762_v3 = vadd.f32 %v5768_v22, %v5766_v61  ;;  %v1773_v52 = vadd.f32 %v5779_v56, %v5777_v48  ;;  %v6025_v20 = vpop.f32.mrf.mxu1 }
 0x17b   :  { %2773 = vst.msk [vmem:[%s6360_s5 + $0xf4] sm:$0xf] %vm2711_vm4, %v4301_v55  ;;  %v3842_v5 = vsel %vm3415_vm6, %v3682_v21, 0.0  ;;  %v1765_v15 = vadd.f32 %v5803_v4, %v5801_v34  ;;  %v1786_v41 = vadd.f32 %v5819_v0, %v5817_v1  ;;  %v3844_v18 = vsel %vm3415_vm6, %v3683_v16, 0.0  ;;  %v6023_v55 = vpop.f32.mrf.mxu0 }
 0x17c   :  { %v3540_v30 = vadd.f32 %v3539_v25, %v3538_v57  ;;  %v3843_v6 = vadd.f32 %v3842_v5, %v3841_v27  ;;  %v2277_v61 = vsel %vm2077_vm13, %v1977_v13, %v2177_v63  ;;  %v1975_v22 = vadd.f32 %v5613_v50, %v1762_v3 }
 0x17d   :  { %v3541_v48 = vsel %vm3415_vm6, %v2274_v47, 0.0  ;;  %v4306_v56 = vpack.c.bf16 %v2277_v61, %v2277_v61  ;;  %v1978_v34 = vadd.f32 %v5613_v50, %v1773_v52  ;;  %v3846_v59 = vsel %vm3415_vm6, %v3684_v2, 0.0 }
 0x17e   :  { %v3845_v4 = vadd.f32 %v3844_v18, %v3843_v6  ;;  %vm2075_vm14 = vcmp.ge.f32.partialorder %v1975_v22, 0.0  ;;  %v2175_v1 = vmul.f32 0.0, %v1975_v22  ;;  %v3542_v0 = vadd.f32 %v3541_v48, %v3540_v30 }
 0x17f   :  { %2778 = vst.msk [vmem:[%s6360_s5 + $0x108] sm:$0xf] %vm2711_vm4, %v4306_v56  ;;  %vm2078_vm15 = vcmp.ge.f32.partialorder %v1978_v34, 0.0  ;;  %v2178_v23 = vmul.f32 0.0, %v1978_v34  ;;  %v1976_v26 = vadd.f32 %v5613_v50, %v1765_v15  ;;  %v1981_v13 = vadd.f32 %v5613_v50, %v1786_v41 }
 0x180   :  { %v2275_v39 = vsel %vm2075_vm14, %v1975_v22, %v2175_v1  ;;  %v3847_v45 = vadd.f32 %v3846_v59, %v3845_v4  ;;  %v1778_v62 = vadd.f32 %v5835_v12, %v5833_v60  ;;  %v3547_v25 = vsel %vm3415_vm6, %v2277_v61, 0.0 }
 0x181   :  { %v4304_v8 = vpack.c.bf16 %v2275_v39, %v2275_v39  ;;  %v3543_v19 = vsel %vm3415_vm6, %v2275_v39, 0.0  ;;  %v3685_v47 = vmul.f32 %v2275_v39, %v2275_v39  ;;  %v2278_v31 = vsel %vm2078_vm15, %v1978_v34, %v2178_v23 }
 0x182   :  { %v3687_v24 = vmul.f32 %v2277_v61, %v2277_v61  ;;  %v3544_v17 = vadd.f32 %v3543_v19, %v3542_v0  ;;  %v4307_v32 = vpack.c.bf16 %v2278_v31, %v2278_v31  ;;  %vm2076_vm0 = vcmp.ge.f32.partialorder %v1976_v26, 0.0 }
 0x183   :  { %2776 = vst.msk [vmem:[%s6360_s5 + $0x100] sm:$0xf] %vm2711_vm4, %v4304_v8  ;;  %v3848_v60 = vsel %vm3415_vm6, %v3685_v47, 0.0  ;;  %v2176_v12 = vmul.f32 0.0, %v1976_v26  ;;  %vm2081_vm1 = vcmp.ge.f32.partialorder %v1981_v13, 0.0  ;;  %v3688_v53 = vmul.f32 %v2278_v31, %v2278_v31 }
 0x184   :  { %v3849_v16 = vadd.f32 %v3848_v60, %v3847_v45  ;;  %2779 = vst.msk [vmem:[%s6360_s5 + $0x10c] sm:$0xf] %vm2711_vm4, %v4307_v32  ;;  %v2181_v40 = vmul.f32 0.0, %v1981_v13  ;;  %v1979_v27 = vadd.f32 %v5613_v50, %v1778_v62  ;;  %v1789_v2 = vadd.f32 %v5854_v43, %v5852_v44 }
 0x185   :  { %v2276_v21 = vsel %vm2076_vm0, %v1976_v26, %v2176_v12  ;;  %v1781_v57 = vadd.f32 %v5866_v46, %v5864_v29  ;;  %v1802_v63 = vadd.f32 %v5883_v35, %v5881_v14  ;;  %v3852_v41 = vsel %vm3415_vm6, %v3687_v24, 0.0  ;;  %v6042_v46 = vpop.f32.mrf.mxu0  ;;  %v6044_v14 = vpop.f32.mrf.mxu1 }
 0x186   :  { %v4305_v3 = vpack.c.bf16 %v2276_v21, %v2276_v21  ;;  %v3545_v5 = vsel %vm3415_vm6, %v2276_v21, 0.0  ;;  %v3686_v52 = vmul.f32 %v2276_v21, %v2276_v21  ;;  %v2281_v15 = vsel %vm2081_vm1, %v1981_v13, %v2181_v40 }
 0x187   :  { %v3549_v30 = vsel %vm3415_vm6, %v2278_v31, 0.0  ;;  %v3546_v6 = vadd.f32 %v3545_v5, %v3544_v17  ;;  %v4310_v61 = vpack.c.bf16 %v2281_v15, %v2281_v15  ;;  %vm2079_vm2 = vcmp.ge.f32.partialorder %v1979_v27, 0.0  ;;  %v6054_v13 = vpop.f32.mrf.mxu0  ;;  %v6056_v62 = vpop.f32.mrf.mxu1 }
 0x188   :  { %2777 = vst.msk [vmem:[%s6360_s5 + $0x104] sm:$0xf] %vm2711_vm4, %v4305_v3  ;;  %v3850_v44 = vsel %vm3415_vm6, %v3686_v52, 0.0  ;;  %v2179_v43 = vmul.f32 0.0, %v1979_v27  ;;  %v1982_v29 = vadd.f32 %v5613_v50, %v1789_v2  ;;  %v3854_v35 = vsel %vm3415_vm6, %v3688_v53, 0.0 }
 0x189   :  { %v3548_v22 = vadd.f32 %v3547_v25, %v3546_v6  ;;  %v3851_v18 = vadd.f32 %v3850_v44, %v3849_v16  ;;  %2782 = vst.msk [vmem:[%s6360_s5 + $0x118] sm:$0xf] %vm2711_vm4, %v4310_v61  ;;  %v1980_v48 = vadd.f32 %v5613_v50, %v1781_v57  ;;  %v1985_v4 = vadd.f32 %v5613_v50, %v1802_v63  ;;  %v6071_v2 = vpop.f32.mrf.mxu0  ;;  %v6073_v57 = vpop.f32.mrf.mxu1 }
 0x18a   :  { %v2279_v56 = vsel %vm2079_vm2, %v1979_v27, %v2179_v43  ;;  %vm2082_vm3 = vcmp.ge.f32.partialorder %v1982_v29, 0.0  ;;  %v2182_v34 = vmul.f32 0.0, %v1982_v29  ;;  %v3555_v8 = vsel %vm3415_vm6, %v2281_v15, 0.0 }
 0x18b   :  { %v3853_v1 = vadd.f32 %v3852_v41, %v3851_v18  ;;  %v4308_v0 = vpack.c.bf16 %v2279_v56, %v2279_v56  ;;  %v3550_v59 = vadd.f32 %v3549_v30, %v3548_v22  ;;  %v3551_v23 = vsel %vm3415_vm6, %v2279_v56, 0.0  ;;  %v6098_v44 = vpop.f32.mrf.mxu1 }
 0x18c   :  { %v3689_v26 = vmul.f32 %v2279_v56, %v2279_v56  ;;  %v2282_v39 = vsel %vm2082_vm3, %v1982_v29, %v2182_v34  ;;  %vm2080_vm5 = vcmp.ge.f32.partialorder %v1980_v48, 0.0  ;;  %v2180_v45 = vmul.f32 0.0, %v1980_v48 }
 0x18d   :  { %2780 = vst.msk [vmem:[%s6360_s5 + $0x110] sm:$0xf] %vm2711_vm4, %v4308_v0  ;;  %v3552_v19 = vadd.f32 %v3551_v23, %v3550_v59  ;;  %v3855_v47 = vadd.f32 %v3854_v35, %v3853_v1  ;;  %v4311_v31 = vpack.c.bf16 %v2282_v39, %v2282_v39  ;;  %v3691_v25 = vmul.f32 %v2281_v15, %v2281_v15 }
 0x18e   :  { %v3856_v24 = vsel %vm3415_vm6, %v3689_v26, 0.0  ;;  %v2280_v17 = vsel %vm2080_vm5, %v1980_v48, %v2180_v45  ;;  %vm2085_vm7 = vcmp.ge.f32.partialorder %v1985_v4, 0.0  ;;  %v3692_v53 = vmul.f32 %v2282_v39, %v2282_v39  ;;  %v6113_v45 = vpop.f32.mrf.mxu1 }
 0x18f   :  { %v3857_v32 = vadd.f32 %v3856_v24, %v3855_v47  ;;  %2783 = vst.msk [vmem:[%s6360_s5 + $0x11c] sm:$0xf] %vm2711_vm4, %v4311_v31  ;;  %v4309_v60 = vpack.c.bf16 %v2280_v17, %v2280_v17  ;;  %v3553_v12 = vsel %vm3415_vm6, %v2280_v17, 0.0  ;;  %v3690_v16 = vmul.f32 %v2280_v17, %v2280_v17 }
 0x190   :  { %v3554_v40 = vadd.f32 %v3553_v12, %v3552_v19  ;;  %v2185_v27 = vmul.f32 0.0, %v1985_v4  ;;  %v1794_v21 = vadd.f32 %v5903_v36, %v5901_v10  ;;  %v1805_v3 = vadd.f32 %v5918_v42, %v5916_v11  ;;  %v6093_v11 = vld [vmem:[%s6359_s4] ss:$0 sm:$0xff] }
 0x191   :  { %2781 = vst.msk [vmem:[%s6360_s5 + $0x114] sm:$0xf] %vm2711_vm4, %v4309_v60  ;;  %v3858_v63 = vsel %vm3415_vm6, %v3690_v16, 0.0  ;;  %v1797_v5 = vadd.f32 %v5939_v33, %v5937_v51  ;;  %v1818_v10 = vadd.f32 %v5958_v7, %v5956_v58  ;;  %v3860_v30 = vsel %vm3415_vm6, %v3691_v25, 0.0  ;;  %v6096_v7 = vpop.f32.mrf.mxu0 }
 0x192   :  { %v3556_v36 = vadd.f32 %v3555_v8, %v3554_v40  ;;  %v3859_v52 = vadd.f32 %v3858_v63, %v3857_v32  ;;  %v2285_v15 = vsel %vm2085_vm7, %v1985_v4, %v2185_v27  ;;  %v1983_v41 = vadd.f32 %v5613_v50, %v1794_v21  ;;  %v6134_v27 = vpop.f32.mrf.mxu1 }
 0x193   :  { %v3557_v6 = vsel %vm3415_vm6, %v2282_v39, 0.0  ;;  %v4314_v61 = vpack.c.bf16 %v2285_v15, %v2285_v15  ;;  %v1986_v42 = vadd.f32 %v6093_v11, %v1805_v3  ;;  %v3862_v50 = vsel %vm3415_vm6, %v3692_v53, 0.0  ;;  %v6111_v39 = vpop.f32.mrf.mxu0 }
 0x194   :  { %v3861_v51 = vadd.f32 %v3860_v30, %v3859_v52  ;;  %vm2083_vm8 = vcmp.ge.f32.partialorder %v1983_v41, 0.0  ;;  %v2183_v33 = vmul.f32 0.0, %v1983_v41  ;;  %v3558_v58 = vadd.f32 %v3557_v6, %v3556_v36  ;;  %v6153_v30 = vpop.f32.mrf.mxu1 }
 0x195   :  { %2786 = vst.msk [vmem:[%s6360_s5 + $0x128] sm:$0xf] %vm2711_vm4, %v4314_v61  ;;  %vm2086_vm9 = vcmp.ge.f32.partialorder %v1986_v42, 0.0  ;;  %v2186_v43 = vmul.f32 0.0, %v1986_v42  ;;  %v1984_v29 = vadd.f32 %v6093_v11, %v1797_v5  ;;  %v1989_v18 = vadd.f32 %v6093_v11, %v1818_v10  ;;  %v6132_v40 = vpop.f32.mrf.mxu0 }
 0x196   :  { %v2283_v35 = vsel %vm2083_vm8, %v1983_v41, %v2183_v33  ;;  %v3863_v22 = vadd.f32 %v3862_v50, %v3861_v51  ;;  %v1810_v48 = vadd.f32 %v5969_v28, %v5967_v38  ;;  %v3563_v0 = vsel %vm3415_vm6, %v2285_v15, 0.0 }
 0x197   :  { %v4312_v56 = vpack.c.bf16 %v2283_v35, %v2283_v35  ;;  %v3559_v34 = vsel %vm3415_vm6, %v2283_v35, 0.0  ;;  %v3693_v4 = vmul.f32 %v2283_v35, %v2283_v35  ;;  %v2286_v1 = vsel %vm2086_vm9, %v1986_v42, %v2186_v43  ;;  %v6151_v41 = vpop.f32.mrf.mxu0 }
 0x198   :  { %v3695_v59 = vmul.f32 %v2285_v15, %v2285_v15  ;;  %v3560_v23 = vadd.f32 %v3559_v34, %v3558_v58  ;;  %v4315_v26 = vpack.c.bf16 %v2286_v1, %v2286_v1  ;;  %vm2084_vm10 = vcmp.ge.f32.partialorder %v1984_v29, 0.0 }
 0x199   :  { %2784 = vst.msk [vmem:[%s6360_s5 + $0x120] sm:$0xf] %vm2711_vm4, %v4312_v56  ;;  %v3864_v38 = vsel %vm3415_vm6, %v3693_v4, 0.0  ;;  %v2184_v28 = vmul.f32 0.0, %v1984_v29  ;;  %vm2089_vm11 = vcmp.ge.f32.partialorder %v1989_v18, 0.0  ;;  %v3696_v19 = vmul.f32 %v2286_v1, %v2286_v1  ;;  %v6162_v34 = vpop.f32.mrf.mxu0  ;;  %v6164_v4 = vpop.f32.mrf.mxu1 }
 0x19a   :  { %v3865_v8 = vadd.f32 %v3864_v38, %v3863_v22  ;;  %2787 = vst.msk [vmem:[%s6360_s5 + $0x12c] sm:$0xf] %vm2711_vm4, %v4315_v26  ;;  %v2189_v47 = vmul.f32 0.0, %v1989_v18  ;;  %v1987_v31 = vadd.f32 %v6093_v11, %v1810_v48  ;;  %v1821_v24 = vadd.f32 %v5993_v49, %v5991_v37 }
 0x19b   :  { %v2284_v25 = vsel %vm2084_vm10, %v1984_v29, %v2184_v28  ;;  %v1813_v17 = vadd.f32 %v6009_v54, %v6007_v9  ;;  %v1834_v32 = vadd.f32 %v6025_v20, %v6023_v55  ;;  %v3868_v21 = vsel %vm3415_vm6, %v3695_v59, 0.0 }
 0x19c   :  { %v4313_v60 = vpack.c.bf16 %v2284_v25, %v2284_v25  ;;  %v3561_v12 = vsel %vm3415_vm6, %v2284_v25, 0.0  ;;  %v3694_v16 = vmul.f32 %v2284_v25, %v2284_v25  ;;  %v2289_v53 = vsel %vm2089_vm11, %v1989_v18, %v2189_v47 }
 0x19d   :  { %v3565_v63 = vsel %vm3415_vm6, %v2286_v1, 0.0  ;;  %v3562_v37 = vadd.f32 %v3561_v12, %v3560_v23  ;;  %v4318_v49 = vpack.c.bf16 %v2289_v53, %v2289_v53  ;;  %vm2087_vm12 = vcmp.ge.f32.partialorder %v1987_v31, 0.0 }
 0x19e   :  { %2785 = vst.msk [vmem:[%s6360_s5 + $0x124] sm:$0xf] %vm2711_vm4, %v4313_v60  ;;  %v3866_v9 = vsel %vm3415_vm6, %v3694_v16, 0.0  ;;  %v2187_v54 = vmul.f32 0.0, %v1987_v31  ;;  %v1990_v55 = vadd.f32 %v6093_v11, %v1821_v24  ;;  %v3870_v20 = vsel %vm3415_vm6, %v3696_v19, 0.0  ;;  %v6188_v60 = vpop.f32.mrf.mxu1 }
 0x19f   :  { %v3564_v3 = vadd.f32 %v3563_v0, %v3562_v37  ;;  %v3867_v5 = vadd.f32 %v3866_v9, %v3865_v8  ;;  %2790 = vst.msk [vmem:[%s6360_s5 + $0x138] sm:$0xf] %vm2711_vm4, %v4318_v49  ;;  %v1988_v10 = vadd.f32 %v6093_v11, %v1813_v17  ;;  %v1993_v15 = vadd.f32 %v6093_v11, %v1834_v32  ;;  %v6186_v32 = vpop.f32.mrf.mxu0 }
 0x1a0   :  { %v2287_v36 = vsel %vm2087_vm12, %v1987_v31, %v2187_v54  ;;  %vm2090_vm13 = vcmp.ge.f32.partialorder %v1990_v55, 0.0  ;;  %v2190_v52 = vmul.f32 0.0, %v1990_v55  ;;  %v3571_v43 = vsel %vm3415_vm6, %v2289_v53, 0.0 }
 0x1a1   :  { %v3869_v6 = vadd.f32 %v3868_v21, %v3867_v5  ;;  %v4316_v61 = vpack.c.bf16 %v2287_v36, %v2287_v36  ;;  %v3566_v42 = vadd.f32 %v3565_v63, %v3564_v3  ;;  %v3567_v51 = vsel %vm3415_vm6, %v2287_v36, 0.0  ;;  %v6202_v54 = vpop.f32.mrf.mxu0 }
 0x1a2   :  { %v3697_v33 = vmul.f32 %v2287_v36, %v2287_v36  ;;  %v2290_v58 = vsel %vm2090_vm13, %v1990_v55, %v2190_v52  ;;  %vm2088_vm14 = vcmp.ge.f32.partialorder %v1988_v10, 0.0  ;;  %v2188_v50 = vmul.f32 0.0, %v1988_v10  ;;  %v6204_v55 = vpop.f32.mrf.mxu1 }
 0x1a3   :  { %2788 = vst.msk [vmem:[%s6360_s5 + $0x130] sm:$0xf] %vm2711_vm4, %v4316_v61  ;;  %v3568_v29 = vadd.f32 %v3567_v51, %v3566_v42  ;;  %v3871_v35 = vadd.f32 %v3870_v20, %v3869_v6  ;;  %v4319_v22 = vpack.c.bf16 %v2290_v58, %v2290_v58  ;;  %v3699_v18 = vmul.f32 %v2289_v53, %v2289_v53 }
 0x1a4   :  { %v3872_v48 = vsel %vm3415_vm6, %v3697_v33, 0.0  ;;  %v2288_v56 = vsel %vm2088_vm14, %v1988_v10, %v2188_v50  ;;  %vm2093_vm15 = vcmp.ge.f32.partialorder %v1993_v15, 0.0  ;;  %v3700_v26 = vmul.f32 %v2290_v58, %v2290_v58  ;;  %v1860_v50 = vpop.f32.mrf.mxu1 }
 0x1a5   :  { %v3873_v1 = vadd.f32 %v3872_v48, %v3871_v35  ;;  %2791 = vst.msk [vmem:[%s6360_s5 + $0x13c] sm:$0xf] %vm2711_vm4, %v4319_v22  ;;  %v4317_v0 = vpack.c.bf16 %v2288_v56, %v2288_v56  ;;  %v3569_v59 = vsel %vm3415_vm6, %v2288_v56, 0.0  ;;  %v3698_v23 = vmul.f32 %v2288_v56, %v2288_v56 }
 0x1a6   :  { %v3570_v38 = vadd.f32 %v3569_v59, %v3568_v29  ;;  %v2193_v28 = vmul.f32 0.0, %v1993_v15  ;;  %v1826_v8 = vadd.f32 %v6044_v14, %v6042_v46  ;;  %v1837_v47 = vadd.f32 %v6056_v62, %v6054_v13 }
 0x1a7   :  { %2789 = vst.msk [vmem:[%s6360_s5 + $0x134] sm:$0xf] %vm2711_vm4, %v4317_v0  ;;  %v3874_v19 = vsel %vm3415_vm6, %v3698_v23, 0.0  ;;  %v1829_v31 = vadd.f32 %v6073_v57, %v6071_v2  ;;  %v1850_v25 = vadd.f32 %v6098_v44, %v6096_v7  ;;  %v3876_v12 = vsel %vm3415_vm6, %v3699_v18, 0.0 }
 0x1a8   :  { %v3572_v24 = vadd.f32 %v3571_v43, %v3570_v38  ;;  %v3875_v17 = vadd.f32 %v3874_v19, %v3873_v1  ;;  %v2293_v46 = vsel %vm2093_vm15, %v1993_v15, %v2193_v28  ;;  %v1991_v14 = vadd.f32 %v6093_v11, %v1826_v8 }
 0x1a9   :  { %v3573_v13 = vsel %vm3415_vm6, %v2290_v58, 0.0  ;;  %v4322_v62 = vpack.c.bf16 %v2293_v46, %v2293_v46  ;;  %v1994_v2 = vadd.f32 %v6093_v11, %v1837_v47  ;;  %v3878_v16 = vsel %vm3415_vm6, %v3700_v26, 0.0  ;;  %v6218_v58 = vpop.f32.mrf.mxu0 }
 0x1aa   :  { %v3877_v57 = vadd.f32 %v3876_v12, %v3875_v17  ;;  %vm2091_vm0 = vcmp.ge.f32.partialorder %v1991_v14, 0.0  ;;  %v2191_v7 = vmul.f32 0.0, %v1991_v14  ;;  %v3574_v44 = vadd.f32 %v3573_v13, %v3572_v24 }
 0x1ab   :  { %2794 = vst.msk [vmem:[%s6360_s5 + $0x148] sm:$0xf] %vm2711_vm4, %v4322_v62  ;;  %vm2094_vm1 = vcmp.ge.f32.partialorder %v1994_v2, 0.0  ;;  %v2194_v53 = vmul.f32 0.0, %v1994_v2  ;;  %v1992_v21 = vadd.f32 %v6093_v11, %v1829_v31  ;;  %v1997_v49 = vadd.f32 %v6093_v11, %v1850_v25 }
 0x1ac   :  { %v2291_v63 = vsel %vm2091_vm0, %v1991_v14, %v2191_v7  ;;  %v3879_v37 = vadd.f32 %v3878_v16, %v3877_v57  ;;  %v1842_v9 = vadd.f32 %v6113_v45, %v6111_v39  ;;  %v3579_v36 = vsel %vm3415_vm6, %v2293_v46, 0.0 }
 0x1ad   :  { %v4320_v20 = vpack.c.bf16 %v2291_v63, %v2291_v63  ;;  %v3575_v3 = vsel %vm3415_vm6, %v2291_v63, 0.0  ;;  %v3701_v5 = vmul.f32 %v2291_v63, %v2291_v63  ;;  %v2294_v10 = vsel %vm2094_vm1, %v1994_v2, %v2194_v53 }
 0x1ae   :  { %v3703_v52 = vmul.f32 %v2293_v46, %v2293_v46  ;;  %v3576_v15 = vadd.f32 %v3575_v3, %v3574_v44  ;;  %v4323_v6 = vpack.c.bf16 %v2294_v10, %v2294_v10  ;;  %vm2092_vm2 = vcmp.ge.f32.partialorder %v1992_v21, 0.0 }
 0x1af   :  { %2792 = vst.msk [vmem:[%s6360_s5 + $0x140] sm:$0xf] %vm2711_vm4, %v4320_v20  ;;  %v3880_v39 = vsel %vm3415_vm6, %v3701_v5, 0.0  ;;  %v2192_v45 = vmul.f32 0.0, %v1992_v21  ;;  %vm2097_vm3 = vcmp.ge.f32.partialorder %v1997_v49, 0.0  ;;  %v3704_v42 = vmul.f32 %v2294_v10, %v2294_v10 }
 0x1b0   :  { %v3881_v61 = vadd.f32 %v3880_v39, %v3879_v37  ;;  %2795 = vst.msk [vmem:[%s6360_s5 + $0x14c] sm:$0xf] %vm2711_vm4, %v4323_v6  ;;  %v2197_v51 = vmul.f32 0.0, %v1997_v49  ;;  %v1995_v33 = vadd.f32 %v6093_v11, %v1842_v9  ;;  %v1853_v29 = vadd.f32 %v6134_v27, %v6132_v40 }
 0x1b1   :  { %v2292_v43 = vsel %vm2092_vm2, %v1992_v21, %v2192_v45  ;;  %v1845_v35 = vadd.f32 %v6153_v30, %v6151_v41  ;;  %v1866_v22 = vadd.f32 %v6164_v4, %v6162_v34  ;;  %v3884_v0 = vsel %vm3415_vm6, %v3703_v52, 0.0  ;;  %v4538_v30 = vpop.f32.mrf.mxu0  ;;  %v4640_v34 = vpop.f32.mrf.mxu1 }
 0x1b2   :  { %v4321_v18 = vpack.c.bf16 %v2292_v43, %v2292_v43  ;;  %v3577_v48 = vsel %vm3415_vm6, %v2292_v43, 0.0  ;;  %v3702_v56 = vmul.f32 %v2292_v43, %v2292_v43  ;;  %v2297_v1 = vsel %vm2097_vm3, %v1997_v49, %v2197_v51 }
 0x1b3   :  { %v3581_v59 = vsel %vm3415_vm6, %v2294_v10, 0.0  ;;  %v3578_v23 = vadd.f32 %v3577_v48, %v3576_v15  ;;  %v4326_v26 = vpack.c.bf16 %v2297_v1, %v2297_v1  ;;  %vm2095_vm5 = vcmp.ge.f32.partialorder %v1995_v33, 0.0  ;;  %v1033_v62 = vpop.f32.mrf.mxu0  ;;  %v1873_v2 = vpop.f32.mrf.mxu1 }
 0x1b4   :  { %2793 = vst.msk [vmem:[%s6360_s5 + $0x144] sm:$0xf] %vm2711_vm4, %v4321_v18  ;;  %v3882_v40 = vsel %vm3415_vm6, %v3702_v56, 0.0  ;;  %v2195_v27 = vmul.f32 0.0, %v1995_v33  ;;  %v1998_v41 = vadd.f32 %v6093_v11, %v1853_v29  ;;  %v3886_v4 = vsel %vm3415_vm6, %v3704_v42, 0.0 }
 0x1b5   :  { %v3580_v38 = vadd.f32 %v3579_v36, %v3578_v23  ;;  %v3883_v28 = vadd.f32 %v3882_v40, %v3881_v61  ;;  %2798 = vst.msk [vmem:[%s6360_s5 + $0x158] sm:$0xf] %vm2711_vm4, %v4326_v26  ;;  %v1996_v8 = vadd.f32 %v6093_v11, %v1845_v35  ;;  %v2001_v31 = vadd.f32 %v6093_v11, %v1866_v22  ;;  %v4539_v52 = vpop.f32.mrf.mxu0  ;;  %v4641_v15 = vpop.f32.mrf.mxu1 }
 0x1b6   :  { %v2295_v19 = vsel %vm2095_vm5, %v1995_v33, %v2195_v27  ;;  %vm2098_vm7 = vcmp.ge.f32.partialorder %v1998_v41, 0.0  ;;  %v2198_v47 = vmul.f32 0.0, %v1998_v41  ;;  %v3587_v57 = vsel %vm3415_vm6, %v2297_v1, 0.0 }
 0x1b7   :  { %v3885_v25 = vadd.f32 %v3884_v0, %v3883_v28  ;;  %v4324_v24 = vpack.c.bf16 %v2295_v19, %v2295_v19  ;;  %v3582_v17 = vadd.f32 %v3581_v59, %v3580_v38  ;;  %v3583_v46 = vsel %vm3415_vm6, %v2295_v19, 0.0 }
 0x1b8   :  { %v3705_v14 = vmul.f32 %v2295_v19, %v2295_v19  ;;  %v2298_v12 = vsel %vm2098_vm7, %v1998_v41, %v2198_v47  ;;  %vm2096_vm8 = vcmp.ge.f32.partialorder %v1996_v8, 0.0  ;;  %v2196_v13 = vmul.f32 0.0, %v1996_v8 }
 0x1b9   :  { %2796 = vst.msk [vmem:[%s6360_s5 + $0x150] sm:$0xf] %vm2711_vm4, %v4324_v24  ;;  %v3584_v7 = vadd.f32 %v3583_v46, %v3582_v17  ;;  %v3887_v44 = vadd.f32 %v3886_v4, %v3885_v25  ;;  %v4327_v16 = vpack.c.bf16 %v2298_v12, %v2298_v12  ;;  %v3707_v53 = vmul.f32 %v2297_v1, %v2297_v1 }
 0x1ba   :  { %v3888_v21 = vsel %vm3415_vm6, %v3705_v14, 0.0  ;;  %v2296_v63 = vsel %vm2096_vm8, %v1996_v8, %v2196_v13  ;;  %vm2101_vm9 = vcmp.ge.f32.partialorder %v2001_v31, 0.0  ;;  %v3708_v3 = vmul.f32 %v2298_v12, %v2298_v12 }
 0x1bb   :  { %v3889_v37 = vadd.f32 %v3888_v21, %v3887_v44  ;;  %2799 = vst.msk [vmem:[%s6360_s5 + $0x15c] sm:$0xf] %vm2711_vm4, %v4327_v16  ;;  %v4325_v49 = vpack.c.bf16 %v2296_v63, %v2296_v63  ;;  %v3585_v9 = vsel %vm3415_vm6, %v2296_v63, 0.0  ;;  %v3706_v20 = vmul.f32 %v2296_v63, %v2296_v63 }
 0x1bc   :  { %v3586_v5 = vadd.f32 %v3585_v9, %v3584_v7  ;;  %v2201_v10 = vmul.f32 0.0, %v2001_v31  ;;  %v1858_v36 = vadd.f32 %v6188_v60, %v6186_v32  ;;  %v1869_v39 = vadd.f32 %v6204_v55, %v6202_v54  ;;  %v1036_v55 = vpop.f32.mrf.mxu0 }
 0x1bd   :  { %2797 = vst.msk [vmem:[%s6360_s5 + $0x154] sm:$0xf] %vm2711_vm4, %v4325_v49  ;;  %v3890_v6 = vsel %vm3415_vm6, %v3706_v20, 0.0  ;;  %v1861_v45 = vadd.f32 %v1860_v50, %v6218_v58  ;;  %v1882_v61 = vadd.f32 %v4640_v34, %v4538_v30  ;;  %v3892_v60 = vsel %vm3415_vm6, %v3707_v53, 0.0  ;;  %v1876_v58 = vpop.f32.mrf.mxu1 }
 0x1be   :  { %v3588_v42 = vadd.f32 %v3587_v57, %v3586_v5  ;;  %v3891_v51 = vadd.f32 %v3890_v6, %v3889_v37  ;;  %v2301_v33 = vsel %vm2101_vm9, %v2001_v31, %v2201_v10  ;;  %v1999_v32 = vadd.f32 %v6093_v11, %v1858_v36  ;;  %v4542_v28 = vpop.f32.mrf.mxu0 }
 0x1bf   :  { %v3589_v43 = vsel %vm3415_vm6, %v2298_v12, 0.0  ;;  %v4330_v29 = vpack.c.bf16 %v2301_v33, %v2301_v33  ;;  %v2002_v35 = vadd.f32 %v6093_v11, %v1869_v39  ;;  %v3894_v50 = vsel %vm3415_vm6, %v3708_v3, 0.0  ;;  %v4644_v8 = vpop.f32.mrf.mxu1 }
 0x1c0   :  { %v3893_v22 = vadd.f32 %v3892_v60, %v3891_v51  ;;  %vm2099_vm10 = vcmp.ge.f32.partialorder %v1999_v32, 0.0  ;;  %v2199_v18 = vmul.f32 0.0, %v1999_v32  ;;  %v3590_v54 = vadd.f32 %v3589_v43, %v3588_v42  ;;  %v1049_v44 = vpop.f32.mrf.mxu0 }
 0x1c1   :  { %2802 = vst.msk [vmem:[%s6360_s5 + $0x168] sm:$0xf] %vm2711_vm4, %v4330_v29  ;;  %vm2102_vm11 = vcmp.ge.f32.partialorder %v2002_v35, 0.0  ;;  %v2202_v48 = vmul.f32 0.0, %v2002_v35  ;;  %v2000_v56 = vadd.f32 %v6093_v11, %v1861_v45  ;;  %v2005_v59 = vadd.f32 %v6093_v11, %v1882_v61  ;;  %v1889_v16 = vpop.f32.mrf.mxu1 }
 0x1c2   :  { %v2299_v1 = vsel %vm2099_vm10, %v1999_v32, %v2199_v18  ;;  %v3895_v0 = vadd.f32 %v3894_v50, %v3893_v22  ;;  %v1874_v23 = vadd.f32 %v1873_v2, %v1033_v62  ;;  %v3595_v30 = vsel %vm3415_vm6, %v2301_v33, 0.0  ;;  %v4543_v39 = vpop.f32.mrf.mxu0 }
 0x1c3   :  { %v4328_v26 = vpack.c.bf16 %v2299_v1, %v2299_v1  ;;  %v3591_v40 = vsel %vm3415_vm6, %v2299_v1, 0.0  ;;  %v3709_v27 = vmul.f32 %v2299_v1, %v2299_v1  ;;  %v2302_v41 = vsel %vm2102_vm11, %v2002_v35, %v2202_v48  ;;  %v4645_v45 = vpop.f32.mrf.mxu1 }
 0x1c4   :  { %v3711_v34 = vmul.f32 %v2301_v33, %v2301_v33  ;;  %v3592_v4 = vadd.f32 %v3591_v40, %v3590_v54  ;;  %v4331_v38 = vpack.c.bf16 %v2302_v41, %v2302_v41  ;;  %vm2100_vm12 = vcmp.ge.f32.partialorder %v2000_v56, 0.0 }
 0x1c5   :  { %2800 = vst.msk [vmem:[%s6360_s5 + $0x160] sm:$0xf] %vm2711_vm4, %v4328_v26  ;;  %v3896_v19 = vsel %vm3415_vm6, %v3709_v27, 0.0  ;;  %v2200_v47 = vmul.f32 0.0, %v2000_v56  ;;  %vm2105_vm13 = vcmp.ge.f32.partialorder %v2005_v59, 0.0  ;;  %v3712_v25 = vmul.f32 %v2302_v41, %v2302_v41  ;;  %v1892_v50 = vpop.f32.mrf.mxu1 }
 0x1c6   :  { %v3897_v31 = vadd.f32 %v3896_v19, %v3895_v0  ;;  %2803 = vst.msk [vmem:[%s6360_s5 + $0x16c] sm:$0xf] %vm2711_vm4, %v4331_v38  ;;  %v2205_v24 = vmul.f32 0.0, %v2005_v59  ;;  %v2003_v17 = vadd.f32 %v6093_v11, %v1874_v23  ;;  %v1885_v14 = vadd.f32 %v4641_v15, %v4539_v52 }
 0x1c7   :  { %v2300_v46 = vsel %vm2100_vm12, %v2000_v56, %v2200_v47  ;;  %v1877_v12 = vadd.f32 %v1876_v58, %v1036_v55  ;;  %v1898_v13 = vadd.f32 %v4644_v8, %v4542_v28  ;;  %v3900_v53 = vsel %vm3415_vm6, %v3711_v34, 0.0  ;;  %v1052_v58 = vpop.f32.mrf.mxu0 }
 0x1c8   :  { %v4329_v62 = vpack.c.bf16 %v2300_v46, %v2300_v46  ;;  %v3593_v2 = vsel %vm3415_vm6, %v2300_v46, 0.0  ;;  %v3710_v57 = vmul.f32 %v2300_v46, %v2300_v46  ;;  %v2305_v7 = vsel %vm2105_vm13, %v2005_v59, %v2205_v24 }
 0x1c9   :  { %v3597_v21 = vsel %vm3415_vm6, %v2302_v41, 0.0  ;;  %v3594_v63 = vadd.f32 %v3593_v2, %v3592_v4  ;;  %v4334_v37 = vpack.c.bf16 %v2305_v7, %v2305_v7  ;;  %vm2103_vm14 = vcmp.ge.f32.partialorder %v2003_v17, 0.0 }
 0x1ca   :  { %2801 = vst.msk [vmem:[%s6360_s5 + $0x164] sm:$0xf] %vm2711_vm4, %v4329_v62  ;;  %v3898_v49 = vsel %vm3415_vm6, %v3710_v57, 0.0  ;;  %v2203_v9 = vmul.f32 0.0, %v2003_v17  ;;  %v2006_v20 = vadd.f32 %v6093_v11, %v1885_v14  ;;  %v3902_v3 = vsel %vm3415_vm6, %v3712_v25, 0.0 }
 0x1cb   :  { %v3596_v5 = vadd.f32 %v3595_v30, %v3594_v63  ;;  %v3899_v10 = vadd.f32 %v3898_v49, %v3897_v31  ;;  %2806 = vst.msk [vmem:[%s6360_s5 + $0x178] sm:$0xf] %vm2711_vm4, %v4334_v37  ;;  %v2004_v36 = vadd.f32 %v6093_v11, %v1877_v12  ;;  %v2009_v6 = vadd.f32 %v6093_v11, %v1898_v13 }
 0x1cc   :  { %v2303_v52 = vsel %vm2103_vm14, %v2003_v17, %v2203_v9  ;;  %vm2106_vm15 = vcmp.ge.f32.partialorder %v2006_v20, 0.0  ;;  %v2206_v15 = vmul.f32 0.0, %v2006_v20  ;;  %v3715_v18 = vmul.f32 %v2305_v7, %v2305_v7 }
 0x1cd   :  { %v3901_v61 = vadd.f32 %v3900_v53, %v3899_v10  ;;  %v4332_v42 = vpack.c.bf16 %v2303_v52, %v2303_v52  ;;  %v3598_v51 = vadd.f32 %v3597_v21, %v3596_v5  ;;  %v3599_v33 = vsel %vm3415_vm6, %v2303_v52, 0.0 }
 0x1ce   :  { %v3713_v32 = vmul.f32 %v2303_v52, %v2303_v52  ;;  %v2306_v60 = vsel %vm2106_vm15, %v2006_v20, %v2206_v15  ;;  %vm2104_vm0 = vcmp.ge.f32.partialorder %v2004_v36, 0.0  ;;  %v2204_v43 = vmul.f32 0.0, %v2004_v36 }
 0x1cf   :  { %2804 = vst.msk [vmem:[%s6360_s5 + $0x170] sm:$0xf] %vm2711_vm4, %v4332_v42  ;;  %v3600_v29 = vadd.f32 %v3599_v33, %v3598_v51  ;;  %v3903_v35 = vadd.f32 %v3902_v3, %v3901_v61  ;;  %v4335_v22 = vpack.c.bf16 %v2306_v60, %v2306_v60  ;;  %vm2109_vm1 = vcmp.ge.f32.partialorder %v2009_v6, 0.0 }
 0x1d0   :  { %v3904_v54 = vsel %vm3415_vm6, %v3713_v32, 0.0  ;;  %v2304_v55 = vsel %vm2104_vm0, %v2004_v36, %v2204_v43  ;;  %v3603_v59 = vsel %vm3415_vm6, %v2305_v7, 0.0  ;;  %v2209_v26 = vmul.f32 0.0, %v2009_v6 }
 0x1d1   :  { %v3905_v48 = vadd.f32 %v3904_v54, %v3903_v35  ;;  %2807 = vst.msk [vmem:[%s6360_s5 + $0x17c] sm:$0xf] %vm2711_vm4, %v4335_v22  ;;  %v4333_v56 = vpack.c.bf16 %v2304_v55, %v2304_v55  ;;  %v3601_v1 = vsel %vm3415_vm6, %v2304_v55, 0.0  ;;  %v3714_v0 = vmul.f32 %v2304_v55, %v2304_v55 }
 0x1d2   :  { %v3602_v23 = vadd.f32 %v3601_v1, %v3600_v29  ;;  %v1890_v40 = vadd.f32 %v1889_v16, %v1049_v44  ;;  %v3716_v27 = vmul.f32 %v2306_v60, %v2306_v60  ;;  %v1901_v30 = vadd.f32 %v4645_v45, %v4543_v39 }
 0x1d3   :  { %2805 = vst.msk [vmem:[%s6360_s5 + $0x174] sm:$0xf] %vm2711_vm4, %v4333_v56  ;;  %v3906_v41 = vsel %vm3415_vm6, %v3714_v0, 0.0  ;;  %v1893_v34 = vadd.f32 %v1892_v50, %v1052_v58  ;;  %v2309_v28 = vsel %vm2109_vm1, %v2009_v6, %v2209_v26  ;;  %v3908_v19 = vsel %vm3415_vm6, %v3715_v18, 0.0 }
 0x1d4   :  { %v3604_v4 = vadd.f32 %v3603_v59, %v3602_v23  ;;  %v3907_v38 = vadd.f32 %v3906_v41, %v3905_v48  ;;  %v2007_v8 = vadd.f32 %v6093_v11, %v1890_v40  ;;  %v4338_v47 = vpack.c.bf16 %v2309_v28, %v2309_v28 }
 0x1d5   :  { %v2010_v31 = vadd.f32 %v6093_v11, %v1901_v30  ;;  %v3605_v25 = vsel %vm3415_vm6, %v2306_v60, 0.0  ;;  %v2008_v12 = vadd.f32 %v6093_v11, %v1893_v34  ;;  %v3910_v13 = vsel %vm3415_vm6, %v3716_v27, 0.0 }
 0x1d6   :  { %v3909_v24 = vadd.f32 %v3908_v19, %v3907_v38  ;;  %vm2107_vm2 = vcmp.ge.f32.partialorder %v2007_v8, 0.0  ;;  %v2207_v17 = vmul.f32 0.0, %v2007_v8  ;;  %2810 = vst.msk [vmem:[%s6360_s5 + $0x188] sm:$0xf] %vm2711_vm4, %v4338_v47  ;;  %v3606_v46 = vadd.f32 %v3605_v25, %v3604_v4 }
 0x1d7   :  { %vm2110_vm3 = vcmp.ge.f32.partialorder %v2010_v31, 0.0  ;;  %v2210_v14 = vmul.f32 0.0, %v2010_v31  ;;  %vm2108_vm5 = vcmp.ge.f32.partialorder %v2008_v12, 0.0  ;;  %v2208_v63 = vmul.f32 0.0, %v2008_v12 }
 0x1d8   :  { %v2307_v62 = vsel %vm2107_vm2, %v2007_v8, %v2207_v17  ;;  %v3911_v7 = vadd.f32 %v3910_v13, %v3909_v24  ;;  %v3719_v9 = vmul.f32 %v2309_v28, %v2309_v28  ;;  %v3611_v36 = vsel %vm3415_vm6, %v2309_v28, 0.0 }
 0x1d9   :  { %v4336_v2 = vpack.c.bf16 %v2307_v62, %v2307_v62  ;;  %v3717_v57 = vmul.f32 %v2307_v62, %v2307_v62  ;;  %v2310_v44 = vsel %vm2110_vm3, %v2010_v31, %v2210_v14  ;;  %v3607_v16 = vsel %vm3415_vm6, %v2307_v62, 0.0 }
 0x1da   :  { %v4339_v53 = vpack.c.bf16 %v2310_v44, %v2310_v44  ;;  %v3608_v21 = vadd.f32 %v3607_v16, %v3606_v46  ;;  %v2308_v49 = vsel %vm2108_vm5, %v2008_v12, %v2208_v63  ;;  %v3720_v52 = vmul.f32 %v2310_v44, %v2310_v44 }
 0x1db   :  { %2808 = vst.msk [vmem:[%s6360_s5 + $0x180] sm:$0xf] %vm2711_vm4, %v4336_v2  ;;  %v3912_v11 = vsel %vm3415_vm6, %v3717_v57, 0.0  ;;  %v4337_v20 = vpack.c.bf16 %v2308_v49, %v2308_v49  ;;  %v3609_v3 = vsel %vm3415_vm6, %v2308_v49, 0.0  ;;  %v3718_v5 = vmul.f32 %v2308_v49, %v2308_v49 }
 0x1dc   :  { %2811 = vst.msk [vmem:[%s6360_s5 + $0x18c] sm:$0xf] %vm2711_vm4, %v4339_v53  ;;  %v3913_v37 = vadd.f32 %v3912_v11, %v3911_v7  ;;  %v3610_v10 = vadd.f32 %v3609_v3, %v3608_v21  ;;  %v3916_v45 = vsel %vm3415_vm6, %v3719_v9, 0.0  ;;  %v3613_v61 = vsel %vm3415_vm6, %v2310_v44, 0.0 }
 0x1dd   :  { %2809 = vst.msk [vmem:[%s6360_s5 + $0x184] sm:$0xf] %vm2711_vm4, %v4337_v20  ;;  %v3914_v15 = vsel %vm3415_vm6, %v3718_v5, 0.0  ;;  %v3918_v33 = vsel %vm3415_vm6, %v3720_v52, 0.0  ;;  %vm3926_vm4 = vcmask 1040384   ;;  %vm3928_vm7 = vcmask 254976  }
 0x1de   :  { %v3612_v6 = vadd.f32 %v3611_v36, %v3610_v10  ;;  %v3915_v39 = vadd.f32 %v3914_v15, %v3913_v37 }
 0x1e0   :  { %v3614_v42 = vadd.f32 %v3613_v61, %v3612_v6  ;;  %v3917_v51 = vadd.f32 %v3916_v45, %v3915_v39 }
 0x1e2   :  { %v3615_v32 = vrot.slane %v3614_v42, 4  ;;  %v3919_v60 = vadd.f32 %v3918_v33, %v3917_v51 }
 0x1e4   :  { %v3616_v43 = vadd.f32 %v3615_v32, %v3614_v42  ;;  %v3920_v29 = vrot.slane %v3919_v60, 4 }
 0x1e6   :  { %v3617_v35 = vrot.slane %v3616_v43, 2  ;;  %v3921_v22 = vadd.f32 %v3920_v29, %v3919_v60 }
 0x1e8   :  { %v3618_v18 = vadd.f32 %v3617_v35, %v3616_v43  ;;  %v3922_v54 = vrot.slane %v3921_v22, 2 }
 0x1ea   :  { %v3619_v55 = vrot.slane %v3618_v18, 1  ;;  %v3923_v58 = vadd.f32 %v3922_v54, %v3921_v22 }
 0x1ec   :  { %v3924_v50 = vrot.slane %v3923_v58, 1  ;;  %v3620_v48 = vadd.f32 %v3619_v55, %v3618_v18 }
 0x1ee   :  { %v3925_v56 = vadd.f32 %v3924_v50, %v3923_v58 }
 0x1f0   :  { %v3927_v1 = vsel %vm3926_vm4, %v3620_v48, %v3925_v56 }
 0x1f1   :  { %3929 = vst.msk [vmem:[%s6361_s6] sm:$0x3] %vm3928_vm7, %v3927_v1 }

// kernel: node_layer_forward.9
= control target key start
LH: loop header
LB: loop body
LE: loop exit
PB: predicated region body
PF: predicated region fallthrough
CT: control target
= control target key end

     0   :  { %vm391_vm0 = vcmask 261120   ;;  %s4554_s0 = inlined_call_operand.vmem [shape: bf16[800,32], index: 0, kind: input, shape index: {}]   ;;  %s4555_s1 = inlined_call_operand.vmem [shape: bf16[32,32], index: 1, kind: input, shape index: {}]   ;;  %s4556_s2 = inlined_call_operand.vmem [shape: f32[1,32], index: 2, kind: input, shape index: {}]   ;;  %s4557_s3 = inlined_call_operand.vmem [shape: bf16[800,32], index: 3, kind: output, shape index: {0}]   ;;  %s4558_s4 = inlined_call_operand.hbm [shape: f32[1,2,32], index: 4, kind: output, shape index: {1}]  }
   0x1   :  { %v3075_v0 = vld [vmem:[%s4555_s1 + $0x8] sm:$0xff]   ;;  %v3076_v1 = vld [vmem:[%s4555_s1] sm:$0xff]   ;;  %v3079_v4 = vld [vmem:[%s4554_s0 + $0x10] sm:$0xff]  }
   0x2   :  { %2966 = vmatprep.subr.bf16.mxu0 %v3075_v0  ;;  %v3077_v2 = vld [vmem:[%s4554_s0] sm:$0xff]   ;;  %3070 = vmatprep.subr.bf16.mxu1 %v3075_v0  ;;  %v3078_v3 = vld [vmem:[%s4554_s0 + $0x8] sm:$0xff]   ;;  %v3080_v5 = vld [vmem:[%s4554_s0 + $0x18] sm:$0xff]  }
   0x3   :  { %2967 = vmatpush3.bf16.msra.mxu0 %v3075_v0  ;;  %3072 = vmatpush3.bf16.msra.mxu1 %v3075_v0  ;;  %v3081_v6 = vld [vmem:[%s4554_s0 + $0x20] sm:$0xff]   ;;  %v3082_v7 = vld [vmem:[%s4554_s0 + $0x28] sm:$0xff]   ;;  %v3083_v8 = vld [vmem:[%s4554_s0 + $0x30] sm:$0xff]  }
   0x4   :  { %2968 = vmatprep.subr.bf16.mxu0 %v3076_v1  ;;  %2970 = vmatprep.mubr.msk.bf16.mxu0 %vm391_vm0, %v3077_v2  ;;  %v3084_v9 = vld [vmem:[%s4554_s0 + $0x38] sm:$0xff]   ;;  %v3103_v10 = vld [vmem:[%s4554_s0 + $0xd0] sm:$0xff]   ;;  %v3105_v12 = vld [vmem:[%s4554_s0 + $0xe0] sm:$0xff]  }
   0x5   :  { %3071 = vmatprep.subr.bf16.mxu1 %v3076_v1  ;;  %v3104_v11 = vld [vmem:[%s4554_s0 + $0xd8] sm:$0xff]   ;;  %3022 = vmatprep.mubr.msk.bf16.mxu1 %vm391_vm0, %v3103_v10  ;;  %v3085_v13 = vld [vmem:[%s4554_s0 + $0x40] sm:$0xff]   ;;  %v3106_v14 = vld [vmem:[%s4554_s0 + $0xe8] sm:$0xff]  }
   0x6   :  { %v3107_v15 = vld [vmem:[%s4554_s0 + $0xf0] sm:$0xff]   ;;  %v3086_v16 = vld [vmem:[%s4554_s0 + $0x48] sm:$0xff]   ;;  %v3108_v18 = vld [vmem:[%s4554_s0 + $0xf8] sm:$0xff]  }
   0x7   :  { %2969 = vmatpush3.bf16.msra.mxu0 %v3076_v1  ;;  %3073 = vmatpush3.bf16.msra.mxu1 %v3076_v1  ;;  %v3087_v17 = vld [vmem:[%s4554_s0 + $0x50] sm:$0xff]   ;;  %v3109_v19 = vld [vmem:[%s4554_s0 + $0x100] sm:$0xff]   ;;  %v3088_v20 = vld [vmem:[%s4554_s0 + $0x58] sm:$0xff]  }
   0x8   :  { %v3089_v21 = vld [vmem:[%s4554_s0 + $0x60] sm:$0xff]   ;;  %v3110_v22 = vld [vmem:[%s4554_s0 + $0x108] sm:$0xff]   ;;  %v3111_v23 = vld [vmem:[%s4554_s0 + $0x110] sm:$0xff]  }
   0xa   :  { %2971 = vmatmul.mubr.msk.bf16.vlgmr.msra.gmra.mxu0 %vm391_vm0, %v3078_v3  ;;  %3023 = vmatmul.mubr.msk.bf16.vlgmr.msra.gmra.mxu1 %vm391_vm0, %v3104_v11 }
   0xb   :  { %2974 = vmatprep.mubr.msk.bf16.mxu0 %vm391_vm0, %v3079_v4  ;;  %3026 = vmatprep.mubr.msk.bf16.mxu1 %vm391_vm0, %v3105_v12 }
  0x12   :  { %2975 = vmatmul.mubr.msk.bf16.gmra.mxu0 %vm391_vm0, %v3080_v5  ;;  %3027 = vmatmul.mubr.msk.bf16.gmra.mxu1 %vm391_vm0, %v3106_v14 }
  0x13   :  { %2978 = vmatprep.mubr.msk.bf16.mxu0 %vm391_vm0, %v3081_v6  ;;  %3030 = vmatprep.mubr.msk.bf16.mxu1 %vm391_vm0, %v3107_v15 }
  0x1a   :  { %2979 = vmatmul.mubr.msk.bf16.gmra.mxu0 %vm391_vm0, %v3082_v7  ;;  %3031 = vmatmul.mubr.msk.bf16.gmra.mxu1 %vm391_vm0, %v3108_v18 }
  0x1b   :  { %2982 = vmatprep.mubr.msk.bf16.mxu0 %vm391_vm0, %v3083_v8  ;;  %3034 = vmatprep.mubr.msk.bf16.mxu1 %vm391_vm0, %v3109_v19 }
  0x22   :  { %2983 = vmatmul.mubr.msk.bf16.gmra.mxu0 %vm391_vm0, %v3084_v9 }
  0x23   :  { %2986 = vmatprep.mubr.msk.bf16.mxu0 %vm391_vm0, %v3085_v13 }
  0x2a   :  { %2987 = vmatmul.mubr.msk.bf16.gmra.mxu0 %vm391_vm0, %v3086_v16 }
  0x2b   :  { %2990 = vmatprep.mubr.msk.bf16.mxu0 %vm391_vm0, %v3087_v17 }
  0x32   :  { %2991 = vmatmul.mubr.msk.bf16.gmra.mxu0 %vm391_vm0, %v3088_v20 }
  0x33   :  { %2994 = vmatprep.mubr.msk.bf16.mxu0 %vm391_vm0, %v3089_v21 }
  0x34   :  { %10 = vsyncpa [#allocation3], 0  ;;  %v3090_v24 = vld [vmem:[%s4554_s0 + $0x68] sm:$0xff]   ;;  %v3091_v25 = vld [vmem:[%s4554_s0 + $0x70] sm:$0xff]   ;;  %3035 = vmatmul.mubr.msk.bf16.gmra.mxu1 %vm391_vm0, %v3110_v22  ;;  %vm1375_vm1 = vcmask 257024   ;;  %vm2589_vm2 = vcmask 1040384  }
  0x35   :  { %3038 = vmatprep.mubr.msk.bf16.mxu1 %vm391_vm0, %v3111_v23  ;;  %v3112_v26 = vld [vmem:[%s4554_s0 + $0x118] sm:$0xff]   ;;  %v3113_v27 = vld [vmem:[%s4554_s0 + $0x120] sm:$0xff]   ;;  %v3114_v30 = vld [vmem:[%s4554_s0 + $0x128] sm:$0xff]   ;;  %vm2591_vm3 = vcmask 254976  }
  0x36   :  { %v3092_v28 = vld [vmem:[%s4554_s0 + $0x78] sm:$0xff]   ;;  %v3093_v29 = vld [vmem:[%s4554_s0 + $0x80] sm:$0xff]   ;;  %v3115_v31 = vld [vmem:[%s4554_s0 + $0x130] sm:$0xff]  }
  0x37   :  { %v3094_v32 = vld [vmem:[%s4554_s0 + $0x88] sm:$0xff]   ;;  %v3095_v33 = vld [vmem:[%s4554_s0 + $0x90] sm:$0xff]   ;;  %v3116_v34 = vld [vmem:[%s4554_s0 + $0x138] sm:$0xff]  }
  0x38   :  { %v3117_v35 = vld [vmem:[%s4554_s0 + $0x140] sm:$0xff]   ;;  %v3096_v36 = vld [vmem:[%s4554_s0 + $0x98] sm:$0xff]   ;;  %v3118_v38 = vld [vmem:[%s4554_s0 + $0x148] sm:$0xff]  }
  0x39   :  { %v3097_v37 = vld [vmem:[%s4554_s0 + $0xa0] sm:$0xff]   ;;  %v3119_v39 = vld [vmem:[%s4554_s0 + $0x150] sm:$0xff]   ;;  %v3098_v40 = vld [vmem:[%s4554_s0 + $0xa8] sm:$0xff]  }
  0x3a   :  { %2995 = vmatmul.mubr.msk.bf16.gmra.mxu0 %vm391_vm0, %v3090_v24  ;;  %v3099_v41 = vld [vmem:[%s4554_s0 + $0xb0] sm:$0xff]   ;;  %v3120_v42 = vld [vmem:[%s4554_s0 + $0x158] sm:$0xff]   ;;  %v3121_v43 = vld [vmem:[%s4554_s0 + $0x160] sm:$0xff]  }
  0x3b   :  { %2998 = vmatprep.mubr.msk.bf16.mxu0 %vm391_vm0, %v3091_v25  ;;  %v3100_v44 = vld [vmem:[%s4554_s0 + $0xb8] sm:$0xff]   ;;  %v3101_v45 = vld [vmem:[%s4554_s0 + $0xc0] sm:$0xff]   ;;  %v3122_v46 = vld [vmem:[%s4554_s0 + $0x168] sm:$0xff]  }
  0x3c   :  { %3039 = vmatmul.mubr.msk.bf16.gmra.mxu1 %vm391_vm0, %v3112_v26  ;;  %v3123_v47 = vld [vmem:[%s4554_s0 + $0x170] sm:$0xff]   ;;  %v3102_v48 = vld [vmem:[%s4554_s0 + $0xc8] sm:$0xff]   ;;  %v3124_v49 = vld [vmem:[%s4554_s0 + $0x178] sm:$0xff]  }
  0x3d   :  { %3042 = vmatprep.mubr.msk.bf16.mxu1 %vm391_vm0, %v3113_v27  ;;  %v3125_v50 = vld [vmem:[%s4554_s0 + $0x180] sm:$0xff]   ;;  %v3126_v51 = vld [vmem:[%s4554_s0 + $0x188] sm:$0xff]  }
  0x3e   :  { %v3385_v52 = vld [vmem:[%s4556_s2] ss:$0 sm:$0xff] }
  0x42   :  { %2999 = vmatmul.mubr.msk.bf16.gmra.mxu0 %vm391_vm0, %v3092_v28 }
  0x43   :  { %3002 = vmatprep.mubr.msk.bf16.mxu0 %vm391_vm0, %v3093_v29 }
  0x44   :  { %3043 = vmatmul.mubr.msk.bf16.gmra.mxu1 %vm391_vm0, %v3114_v30 }
  0x45   :  { %3046 = vmatprep.mubr.msk.bf16.mxu1 %vm391_vm0, %v3115_v31 }
  0x4a   :  { %3003 = vmatmul.mubr.msk.bf16.gmra.mxu0 %vm391_vm0, %v3094_v32 }
  0x4b   :  { %3006 = vmatprep.mubr.msk.bf16.mxu0 %vm391_vm0, %v3095_v33 }
  0x4c   :  { %3047 = vmatmul.mubr.msk.bf16.gmra.mxu1 %vm391_vm0, %v3116_v34 }
  0x4d   :  { %3050 = vmatprep.mubr.msk.bf16.mxu1 %vm391_vm0, %v3117_v35 }
  0x52   :  { %3007 = vmatmul.mubr.msk.bf16.gmra.mxu0 %vm391_vm0, %v3096_v36 }
  0x53   :  { %3010 = vmatprep.mubr.msk.bf16.mxu0 %vm391_vm0, %v3097_v37 }
  0x54   :  { %3051 = vmatmul.mubr.msk.bf16.gmra.mxu1 %vm391_vm0, %v3118_v38 }
  0x55   :  { %3054 = vmatprep.mubr.msk.bf16.mxu1 %vm391_vm0, %v3119_v39 }
  0x5a   :  { %3011 = vmatmul.mubr.msk.bf16.gmra.mxu0 %vm391_vm0, %v3098_v40 }
  0x5b   :  { %3014 = vmatprep.mubr.msk.bf16.mxu0 %vm391_vm0, %v3099_v41 }
  0x5c   :  { %3055 = vmatmul.mubr.msk.bf16.gmra.mxu1 %vm391_vm0, %v3120_v42 }
  0x5d   :  { %3058 = vmatprep.mubr.msk.bf16.mxu1 %vm391_vm0, %v3121_v43 }
  0x62   :  { %3015 = vmatmul.mubr.msk.bf16.gmra.mxu0 %vm391_vm0, %v3100_v44 }
  0x63   :  { %3018 = vmatprep.mubr.msk.bf16.mxu0 %vm391_vm0, %v3101_v45 }
  0x64   :  { %3059 = vmatmul.mubr.msk.bf16.gmra.mxu1 %vm391_vm0, %v3122_v46 }
  0x65   :  { %3062 = vmatprep.mubr.msk.bf16.mxu1 %vm391_vm0, %v3123_v47 }
  0x6a   :  { %3019 = vmatmul.mubr.msk.bf16.gmra.mxu0 %vm391_vm0, %v3102_v48 }
  0x6c   :  { %3063 = vmatmul.mubr.msk.bf16.gmra.mxu1 %vm391_vm0, %v3124_v49 }
  0x6d   :  { %3066 = vmatprep.mubr.msk.bf16.mxu1 %vm391_vm0, %v3125_v50 }
  0x74   :  { %3067 = vmatmul.mubr.msk.bf16.gmra.mxu1 %vm391_vm0, %v3126_v51 }
  0xca   :  { %v2972_v53 = vpop.f32.mrf.mxu0 }
  0xcb   :  { %v585_v54 = vadd.f32 %v2972_v53, %v3385_v52 }
  0xcc   :  { %v576_v55 = vpop.f32.mrf.mxu0 }
  0xcd   :  { %v2816_v56 = vpack.c.bf16 %v585_v54, %v585_v54  ;;  %v577_v57 = vadd.f32 %v3385_v52, %v576_v55  ;;  %v2286_v0 = vmul.f32 %v585_v54, %v585_v54  ;;  %v2082_v8 = vsel %vm391_vm0, %v585_v54, 0.0  ;;  %v3024_v54 = vpop.f32.mrf.mxu1 }
  0xce   :  { %v2973_v58 = vpop.f32.mrf.mxu0 }
  0xcf   :  { %1378 = vst.msk [vmem:[%s4557_s3 + $0x8] sm:$0xf] %vm1375_vm1, %v2816_v56  ;;  %v2814_v59 = vpack.c.bf16 %v577_v57, %v577_v57  ;;  %v588_v60 = vadd.f32 %v2973_v58, %v3385_v52  ;;  %v2284_v62 = vmul.f32 %v577_v57, %v577_v57  ;;  %v2079_v1 = vsel %vm391_vm0, %v577_v57, 0.0 }
  0xd0   :  { %v579_v61 = vpop.f32.mrf.mxu0  ;;  %v2387_v19 = vsel %vm391_vm0, %v2286_v0, 0.0 }
  0xd1   :  { %1376 = vst.msk [vmem:[%s4557_s3] sm:$0xf] %vm1375_vm1, %v2814_v59  ;;  %v580_v63 = vadd.f32 %v3385_v52, %v579_v61  ;;  %v2817_v2 = vpack.c.bf16 %v588_v60, %v588_v60  ;;  %v2384_v11 = vsel %vm391_vm0, %v2284_v62, 0.0  ;;  %v2287_v12 = vmul.f32 %v588_v60, %v588_v60 }
  0xd2   :  { %v2976_v3 = vpop.f32.mrf.mxu0  ;;  %v2084_v20 = vsel %vm391_vm0, %v588_v60, 0.0  ;;  %v3450_v59 = vadd.f32 %v3024_v54, %v3385_v52 }
  0xd3   :  { %v2815_v4 = vpack.c.bf16 %v580_v63, %v580_v63  ;;  %v2080_v5 = vsel %vm391_vm0, %v580_v63, 0.0  ;;  %v2285_v6 = vmul.f32 %v580_v63, %v580_v63  ;;  %v601_v7 = vadd.f32 %v2976_v3, %v3385_v52  ;;  %1379 = vst.msk [vmem:[%s4557_s3 + $0xc] sm:$0xf] %vm1375_vm1, %v2817_v2  ;;  %v784_v63 = vpop.f32.mrf.mxu1 }
  0xd4   :  { %v2081_v9 = vadd.f32 %v2080_v5, %v2079_v1  ;;  %v592_v10 = vpop.f32.mrf.mxu0  ;;  %v2389_v26 = vsel %vm391_vm0, %v2287_v12, 0.0 }
  0xd5   :  { %1377 = vst.msk [vmem:[%s4557_s3 + $0x4] sm:$0xf] %vm1375_vm1, %v2815_v4  ;;  %v2385_v13 = vsel %vm391_vm0, %v2285_v6, 0.0  ;;  %v2820_v14 = vpack.c.bf16 %v601_v7, %v601_v7  ;;  %v593_v17 = vadd.f32 %v3385_v52, %v592_v10  ;;  %v2290_v34 = vmul.f32 %v601_v7, %v601_v7 }
  0xd6   :  { %v2083_v15 = vadd.f32 %v2082_v8, %v2081_v9  ;;  %v2386_v16 = vadd.f32 %v2385_v13, %v2384_v11  ;;  %v2977_v18 = vpop.f32.mrf.mxu0  ;;  %v2090_v44 = vsel %vm391_vm0, %v601_v7, 0.0  ;;  %v2868_v4 = vpack.c.bf16 %v3450_v59, %v3450_v59  ;;  %v3466_v9 = vpop.f32.mrf.mxu1 }
  0xd7   :  { %1382 = vst.msk [vmem:[%s4557_s3 + $0x18] sm:$0xf] %vm1375_vm1, %v2820_v14  ;;  %v604_v21 = vadd.f32 %v2977_v18, %v3385_v52  ;;  %v2818_v24 = vpack.c.bf16 %v593_v17, %v593_v17  ;;  %v2086_v27 = vsel %vm391_vm0, %v593_v17, 0.0  ;;  %v2288_v28 = vmul.f32 %v593_v17, %v593_v17 }
  0xd8   :  { %v2085_v22 = vadd.f32 %v2084_v20, %v2083_v15  ;;  %v2388_v23 = vadd.f32 %v2387_v19, %v2386_v16  ;;  %v595_v25 = vpop.f32.mrf.mxu0  ;;  %v2395_v49 = vsel %vm391_vm0, %v2290_v34, 0.0  ;;  %1430 = vst.msk [vmem:[%s4557_s3 + $0xd8] sm:$0xf] %vm1375_vm1, %v2868_v4  ;;  %v3474_v18 = vpop.f32.mrf.mxu1 }
  0xd9   :  { %v2821_v29 = vpack.c.bf16 %v604_v21, %v604_v21  ;;  %1380 = vst.msk [vmem:[%s4557_s3 + $0x10] sm:$0xf] %vm1375_vm1, %v2818_v24  ;;  %v596_v32 = vadd.f32 %v3385_v52, %v595_v25  ;;  %v2391_v35 = vsel %vm391_vm0, %v2288_v28, 0.0  ;;  %v2291_v45 = vmul.f32 %v604_v21, %v604_v21 }
  0xda   :  { %v2390_v30 = vadd.f32 %v2389_v26, %v2388_v23  ;;  %v2087_v31 = vadd.f32 %v2086_v27, %v2085_v22  ;;  %v2980_v33 = vpop.f32.mrf.mxu0  ;;  %v2092_v55 = vsel %vm391_vm0, %v604_v21, 0.0  ;;  %v3489_v27 = vadd.f32 %v3385_v52, %v784_v63  ;;  %v3491_v28 = vpop.f32.mrf.mxu1 }
  0xdb   :  { %1383 = vst.msk [vmem:[%s4557_s3 + $0x1c] sm:$0xf] %vm1375_vm1, %v2821_v29  ;;  %v617_v36 = vadd.f32 %v2980_v33, %v3385_v52  ;;  %v2819_v38 = vpack.c.bf16 %v596_v32, %v596_v32  ;;  %v2088_v39 = vsel %vm391_vm0, %v596_v32, 0.0  ;;  %v2289_v40 = vmul.f32 %v596_v32, %v596_v32 }
  0xdc   :  { %v2392_v37 = vadd.f32 %v2391_v35, %v2390_v30  ;;  %v608_v41 = vpop.f32.mrf.mxu0  ;;  %v2089_v42 = vadd.f32 %v2088_v39, %v2087_v31  ;;  %v2397_v0 = vsel %vm391_vm0, %v2291_v45, 0.0 }
  0xdd   :  { %v2824_v43 = vpack.c.bf16 %v617_v36, %v617_v36  ;;  %1381 = vst.msk [vmem:[%s4557_s3 + $0x14] sm:$0xf] %vm1375_vm1, %v2819_v38  ;;  %v2393_v46 = vsel %vm391_vm0, %v2289_v40, 0.0  ;;  %v609_v47 = vadd.f32 %v3385_v52, %v608_v41  ;;  %v2294_v6 = vmul.f32 %v617_v36, %v617_v36 }
  0xde   :  { %v2981_v48 = vpop.f32.mrf.mxu0  ;;  %v2091_v50 = vadd.f32 %v2090_v44, %v2089_v42  ;;  %v2394_v51 = vadd.f32 %v2393_v46, %v2392_v37  ;;  %v2098_v19 = vsel %vm391_vm0, %v617_v36, 0.0  ;;  %v3495_v37 = vpop.f32.mrf.mxu1  ;;  %v2866_v46 = vpack.c.bf16 %v3489_v27, %v3489_v27 }
  0xdf   :  { %1386 = vst.msk [vmem:[%s4557_s3 + $0x28] sm:$0xf] %vm1375_vm1, %v2824_v43  ;;  %v620_v53 = vadd.f32 %v2981_v48, %v3385_v52  ;;  %v2822_v56 = vpack.c.bf16 %v609_v47, %v609_v47  ;;  %v2292_v57 = vmul.f32 %v609_v47, %v609_v47  ;;  %v2094_v1 = vsel %vm391_vm0, %v609_v47, 0.0 }
  0xe0   :  { %v611_v58 = vpop.f32.mrf.mxu0  ;;  %v2093_v60 = vadd.f32 %v2092_v55, %v2091_v50  ;;  %v2396_v61 = vadd.f32 %v2395_v49, %v2394_v51  ;;  %v2403_v29 = vsel %vm391_vm0, %v2294_v6, 0.0  ;;  %v3511_v47 = vpop.f32.mrf.mxu1  ;;  %1428 = vst.msk [vmem:[%s4557_s3 + $0xd0] sm:$0xf] %vm1375_vm1, %v2866_v46 }
  0xe1   :  { %v2825_v62 = vpack.c.bf16 %v620_v53, %v620_v53  ;;  %1384 = vst.msk [vmem:[%s4557_s3 + $0x20] sm:$0xf] %vm1375_vm1, %v2822_v56  ;;  %v612_v2 = vadd.f32 %v3385_v52, %v611_v58  ;;  %v2399_v10 = vsel %vm391_vm0, %v2292_v57, 0.0  ;;  %v2295_v20 = vmul.f32 %v620_v53, %v620_v53 }
  0xe2   :  { %v2984_v3 = vpop.f32.mrf.mxu0  ;;  %v2398_v5 = vadd.f32 %v2397_v0, %v2396_v61  ;;  %v2095_v7 = vadd.f32 %v2094_v1, %v2093_v60  ;;  %v2100_v30 = vsel %vm391_vm0, %v620_v53, 0.0  ;;  %v3519_v57 = vpop.f32.mrf.mxu1 }
  0xe3   :  { %1387 = vst.msk [vmem:[%s4557_s3 + $0x2c] sm:$0xf] %vm1375_vm1, %v2825_v62  ;;  %v633_v8 = vadd.f32 %v2984_v3, %v3385_v52  ;;  %v2823_v11 = vpack.c.bf16 %v612_v2, %v612_v2  ;;  %v2096_v12 = vsel %vm391_vm0, %v612_v2, 0.0  ;;  %v2293_v13 = vmul.f32 %v612_v2, %v612_v2 }
  0xe4   :  { %v624_v14 = vpop.f32.mrf.mxu0  ;;  %v2400_v15 = vadd.f32 %v2399_v10, %v2398_v5  ;;  %v2097_v16 = vadd.f32 %v2096_v12, %v2095_v7  ;;  %v2405_v38 = vsel %vm391_vm0, %v2295_v20, 0.0  ;;  %v3533_v3 = vpop.f32.mrf.mxu1 }
  0xe5   :  { %v2828_v17 = vpack.c.bf16 %v633_v8, %v633_v8  ;;  %1385 = vst.msk [vmem:[%s4557_s3 + $0x24] sm:$0xf] %vm1375_vm1, %v2823_v11  ;;  %v2401_v21 = vsel %vm391_vm0, %v2293_v13, 0.0  ;;  %v625_v22 = vadd.f32 %v3385_v52, %v624_v14  ;;  %v2298_v39 = vmul.f32 %v633_v8, %v633_v8 }
  0xe6   :  { %v2985_v23 = vpop.f32.mrf.mxu0  ;;  %v2099_v24 = vadd.f32 %v2098_v19, %v2097_v16  ;;  %v2402_v25 = vadd.f32 %v2401_v21, %v2400_v15  ;;  %v2106_v58 = vsel %vm391_vm0, %v633_v8, 0.0  ;;  %v3537_v13 = vpop.f32.mrf.mxu1 }
  0xe7   :  { %1390 = vst.msk [vmem:[%s4557_s3 + $0x38] sm:$0xf] %vm1375_vm1, %v2828_v17  ;;  %v636_v26 = vadd.f32 %v2985_v23, %v3385_v52  ;;  %v2826_v31 = vpack.c.bf16 %v625_v22, %v625_v22  ;;  %v2296_v32 = vmul.f32 %v625_v22, %v625_v22  ;;  %v2102_v40 = vsel %vm391_vm0, %v625_v22, 0.0 }
  0xe8   :  { %v627_v33 = vpop.f32.mrf.mxu0  ;;  %v2101_v34 = vadd.f32 %v2100_v30, %v2099_v24  ;;  %v2404_v35 = vadd.f32 %v2403_v29, %v2402_v25  ;;  %v2411_v4 = vsel %vm391_vm0, %v2298_v39, 0.0  ;;  %v3553_v23 = vadd.f32 %v3466_v9, %v3385_v52  ;;  %v3555_v24 = vpop.f32.mrf.mxu1 }
  0xe9   :  { %v2829_v36 = vpack.c.bf16 %v636_v26, %v636_v26  ;;  %1388 = vst.msk [vmem:[%s4557_s3 + $0x30] sm:$0xf] %vm1375_vm1, %v2826_v31  ;;  %v628_v41 = vadd.f32 %v3385_v52, %v627_v33  ;;  %v2407_v48 = vsel %vm391_vm0, %v2296_v32, 0.0  ;;  %v2299_v60 = vmul.f32 %v636_v26, %v636_v26 }
  0xea   :  { %v2988_v42 = vpop.f32.mrf.mxu0  ;;  %v2406_v43 = vadd.f32 %v2405_v38, %v2404_v35  ;;  %v2103_v44 = vadd.f32 %v2102_v40, %v2101_v34  ;;  %v2108_v5 = vsel %vm391_vm0, %v636_v26, 0.0 }
  0xeb   :  { %1391 = vst.msk [vmem:[%s4557_s3 + $0x3c] sm:$0xf] %vm1375_vm1, %v2829_v36  ;;  %v649_v45 = vadd.f32 %v2988_v42, %v3385_v52  ;;  %v2827_v49 = vpack.c.bf16 %v628_v41, %v628_v41  ;;  %v2104_v50 = vsel %vm391_vm0, %v628_v41, 0.0  ;;  %v2297_v51 = vmul.f32 %v628_v41, %v628_v41  ;;  %v3560_v36 = vpop.f32.mrf.mxu1 }
  0xec   :  { %v640_v53 = vpop.f32.mrf.mxu0  ;;  %v2408_v54 = vadd.f32 %v2407_v48, %v2406_v43  ;;  %v2105_v55 = vadd.f32 %v2104_v50, %v2103_v44  ;;  %v2413_v14 = vsel %vm391_vm0, %v2299_v60, 0.0  ;;  %v2869_v41 = vpack.c.bf16 %v3553_v23, %v3553_v23 }
  0xed   :  { %v2832_v56 = vpack.c.bf16 %v649_v45, %v649_v45  ;;  %1389 = vst.msk [vmem:[%s4557_s3 + $0x34] sm:$0xf] %vm1375_vm1, %v2827_v49  ;;  %v2409_v61 = vsel %vm391_vm0, %v2297_v51, 0.0  ;;  %v641_v62 = vadd.f32 %v3385_v52, %v640_v53  ;;  %v2302_v15 = vmul.f32 %v649_v45, %v649_v45 }
  0xee   :  { %v2989_v63 = vpop.f32.mrf.mxu0  ;;  %v2107_v0 = vadd.f32 %v2106_v58, %v2105_v55  ;;  %v2410_v1 = vadd.f32 %v2409_v61, %v2408_v54  ;;  %v2114_v32 = vsel %vm391_vm0, %v649_v45, 0.0  ;;  %1431 = vst.msk [vmem:[%s4557_s3 + $0xdc] sm:$0xf] %vm1375_vm1, %v2869_v41 }
  0xef   :  { %1394 = vst.msk [vmem:[%s4557_s3 + $0x48] sm:$0xf] %vm1375_vm1, %v2832_v56  ;;  %v652_v2 = vadd.f32 %v2989_v63, %v3385_v52  ;;  %v2830_v6 = vpack.c.bf16 %v641_v62, %v641_v62  ;;  %v2300_v7 = vmul.f32 %v641_v62, %v641_v62  ;;  %v2110_v16 = vsel %vm391_vm0, %v641_v62, 0.0 }
  0xf0   :  { %v643_v8 = vpop.f32.mrf.mxu0  ;;  %v2109_v10 = vadd.f32 %v2108_v5, %v2107_v0  ;;  %v2412_v11 = vadd.f32 %v2411_v4, %v2410_v1  ;;  %v2419_v46 = vsel %vm391_vm0, %v2302_v15, 0.0  ;;  %v3599_v4 = vadd.f32 %v3385_v52, %v3474_v18 }
  0xf1   :  { %v2833_v12 = vpack.c.bf16 %v652_v2, %v652_v2  ;;  %1392 = vst.msk [vmem:[%s4557_s3 + $0x40] sm:$0xf] %vm1375_vm1, %v2830_v6  ;;  %v644_v17 = vadd.f32 %v3385_v52, %v643_v8  ;;  %v2415_v25 = vsel %vm391_vm0, %v2300_v7, 0.0  ;;  %v2303_v38 = vmul.f32 %v652_v2, %v652_v2 }
  0xf2   :  { %v2992_v19 = vpop.f32.mrf.mxu0  ;;  %v2414_v20 = vadd.f32 %v2413_v14, %v2412_v11  ;;  %v2111_v21 = vadd.f32 %v2110_v16, %v2109_v10  ;;  %v2116_v48 = vsel %vm391_vm0, %v652_v2, 0.0 }
  0xf3   :  { %1395 = vst.msk [vmem:[%s4557_s3 + $0x4c] sm:$0xf] %vm1375_vm1, %v2833_v12  ;;  %v665_v22 = vadd.f32 %v2992_v19, %v3385_v52  ;;  %v2831_v26 = vpack.c.bf16 %v644_v17, %v644_v17  ;;  %v2112_v29 = vsel %vm391_vm0, %v644_v17, 0.0  ;;  %v2301_v30 = vmul.f32 %v644_v17, %v644_v17 }
  0xf4   :  { %v656_v31 = vpop.f32.mrf.mxu0  ;;  %v2416_v33 = vadd.f32 %v2415_v25, %v2414_v20  ;;  %v2113_v34 = vadd.f32 %v2112_v29, %v2111_v21  ;;  %v3575_v45 = vpop.f32.mrf.mxu1  ;;  %v2421_v58 = vsel %vm391_vm0, %v2303_v38, 0.0  ;;  %v2867_v29 = vpack.c.bf16 %v3599_v4, %v3599_v4 }
  0xf5   :  { %v2836_v35 = vpack.c.bf16 %v665_v22, %v665_v22  ;;  %1393 = vst.msk [vmem:[%s4557_s3 + $0x44] sm:$0xf] %vm1375_vm1, %v2831_v26  ;;  %v2417_v9 = vsel %vm391_vm0, %v2301_v30, 0.0  ;;  %v657_v39 = vadd.f32 %v3385_v52, %v656_v31  ;;  %v2306_v60 = vmul.f32 %v665_v22, %v665_v22 }
  0xf6   :  { %v2993_v40 = vpop.f32.mrf.mxu0  ;;  %v2115_v42 = vadd.f32 %v2114_v32, %v2113_v34  ;;  %v2418_v43 = vadd.f32 %v2417_v9, %v2416_v33  ;;  %v3583_v56 = vpop.f32.mrf.mxu1  ;;  %v2122_v17 = vsel %vm391_vm0, %v665_v22, 0.0  ;;  %1429 = vst.msk [vmem:[%s4557_s3 + $0xd4] sm:$0xf] %vm1375_vm1, %v2867_v29 }
  0xf7   :  { %1398 = vst.msk [vmem:[%s4557_s3 + $0x58] sm:$0xf] %vm1375_vm1, %v2836_v35  ;;  %v668_v44 = vadd.f32 %v2993_v40, %v3385_v52  ;;  %v2834_v49 = vpack.c.bf16 %v657_v39, %v657_v39  ;;  %v2304_v50 = vmul.f32 %v657_v39, %v657_v39  ;;  %v2118_v61 = vsel %vm391_vm0, %v657_v39, 0.0 }
  0xf8   :  { %v659_v51 = vpop.f32.mrf.mxu0  ;;  %v2117_v53 = vadd.f32 %v2116_v48, %v2115_v42  ;;  %v2420_v54 = vadd.f32 %v2419_v46, %v2418_v43  ;;  %v3601_v5 = vpop.f32.mrf.mxu1  ;;  %v2427_v31 = vsel %vm391_vm0, %v2306_v60, 0.0 }
  0xf9   :  { %v2837_v55 = vpack.c.bf16 %v668_v44, %v668_v44  ;;  %1396 = vst.msk [vmem:[%s4557_s3 + $0x50] sm:$0xf] %vm1375_vm1, %v2834_v49  ;;  %v660_v62 = vadd.f32 %v3385_v52, %v659_v51  ;;  %v2423_v6 = vsel %vm391_vm0, %v2304_v50, 0.0  ;;  %v2307_v19 = vmul.f32 %v668_v44, %v668_v44 }
  0xfa   :  { %v2996_v63 = vpop.f32.mrf.mxu0  ;;  %v2422_v0 = vadd.f32 %v2421_v58, %v2420_v54  ;;  %v2119_v1 = vadd.f32 %v2118_v61, %v2117_v53  ;;  %v3605_v16 = vpop.f32.mrf.mxu1  ;;  %v2124_v32 = vsel %vm391_vm0, %v668_v44, 0.0 }
  0xfb   :  { %1399 = vst.msk [vmem:[%s4557_s3 + $0x5c] sm:$0xf] %vm1375_vm1, %v2837_v55  ;;  %v681_v2 = vadd.f32 %v2996_v63, %v3385_v52  ;;  %v2835_v7 = vpack.c.bf16 %v660_v62, %v660_v62  ;;  %v2120_v8 = vsel %vm391_vm0, %v660_v62, 0.0  ;;  %v2305_v10 = vmul.f32 %v660_v62, %v660_v62 }
  0xfc   :  { %v672_v11 = vpop.f32.mrf.mxu0  ;;  %v2424_v12 = vadd.f32 %v2423_v6, %v2422_v0  ;;  %v2121_v14 = vadd.f32 %v2120_v8, %v2119_v1  ;;  %v3621_v30 = vpop.f32.mrf.mxu1  ;;  %v2429_v41 = vsel %vm391_vm0, %v2307_v19, 0.0 }
  0xfd   :  { %v2840_v15 = vpack.c.bf16 %v681_v2, %v681_v2  ;;  %1397 = vst.msk [vmem:[%s4557_s3 + $0x54] sm:$0xf] %vm1375_vm1, %v2835_v7  ;;  %v2425_v18 = vsel %vm391_vm0, %v2305_v10, 0.0  ;;  %v673_v20 = vadd.f32 %v3385_v52, %v672_v11  ;;  %v2310_v48 = vmul.f32 %v681_v2, %v681_v2 }
  0xfe   :  { %v2997_v21 = vpop.f32.mrf.mxu0  ;;  %v2123_v25 = vadd.f32 %v2122_v17, %v2121_v14  ;;  %v2426_v26 = vadd.f32 %v2425_v18, %v2424_v12  ;;  %v3629_v40 = vpop.f32.mrf.mxu1  ;;  %v2130_v1 = vsel %vm391_vm0, %v681_v2, 0.0  ;;  %v3663_v14 = vadd.f32 %v3491_v28, %v3385_v52 }
  0xff   :  { %1402 = vst.msk [vmem:[%s4557_s3 + $0x68] sm:$0xf] %vm1375_vm1, %v2840_v15  ;;  %v684_v22 = vadd.f32 %v2997_v21, %v3385_v52  ;;  %v2838_v33 = vpack.c.bf16 %v673_v20, %v673_v20  ;;  %v2308_v34 = vmul.f32 %v673_v20, %v673_v20  ;;  %v2126_v42 = vsel %vm391_vm0, %v673_v20, 0.0 }
 0x100   :  { %v675_v35 = vpop.f32.mrf.mxu0  ;;  %v2125_v38 = vadd.f32 %v2124_v32, %v2123_v25  ;;  %v2428_v9 = vadd.f32 %v2427_v31, %v2426_v26  ;;  %v3643_v51 = vpop.f32.mrf.mxu1  ;;  %v2435_v17 = vsel %vm391_vm0, %v2310_v48, 0.0 }
 0x101   :  { %v2841_v39 = vpack.c.bf16 %v684_v22, %v684_v22  ;;  %1400 = vst.msk [vmem:[%s4557_s3 + $0x60] sm:$0xf] %vm1375_vm1, %v2838_v33  ;;  %v676_v43 = vadd.f32 %v3385_v52, %v675_v35  ;;  %v2431_v53 = vsel %vm391_vm0, %v2308_v34, 0.0  ;;  %v2311_v6 = vmul.f32 %v684_v22, %v684_v22 }
 0x102   :  { %v3000_v44 = vpop.f32.mrf.mxu0  ;;  %v2430_v46 = vadd.f32 %v2429_v41, %v2428_v9  ;;  %v2127_v49 = vadd.f32 %v2126_v42, %v2125_v38  ;;  %v3647_v0 = vpop.f32.mrf.mxu1  ;;  %v2132_v19 = vsel %vm391_vm0, %v684_v22, 0.0  ;;  %v2872_v34 = vpack.c.bf16 %v3663_v14, %v3663_v14 }
 0x103   :  { %1403 = vst.msk [vmem:[%s4557_s3 + $0x6c] sm:$0xf] %vm1375_vm1, %v2841_v39  ;;  %v697_v50 = vadd.f32 %v3000_v44, %v3385_v52  ;;  %v2839_v54 = vpack.c.bf16 %v676_v43, %v676_v43  ;;  %v2128_v55 = vsel %vm391_vm0, %v676_v43, 0.0  ;;  %v2309_v58 = vmul.f32 %v676_v43, %v676_v43 }
 0x104   :  { %v688_v60 = vpop.f32.mrf.mxu0  ;;  %v2432_v61 = vadd.f32 %v2431_v53, %v2430_v46  ;;  %v2129_v62 = vadd.f32 %v2128_v55, %v2127_v49  ;;  %v3665_v15 = vpop.f32.mrf.mxu1  ;;  %v2437_v32 = vsel %vm391_vm0, %v2311_v6, 0.0  ;;  %1434 = vst.msk [vmem:[%s4557_s3 + $0xe8] sm:$0xf] %vm1375_vm1, %v2872_v34  ;;  %v3707_v6 = vadd.f32 %v3385_v52, %v3495_v37 }
 0x105   :  { %v2844_v63 = vpack.c.bf16 %v697_v50, %v697_v50  ;;  %1401 = vst.msk [vmem:[%s4557_s3 + $0x64] sm:$0xf] %vm1375_vm1, %v2839_v54  ;;  %v2433_v7 = vsel %vm391_vm0, %v2309_v58, 0.0  ;;  %v689_v8 = vadd.f32 %v3385_v52, %v688_v60  ;;  %v2314_v38 = vmul.f32 %v697_v50, %v697_v50 }
 0x106   :  { %v3001_v10 = vpop.f32.mrf.mxu0  ;;  %v2131_v11 = vadd.f32 %v2130_v1, %v2129_v62  ;;  %v2434_v12 = vadd.f32 %v2433_v7, %v2432_v61  ;;  %v3669_v31 = vpop.f32.mrf.mxu1  ;;  %v2138_v55 = vsel %vm391_vm0, %v697_v50, 0.0 }
 0x107   :  { %1406 = vst.msk [vmem:[%s4557_s3 + $0x78] sm:$0xf] %vm1375_vm1, %v2844_v63  ;;  %v700_v2 = vadd.f32 %v3001_v10, %v3385_v52  ;;  %v2842_v18 = vpack.c.bf16 %v689_v8, %v689_v8  ;;  %v2312_v20 = vmul.f32 %v689_v8, %v689_v8  ;;  %v2134_v28 = vsel %vm391_vm0, %v689_v8, 0.0 }
 0x108   :  { %v691_v21 = vpop.f32.mrf.mxu0  ;;  %v2133_v25 = vadd.f32 %v2132_v19, %v2131_v11  ;;  %v2436_v26 = vadd.f32 %v2435_v17, %v2434_v12  ;;  %v3691_v48 = vpop.f32.mrf.mxu1  ;;  %v2443_v7 = vsel %vm391_vm0, %v2314_v38, 0.0 }
 0x109   :  { %v2845_v29 = vpack.c.bf16 %v700_v2, %v700_v2  ;;  %1404 = vst.msk [vmem:[%s4557_s3 + $0x70] sm:$0xf] %vm1375_vm1, %v2842_v18  ;;  %v692_v33 = vadd.f32 %v3385_v52, %v691_v21  ;;  %v2439_v41 = vsel %vm391_vm0, %v2312_v20, 0.0  ;;  %v2315_v58 = vmul.f32 %v700_v2, %v700_v2 }
 0x10a   :  { %v3004_v22 = vpop.f32.mrf.mxu0  ;;  %v2438_v35 = vadd.f32 %v2437_v32, %v2436_v26  ;;  %v2135_v9 = vadd.f32 %v2134_v28, %v2133_v25  ;;  %v2140_v8 = vsel %vm391_vm0, %v700_v2, 0.0  ;;  %v3711_v17 = vpop.f32.mrf.mxu1 }
 0x10b   :  { %1407 = vst.msk [vmem:[%s4557_s3 + $0x7c] sm:$0xf] %vm1375_vm1, %v2845_v29  ;;  %v713_v39 = vadd.f32 %v3004_v22, %v3385_v52  ;;  %v2843_v42 = vpack.c.bf16 %v692_v33, %v692_v33  ;;  %v2136_v43 = vsel %vm391_vm0, %v692_v33, 0.0  ;;  %v2313_v44 = vmul.f32 %v692_v33, %v692_v33 }
 0x10c   :  { %v704_v46 = vpop.f32.mrf.mxu0  ;;  %v2440_v49 = vadd.f32 %v2439_v41, %v2438_v35  ;;  %v2137_v53 = vadd.f32 %v2136_v43, %v2135_v9  ;;  %v2445_v21 = vsel %vm391_vm0, %v2315_v58, 0.0  ;;  %v2870_v33 = vpack.c.bf16 %v3707_v6, %v3707_v6  ;;  %v3729_v41 = vpop.f32.mrf.mxu1 }
 0x10d   :  { %v2848_v54 = vpack.c.bf16 %v713_v39, %v713_v39  ;;  %1405 = vst.msk [vmem:[%s4557_s3 + $0x74] sm:$0xf] %vm1375_vm1, %v2843_v42  ;;  %v2441_v60 = vsel %vm391_vm0, %v2313_v44, 0.0  ;;  %v705_v61 = vadd.f32 %v3385_v52, %v704_v46  ;;  %v2318_v25 = vmul.f32 %v713_v39, %v713_v39 }
 0x10e   :  { %v3005_v62 = vpop.f32.mrf.mxu0  ;;  %v2139_v63 = vadd.f32 %v2138_v55, %v2137_v53  ;;  %v2442_v1 = vadd.f32 %v2441_v60, %v2440_v49  ;;  %1432 = vst.msk [vmem:[%s4557_s3 + $0xe0] sm:$0xf] %vm1375_vm1, %v2870_v33  ;;  %v2146_v46 = vsel %vm391_vm0, %v713_v39, 0.0 }
 0x10f   :  { %1410 = vst.msk [vmem:[%s4557_s3 + $0x88] sm:$0xf] %vm1375_vm1, %v2848_v54  ;;  %v716_v50 = vadd.f32 %v3005_v62, %v3385_v52  ;;  %v2846_v10 = vpack.c.bf16 %v705_v61, %v705_v61  ;;  %v2316_v11 = vmul.f32 %v705_v61, %v705_v61  ;;  %v2142_v37 = vsel %vm391_vm0, %v705_v61, 0.0 }
 0x110   :  { %v707_v12 = vpop.f32.mrf.mxu0  ;;  %v2141_v19 = vadd.f32 %v2140_v8, %v2139_v63  ;;  %v2444_v18 = vadd.f32 %v2443_v7, %v2442_v1  ;;  %v2451_v61 = vsel %vm391_vm0, %v2318_v25, 0.0  ;;  %v3749_v8 = vpop.f32.mrf.mxu1 }
 0x111   :  { %v2849_v20 = vpack.c.bf16 %v716_v50, %v716_v50  ;;  %1408 = vst.msk [vmem:[%s4557_s3 + $0x80] sm:$0xf] %vm1375_vm1, %v2846_v10  ;;  %v708_v2 = vadd.f32 %v3385_v52, %v707_v12  ;;  %v2447_v22 = vsel %vm391_vm0, %v2316_v11, 0.0  ;;  %v2319_v49 = vmul.f32 %v716_v50, %v716_v50 }
 0x112   :  { %v3008_v26 = vpop.f32.mrf.mxu0  ;;  %v2446_v29 = vadd.f32 %v2445_v21, %v2444_v18  ;;  %v2143_v32 = vadd.f32 %v2142_v37, %v2141_v19  ;;  %v2148_v62 = vsel %vm391_vm0, %v716_v50, 0.0 }
 0x113   :  { %1411 = vst.msk [vmem:[%s4557_s3 + $0x8c] sm:$0xf] %vm1375_vm1, %v2849_v20  ;;  %v729_v28 = vadd.f32 %v3008_v26, %v3385_v52  ;;  %v2847_v34 = vpack.c.bf16 %v708_v2, %v708_v2  ;;  %v2144_v35 = vsel %vm391_vm0, %v708_v2, 0.0  ;;  %v2317_v38 = vmul.f32 %v708_v2, %v708_v2 }
 0x114   :  { %v720_v9 = vpop.f32.mrf.mxu0  ;;  %v2448_v42 = vadd.f32 %v2447_v22, %v2446_v29  ;;  %v2145_v43 = vadd.f32 %v2144_v35, %v2143_v32  ;;  %v2453_v19 = vsel %vm391_vm0, %v2319_v49, 0.0  ;;  %v3765_v26 = vadd.f32 %v3511_v47, %v3385_v52  ;;  %v3769_v35 = vpop.f32.mrf.mxu1 }
 0x115   :  { %v2852_v44 = vpack.c.bf16 %v729_v28, %v729_v28  ;;  %1409 = vst.msk [vmem:[%s4557_s3 + $0x84] sm:$0xf] %vm1375_vm1, %v2847_v34  ;;  %v2449_v53 = vsel %vm391_vm0, %v2317_v38, 0.0  ;;  %v721_v54 = vadd.f32 %v3385_v52, %v720_v9  ;;  %v2322_v18 = vmul.f32 %v729_v28, %v729_v28 }
 0x116   :  { %v3009_v55 = vpop.f32.mrf.mxu0  ;;  %v2147_v58 = vadd.f32 %v2146_v46, %v2145_v43  ;;  %v2450_v60 = vadd.f32 %v2449_v53, %v2448_v42  ;;  %v2154_v38 = vsel %vm391_vm0, %v729_v28, 0.0  ;;  %v2873_v53 = vpack.c.bf16 %v3765_v26, %v3765_v26 }
 0x117   :  { %1414 = vst.msk [vmem:[%s4557_s3 + $0x98] sm:$0xf] %vm1375_vm1, %v2852_v44  ;;  %v732_v39 = vadd.f32 %v3009_v55, %v3385_v52  ;;  %v2850_v63 = vpack.c.bf16 %v721_v54, %v721_v54  ;;  %v2320_v1 = vmul.f32 %v721_v54, %v721_v54  ;;  %v2150_v20 = vsel %vm391_vm0, %v721_v54, 0.0 }
 0x118   :  { %v723_v7 = vpop.f32.mrf.mxu0  ;;  %v2149_v10 = vadd.f32 %v2148_v62, %v2147_v58  ;;  %v2452_v11 = vadd.f32 %v2451_v61, %v2450_v60  ;;  %v2459_v58 = vsel %vm391_vm0, %v2322_v18, 0.0  ;;  %1435 = vst.msk [vmem:[%s4557_s3 + $0xec] sm:$0xf] %vm1375_vm1, %v2873_v53 }
 0x119   :  { %v2853_v12 = vpack.c.bf16 %v732_v39, %v732_v39  ;;  %1412 = vst.msk [vmem:[%s4557_s3 + $0x90] sm:$0xf] %vm1375_vm1, %v2850_v63  ;;  %v724_v50 = vadd.f32 %v3385_v52, %v723_v7  ;;  %v2455_v29 = vsel %vm391_vm0, %v2320_v1, 0.0  ;;  %v2323_v44 = vmul.f32 %v732_v39, %v732_v39  ;;  %v3791_v1 = vpop.f32.mrf.mxu1 }
 0x11a   :  { %v3012_v21 = vpop.f32.mrf.mxu0  ;;  %v2454_v25 = vadd.f32 %v2453_v19, %v2452_v11  ;;  %v2151_v37 = vadd.f32 %v2150_v20, %v2149_v10  ;;  %v2156_v60 = vsel %vm391_vm0, %v732_v39, 0.0 }
 0x11b   :  { %1415 = vst.msk [vmem:[%s4557_s3 + $0x9c] sm:$0xf] %vm1375_vm1, %v2853_v12  ;;  %v745_v2 = vadd.f32 %v3012_v21, %v3385_v52  ;;  %v2851_v32 = vpack.c.bf16 %v724_v50, %v724_v50  ;;  %v2152_v33 = vsel %vm391_vm0, %v724_v50, 0.0  ;;  %v2321_v22 = vmul.f32 %v724_v50, %v724_v50 }
 0x11c   :  { %v736_v34 = vpop.f32.mrf.mxu0  ;;  %v2456_v9 = vadd.f32 %v2455_v29, %v2454_v25  ;;  %v2153_v42 = vadd.f32 %v2152_v33, %v2151_v37  ;;  %v2461_v12 = vsel %vm391_vm0, %v2323_v44, 0.0  ;;  %v3807_v37 = vadd.f32 %v3385_v52, %v3519_v57 }
 0x11d   :  { %v2856_v43 = vpack.c.bf16 %v745_v2, %v745_v2  ;;  %1413 = vst.msk [vmem:[%s4557_s3 + $0x94] sm:$0xf] %vm1375_vm1, %v2851_v32  ;;  %v2457_v47 = vsel %vm391_vm0, %v2321_v22, 0.0  ;;  %v737_v46 = vadd.f32 %v3385_v52, %v736_v34  ;;  %v2326_v19 = vmul.f32 %v745_v2, %v745_v2 }
 0x11e   :  { %v3013_v49 = vpop.f32.mrf.mxu0  ;;  %v2155_v54 = vadd.f32 %v2154_v38, %v2153_v42  ;;  %v2458_v55 = vadd.f32 %v2457_v47, %v2456_v9  ;;  %v3811_v38 = vpop.f32.mrf.mxu1  ;;  %v2162_v44 = vsel %vm391_vm0, %v745_v2, 0.0 }
 0x11f   :  { %1418 = vst.msk [vmem:[%s4557_s3 + $0xa8] sm:$0xf] %vm1375_vm1, %v2856_v43  ;;  %v748_v28 = vadd.f32 %v3013_v49, %v3385_v52  ;;  %v2854_v61 = vpack.c.bf16 %v737_v46, %v737_v46  ;;  %v2324_v62 = vmul.f32 %v737_v46, %v737_v46  ;;  %v2158_v39 = vsel %vm391_vm0, %v737_v46, 0.0 }
 0x120   :  { %v739_v63 = vpop.f32.mrf.mxu0  ;;  %v2460_v7 = vadd.f32 %v2459_v58, %v2458_v55  ;;  %v2157_v10 = vadd.f32 %v2156_v60, %v2155_v54  ;;  %v2871_v55 = vpack.c.bf16 %v3807_v37, %v3807_v37  ;;  %v2467_v58 = vsel %vm391_vm0, %v2326_v19, 0.0 }
 0x121   :  { %v2857_v11 = vpack.c.bf16 %v748_v28, %v748_v28  ;;  %1416 = vst.msk [vmem:[%s4557_s3 + $0xa0] sm:$0xf] %vm1375_vm1, %v2854_v61  ;;  %v740_v18 = vadd.f32 %v3385_v52, %v739_v63  ;;  %v2463_v29 = vsel %vm391_vm0, %v2324_v62, 0.0  ;;  %v2327_v47 = vmul.f32 %v748_v28, %v748_v28 }
 0x122   :  { %v3016_v20 = vpop.f32.mrf.mxu0  ;;  %v2159_v50 = vadd.f32 %v2158_v39, %v2157_v10  ;;  %v2462_v21 = vadd.f32 %v2461_v12, %v2460_v7  ;;  %v2164_v60 = vsel %vm391_vm0, %v748_v28, 0.0  ;;  %v3829_v7 = vpop.f32.mrf.mxu1  ;;  %1433 = vst.msk [vmem:[%s4557_s3 + $0xe4] sm:$0xf] %vm1375_vm1, %v2871_v55 }
 0x123   :  { %1419 = vst.msk [vmem:[%s4557_s3 + $0xac] sm:$0xf] %vm1375_vm1, %v2857_v11  ;;  %v761_v25 = vadd.f32 %v3016_v20, %v3385_v52  ;;  %v2855_v32 = vpack.c.bf16 %v740_v18, %v740_v18  ;;  %v2160_v33 = vsel %vm391_vm0, %v740_v18, 0.0  ;;  %v2325_v22 = vmul.f32 %v740_v18, %v740_v18 }
 0x124   :  { %v752_v34 = vpop.f32.mrf.mxu0  ;;  %v2464_v9 = vadd.f32 %v2463_v29, %v2462_v21  ;;  %v2161_v42 = vadd.f32 %v2160_v33, %v2159_v50  ;;  %v2469_v39 = vsel %vm391_vm0, %v2327_v47, 0.0 }
 0x125   :  { %v2860_v43 = vpack.c.bf16 %v761_v25, %v761_v25  ;;  %1417 = vst.msk [vmem:[%s4557_s3 + $0xa4] sm:$0xf] %vm1375_vm1, %v2855_v32  ;;  %v2465_v57 = vsel %vm391_vm0, %v2325_v22, 0.0  ;;  %v753_v46 = vadd.f32 %v3385_v52, %v752_v34  ;;  %v2330_v20 = vmul.f32 %v761_v25, %v761_v25 }
 0x126   :  { %v3017_v49 = vpop.f32.mrf.mxu0  ;;  %v2163_v53 = vadd.f32 %v2162_v44, %v2161_v42  ;;  %v2466_v54 = vadd.f32 %v2465_v57, %v2464_v9  ;;  %v3849_v42 = vpop.f32.mrf.mxu1  ;;  %v2170_v57 = vsel %vm391_vm0, %v761_v25, 0.0 }
 0x127   :  { %1422 = vst.msk [vmem:[%s4557_s3 + $0xb8] sm:$0xf] %vm1375_vm1, %v2860_v43  ;;  %v764_v2 = vadd.f32 %v3017_v49, %v3385_v52  ;;  %v2858_v61 = vpack.c.bf16 %v753_v46, %v753_v46  ;;  %v2328_v62 = vmul.f32 %v753_v46, %v753_v46  ;;  %v2166_v28 = vsel %vm391_vm0, %v753_v46, 0.0 }
 0x128   :  { %v755_v63 = vpop.f32.mrf.mxu0  ;;  %v2468_v10 = vadd.f32 %v2467_v58, %v2466_v54  ;;  %v2165_v11 = vadd.f32 %v2164_v60, %v2163_v53  ;;  %v3865_v60 = vadd.f32 %v3533_v3, %v3385_v52 }
 0x129   :  { %v2861_v12 = vpack.c.bf16 %v764_v2, %v764_v2  ;;  %1420 = vst.msk [vmem:[%s4557_s3 + $0xb0] sm:$0xf] %vm1375_vm1, %v2858_v61  ;;  %v756_v19 = vadd.f32 %v3385_v52, %v755_v63  ;;  %v2471_v32 = vsel %vm391_vm0, %v2328_v62, 0.0  ;;  %v2331_v46 = vmul.f32 %v764_v2, %v764_v2 }
 0x12a   :  { %v3020_v18 = vpop.f32.mrf.mxu0  ;;  %v2167_v50 = vadd.f32 %v2166_v28, %v2165_v11  ;;  %v2470_v21 = vadd.f32 %v2469_v39, %v2468_v10  ;;  %v2475_v61 = vsel %vm391_vm0, %v2330_v20, 0.0  ;;  %v2172_v62 = vsel %vm391_vm0, %v764_v2, 0.0 }
 0x12b   :  { %1423 = vst.msk [vmem:[%s4557_s3 + $0xbc] sm:$0xf] %vm1375_vm1, %v2861_v12  ;;  %v777_v29 = vadd.f32 %v3020_v18, %v3385_v52  ;;  %v2859_v33 = vpack.c.bf16 %v756_v19, %v756_v19  ;;  %v2168_v22 = vsel %vm391_vm0, %v756_v19, 0.0  ;;  %v2329_v34 = vmul.f32 %v756_v19, %v756_v19  ;;  %v3869_v12 = vpop.f32.mrf.mxu1 }
 0x12c   :  { %v768_v9 = vpop.f32.mrf.mxu0  ;;  %v2472_v43 = vadd.f32 %v2471_v32, %v2470_v21  ;;  %v2169_v44 = vadd.f32 %v2168_v22, %v2167_v50  ;;  %v2477_v18 = vsel %vm391_vm0, %v2331_v46, 0.0  ;;  %v2876_v2 = vpack.c.bf16 %v3865_v60, %v3865_v60 }
 0x12d   :  { %v2864_v47 = vpack.c.bf16 %v777_v29, %v777_v29  ;;  %1421 = vst.msk [vmem:[%s4557_s3 + $0xb4] sm:$0xf] %vm1375_vm1, %v2859_v33  ;;  %v2473_v49 = vsel %vm391_vm0, %v2329_v34, 0.0  ;;  %v769_v53 = vadd.f32 %v3385_v52, %v768_v9  ;;  %v2178_v50 = vsel %vm391_vm0, %v777_v29, 0.0 }
 0x12e   :  { %v3021_v54 = vpop.f32.mrf.mxu0  ;;  %v2171_v55 = vadd.f32 %v2170_v57, %v2169_v44  ;;  %v2474_v58 = vadd.f32 %v2473_v49, %v2472_v43  ;;  %v2334_v21 = vmul.f32 %v777_v29, %v777_v29  ;;  %1438 = vst.msk [vmem:[%s4557_s3 + $0xf8] sm:$0xf] %vm1375_vm1, %v2876_v2  ;;  %v3896_v57 = vld [vmem:[%s4556_s2] ss:$0 sm:$0xff] }
 0x12f   :  { %1426 = vst.msk [vmem:[%s4557_s3 + $0xc8] sm:$0xf] %vm1375_vm1, %v2864_v47  ;;  %v780_v25 = vadd.f32 %v3021_v54, %v3385_v52  ;;  %v2862_v63 = vpack.c.bf16 %v769_v53, %v769_v53  ;;  %v2332_v10 = vmul.f32 %v769_v53, %v769_v53  ;;  %v2174_v3 = vsel %vm391_vm0, %v769_v53, 0.0 }
 0x130   :  { %v771_v11 = vpop.f32.mrf.mxu0  ;;  %v2476_v39 = vadd.f32 %v2475_v61, %v2474_v58  ;;  %v2173_v28 = vadd.f32 %v2172_v62, %v2171_v55  ;;  %v3900_v46 = vadd.f32 %v3896_v57, %v3537_v13  ;;  %v3909_v53 = vadd.f32 %v3896_v57, %v3555_v24 }
 0x131   :  { %v2865_v19 = vpack.c.bf16 %v780_v25, %v780_v25  ;;  %1424 = vst.msk [vmem:[%s4557_s3 + $0xc0] sm:$0xf] %vm1375_vm1, %v2862_v63  ;;  %v772_v20 = vadd.f32 %v3385_v52, %v771_v11  ;;  %v2479_v22 = vsel %vm391_vm0, %v2332_v10, 0.0  ;;  %v3891_v52 = vpop.f32.mrf.mxu1  ;;  %v2335_v44 = vmul.f32 %v780_v25, %v780_v25 }
 0x132   :  { %v2175_v32 = vadd.f32 %v2174_v3, %v2173_v28  ;;  %v2478_v33 = vadd.f32 %v2477_v18, %v2476_v39  ;;  %v3913_v54 = vadd.f32 %v3896_v57, %v3560_v36  ;;  %v3917_v55 = vadd.f32 %v3896_v57, %v3575_v45 }
 0x133   :  { %1427 = vst.msk [vmem:[%s4557_s3 + $0xcc] sm:$0xf] %vm1375_vm1, %v2865_v19  ;;  %v2863_v34 = vpack.c.bf16 %v772_v20, %v772_v20  ;;  %v2176_v9 = vsel %vm391_vm0, %v772_v20, 0.0  ;;  %v2333_v43 = vmul.f32 %v772_v20, %v772_v20  ;;  %v2336_v13 = vmul.f32 %v3489_v27, %v3489_v27  ;;  %v3927_v10 = vpop.f32.mrf.mxu1 }
 0x134   :  { %v2480_v29 = vadd.f32 %v2479_v22, %v2478_v33  ;;  %v2177_v47 = vadd.f32 %v2176_v9, %v2175_v32  ;;  %v2874_v62 = vpack.c.bf16 %v3900_v46, %v3900_v46  ;;  %v2483_v63 = vsel %vm391_vm0, %v2334_v21, 0.0 }
 0x135   :  { %1425 = vst.msk [vmem:[%s4557_s3 + $0xc4] sm:$0xf] %vm1375_vm1, %v2863_v34  ;;  %v2481_v49 = vsel %vm391_vm0, %v2333_v43, 0.0  ;;  %v2180_v24 = vsel %vm391_vm0, %v780_v25, 0.0  ;;  %v2877_v36 = vpack.c.bf16 %v3909_v53, %v3909_v53  ;;  %v2875_v39 = vpack.c.bf16 %v3913_v54, %v3913_v54  ;;  %v3971_v22 = vpop.f32.mrf.mxu1 }
 0x136   :  { %v2179_v58 = vadd.f32 %v2178_v50, %v2177_v47  ;;  %v2482_v61 = vadd.f32 %v2481_v49, %v2480_v29  ;;  %1436 = vst.msk [vmem:[%s4557_s3 + $0xf0] sm:$0xf] %vm1375_vm1, %v2874_v62  ;;  %v2485_v28 = vsel %vm391_vm0, %v2335_v44, 0.0  ;;  %v2182_v25 = vsel %vm391_vm0, %v3489_v27, 0.0 }
 0x137   :  { %v2337_v19 = vmul.f32 %v3599_v4, %v3599_v4  ;;  %1439 = vst.msk [vmem:[%s4557_s3 + $0xfc] sm:$0xf] %vm1375_vm1, %v2877_v36  ;;  %v2880_v18 = vpack.c.bf16 %v3917_v55, %v3917_v55  ;;  %v2338_v3 = vmul.f32 %v3450_v59, %v3450_v59  ;;  %v2487_v20 = vsel %vm391_vm0, %v2336_v13, 0.0  ;;  %1437 = vst.msk [vmem:[%s4557_s3 + $0xf4] sm:$0xf] %vm1375_vm1, %v2875_v39 }
 0x138   :  { %v2484_v11 = vadd.f32 %v2483_v63, %v2482_v61  ;;  %v2181_v45 = vadd.f32 %v2180_v24, %v2179_v58  ;;  %v2184_v27 = vsel %vm391_vm0, %v3599_v4, 0.0  ;;  %v3961_v21 = vadd.f32 %v3896_v57, %v3583_v56  ;;  %v4001_v58 = vpop.f32.mrf.mxu1 }
 0x139   :  { %1442 = vst.msk [vmem:[%s4557_s3 + $0x108] sm:$0xf] %vm1375_vm1, %v2880_v18  ;;  %v3965_v32 = vadd.f32 %v3896_v57, %v3601_v5  ;;  %v3969_v33 = vadd.f32 %v3896_v57, %v3605_v16  ;;  %v2339_v4 = vmul.f32 %v3553_v23, %v3553_v23  ;;  %v3977_v43 = vadd.f32 %v3896_v57, %v3621_v30 }
 0x13a   :  { %v2183_v2 = vadd.f32 %v2182_v25, %v2181_v45  ;;  %v2486_v50 = vadd.f32 %v2485_v28, %v2484_v11  ;;  %v2186_v56 = vsel %vm391_vm0, %v3450_v59, 0.0  ;;  %v2489_v5 = vsel %vm391_vm0, %v2337_v19, 0.0 }
 0x13b   :  { %v2878_v16 = vpack.c.bf16 %v3961_v21, %v3961_v21  ;;  %v2881_v29 = vpack.c.bf16 %v3965_v32, %v3965_v32  ;;  %v2491_v49 = vsel %vm391_vm0, %v2338_v3, 0.0  ;;  %v2188_v13 = vsel %vm391_vm0, %v3553_v23, 0.0  ;;  %v4037_v3 = vpop.f32.mrf.mxu1 }
 0x13c   :  { %v2185_v34 = vadd.f32 %v2184_v27, %v2183_v2  ;;  %v2488_v9 = vadd.f32 %v2487_v20, %v2486_v50  ;;  %v2340_v30 = vmul.f32 %v3707_v6, %v3707_v6  ;;  %v2879_v59 = vpack.c.bf16 %v3969_v33, %v3969_v33 }
 0x13d   :  { %1440 = vst.msk [vmem:[%s4557_s3 + $0x100] sm:$0xf] %vm1375_vm1, %v2878_v16  ;;  %1443 = vst.msk [vmem:[%s4557_s3 + $0x10c] sm:$0xf] %vm1375_vm1, %v2881_v29  ;;  %v2493_v23 = vsel %vm391_vm0, %v2339_v4, 0.0  ;;  %v2884_v63 = vpack.c.bf16 %v3977_v43, %v3977_v43  ;;  %v2342_v24 = vmul.f32 %v3663_v14, %v3663_v14  ;;  %v2190_v36 = vsel %vm391_vm0, %v3707_v6, 0.0  ;;  %v4081_v29 = vpop.f32.mrf.mxu1 }
 0x13e   :  { %v2187_v44 = vadd.f32 %v2186_v56, %v2185_v34  ;;  %v2490_v47 = vadd.f32 %v2489_v5, %v2488_v9  ;;  %v2341_v11 = vmul.f32 %v3807_v37, %v3807_v37  ;;  %1441 = vst.msk [vmem:[%s4557_s3 + $0x104] sm:$0xf] %vm1375_vm1, %v2879_v59  ;;  %v4018_v45 = vadd.f32 %v3896_v57, %v3629_v40 }
 0x13f   :  { %1446 = vst.msk [vmem:[%s4557_s3 + $0x118] sm:$0xf] %vm1375_vm1, %v2884_v63  ;;  %v4026_v6 = vadd.f32 %v3896_v57, %v3643_v51  ;;  %v4030_v25 = vadd.f32 %v3896_v57, %v3647_v0  ;;  %v2495_v19 = vsel %vm391_vm0, %v2340_v30, 0.0  ;;  %v2192_v40 = vsel %vm391_vm0, %v3807_v37, 0.0 }
 0x140   :  { %v2492_v61 = vadd.f32 %v2491_v49, %v2490_v47  ;;  %v2189_v62 = vadd.f32 %v2188_v13, %v2187_v44  ;;  %v2882_v18 = vpack.c.bf16 %v4018_v45, %v4018_v45  ;;  %v2194_v20 = vsel %vm391_vm0, %v3663_v14, 0.0 }
 0x141   :  { %v2885_v50 = vpack.c.bf16 %v4026_v6, %v4026_v6  ;;  %v2499_v0 = vsel %vm391_vm0, %v2342_v24, 0.0  ;;  %v2343_v27 = vmul.f32 %v3765_v26, %v3765_v26  ;;  %v2497_v37 = vsel %vm391_vm0, %v2341_v11, 0.0  ;;  %v4109_v24 = vpop.f32.mrf.mxu1 }
 0x142   :  { %v2191_v39 = vadd.f32 %v2190_v36, %v2189_v62  ;;  %v2494_v28 = vadd.f32 %v2493_v23, %v2492_v61  ;;  %1444 = vst.msk [vmem:[%s4557_s3 + $0x110] sm:$0xf] %vm1375_vm1, %v2882_v18  ;;  %v2883_v14 = vpack.c.bf16 %v4030_v25, %v4030_v25  ;;  %v2196_v4 = vsel %vm391_vm0, %v3765_v26, 0.0 }
 0x143   :  { %1447 = vst.msk [vmem:[%s4557_s3 + $0x11c] sm:$0xf] %vm1375_vm1, %v2885_v50  ;;  %v4061_v56 = vadd.f32 %v3896_v57, %v3665_v15  ;;  %v2344_v5 = vmul.f32 %v3900_v46, %v3900_v46  ;;  %v4071_v26 = vadd.f32 %v3896_v57, %v3669_v31  ;;  %v4075_v16 = vadd.f32 %v3896_v57, %v3691_v48 }
 0x144   :  { %v2496_v2 = vadd.f32 %v2495_v19, %v2494_v28  ;;  %v2193_v51 = vadd.f32 %v2192_v40, %v2191_v39  ;;  %1445 = vst.msk [vmem:[%s4557_s3 + $0x114] sm:$0xf] %vm1375_vm1, %v2883_v14  ;;  %v4079_v15 = vadd.f32 %v3896_v57, %v3711_v17  ;;  %v2501_v13 = vsel %vm391_vm0, %v2343_v27, 0.0 }
 0x145   :  { %v2888_v49 = vpack.c.bf16 %v4061_v56, %v4061_v56  ;;  %v2198_v31 = vsel %vm391_vm0, %v3900_v46, 0.0  ;;  %v2345_v48 = vmul.f32 %v3913_v54, %v3913_v54  ;;  %v2886_v30 = vpack.c.bf16 %v4071_v26, %v4071_v26 }
 0x146   :  { %v2195_v34 = vadd.f32 %v2194_v20, %v2193_v51  ;;  %v2498_v9 = vadd.f32 %v2497_v37, %v2496_v2  ;;  %v2889_v23 = vpack.c.bf16 %v4075_v16, %v4075_v16  ;;  %v2346_v61 = vmul.f32 %v3865_v60, %v3865_v60 }
 0x147   :  { %1450 = vst.msk [vmem:[%s4557_s3 + $0x128] sm:$0xf] %vm1375_vm1, %v2888_v49  ;;  %v2503_v46 = vsel %vm391_vm0, %v2344_v5, 0.0  ;;  %v2200_v62 = vsel %vm391_vm0, %v3913_v54, 0.0  ;;  %1448 = vst.msk [vmem:[%s4557_s3 + $0x120] sm:$0xf] %vm1375_vm1, %v2886_v30  ;;  %v2887_v63 = vpack.c.bf16 %v4079_v15, %v4079_v15  ;;  %v2347_v54 = vmul.f32 %v3909_v53, %v3909_v53 }
 0x148   :  { %v2500_v44 = vadd.f32 %v2499_v0, %v2498_v9  ;;  %v2197_v47 = vadd.f32 %v2196_v4, %v2195_v34  ;;  %v2202_v36 = vsel %vm391_vm0, %v3865_v60, 0.0  ;;  %1451 = vst.msk [vmem:[%s4557_s3 + $0x12c] sm:$0xf] %vm1375_vm1, %v2889_v23  ;;  %v2505_v28 = vsel %vm391_vm0, %v2345_v48, 0.0  ;;  %v4147_v0 = vpop.f32.mrf.mxu1 }
 0x149   :  { %1449 = vst.msk [vmem:[%s4557_s3 + $0x124] sm:$0xf] %vm1375_vm1, %v2887_v63  ;;  %v4126_v60 = vadd.f32 %v3896_v57, %v3729_v41  ;;  %v4130_v19 = vadd.f32 %v3896_v57, %v3749_v8  ;;  %v4134_v20 = vadd.f32 %v3896_v57, %v3769_v35  ;;  %v4138_v2 = vadd.f32 %v3896_v57, %v3791_v1 }
 0x14a   :  { %v2199_v17 = vadd.f32 %v2198_v31, %v2197_v47  ;;  %v2502_v59 = vadd.f32 %v2501_v13, %v2500_v44  ;;  %v2507_v51 = vsel %vm391_vm0, %v2346_v61, 0.0  ;;  %v2204_v41 = vsel %vm391_vm0, %v3909_v53, 0.0  ;;  %v4181_v13 = vpop.f32.mrf.mxu1 }
 0x14b   :  { %v2348_v50 = vmul.f32 %v3961_v21, %v3961_v21  ;;  %v2892_v8 = vpack.c.bf16 %v4126_v60, %v4126_v60  ;;  %v2890_v37 = vpack.c.bf16 %v4130_v19, %v4130_v19  ;;  %v2509_v1 = vsel %vm391_vm0, %v2347_v54, 0.0 }
 0x14c   :  { %v2504_v11 = vadd.f32 %v2503_v46, %v2502_v59  ;;  %v2201_v39 = vadd.f32 %v2200_v62, %v2199_v17  ;;  %v2206_v14 = vsel %vm391_vm0, %v3961_v21, 0.0  ;;  %v2349_v53 = vmul.f32 %v3969_v33, %v3969_v33 }
 0x14d   :  { %1454 = vst.msk [vmem:[%s4557_s3 + $0x138] sm:$0xf] %vm1375_vm1, %v2892_v8  ;;  %v2893_v4 = vpack.c.bf16 %v4134_v20, %v4134_v20  ;;  %v2350_v34 = vmul.f32 %v3917_v55, %v3917_v55  ;;  %1452 = vst.msk [vmem:[%s4557_s3 + $0x130] sm:$0xf] %vm1375_vm1, %v2890_v37  ;;  %v2891_v21 = vpack.c.bf16 %v4138_v2, %v4138_v2  ;;  %v2511_v44 = vsel %vm391_vm0, %v2348_v50, 0.0 }
 0x14e   :  { %v2203_v40 = vadd.f32 %v2202_v36, %v2201_v39  ;;  %v2506_v18 = vadd.f32 %v2505_v28, %v2504_v11  ;;  %v2208_v47 = vsel %vm391_vm0, %v3969_v33, 0.0  ;;  %v4179_v49 = vadd.f32 %v3896_v57, %v3811_v38  ;;  %v4217_v11 = vpop.f32.mrf.mxu1 }
 0x14f   :  { %1455 = vst.msk [vmem:[%s4557_s3 + $0x13c] sm:$0xf] %vm1375_vm1, %v2893_v4  ;;  %1453 = vst.msk [vmem:[%s4557_s3 + $0x134] sm:$0xf] %vm1375_vm1, %v2891_v21  ;;  %v4189_v33 = vadd.f32 %v3896_v57, %v3829_v7  ;;  %v2210_v30 = vsel %vm391_vm0, %v3917_v55, 0.0  ;;  %v2351_v38 = vmul.f32 %v3965_v32, %v3965_v32  ;;  %v2513_v17 = vsel %vm391_vm0, %v2349_v53, 0.0 }
 0x150   :  { %v2508_v27 = vadd.f32 %v2507_v51, %v2506_v18  ;;  %v2205_v35 = vadd.f32 %v2204_v41, %v2203_v40  ;;  %v2896_v59 = vpack.c.bf16 %v4179_v49, %v4179_v49  ;;  %v2515_v23 = vsel %vm391_vm0, %v2350_v34, 0.0 }
 0x151   :  { %v2894_v62 = vpack.c.bf16 %v4189_v33, %v4189_v33  ;;  %v2212_v7 = vsel %vm391_vm0, %v3965_v32, 0.0  ;;  %v2352_v55 = vmul.f32 %v4018_v45, %v4018_v45  ;;  %v4211_v63 = vadd.f32 %v3896_v57, %v3849_v42 }
 0x152   :  { %v2207_v9 = vadd.f32 %v2206_v14, %v2205_v35  ;;  %v2510_v5 = vadd.f32 %v2509_v1, %v2508_v27  ;;  %1458 = vst.msk [vmem:[%s4557_s3 + $0x148] sm:$0xf] %vm1375_vm1, %v2896_v59  ;;  %v4215_v36 = vadd.f32 %v3896_v57, %v3869_v12  ;;  %v4225_v54 = vadd.f32 %v3896_v57, %v3891_v52  ;;  %v4251_v27 = vpop.f32.mrf.mxu1 }
 0x153   :  { %1456 = vst.msk [vmem:[%s4557_s3 + $0x140] sm:$0xf] %vm1375_vm1, %v2894_v62  ;;  %v4229_v42 = vadd.f32 %v3896_v57, %v3927_v10  ;;  %v2517_v12 = vsel %vm391_vm0, %v2351_v38, 0.0  ;;  %v2214_v28 = vsel %vm391_vm0, %v4018_v45, 0.0  ;;  %v2353_v40 = vmul.f32 %v4030_v25, %v4030_v25 }
 0x154   :  { %v2512_v31 = vadd.f32 %v2511_v44, %v2510_v5  ;;  %v2209_v48 = vadd.f32 %v2208_v47, %v2207_v9  ;;  %v2897_v18 = vpack.c.bf16 %v4211_v63, %v4211_v63  ;;  %v2895_v52 = vpack.c.bf16 %v4215_v36, %v4215_v36  ;;  %v947_v47 = vpop.f32.mrf.mxu1 }
 0x155   :  { %v2354_v10 = vmul.f32 %v3977_v43, %v3977_v43  ;;  %v2519_v50 = vsel %vm391_vm0, %v2352_v55, 0.0  ;;  %v2216_v8 = vsel %vm391_vm0, %v4030_v25, 0.0  ;;  %v2900_v45 = vpack.c.bf16 %v4225_v54, %v4225_v54 }
 0x156   :  { %v2211_v61 = vadd.f32 %v2210_v30, %v2209_v48  ;;  %v2514_v46 = vadd.f32 %v2513_v17, %v2512_v31  ;;  %1459 = vst.msk [vmem:[%s4557_s3 + $0x14c] sm:$0xf] %vm1375_vm1, %v2897_v18  ;;  %v2355_v37 = vmul.f32 %v4026_v6, %v4026_v6  ;;  %1457 = vst.msk [vmem:[%s4557_s3 + $0x144] sm:$0xf] %vm1375_vm1, %v2895_v52  ;;  %v2218_v14 = vsel %vm391_vm0, %v3977_v43, 0.0  ;;  %v3068_v55 = vpop.f32.mrf.mxu1 }
 0x157   :  { %v2898_v25 = vpack.c.bf16 %v4229_v42, %v4229_v42  ;;  %v2521_v53 = vsel %vm391_vm0, %v2353_v40, 0.0  ;;  %1462 = vst.msk [vmem:[%s4557_s3 + $0x158] sm:$0xf] %vm1375_vm1, %v2900_v45  ;;  %v4270_v4 = vadd.f32 %v3896_v57, %v3971_v22  ;;  %v4278_v43 = vadd.f32 %v3896_v57, %v4001_v58 }
 0x158   :  { %v2516_v39 = vadd.f32 %v2515_v23, %v2514_v46  ;;  %v2213_v32 = vadd.f32 %v2212_v7, %v2211_v61  ;;  %v2523_v5 = vsel %vm391_vm0, %v2354_v10, 0.0  ;;  %v2220_v21 = vsel %vm391_vm0, %v4026_v6, 0.0 }
 0x159   :  { %1460 = vst.msk [vmem:[%s4557_s3 + $0x150] sm:$0xf] %vm1375_vm1, %v2898_v25  ;;  %v2356_v22 = vmul.f32 %v4071_v26, %v4071_v26  ;;  %v2901_v44 = vpack.c.bf16 %v4270_v4, %v4270_v4  ;;  %v2525_v31 = vsel %vm391_vm0, %v2355_v37, 0.0  ;;  %v2899_v58 = vpack.c.bf16 %v4278_v43, %v4278_v43 }
 0x15a   :  { %v2215_v51 = vadd.f32 %v2214_v28, %v2213_v32  ;;  %v2518_v41 = vadd.f32 %v2517_v12, %v2516_v39  ;;  %v2222_v38 = vsel %vm391_vm0, %v4071_v26, 0.0  ;;  %v2357_v6 = vmul.f32 %v4079_v15, %v4079_v15 }
 0x15b   :  { %1463 = vst.msk [vmem:[%s4557_s3 + $0x15c] sm:$0xf] %vm1375_vm1, %v2901_v44  ;;  %v4300_v17 = vadd.f32 %v3896_v57, %v4037_v3  ;;  %v4304_v59 = vadd.f32 %v3896_v57, %v4081_v29  ;;  %1461 = vst.msk [vmem:[%s4557_s3 + $0x154] sm:$0xf] %vm1375_vm1, %v2899_v58  ;;  %v4312_v26 = vadd.f32 %v3896_v57, %v4109_v24  ;;  %v2527_v29 = vsel %vm391_vm0, %v2356_v22, 0.0 }
 0x15c   :  { %v2520_v35 = vadd.f32 %v2519_v50, %v2518_v41  ;;  %v2217_v1 = vadd.f32 %v2216_v8, %v2215_v51  ;;  %v4316_v46 = vadd.f32 %v3896_v57, %v4147_v0  ;;  %v2358_v3 = vmul.f32 %v4061_v56, %v4061_v56  ;;  %v960_v50 = vpop.f32.mrf.mxu1 }
 0x15d   :  { %v2224_v62 = vsel %vm391_vm0, %v4079_v15, 0.0  ;;  %v2904_v7 = vpack.c.bf16 %v4300_v17, %v4300_v17  ;;  %v2902_v24 = vpack.c.bf16 %v4304_v59, %v4304_v59  ;;  %v2226_v0 = vsel %vm391_vm0, %v4061_v56, 0.0 }
 0x15e   :  { %v2219_v34 = vadd.f32 %v2218_v14, %v2217_v1  ;;  %v2522_v9 = vadd.f32 %v2521_v53, %v2520_v35  ;;  %v2359_v12 = vmul.f32 %v4075_v16, %v4075_v16  ;;  %v2529_v28 = vsel %vm391_vm0, %v2357_v6, 0.0 }
 0x15f   :  { %1466 = vst.msk [vmem:[%s4557_s3 + $0x168] sm:$0xf] %vm1375_vm1, %v2904_v7  ;;  %v2905_v15 = vpack.c.bf16 %v4312_v26, %v4312_v26  ;;  %1464 = vst.msk [vmem:[%s4557_s3 + $0x160] sm:$0xf] %vm1375_vm1, %v2902_v24  ;;  %v2903_v56 = vpack.c.bf16 %v4316_v46, %v4316_v46  ;;  %v2531_v51 = vsel %vm391_vm0, %v2358_v3, 0.0  ;;  %v2228_v41 = vsel %vm391_vm0, %v4075_v16, 0.0 }
 0x160   :  { %v2524_v48 = vadd.f32 %v2523_v5, %v2522_v9  ;;  %v2221_v30 = vadd.f32 %v2220_v21, %v2219_v34  ;;  %v2360_v52 = vmul.f32 %v4130_v19, %v4130_v19  ;;  %v4355_v10 = vadd.f32 %v3896_v57, %v4181_v13  ;;  %v3069_v21 = vpop.f32.mrf.mxu1 }
 0x161   :  { %1467 = vst.msk [vmem:[%s4557_s3 + $0x16c] sm:$0xf] %vm1375_vm1, %v2905_v15  ;;  %1465 = vst.msk [vmem:[%s4557_s3 + $0x164] sm:$0xf] %vm1375_vm1, %v2903_v56  ;;  %v4363_v16 = vadd.f32 %v3896_v57, %v4217_v11  ;;  %v2533_v35 = vsel %vm391_vm0, %v2359_v12, 0.0  ;;  %v2230_v37 = vsel %vm391_vm0, %v4130_v19, 0.0  ;;  %v2361_v13 = vmul.f32 %v4138_v2, %v4138_v2 }
 0x162   :  { %v2223_v23 = vadd.f32 %v2222_v38, %v2221_v30  ;;  %v2526_v61 = vadd.f32 %v2525_v31, %v2524_v48  ;;  %v2908_v1 = vpack.c.bf16 %v4355_v10, %v4355_v10  ;;  %v2362_v25 = vmul.f32 %v4126_v60, %v4126_v60 }
 0x163   :  { %v2906_v11 = vpack.c.bf16 %v4363_v16, %v4363_v16  ;;  %v2535_v34 = vsel %vm391_vm0, %v2360_v52, 0.0  ;;  %v2232_v9 = vsel %vm391_vm0, %v4138_v2, 0.0  ;;  %v4385_v19 = vadd.f32 %v3896_v57, %v4251_v27 }
 0x164   :  { %v2528_v39 = vadd.f32 %v2527_v29, %v2526_v61  ;;  %v2225_v32 = vadd.f32 %v2224_v62, %v2223_v23  ;;  %1470 = vst.msk [vmem:[%s4557_s3 + $0x178] sm:$0xf] %vm1375_vm1, %v2908_v1  ;;  %v4388_v5 = vadd.f32 %v3896_v57, %v947_v47  ;;  %v4395_v2 = vadd.f32 %v3896_v57, %v3068_v55  ;;  %v963_v29 = vpop.f32.mrf.mxu1 }
 0x165   :  { %1468 = vst.msk [vmem:[%s4557_s3 + $0x170] sm:$0xf] %vm1375_vm1, %v2906_v11  ;;  %v4398_v31 = vadd.f32 %v3896_v57, %v960_v50  ;;  %v2234_v27 = vsel %vm391_vm0, %v4126_v60, 0.0  ;;  %v2363_v47 = vmul.f32 %v4134_v20, %v4134_v20  ;;  %v2537_v48 = vsel %vm391_vm0, %v2361_v13, 0.0 }
 0x166   :  { %v2227_v40 = vadd.f32 %v2226_v0, %v2225_v32  ;;  %v2530_v18 = vadd.f32 %v2529_v28, %v2528_v39  ;;  %v2909_v30 = vpack.c.bf16 %v4385_v19, %v4385_v19  ;;  %v2907_v6 = vpack.c.bf16 %v4388_v5, %v4388_v5 }
 0x167   :  { %v2539_v23 = vsel %vm391_vm0, %v2362_v25, 0.0  ;;  %v2236_v61 = vsel %vm391_vm0, %v4134_v20, 0.0  ;;  %v2364_v60 = vmul.f32 %v4189_v33, %v4189_v33  ;;  %v2912_v3 = vpack.c.bf16 %v4395_v2, %v4395_v2 }
 0x168   :  { %v2532_v8 = vadd.f32 %v2531_v51, %v2530_v18  ;;  %v2229_v45 = vadd.f32 %v2228_v41, %v2227_v40  ;;  %1471 = vst.msk [vmem:[%s4557_s3 + $0x17c] sm:$0xf] %vm1375_vm1, %v2909_v30  ;;  %1469 = vst.msk [vmem:[%s4557_s3 + $0x174] sm:$0xf] %vm1375_vm1, %v2907_v6  ;;  %v2910_v20 = vpack.c.bf16 %v4398_v31, %v4398_v31  ;;  %v2541_v55 = vsel %vm391_vm0, %v2363_v47, 0.0 }
 0x169   :  { %v2238_v39 = vsel %vm391_vm0, %v4189_v33, 0.0  ;;  %v2365_v32 = vmul.f32 %v4215_v36, %v4215_v36  ;;  %1474 = vst.msk [vmem:[%s4557_s3 + $0x188] sm:$0xf] %vm1375_vm1, %v2912_v3  ;;  %v4436_v24 = vadd.f32 %v3896_v57, %v3069_v21  ;;  %v4443_v33 = vadd.f32 %v3896_v57, %v963_v29 }
 0x16a   :  { %v2231_v14 = vadd.f32 %v2230_v37, %v2229_v45  ;;  %v2534_v53 = vadd.f32 %v2533_v35, %v2532_v8  ;;  %1472 = vst.msk [vmem:[%s4557_s3 + $0x180] sm:$0xf] %vm1375_vm1, %v2910_v20  ;;  %v2366_v28 = vmul.f32 %v4179_v49, %v4179_v49  ;;  %v2543_v15 = vsel %vm391_vm0, %v2364_v60, 0.0 }
 0x16b   :  { %v2240_v40 = vsel %vm391_vm0, %v4215_v36, 0.0  ;;  %v2913_v18 = vpack.c.bf16 %v4436_v24, %v4436_v24  ;;  %v2911_v41 = vpack.c.bf16 %v4443_v33, %v4443_v33  ;;  %v2242_v57 = vsel %vm391_vm0, %v4179_v49, 0.0 }
 0x16c   :  { %v2536_v22 = vadd.f32 %v2535_v34, %v2534_v53  ;;  %v2233_v44 = vadd.f32 %v2232_v9, %v2231_v14  ;;  %v2367_v52 = vmul.f32 %v4211_v63, %v4211_v63  ;;  %v2545_v50 = vsel %vm391_vm0, %v2365_v32, 0.0 }
 0x16d   :  { %1475 = vst.msk [vmem:[%s4557_s3 + $0x18c] sm:$0xf] %vm1375_vm1, %v2913_v18  ;;  %1473 = vst.msk [vmem:[%s4557_s3 + $0x184] sm:$0xf] %vm1375_vm1, %v2911_v41  ;;  %v2547_v45 = vsel %vm391_vm0, %v2366_v28, 0.0  ;;  %v2244_v49 = vsel %vm391_vm0, %v4211_v63, 0.0  ;;  %v2368_v35 = vmul.f32 %v4229_v42, %v4229_v42  ;;  %v2369_v14 = vmul.f32 %v4278_v43, %v4278_v43 }
 0x16e   :  { %v2235_v58 = vadd.f32 %v2234_v27, %v2233_v44  ;;  %v2538_v38 = vadd.f32 %v2537_v48, %v2536_v22  ;;  %v2549_v1 = vsel %vm391_vm0, %v2367_v52, 0.0  ;;  %v2246_v25 = vsel %vm391_vm0, %v4229_v42, 0.0  ;;  %s3150_s3 = smov [#allocation2]  }
 0x16f   :  { %v2370_v34 = vmul.f32 %v4225_v54, %v4225_v54  ;;  %v2551_v63 = vsel %vm391_vm0, %v2368_v35, 0.0  ;;  %v2248_v9 = vsel %vm391_vm0, %v4278_v43, 0.0  ;;  %v2250_v44 = vsel %vm391_vm0, %v4225_v54, 0.0  ;;  %s2601_s15 = sshll.u32 %s3150_s3, 4  ;;  %s2602_s15 = int_to_ptr.vmem [resolvable:$true] %s2601_s15 }
 0x170   :  { %v2540_v62 = vadd.f32 %v2539_v23, %v2538_v38  ;;  %v2237_v7 = vadd.f32 %v2236_v61, %v2235_v58  ;;  %v2371_v42 = vmul.f32 %v4270_v4, %v4270_v4  ;;  %v2553_v27 = vsel %vm391_vm0, %v2369_v14, 0.0  ;;  %s3128_s16 = scalar_lea.vmem %s2602_s15, 32  ;;  %p3133_p1 = scmp.lt.s32.totalorder %s2602_s15, %s2602_s15 }
 0x171   :  { %v2555_v30 = vsel %vm391_vm0, %v2370_v34, 0.0  ;;  %v2252_v58 = vsel %vm391_vm0, %v4270_v4, 0.0  ;;  %v2372_v43 = vmul.f32 %v4304_v59, %v4304_v59  ;;  %v2254_v54 = vsel %vm391_vm0, %v4304_v59, 0.0  ;;  %p3129_p0 = scmp.ne.s32.totalorder %s2602_s15, %s3128_s16  ;;  %p3134_p2 = scmp.lt.s32.totalorder %s3128_s16, %s3128_s16 }
 0x172   :  { %v2239_v0 = vadd.f32 %v2238_v39, %v2237_v7  ;;  %v2542_v12 = vadd.f32 %v2541_v55, %v2540_v62  ;;  %v2557_v23 = vsel %vm391_vm0, %v2371_v42, 0.0  ;;  %v2373_v61 = vmul.f32 %v4316_v46, %v4316_v46 }
 0x173   :  { %v2374_v29 = vmul.f32 %v4300_v17, %v4300_v17  ;;  %v2559_v4 = vsel %vm391_vm0, %v2372_v43, 0.0  ;;  %v2256_v62 = vsel %vm391_vm0, %v4316_v46, 0.0  ;;  %v2258_v55 = vsel %vm391_vm0, %v4300_v17, 0.0  ;;  %p3135_p3 = por %p3134_p2, %p3133_p1 }
 0x174   :  { %v2544_v56 = vadd.f32 %v2543_v15, %v2542_v12  ;;  %v2241_v51 = vadd.f32 %v2240_v40, %v2239_v0  ;;  %v2375_v59 = vmul.f32 %v4312_v26, %v4312_v26  ;;  %v2561_v39 = vsel %vm391_vm0, %v2373_v61, 0.0 }
 0x175   :  { %v2563_v12 = vsel %vm391_vm0, %v2374_v29, 0.0  ;;  %v2260_v28 = vsel %vm391_vm0, %v4312_v26, 0.0  ;;  %v2376_v46 = vmul.f32 %v4363_v16, %v4363_v16  ;;  %v2262_v17 = vsel %vm391_vm0, %v4363_v16, 0.0  ;;  %p3136_p4 = pnand %p3135_p3, %p3129_p0 }
 0x176   :  { %v2243_v36 = vadd.f32 %v2242_v57, %v2241_v51  ;;  %v2546_v8 = vadd.f32 %v2545_v50, %v2544_v56  ;;  %v2565_v18 = vsel %vm391_vm0, %v2375_v59, 0.0  ;;  %v2377_v56 = vmul.f32 %v4388_v5, %v4388_v5 }
 0x177   :  { %v2378_v57 = vmul.f32 %v4355_v10, %v4355_v10  ;;  %v2567_v26 = vsel %vm391_vm0, %v2376_v46, 0.0  ;;  %v2264_v52 = vsel %vm391_vm0, %v4388_v5, 0.0  ;;  %v2379_v16 = vmul.f32 %v4385_v19, %v4385_v19 }
 0x178   :  { %v2548_v37 = vadd.f32 %v2547_v45, %v2546_v8  ;;  %v2245_v13 = vadd.f32 %v2244_v49, %v2243_v36  ;;  %v2266_v8 = vsel %vm391_vm0, %v4355_v10, 0.0  ;;  %v2569_v45 = vsel %vm391_vm0, %v2377_v56, 0.0 }
 0x179   :  { %v2380_v5 = vmul.f32 %v4398_v31, %v4398_v31  ;;  %v2573_v14 = vsel %vm391_vm0, %v2379_v16, 0.0  ;;  %v2270_v10 = vsel %vm391_vm0, %v4398_v31, 0.0  ;;  %v2383_v31 = vmul.f32 %v4436_v24, %v4436_v24 }
 0x17a   :  { %v2247_v53 = vadd.f32 %v2246_v25, %v2245_v13  ;;  %v2550_v11 = vadd.f32 %v2549_v1, %v2548_v37  ;;  %v2571_v37 = vsel %vm391_vm0, %v2378_v57, 0.0  ;;  %v2268_v13 = vsel %vm391_vm0, %v4385_v19, 0.0 }
 0x17b   :  { %v2575_v19 = vsel %vm391_vm0, %v2380_v5, 0.0 }
 0x17c   :  { %v2552_v21 = vadd.f32 %v2551_v63, %v2550_v11  ;;  %v2249_v22 = vadd.f32 %v2248_v9, %v2247_v53  ;;  %v2381_v53 = vmul.f32 %v4443_v33, %v4443_v33  ;;  %v2382_v63 = vmul.f32 %v4395_v2, %v4395_v2 }
 0x17d   :  { %v2272_v9 = vsel %vm391_vm0, %v4443_v33, 0.0  ;;  %v2581_v33 = vsel %vm391_vm0, %v2383_v31, 0.0 }
 0x17e   :  { %v2251_v47 = vadd.f32 %v2250_v44, %v2249_v22  ;;  %v2554_v48 = vadd.f32 %v2553_v27, %v2552_v21  ;;  %v2274_v44 = vsel %vm391_vm0, %v4395_v2, 0.0  ;;  %v2577_v42 = vsel %vm391_vm0, %v2381_v53, 0.0 }
 0x180   :  { %v2556_v38 = vadd.f32 %v2555_v30, %v2554_v48  ;;  %v2253_v6 = vadd.f32 %v2252_v58, %v2251_v47  ;;  %v2579_v48 = vsel %vm391_vm0, %v2382_v63, 0.0  ;;  %v2276_v30 = vsel %vm391_vm0, %v4436_v24, 0.0 }
 0x182   :  { %v2255_v60 = vadd.f32 %v2254_v54, %v2253_v6  ;;  %v2558_v3 = vadd.f32 %v2557_v23, %v2556_v38 }
 0x184   :  { %v2560_v7 = vadd.f32 %v2559_v4, %v2558_v3  ;;  %v2257_v20 = vadd.f32 %v2256_v62, %v2255_v60 }
 0x186   :  { %v2259_v32 = vadd.f32 %v2258_v55, %v2257_v20  ;;  %v2562_v0 = vadd.f32 %v2561_v39, %v2560_v7 }
 0x188   :  { %v2564_v15 = vadd.f32 %v2563_v12, %v2562_v0  ;;  %v2261_v40 = vadd.f32 %v2260_v28, %v2259_v32 }
 0x18a   :  { %v2263_v51 = vadd.f32 %v2262_v17, %v2261_v40  ;;  %v2566_v41 = vadd.f32 %v2565_v18, %v2564_v15 }
 0x18c   :  { %v2568_v50 = vadd.f32 %v2567_v26, %v2566_v41  ;;  %v2265_v36 = vadd.f32 %v2264_v52, %v2263_v51 }
 0x18e   :  { %v2267_v49 = vadd.f32 %v2266_v8, %v2265_v36  ;;  %v2570_v35 = vadd.f32 %v2569_v45, %v2568_v50 }
 0x190   :  { %v2572_v1 = vadd.f32 %v2571_v37, %v2570_v35  ;;  %v2269_v25 = vadd.f32 %v2268_v13, %v2267_v49 }
 0x192   :  { %v2271_v11 = vadd.f32 %v2270_v10, %v2269_v25  ;;  %v2574_v34 = vadd.f32 %v2573_v14, %v2572_v1 }
 0x194   :  { %v2576_v21 = vadd.f32 %v2575_v19, %v2574_v34  ;;  %v2273_v22 = vadd.f32 %v2272_v9, %v2271_v11 }
 0x196   :  { %v2275_v27 = vadd.f32 %v2274_v44, %v2273_v22  ;;  %v2578_v47 = vadd.f32 %v2577_v42, %v2576_v21 }
 0x198   :  { %v2277_v58 = vadd.f32 %v2276_v30, %v2275_v27  ;;  %v2580_v43 = vadd.f32 %v2579_v48, %v2578_v47 }
 0x19a   :  { %v2278_v38 = vrot.slane %v2277_v58, 4  ;;  %v2582_v6 = vadd.f32 %v2581_v33, %v2580_v43 }
 0x19c   :  { %v2279_v23 = vadd.f32 %v2278_v38, %v2277_v58  ;;  %v2583_v2 = vrot.slane %v2582_v6, 4 }
 0x19e   :  { %v2280_v54 = vrot.slane %v2279_v23, 2  ;;  %v2584_v61 = vadd.f32 %v2583_v2, %v2582_v6 }
 0x1a0   :  { %v2281_v60 = vadd.f32 %v2280_v54, %v2279_v23  ;;  %v2585_v3 = vrot.slane %v2584_v61, 2 }
 0x1a2   :  { %v2282_v29 = vrot.slane %v2281_v60, 1  ;;  %v2586_v4 = vadd.f32 %v2585_v3, %v2584_v61 }
 0x1a4   :  { %v2587_v62 = vrot.slane %v2586_v4, 1  ;;  %v2283_v7 = vadd.f32 %v2282_v29, %v2281_v60 }
 0x1a6   :  { %v2588_v24 = vadd.f32 %v2587_v62, %v2586_v4 }
 0x1a8   :  { %v2590_v20 = vsel %vm2589_vm2, %v2283_v7, %v2588_v24 }
 0x1a9   :  { %2592 = vst.msk [vmem:[#allocation2] sm:$0x3] %vm2591_vm3, %v2590_v20 }
 0x1aa   :  { %3139 = shalt.err (!%p3136_p4)
}
 0x1ab   :  { %2604 = dma.vmem_to_hbm [thread:$0]  %s2602_s15, 32, %s4558_s4, [#allocation3]  }
 0x1ac   :  { %3148 = dma.done.wait [#allocation3], 32  }
 0x1ad   :  { %3149 = vsyncadd [#allocation3], 4294967264 }
 0x1ae   :  { %2610 = vsyncpa [#allocation3], 1 }

// kernel: node_layer_forward.8
= control target key start
LH: loop header
LB: loop body
LE: loop exit
PB: predicated region body
PF: predicated region fallthrough
CT: control target
= control target key end

     0   :  { %vm390_vm0 = vcmask 261120   ;;  %vm1674_vm2 = vcmask 257024   ;;  %s4554_s1 = inlined_call_operand.vmem [shape: bf16[32,32], index: 1, kind: input, shape index: {}]   ;;  %s4555_s0 = inlined_call_operand.vmem [shape: bf16[800,32], index: 0, kind: input, shape index: {}]   ;;  %s4556_s2 = inlined_call_operand.vmem [shape: f32[1,32], index: 2, kind: input, shape index: {}]   ;;  %s4557_s3 = inlined_call_operand.vmem [shape: bf16[800,32], index: 3, kind: output, shape index: {0}]   ;;  %s4558_s4 = inlined_call_operand.vmem [shape: f32[1,2,32], index: 4, kind: output, shape index: {1}]  }
   0x1   :  { %v3363_v0 = vld [vmem:[%s4554_s1 + $0x8] sm:$0xff]   ;;  %v3364_v1 = vld [vmem:[%s4554_s1] sm:$0xff]   ;;  %v3367_v4 = vld [vmem:[%s4555_s0 + $0x10] sm:$0xff]  }
   0x2   :  { %3255 = vmatprep.subr.bf16.mxu0 %v3363_v0  ;;  %v3365_v2 = vld [vmem:[%s4555_s0] sm:$0xff]   ;;  %3359 = vmatprep.subr.bf16.mxu1 %v3363_v0  ;;  %v3366_v3 = vld [vmem:[%s4555_s0 + $0x8] sm:$0xff]   ;;  %v3368_v5 = vld [vmem:[%s4555_s0 + $0x18] sm:$0xff]  }
   0x3   :  { %3256 = vmatpush3.bf16.msra.mxu0 %v3363_v0  ;;  %3361 = vmatpush3.bf16.msra.mxu1 %v3363_v0  ;;  %v3369_v6 = vld [vmem:[%s4555_s0 + $0x20] sm:$0xff]   ;;  %v3370_v7 = vld [vmem:[%s4555_s0 + $0x28] sm:$0xff]   ;;  %v3371_v8 = vld [vmem:[%s4555_s0 + $0x30] sm:$0xff]  }
   0x4   :  { %3257 = vmatprep.subr.bf16.mxu0 %v3364_v1  ;;  %3259 = vmatprep.mubr.msk.bf16.mxu0 %vm390_vm0, %v3365_v2  ;;  %v3390_v9 = vld [vmem:[%s4555_s0 + $0xd0] sm:$0xff]   ;;  %v3372_v10 = vld [vmem:[%s4555_s0 + $0x38] sm:$0xff]   ;;  %v3393_v12 = vld [vmem:[%s4555_s0 + $0xe0] sm:$0xff]  }
   0x5   :  { %3360 = vmatprep.subr.bf16.mxu1 %v3364_v1  ;;  %3311 = vmatprep.mubr.msk.bf16.mxu1 %vm390_vm0, %v3390_v9  ;;  %v3392_v11 = vld [vmem:[%s4555_s0 + $0xd8] sm:$0xff]   ;;  %v3373_v13 = vld [vmem:[%s4555_s0 + $0x40] sm:$0xff]   ;;  %v3394_v14 = vld [vmem:[%s4555_s0 + $0xe8] sm:$0xff]  }
   0x6   :  { %v3395_v15 = vld [vmem:[%s4555_s0 + $0xf0] sm:$0xff]   ;;  %v3374_v16 = vld [vmem:[%s4555_s0 + $0x48] sm:$0xff]   ;;  %v3396_v18 = vld [vmem:[%s4555_s0 + $0xf8] sm:$0xff]  }
   0x7   :  { %3258 = vmatpush3.bf16.msra.mxu0 %v3364_v1  ;;  %3362 = vmatpush3.bf16.msra.mxu1 %v3364_v1  ;;  %v3375_v17 = vld [vmem:[%s4555_s0 + $0x50] sm:$0xff]   ;;  %v3397_v19 = vld [vmem:[%s4555_s0 + $0x100] sm:$0xff]   ;;  %v3376_v20 = vld [vmem:[%s4555_s0 + $0x58] sm:$0xff]  }
   0x8   :  { %v3377_v21 = vld [vmem:[%s4555_s0 + $0x60] sm:$0xff]   ;;  %v3398_v22 = vld [vmem:[%s4555_s0 + $0x108] sm:$0xff]   ;;  %v3399_v23 = vld [vmem:[%s4555_s0 + $0x110] sm:$0xff]  }
   0x9   :  { %v3378_v24 = vld [vmem:[%s4555_s0 + $0x68] sm:$0xff]   ;;  %v3379_v25 = vld [vmem:[%s4555_s0 + $0x70] sm:$0xff]   ;;  %v3400_v26 = vld [vmem:[%s4555_s0 + $0x118] sm:$0xff]  }
   0xa   :  { %3260 = vmatmul.mubr.msk.bf16.vlgmr.msra.gmra.mxu0 %vm390_vm0, %v3366_v3  ;;  %3312 = vmatmul.mubr.msk.bf16.vlgmr.msra.gmra.mxu1 %vm390_vm0, %v3392_v11  ;;  %v3401_v27 = vld [vmem:[%s4555_s0 + $0x120] sm:$0xff]   ;;  %v3380_v28 = vld [vmem:[%s4555_s0 + $0x78] sm:$0xff]   ;;  %v3402_v30 = vld [vmem:[%s4555_s0 + $0x128] sm:$0xff]  }
   0xb   :  { %3263 = vmatprep.mubr.msk.bf16.mxu0 %vm390_vm0, %v3367_v4  ;;  %3315 = vmatprep.mubr.msk.bf16.mxu1 %vm390_vm0, %v3393_v12  ;;  %v3381_v29 = vld [vmem:[%s4555_s0 + $0x80] sm:$0xff]   ;;  %v3403_v31 = vld [vmem:[%s4555_s0 + $0x130] sm:$0xff]   ;;  %v3382_v32 = vld [vmem:[%s4555_s0 + $0x88] sm:$0xff]  }
   0xc   :  { %v3383_v33 = vld [vmem:[%s4555_s0 + $0x90] sm:$0xff]   ;;  %v3404_v34 = vld [vmem:[%s4555_s0 + $0x138] sm:$0xff]   ;;  %v3405_v35 = vld [vmem:[%s4555_s0 + $0x140] sm:$0xff]  }
   0xd   :  { %v3384_v36 = vld [vmem:[%s4555_s0 + $0x98] sm:$0xff]   ;;  %v3385_v37 = vld [vmem:[%s4555_s0 + $0xa0] sm:$0xff]   ;;  %v3406_v38 = vld [vmem:[%s4555_s0 + $0x148] sm:$0xff]  }
   0xe   :  { %v3407_v39 = vld [vmem:[%s4555_s0 + $0x150] sm:$0xff]   ;;  %v3386_v40 = vld [vmem:[%s4555_s0 + $0xa8] sm:$0xff]   ;;  %v3408_v42 = vld [vmem:[%s4555_s0 + $0x158] sm:$0xff]  }
   0xf   :  { %v3387_v41 = vld [vmem:[%s4555_s0 + $0xb0] sm:$0xff]   ;;  %v3409_v43 = vld [vmem:[%s4555_s0 + $0x160] sm:$0xff]   ;;  %v3388_v44 = vld [vmem:[%s4555_s0 + $0xb8] sm:$0xff]  }
  0x10   :  { %v3389_v45 = vld [vmem:[%s4555_s0 + $0xc0] sm:$0xff]   ;;  %v3410_v46 = vld [vmem:[%s4555_s0 + $0x168] sm:$0xff]   ;;  %v3411_v47 = vld [vmem:[%s4555_s0 + $0x170] sm:$0xff]  }
  0x11   :  { %v3391_v48 = vld [vmem:[%s4555_s0 + $0xc8] sm:$0xff]   ;;  %v3412_v49 = vld [vmem:[%s4555_s0 + $0x178] sm:$0xff]   ;;  %v3413_v50 = vld [vmem:[%s4555_s0 + $0x180] sm:$0xff]  }
  0x12   :  { %3264 = vmatmul.mubr.msk.bf16.gmra.mxu0 %vm390_vm0, %v3368_v5  ;;  %3316 = vmatmul.mubr.msk.bf16.gmra.mxu1 %vm390_vm0, %v3394_v14  ;;  %v3414_v51 = vld [vmem:[%s4555_s0 + $0x188] sm:$0xff]   ;;  %v3651_v52 = vld [vmem:[%s4556_s2] ss:$0 sm:$0xff] }
  0x13   :  { %3267 = vmatprep.mubr.msk.bf16.mxu0 %vm390_vm0, %v3369_v6  ;;  %3319 = vmatprep.mubr.msk.bf16.mxu1 %vm390_vm0, %v3395_v15 }
  0x1a   :  { %3268 = vmatmul.mubr.msk.bf16.gmra.mxu0 %vm390_vm0, %v3370_v7  ;;  %3320 = vmatmul.mubr.msk.bf16.gmra.mxu1 %vm390_vm0, %v3396_v18 }
  0x1b   :  { %3271 = vmatprep.mubr.msk.bf16.mxu0 %vm390_vm0, %v3371_v8  ;;  %3323 = vmatprep.mubr.msk.bf16.mxu1 %vm390_vm0, %v3397_v19 }
  0x22   :  { %3272 = vmatmul.mubr.msk.bf16.gmra.mxu0 %vm390_vm0, %v3372_v10  ;;  %3324 = vmatmul.mubr.msk.bf16.gmra.mxu1 %vm390_vm0, %v3398_v22 }
  0x23   :  { %3275 = vmatprep.mubr.msk.bf16.mxu0 %vm390_vm0, %v3373_v13  ;;  %3327 = vmatprep.mubr.msk.bf16.mxu1 %vm390_vm0, %v3399_v23 }
  0x2a   :  { %3276 = vmatmul.mubr.msk.bf16.gmra.mxu0 %vm390_vm0, %v3374_v16  ;;  %3328 = vmatmul.mubr.msk.bf16.gmra.mxu1 %vm390_vm0, %v3400_v26 }
  0x2b   :  { %3279 = vmatprep.mubr.msk.bf16.mxu0 %vm390_vm0, %v3375_v17  ;;  %3331 = vmatprep.mubr.msk.bf16.mxu1 %vm390_vm0, %v3401_v27 }
  0x32   :  { %3280 = vmatmul.mubr.msk.bf16.gmra.mxu0 %vm390_vm0, %v3376_v20  ;;  %3332 = vmatmul.mubr.msk.bf16.gmra.mxu1 %vm390_vm0, %v3402_v30 }
  0x33   :  { %3283 = vmatprep.mubr.msk.bf16.mxu0 %vm390_vm0, %v3377_v21  ;;  %3335 = vmatprep.mubr.msk.bf16.mxu1 %vm390_vm0, %v3403_v31 }
  0x3a   :  { %3284 = vmatmul.mubr.msk.bf16.gmra.mxu0 %vm390_vm0, %v3378_v24  ;;  %3336 = vmatmul.mubr.msk.bf16.gmra.mxu1 %vm390_vm0, %v3404_v34 }
  0x3b   :  { %3287 = vmatprep.mubr.msk.bf16.mxu0 %vm390_vm0, %v3379_v25  ;;  %3339 = vmatprep.mubr.msk.bf16.mxu1 %vm390_vm0, %v3405_v35 }
  0x42   :  { %3288 = vmatmul.mubr.msk.bf16.gmra.mxu0 %vm390_vm0, %v3380_v28  ;;  %3340 = vmatmul.mubr.msk.bf16.gmra.mxu1 %vm390_vm0, %v3406_v38 }
  0x43   :  { %3291 = vmatprep.mubr.msk.bf16.mxu0 %vm390_vm0, %v3381_v29  ;;  %3343 = vmatprep.mubr.msk.bf16.mxu1 %vm390_vm0, %v3407_v39 }
  0x4a   :  { %3292 = vmatmul.mubr.msk.bf16.gmra.mxu0 %vm390_vm0, %v3382_v32  ;;  %3344 = vmatmul.mubr.msk.bf16.gmra.mxu1 %vm390_vm0, %v3408_v42 }
  0x4b   :  { %3295 = vmatprep.mubr.msk.bf16.mxu0 %vm390_vm0, %v3383_v33  ;;  %3347 = vmatprep.mubr.msk.bf16.mxu1 %vm390_vm0, %v3409_v43 }
  0x52   :  { %3296 = vmatmul.mubr.msk.bf16.gmra.mxu0 %vm390_vm0, %v3384_v36  ;;  %3348 = vmatmul.mubr.msk.bf16.gmra.mxu1 %vm390_vm0, %v3410_v46 }
  0x53   :  { %3299 = vmatprep.mubr.msk.bf16.mxu0 %vm390_vm0, %v3385_v37  ;;  %3351 = vmatprep.mubr.msk.bf16.mxu1 %vm390_vm0, %v3411_v47 }
  0x5a   :  { %3300 = vmatmul.mubr.msk.bf16.gmra.mxu0 %vm390_vm0, %v3386_v40  ;;  %3352 = vmatmul.mubr.msk.bf16.gmra.mxu1 %vm390_vm0, %v3412_v49 }
  0x5b   :  { %3303 = vmatprep.mubr.msk.bf16.mxu0 %vm390_vm0, %v3387_v41  ;;  %3355 = vmatprep.mubr.msk.bf16.mxu1 %vm390_vm0, %v3413_v50 }
  0x62   :  { %3304 = vmatmul.mubr.msk.bf16.gmra.mxu0 %vm390_vm0, %v3388_v44  ;;  %3356 = vmatmul.mubr.msk.bf16.gmra.mxu1 %vm390_vm0, %v3414_v51 }
  0x63   :  { %3307 = vmatprep.mubr.msk.bf16.mxu0 %vm390_vm0, %v3389_v45 }
  0x6a   :  { %3308 = vmatmul.mubr.msk.bf16.gmra.mxu0 %vm390_vm0, %v3391_v48 }
  0xca   :  { %v3261_v53 = vpop.f32.mrf.mxu0 }
  0xcb   :  { %v584_v54 = vadd.f32 %v3261_v53, %v3651_v52 }
  0xcc   :  { %v575_v55 = vpop.f32.mrf.mxu0 }
  0xcd   :  { %vm976_vm1 = vcmp.ge.f32.partialorder %v584_v54, 0.0  ;;  %v1076_v56 = vmul.f32 0.0, %v584_v54  ;;  %v576_v57 = vadd.f32 %v3651_v52, %v575_v55 }
  0xce   :  { %v3262_v58 = vpop.f32.mrf.mxu0 }
  0xcf   :  { %v1176_v59 = vsel %vm976_vm1, %v584_v54, %v1076_v56  ;;  %vm974_vm3 = vcmp.ge.f32.partialorder %v576_v57, 0.0  ;;  %v1074_v60 = vmul.f32 0.0, %v576_v57  ;;  %v587_v61 = vadd.f32 %v3262_v58, %v3651_v52 }
  0xd0   :  { %v3105_v62 = vpack.c.bf16 %v1176_v59, %v1176_v59  ;;  %v578_v63 = vpop.f32.mrf.mxu0  ;;  %v2381_v8 = vsel %vm390_vm0, %v1176_v59, 0.0  ;;  %v2585_v9 = vmul.f32 %v1176_v59, %v1176_v59 }
  0xd1   :  { %v1174_v0 = vsel %vm974_vm3, %v576_v57, %v1074_v60  ;;  %vm977_vm4 = vcmp.ge.f32.partialorder %v587_v61, 0.0  ;;  %v1077_v1 = vmul.f32 0.0, %v587_v61  ;;  %v579_v2 = vadd.f32 %v3651_v52, %v578_v63 }
  0xd2   :  { %1677 = vst.msk [vmem:[%s4557_s3 + $0x8] sm:$0xf] %vm1674_vm2, %v3105_v62  ;;  %v3103_v3 = vpack.c.bf16 %v1174_v0, %v1174_v0  ;;  %v3265_v4 = vpop.f32.mrf.mxu0  ;;  %v2583_v10 = vmul.f32 %v1174_v0, %v1174_v0  ;;  %v2378_v16 = vsel %vm390_vm0, %v1174_v0, 0.0  ;;  %v2686_v33 = vsel %vm390_vm0, %v2585_v9, 0.0 }
  0xd3   :  { %v1177_v5 = vsel %vm977_vm4, %v587_v61, %v1077_v1  ;;  %vm975_vm5 = vcmp.ge.f32.partialorder %v579_v2, 0.0  ;;  %v1075_v6 = vmul.f32 0.0, %v579_v2  ;;  %v600_v7 = vadd.f32 %v3265_v4, %v3651_v52 }
  0xd4   :  { %1675 = vst.msk [vmem:[%s4557_s3] sm:$0xf] %vm1674_vm2, %v3103_v3  ;;  %v3106_v11 = vpack.c.bf16 %v1177_v5, %v1177_v5  ;;  %v591_v12 = vpop.f32.mrf.mxu0  ;;  %v2683_v24 = vsel %vm390_vm0, %v2583_v10, 0.0  ;;  %v2586_v25 = vmul.f32 %v1177_v5, %v1177_v5  ;;  %v2383_v34 = vsel %vm390_vm0, %v1177_v5, 0.0 }
  0xd5   :  { %v1175_v13 = vsel %vm975_vm5, %v579_v2, %v1075_v6  ;;  %vm980_vm6 = vcmp.ge.f32.partialorder %v600_v7, 0.0  ;;  %v1080_v14 = vmul.f32 0.0, %v600_v7  ;;  %v592_v15 = vadd.f32 %v3651_v52, %v591_v12 }
  0xd6   :  { %1678 = vst.msk [vmem:[%s4557_s3 + $0xc] sm:$0xf] %vm1674_vm2, %v3106_v11  ;;  %v3104_v17 = vpack.c.bf16 %v1175_v13, %v1175_v13  ;;  %v2379_v18 = vsel %vm390_vm0, %v1175_v13, 0.0  ;;  %v2584_v19 = vmul.f32 %v1175_v13, %v1175_v13  ;;  %v3266_v20 = vpop.f32.mrf.mxu0  ;;  %v2688_v41 = vsel %vm390_vm0, %v2586_v25, 0.0 }
  0xd7   :  { %v2380_v21 = vadd.f32 %v2379_v18, %v2378_v16  ;;  %v1180_v22 = vsel %vm980_vm6, %v600_v7, %v1080_v14  ;;  %vm978_vm7 = vcmp.ge.f32.partialorder %v592_v15, 0.0  ;;  %v1078_v23 = vmul.f32 0.0, %v592_v15  ;;  %v3313_v16 = vpop.f32.mrf.mxu1 }
  0xd8   :  { %1676 = vst.msk [vmem:[%s4557_s3 + $0x4] sm:$0xf] %vm1674_vm2, %v3104_v17  ;;  %v2684_v26 = vsel %vm390_vm0, %v2584_v19, 0.0  ;;  %v3109_v27 = vpack.c.bf16 %v1180_v22, %v1180_v22  ;;  %v594_v28 = vpop.f32.mrf.mxu0  ;;  %v603_v32 = vadd.f32 %v3266_v20, %v3651_v52  ;;  %v2389_v42 = vsel %vm390_vm0, %v1180_v22, 0.0 }
  0xd9   :  { %v2382_v29 = vadd.f32 %v2381_v8, %v2380_v21  ;;  %v2685_v30 = vadd.f32 %v2684_v26, %v2683_v24  ;;  %v1178_v31 = vsel %vm978_vm7, %v592_v15, %v1078_v23  ;;  %v595_v43 = vadd.f32 %v3651_v52, %v594_v28 }
  0xda   :  { %1681 = vst.msk [vmem:[%s4557_s3 + $0x18] sm:$0xf] %vm1674_vm2, %v3109_v27  ;;  %v3107_v35 = vpack.c.bf16 %v1178_v31, %v1178_v31  ;;  %v2587_v36 = vmul.f32 %v1178_v31, %v1178_v31  ;;  %v3269_v37 = vpop.f32.mrf.mxu0  ;;  %vm981_vm8 = vcmp.ge.f32.partialorder %v603_v32, 0.0  ;;  %v1081_v40 = vmul.f32 0.0, %v603_v32 }
  0xdb   :  { %v2384_v38 = vadd.f32 %v2383_v34, %v2382_v29  ;;  %v2687_v39 = vadd.f32 %v2686_v33, %v2685_v30  ;;  %v616_v44 = vadd.f32 %v3269_v37, %v3651_v52  ;;  %v2589_v47 = vmul.f32 %v1180_v22, %v1180_v22 }
  0xdc   :  { %1679 = vst.msk [vmem:[%s4557_s3 + $0x10] sm:$0xf] %vm1674_vm2, %v3107_v35  ;;  %v607_v45 = vpop.f32.mrf.mxu0  ;;  %v1181_v48 = vsel %vm981_vm8, %v603_v32, %v1081_v40  ;;  %v2385_v50 = vsel %vm390_vm0, %v1178_v31, 0.0  ;;  %v2690_v51 = vsel %vm390_vm0, %v2587_v36, 0.0  ;;  %vm979_vm9 = vcmp.ge.f32.partialorder %v595_v43, 0.0 }
  0xdd   :  { %v2689_v46 = vadd.f32 %v2688_v41, %v2687_v39  ;;  %v608_v49 = vadd.f32 %v3651_v52, %v607_v45  ;;  %v3110_v53 = vpack.c.bf16 %v1181_v48, %v1181_v48  ;;  %v2386_v55 = vadd.f32 %v2385_v50, %v2384_v38 }
  0xde   :  { %v3270_v54 = vpop.f32.mrf.mxu0  ;;  %v1079_v56 = vmul.f32 0.0, %v595_v43  ;;  %vm984_vm10 = vcmp.ge.f32.partialorder %v616_v44, 0.0  ;;  %v1084_v57 = vmul.f32 0.0, %v616_v44  ;;  %v2590_v59 = vmul.f32 %v1181_v48, %v1181_v48 }
  0xdf   :  { %v2691_v58 = vadd.f32 %v2690_v51, %v2689_v46  ;;  %1682 = vst.msk [vmem:[%s4557_s3 + $0x1c] sm:$0xf] %vm1674_vm2, %v3110_v53  ;;  %vm982_vm11 = vcmp.ge.f32.partialorder %v608_v49, 0.0  ;;  %v1082_v60 = vmul.f32 0.0, %v608_v49  ;;  %v619_v0 = vadd.f32 %v3270_v54, %v3651_v52 }
  0xe0   :  { %v610_v61 = vpop.f32.mrf.mxu0  ;;  %v1179_v62 = vsel %vm979_vm9, %v595_v43, %v1079_v56  ;;  %v1184_v63 = vsel %vm984_vm10, %v616_v44, %v1084_v57  ;;  %v2694_v7 = vsel %vm390_vm0, %v2589_v47, 0.0  ;;  %v2391_v8 = vsel %vm390_vm0, %v1181_v48, 0.0 }
  0xe1   :  { %v611_v1 = vadd.f32 %v3651_v52, %v610_v61  ;;  %v3108_v2 = vpack.c.bf16 %v1179_v62, %v1179_v62  ;;  %v2387_v3 = vsel %vm390_vm0, %v1179_v62, 0.0  ;;  %v2588_v4 = vmul.f32 %v1179_v62, %v1179_v62 }
  0xe2   :  { %v3113_v5 = vpack.c.bf16 %v1184_v63, %v1184_v63  ;;  %v3273_v6 = vpop.f32.mrf.mxu0  ;;  %v2388_v9 = vadd.f32 %v2387_v3, %v2386_v55  ;;  %v1182_v10 = vsel %vm982_vm11, %v608_v49, %v1082_v60  ;;  %v2696_v11 = vsel %vm390_vm0, %v2590_v59, 0.0 }
  0xe3   :  { %1680 = vst.msk [vmem:[%s4557_s3 + $0x14] sm:$0xf] %vm1674_vm2, %v3108_v2  ;;  %v2692_v12 = vsel %vm390_vm0, %v2588_v4, 0.0  ;;  %v3111_v13 = vpack.c.bf16 %v1182_v10, %v1182_v10  ;;  %v2591_v14 = vmul.f32 %v1182_v10, %v1182_v10  ;;  %vm985_vm12 = vcmp.ge.f32.partialorder %v619_v0, 0.0 }
  0xe4   :  { %1685 = vst.msk [vmem:[%s4557_s3 + $0x28] sm:$0xf] %vm1674_vm2, %v3113_v5  ;;  %v623_v15 = vpop.f32.mrf.mxu0  ;;  %v2390_v17 = vadd.f32 %v2389_v42, %v2388_v9  ;;  %v2693_v18 = vadd.f32 %v2692_v12, %v2691_v58  ;;  %v3718_v19 = vadd.f32 %v3313_v16, %v3651_v52  ;;  %v2593_v20 = vmul.f32 %v1184_v63, %v1184_v63 }
  0xe5   :  { %1683 = vst.msk [vmem:[%s4557_s3 + $0x20] sm:$0xf] %vm1674_vm2, %v3111_v13  ;;  %v1085_v21 = vmul.f32 0.0, %v619_v0  ;;  %vm983_vm13 = vcmp.ge.f32.partialorder %v611_v1, 0.0  ;;  %v1083_v22 = vmul.f32 0.0, %v611_v1  ;;  %v2393_v26 = vsel %vm390_vm0, %v1182_v10, 0.0 }
  0xe6   :  { %v3274_v23 = vpop.f32.mrf.mxu0  ;;  %v2392_v24 = vadd.f32 %v2391_v8, %v2390_v17  ;;  %v2695_v25 = vadd.f32 %v2694_v7, %v2693_v18  ;;  %v632_v27 = vadd.f32 %v3273_v6, %v3651_v52  ;;  %v2698_v28 = vsel %vm390_vm0, %v2591_v14, 0.0 }
  0xe7   :  { %v1185_v29 = vsel %vm985_vm12, %v619_v0, %v1085_v21  ;;  %v1183_v30 = vsel %vm983_vm13, %v611_v1, %v1083_v22  ;;  %v624_v31 = vadd.f32 %v3651_v52, %v623_v15  ;;  %v635_v36 = vadd.f32 %v3274_v23, %v3651_v52 }
  0xe8   :  { %v626_v32 = vpop.f32.mrf.mxu0  ;;  %v2697_v33 = vadd.f32 %v2696_v11, %v2695_v25  ;;  %v2394_v34 = vadd.f32 %v2393_v26, %v2392_v24  ;;  %v3114_v35 = vpack.c.bf16 %v1185_v29, %v1185_v29  ;;  %v2594_v37 = vmul.f32 %v1185_v29, %v1185_v29 }
  0xe9   :  { %v3112_v38 = vpack.c.bf16 %v1183_v30, %v1183_v30  ;;  %v2395_v39 = vsel %vm390_vm0, %v1183_v30, 0.0  ;;  %v2592_v40 = vmul.f32 %v1183_v30, %v1183_v30  ;;  %vm988_vm14 = vcmp.ge.f32.partialorder %v632_v27, 0.0 }
  0xea   :  { %v3277_v41 = vpop.f32.mrf.mxu0  ;;  %v2699_v42 = vadd.f32 %v2698_v28, %v2697_v33  ;;  %1686 = vst.msk [vmem:[%s4557_s3 + $0x2c] sm:$0xf] %vm1674_vm2, %v3114_v35  ;;  %v2396_v43 = vadd.f32 %v2395_v39, %v2394_v34  ;;  %v1088_v44 = vmul.f32 0.0, %v632_v27  ;;  %v2397_v45 = vsel %vm390_vm0, %v1184_v63, 0.0 }
  0xeb   :  { %1684 = vst.msk [vmem:[%s4557_s3 + $0x24] sm:$0xf] %vm1674_vm2, %v3112_v38  ;;  %v2700_v46 = vsel %vm390_vm0, %v2592_v40, 0.0  ;;  %vm986_vm15 = vcmp.ge.f32.partialorder %v624_v31, 0.0  ;;  %v1086_v47 = vmul.f32 0.0, %v624_v31  ;;  %v2702_v49 = vsel %vm390_vm0, %v2593_v20, 0.0 }
  0xec   :  { %v639_v48 = vpop.f32.mrf.mxu0  ;;  %v2398_v50 = vadd.f32 %v2397_v45, %v2396_v43  ;;  %v2701_v51 = vadd.f32 %v2700_v46, %v2699_v42  ;;  %v1188_v53 = vsel %vm988_vm14, %v632_v27, %v1088_v44  ;;  %v2399_v54 = vsel %vm390_vm0, %v1185_v29, 0.0 }
  0xed   :  { %v2704_v55 = vsel %vm390_vm0, %v2594_v37, 0.0  ;;  %v3117_v56 = vpack.c.bf16 %v1188_v53, %v1188_v53  ;;  %v1186_v57 = vsel %vm986_vm15, %v624_v31, %v1086_v47  ;;  %vm989_vm1 = vcmp.ge.f32.partialorder %v635_v36, 0.0 }
  0xee   :  { %v3278_v58 = vpop.f32.mrf.mxu0  ;;  %v2400_v59 = vadd.f32 %v2399_v54, %v2398_v50  ;;  %v2703_v60 = vadd.f32 %v2702_v49, %v2701_v51  ;;  %v3115_v61 = vpack.c.bf16 %v1186_v57, %v1186_v57  ;;  %v2401_v62 = vsel %vm390_vm0, %v1186_v57, 0.0 }
  0xef   :  { %1689 = vst.msk [vmem:[%s4557_s3 + $0x38] sm:$0xf] %vm1674_vm2, %v3117_v56  ;;  %v2595_v63 = vmul.f32 %v1186_v57, %v1186_v57  ;;  %v1089_v0 = vmul.f32 0.0, %v635_v36  ;;  %v627_v1 = vadd.f32 %v3651_v52, %v626_v32  ;;  %v648_v5 = vadd.f32 %v3277_v41, %v3651_v52 }
  0xf0   :  { %v642_v2 = vpop.f32.mrf.mxu0  ;;  %v2705_v3 = vadd.f32 %v2704_v55, %v2703_v60  ;;  %1687 = vst.msk [vmem:[%s4557_s3 + $0x30] sm:$0xf] %vm1674_vm2, %v3115_v61  ;;  %v2402_v4 = vadd.f32 %v2401_v62, %v2400_v59  ;;  %v640_v6 = vadd.f32 %v3651_v52, %v639_v48  ;;  %v2405_v11 = vsel %vm390_vm0, %v1188_v53, 0.0 }
  0xf1   :  { %v2706_v7 = vsel %vm390_vm0, %v2595_v63, 0.0  ;;  %v1189_v8 = vsel %vm989_vm1, %v635_v36, %v1089_v0  ;;  %vm987_vm3 = vcmp.ge.f32.partialorder %v627_v1, 0.0  ;;  %v1087_v9 = vmul.f32 0.0, %v627_v1 }
  0xf2   :  { %v3281_v10 = vpop.f32.mrf.mxu0  ;;  %v2597_v12 = vmul.f32 %v1188_v53, %v1188_v53  ;;  %v2707_v13 = vadd.f32 %v2706_v7, %v2705_v3  ;;  %v3118_v14 = vpack.c.bf16 %v1189_v8, %v1189_v8  ;;  %v2598_v15 = vmul.f32 %v1189_v8, %v1189_v8 }
  0xf3   :  { %v1187_v16 = vsel %vm987_vm3, %v627_v1, %v1087_v9  ;;  %vm992_vm4 = vcmp.ge.f32.partialorder %v648_v5, 0.0  ;;  %v1092_v17 = vmul.f32 0.0, %v648_v5  ;;  %vm990_vm5 = vcmp.ge.f32.partialorder %v640_v6, 0.0 }
  0xf4   :  { %v655_v18 = vpop.f32.mrf.mxu0  ;;  %1690 = vst.msk [vmem:[%s4557_s3 + $0x3c] sm:$0xf] %vm1674_vm2, %v3118_v14  ;;  %v3116_v20 = vpack.c.bf16 %v1187_v16, %v1187_v16  ;;  %v2403_v21 = vsel %vm390_vm0, %v1187_v16, 0.0  ;;  %v2596_v22 = vmul.f32 %v1187_v16, %v1187_v16  ;;  %v1090_v25 = vmul.f32 0.0, %v640_v6 }
  0xf5   :  { %v2404_v23 = vadd.f32 %v2403_v21, %v2402_v4  ;;  %v1192_v24 = vsel %vm992_vm4, %v648_v5, %v1092_v17  ;;  %v651_v26 = vadd.f32 %v3278_v58, %v3651_v52  ;;  %v2710_v28 = vsel %vm390_vm0, %v2597_v12, 0.0 }
  0xf6   :  { %v3282_v27 = vpop.f32.mrf.mxu0  ;;  %1688 = vst.msk [vmem:[%s4557_s3 + $0x34] sm:$0xf] %vm1674_vm2, %v3116_v20  ;;  %v2708_v29 = vsel %vm390_vm0, %v2596_v22, 0.0  ;;  %v3121_v30 = vpack.c.bf16 %v1192_v24, %v1192_v24  ;;  %v2601_v31 = vmul.f32 %v1192_v24, %v1192_v24  ;;  %v2407_v32 = vsel %vm390_vm0, %v1189_v8, 0.0 }
  0xf7   :  { %v2406_v33 = vadd.f32 %v2405_v11, %v2404_v23  ;;  %v2709_v34 = vadd.f32 %v2708_v29, %v2707_v13  ;;  %v1190_v35 = vsel %vm990_vm5, %v640_v6, %v1090_v25  ;;  %v2712_v37 = vsel %vm390_vm0, %v2598_v15, 0.0 }
  0xf8   :  { %v658_v36 = vpop.f32.mrf.mxu0  ;;  %1693 = vst.msk [vmem:[%s4557_s3 + $0x48] sm:$0xf] %vm1674_vm2, %v3121_v30  ;;  %v3119_v38 = vpack.c.bf16 %v1190_v35, %v1190_v35  ;;  %v2599_v39 = vmul.f32 %v1190_v35, %v1190_v35  ;;  %vm993_vm6 = vcmp.ge.f32.partialorder %v651_v26, 0.0  ;;  %v1093_v42 = vmul.f32 0.0, %v651_v26 }
  0xf9   :  { %v2408_v40 = vadd.f32 %v2407_v32, %v2406_v33  ;;  %v2711_v41 = vadd.f32 %v2710_v28, %v2709_v34  ;;  %v643_v43 = vadd.f32 %v3651_v52, %v642_v2  ;;  %v2413_v45 = vsel %vm390_vm0, %v1192_v24, 0.0  ;;  %v3809_v24 = vpop.f32.mrf.mxu1 }
  0xfa   :  { %v3285_v44 = vpop.f32.mrf.mxu0  ;;  %v2718_v46 = vsel %vm390_vm0, %v2601_v31, 0.0  ;;  %1691 = vst.msk [vmem:[%s4557_s3 + $0x40] sm:$0xf] %vm1674_vm2, %v3119_v38  ;;  %v664_v47 = vadd.f32 %v3281_v10, %v3651_v52  ;;  %v656_v48 = vadd.f32 %v3651_v52, %v655_v18  ;;  %v2409_v50 = vsel %vm390_vm0, %v1190_v35, 0.0 }
  0xfb   :  { %v2713_v49 = vadd.f32 %v2712_v37, %v2711_v41  ;;  %v1193_v51 = vsel %vm993_vm6, %v651_v26, %v1093_v42  ;;  %vm991_vm7 = vcmp.ge.f32.partialorder %v643_v43, 0.0  ;;  %v2410_v54 = vadd.f32 %v2409_v50, %v2408_v40  ;;  %v3826_v41 = vpop.f32.mrf.mxu1 }
  0xfc   :  { %v671_v53 = vpop.f32.mrf.mxu0  ;;  %v3122_v55 = vpack.c.bf16 %v1193_v51, %v1193_v51  ;;  %v1091_v56 = vmul.f32 0.0, %v643_v43  ;;  %v667_v57 = vadd.f32 %v3282_v27, %v3651_v52  ;;  %v2714_v58 = vsel %vm390_vm0, %v2599_v39, 0.0 }
  0xfd   :  { %v2602_v59 = vmul.f32 %v1193_v51, %v1193_v51  ;;  %vm996_vm8 = vcmp.ge.f32.partialorder %v664_v47, 0.0  ;;  %v1096_v60 = vmul.f32 0.0, %v664_v47  ;;  %v2715_v62 = vadd.f32 %v2714_v58, %v2713_v49 }
  0xfe   :  { %v3286_v61 = vpop.f32.mrf.mxu0  ;;  %1694 = vst.msk [vmem:[%s4557_s3 + $0x4c] sm:$0xf] %vm1674_vm2, %v3122_v55  ;;  %v1191_v63 = vsel %vm991_vm7, %v643_v43, %v1091_v56  ;;  %vm994_vm9 = vcmp.ge.f32.partialorder %v656_v48, 0.0  ;;  %v1094_v0 = vmul.f32 0.0, %v656_v48  ;;  %v2415_v6 = vsel %vm390_vm0, %v1193_v51, 0.0 }
  0xff   :  { %v3120_v1 = vpack.c.bf16 %v1191_v63, %v1191_v63  ;;  %v2411_v2 = vsel %vm390_vm0, %v1191_v63, 0.0  ;;  %v2600_v3 = vmul.f32 %v1191_v63, %v1191_v63  ;;  %v1196_v4 = vsel %vm996_vm8, %v664_v47, %v1096_v60  ;;  %v3840_v60 = vpop.f32.mrf.mxu1 }
 0x100   :  { %v3792_v5 = vpop.f32.mrf.mxu0  ;;  %v2412_v7 = vadd.f32 %v2411_v2, %v2410_v54  ;;  %v3125_v8 = vpack.c.bf16 %v1196_v4, %v1196_v4  ;;  %vm997_vm10 = vcmp.ge.f32.partialorder %v667_v57, 0.0  ;;  %v1194_v10 = vsel %vm994_vm9, %v656_v48, %v1094_v0 }
 0x101   :  { %1692 = vst.msk [vmem:[%s4557_s3 + $0x44] sm:$0xf] %vm1674_vm2, %v3120_v1  ;;  %v2716_v9 = vsel %vm390_vm0, %v2600_v3, 0.0  ;;  %v1097_v11 = vmul.f32 0.0, %v667_v57  ;;  %v659_v12 = vadd.f32 %v3651_v52, %v658_v36  ;;  %v2720_v14 = vsel %vm390_vm0, %v2602_v59, 0.0 }
 0x102   :  { %v3801_v13 = vpop.f32.mrf.mxu0  ;;  %v2414_v15 = vadd.f32 %v2413_v45, %v2412_v7  ;;  %v2717_v16 = vadd.f32 %v2716_v9, %v2715_v62  ;;  %1697 = vst.msk [vmem:[%s4557_s3 + $0x58] sm:$0xf] %vm1674_vm2, %v3125_v8  ;;  %v3123_v17 = vpack.c.bf16 %v1194_v10, %v1194_v10  ;;  %v2421_v18 = vsel %vm390_vm0, %v1196_v4, 0.0 }
 0x103   :  { %v2605_v20 = vmul.f32 %v1196_v4, %v1196_v4  ;;  %v2603_v21 = vmul.f32 %v1194_v10, %v1194_v10  ;;  %v1197_v22 = vsel %vm997_vm10, %v667_v57, %v1097_v11  ;;  %vm995_vm11 = vcmp.ge.f32.partialorder %v659_v12, 0.0 }
 0x104   :  { %v687_v23 = vpop.f32.mrf.mxu0  ;;  %v2416_v25 = vadd.f32 %v2415_v6, %v2414_v15  ;;  %v2719_v26 = vadd.f32 %v2718_v46, %v2717_v16  ;;  %1695 = vst.msk [vmem:[%s4557_s3 + $0x50] sm:$0xf] %vm1674_vm2, %v3123_v17  ;;  %v3126_v27 = vpack.c.bf16 %v1197_v22, %v1197_v22  ;;  %v2417_v28 = vsel %vm390_vm0, %v1194_v10, 0.0 }
 0x105   :  { %v2722_v29 = vsel %vm390_vm0, %v2603_v21, 0.0  ;;  %v1095_v30 = vmul.f32 0.0, %v659_v12  ;;  %v680_v31 = vadd.f32 %v3285_v44, %v3651_v52  ;;  %v2606_v35 = vmul.f32 %v1197_v22, %v1197_v22 }
 0x106   :  { %v3290_v32 = vpop.f32.mrf.mxu0  ;;  %v2721_v33 = vadd.f32 %v2720_v14, %v2719_v26  ;;  %v2418_v34 = vadd.f32 %v2417_v28, %v2416_v25  ;;  %1698 = vst.msk [vmem:[%s4557_s3 + $0x5c] sm:$0xf] %vm1674_vm2, %v3126_v27  ;;  %v672_v36 = vadd.f32 %v3651_v52, %v671_v53  ;;  %v683_v39 = vadd.f32 %v3286_v61, %v3651_v52  ;;  %v3863_v14 = vpop.f32.mrf.mxu1 }
 0x107   :  { %v1195_v37 = vsel %vm995_vm11, %v659_v12, %v1095_v30  ;;  %vm1000_vm12 = vcmp.ge.f32.partialorder %v680_v31, 0.0  ;;  %v1100_v38 = vmul.f32 0.0, %v680_v31  ;;  %v2726_v50 = vsel %vm390_vm0, %v2605_v20, 0.0 }
 0x108   :  { %v3824_v40 = vpop.f32.mrf.mxu0  ;;  %v2723_v42 = vadd.f32 %v2722_v29, %v2721_v33  ;;  %v3124_v43 = vpack.c.bf16 %v1195_v37, %v1195_v37  ;;  %v2419_v44 = vsel %vm390_vm0, %v1195_v37, 0.0  ;;  %v2604_v45 = vmul.f32 %v1195_v37, %v1195_v37 }
 0x109   :  { %v2420_v46 = vadd.f32 %v2419_v44, %v2418_v34  ;;  %v1200_v47 = vsel %vm1000_vm12, %v680_v31, %v1100_v38  ;;  %vm998_vm13 = vcmp.ge.f32.partialorder %v672_v36, 0.0  ;;  %v1098_v48 = vmul.f32 0.0, %v672_v36 }
 0x10a   :  { %v3829_v49 = vpop.f32.mrf.mxu0  ;;  %1696 = vst.msk [vmem:[%s4557_s3 + $0x54] sm:$0xf] %vm1674_vm2, %v3124_v43  ;;  %v2724_v51 = vsel %vm390_vm0, %v2604_v45, 0.0  ;;  %v3129_v53 = vpack.c.bf16 %v1200_v47, %v1200_v47  ;;  %v2609_v54 = vmul.f32 %v1200_v47, %v1200_v47  ;;  %v2423_v55 = vsel %vm390_vm0, %v1197_v22, 0.0 }
 0x10b   :  { %v2422_v56 = vadd.f32 %v2421_v18, %v2420_v46  ;;  %v2725_v57 = vadd.f32 %v2724_v51, %v2723_v42  ;;  %v1198_v58 = vsel %vm998_vm13, %v672_v36, %v1098_v48  ;;  %v2728_v61 = vsel %vm390_vm0, %v2606_v35, 0.0 }
 0x10c   :  { %v3838_v59 = vpop.f32.mrf.mxu0  ;;  %1701 = vst.msk [vmem:[%s4557_s3 + $0x68] sm:$0xf] %vm1674_vm2, %v3129_v53  ;;  %v3127_v62 = vpack.c.bf16 %v1198_v58, %v1198_v58  ;;  %v2607_v63 = vmul.f32 %v1198_v58, %v1198_v58  ;;  %vm1001_vm14 = vcmp.ge.f32.partialorder %v683_v39, 0.0  ;;  %v1101_v2 = vmul.f32 0.0, %v683_v39 }
 0x10d   :  { %v2424_v0 = vadd.f32 %v2423_v55, %v2422_v56  ;;  %v2727_v1 = vadd.f32 %v2726_v50, %v2725_v57  ;;  %v675_v3 = vadd.f32 %v3651_v52, %v3792_v5  ;;  %v2429_v6 = vsel %vm390_vm0, %v1200_v47, 0.0 }
 0x10e   :  { %v3849_v4 = vpop.f32.mrf.mxu0  ;;  %v2734_v7 = vsel %vm390_vm0, %v2609_v54, 0.0  ;;  %1699 = vst.msk [vmem:[%s4557_s3 + $0x60] sm:$0xf] %vm1674_vm2, %v3127_v62  ;;  %v696_v8 = vadd.f32 %v3801_v13, %v3651_v52  ;;  %v688_v9 = vadd.f32 %v3651_v52, %v687_v23  ;;  %v2425_v11 = vsel %vm390_vm0, %v1198_v58, 0.0 }
 0x10f   :  { %v2729_v10 = vadd.f32 %v2728_v61, %v2727_v1  ;;  %v1201_v5 = vsel %vm1001_vm14, %v683_v39, %v1101_v2  ;;  %vm999_vm15 = vcmp.ge.f32.partialorder %v675_v3, 0.0  ;;  %v2426_v15 = vadd.f32 %v2425_v11, %v2424_v0 }
 0x110   :  { %v3861_v12 = vpop.f32.mrf.mxu0  ;;  %v3130_v16 = vpack.c.bf16 %v1201_v5, %v1201_v5  ;;  %v1099_v17 = vmul.f32 0.0, %v675_v3  ;;  %v699_v18 = vadd.f32 %v3290_v32, %v3651_v52  ;;  %v2730_v20 = vsel %vm390_vm0, %v2607_v63, 0.0  ;;  %v3876_v32 = vpop.f32.mrf.mxu1 }
 0x111   :  { %v2610_v21 = vmul.f32 %v1201_v5, %v1201_v5  ;;  %vm1004_vm1 = vcmp.ge.f32.partialorder %v696_v8, 0.0  ;;  %v1104_v13 = vmul.f32 0.0, %v696_v8  ;;  %v2731_v23 = vadd.f32 %v2730_v20, %v2729_v10 }
 0x112   :  { %v3867_v22 = vpop.f32.mrf.mxu0  ;;  %1702 = vst.msk [vmem:[%s4557_s3 + $0x6c] sm:$0xf] %vm1674_vm2, %v3130_v16  ;;  %v1199_v25 = vsel %vm999_vm15, %v675_v3, %v1099_v17  ;;  %vm1002_vm3 = vcmp.ge.f32.partialorder %v688_v9, 0.0  ;;  %v1102_v26 = vmul.f32 0.0, %v688_v9  ;;  %v2431_v33 = vsel %vm390_vm0, %v1201_v5, 0.0 }
 0x113   :  { %v3128_v27 = vpack.c.bf16 %v1199_v25, %v1199_v25  ;;  %v2427_v28 = vsel %vm390_vm0, %v1199_v25, 0.0  ;;  %v2608_v29 = vmul.f32 %v1199_v25, %v1199_v25  ;;  %v1204_v30 = vsel %vm1004_vm1, %v696_v8, %v1104_v13 }
 0x114   :  { %v3874_v31 = vpop.f32.mrf.mxu0  ;;  %v2428_v34 = vadd.f32 %v2427_v28, %v2426_v15  ;;  %v3133_v35 = vpack.c.bf16 %v1204_v30, %v1204_v30  ;;  %vm1005_vm4 = vcmp.ge.f32.partialorder %v699_v18, 0.0  ;;  %v1202_v37 = vsel %vm1002_vm3, %v688_v9, %v1102_v26 }
 0x115   :  { %1700 = vst.msk [vmem:[%s4557_s3 + $0x64] sm:$0xf] %vm1674_vm2, %v3128_v27  ;;  %v2732_v36 = vsel %vm390_vm0, %v2608_v29, 0.0  ;;  %v1105_v38 = vmul.f32 0.0, %v699_v18  ;;  %v691_v39 = vadd.f32 %v3651_v52, %v3824_v40  ;;  %v2736_v43 = vsel %vm390_vm0, %v2610_v21, 0.0  ;;  %v3896_v40 = vpop.f32.mrf.mxu1 }
 0x116   :  { %v3886_v42 = vpop.f32.mrf.mxu0  ;;  %v2430_v44 = vadd.f32 %v2429_v6, %v2428_v34  ;;  %v2733_v45 = vadd.f32 %v2732_v36, %v2731_v23  ;;  %1705 = vst.msk [vmem:[%s4557_s3 + $0x78] sm:$0xf] %vm1674_vm2, %v3133_v35  ;;  %v3131_v46 = vpack.c.bf16 %v1202_v37, %v1202_v37  ;;  %v2437_v47 = vsel %vm390_vm0, %v1204_v30, 0.0 }
 0x117   :  { %v2613_v48 = vmul.f32 %v1204_v30, %v1204_v30  ;;  %v2611_v50 = vmul.f32 %v1202_v37, %v1202_v37  ;;  %v1205_v51 = vsel %vm1005_vm4, %v699_v18, %v1105_v38  ;;  %vm1003_vm5 = vcmp.ge.f32.partialorder %v691_v39, 0.0 }
 0x118   :  { %v3894_v53 = vpop.f32.mrf.mxu0  ;;  %v2432_v54 = vadd.f32 %v2431_v33, %v2430_v44  ;;  %v2735_v55 = vadd.f32 %v2734_v7, %v2733_v45  ;;  %1703 = vst.msk [vmem:[%s4557_s3 + $0x70] sm:$0xf] %vm1674_vm2, %v3131_v46  ;;  %v3134_v56 = vpack.c.bf16 %v1205_v51, %v1205_v51  ;;  %v2433_v57 = vsel %vm390_vm0, %v1202_v37, 0.0 }
 0x119   :  { %v2738_v58 = vsel %vm390_vm0, %v2611_v50, 0.0  ;;  %v1103_v61 = vmul.f32 0.0, %v691_v39  ;;  %v712_v62 = vadd.f32 %v3829_v49, %v3651_v52  ;;  %v2614_v1 = vmul.f32 %v1205_v51, %v1205_v51  ;;  %v3916_v49 = vpop.f32.mrf.mxu1 }
 0x11a   :  { %v2737_v63 = vadd.f32 %v2736_v43, %v2735_v55  ;;  %v2434_v0 = vadd.f32 %v2433_v57, %v2432_v54  ;;  %1706 = vst.msk [vmem:[%s4557_s3 + $0x7c] sm:$0xf] %vm1674_vm2, %v3134_v56  ;;  %v704_v2 = vadd.f32 %v3651_v52, %v3838_v59  ;;  %v715_v7 = vadd.f32 %v3849_v4, %v3651_v52  ;;  %v3914_v8 = vpop.f32.mrf.mxu0 }
 0x11b   :  { %v1203_v3 = vsel %vm1003_vm5, %v691_v39, %v1103_v61  ;;  %vm1008_vm6 = vcmp.ge.f32.partialorder %v712_v62, 0.0  ;;  %v1108_v6 = vmul.f32 0.0, %v712_v62  ;;  %v2742_v59 = vsel %vm390_vm0, %v2613_v48, 0.0  ;;  %v3928_v27 = vpop.f32.mrf.mxu1 }
 0x11c   :  { %v2739_v9 = vadd.f32 %v2738_v58, %v2737_v63  ;;  %v3132_v10 = vpack.c.bf16 %v1203_v3, %v1203_v3  ;;  %v2435_v11 = vsel %vm390_vm0, %v1203_v3, 0.0  ;;  %v2612_v5 = vmul.f32 %v1203_v3, %v1203_v3  ;;  %v3926_v26 = vpop.f32.mrf.mxu0 }
 0x11d   :  { %v2436_v15 = vadd.f32 %v2435_v11, %v2434_v0  ;;  %v1208_v16 = vsel %vm1008_vm6, %v712_v62, %v1108_v6  ;;  %vm1006_vm7 = vcmp.ge.f32.partialorder %v704_v2, 0.0  ;;  %v1106_v17 = vmul.f32 0.0, %v704_v2 }
 0x11e   :  { %1704 = vst.msk [vmem:[%s4557_s3 + $0x74] sm:$0xf] %vm1674_vm2, %v3132_v10  ;;  %v2740_v4 = vsel %vm390_vm0, %v2612_v5, 0.0  ;;  %v3137_v18 = vpack.c.bf16 %v1208_v16, %v1208_v16  ;;  %v2617_v20 = vmul.f32 %v1208_v16, %v1208_v16  ;;  %v2439_v21 = vsel %vm390_vm0, %v1205_v51, 0.0 }
 0x11f   :  { %v2438_v13 = vadd.f32 %v2437_v47, %v2436_v15  ;;  %v2741_v23 = vadd.f32 %v2740_v4, %v2739_v9  ;;  %v1206_v25 = vsel %vm1006_vm7, %v704_v2, %v1106_v17  ;;  %v2744_v28 = vsel %vm390_vm0, %v2614_v1, 0.0  ;;  %v3948_v47 = vpop.f32.mrf.mxu1 }
 0x120   :  { %1709 = vst.msk [vmem:[%s4557_s3 + $0x88] sm:$0xf] %vm1674_vm2, %v3137_v18  ;;  %v3135_v29 = vpack.c.bf16 %v1206_v25, %v1206_v25  ;;  %v2615_v30 = vmul.f32 %v1206_v25, %v1206_v25  ;;  %vm1009_vm8 = vcmp.ge.f32.partialorder %v715_v7, 0.0  ;;  %v1109_v35 = vmul.f32 0.0, %v715_v7 }
 0x121   :  { %v2440_v33 = vadd.f32 %v2439_v21, %v2438_v13  ;;  %v2743_v34 = vadd.f32 %v2742_v59, %v2741_v23  ;;  %v707_v36 = vadd.f32 %v3651_v52, %v3861_v12  ;;  %v2445_v37 = vsel %vm390_vm0, %v1208_v16, 0.0  ;;  %v3302_v12 = vpop.f32.mrf.mxu0  ;;  %v3960_v1 = vpop.f32.mrf.mxu1 }
 0x122   :  { %v2750_v38 = vsel %vm390_vm0, %v2617_v20, 0.0  ;;  %1707 = vst.msk [vmem:[%s4557_s3 + $0x80] sm:$0xf] %vm1674_vm2, %v3135_v29  ;;  %v728_v39 = vadd.f32 %v3867_v22, %v3651_v52  ;;  %v720_v43 = vadd.f32 %v3651_v52, %v3874_v31  ;;  %v2441_v45 = vsel %vm390_vm0, %v1206_v25, 0.0 }
 0x123   :  { %v2745_v44 = vadd.f32 %v2744_v28, %v2743_v34  ;;  %v1209_v46 = vsel %vm1009_vm8, %v715_v7, %v1109_v35  ;;  %vm1007_vm9 = vcmp.ge.f32.partialorder %v707_v36, 0.0  ;;  %v2442_v48 = vadd.f32 %v2441_v45, %v2440_v33  ;;  %v3976_v13 = vpop.f32.mrf.mxu1 }
 0x124   :  { %v3138_v50 = vpack.c.bf16 %v1209_v46, %v1209_v46  ;;  %v1107_v51 = vmul.f32 0.0, %v707_v36  ;;  %v731_v54 = vadd.f32 %v3886_v42, %v3651_v52  ;;  %v2746_v55 = vsel %vm390_vm0, %v2615_v30, 0.0  ;;  %v3958_v42 = vpop.f32.mrf.mxu0 }
 0x125   :  { %v2618_v22 = vmul.f32 %v1209_v46, %v1209_v46  ;;  %vm1012_vm10 = vcmp.ge.f32.partialorder %v728_v39, 0.0  ;;  %v1112_v56 = vmul.f32 0.0, %v728_v39  ;;  %v2747_v31 = vadd.f32 %v2746_v55, %v2745_v44  ;;  %v3993_v45 = vpop.f32.mrf.mxu1 }
 0x126   :  { %1710 = vst.msk [vmem:[%s4557_s3 + $0x8c] sm:$0xf] %vm1674_vm2, %v3138_v50  ;;  %v1207_v57 = vsel %vm1007_vm9, %v707_v36, %v1107_v51  ;;  %vm1010_vm11 = vcmp.ge.f32.partialorder %v720_v43, 0.0  ;;  %v1110_v58 = vmul.f32 0.0, %v720_v43  ;;  %v2447_v2 = vsel %vm390_vm0, %v1209_v46, 0.0  ;;  %v3305_v21 = vpop.f32.mrf.mxu0 }
 0x127   :  { %v3136_v61 = vpack.c.bf16 %v1207_v57, %v1207_v57  ;;  %v2443_v62 = vsel %vm390_vm0, %v1207_v57, 0.0  ;;  %v2616_v63 = vmul.f32 %v1207_v57, %v1207_v57  ;;  %v1212_v0 = vsel %vm1012_vm10, %v728_v39, %v1112_v56 }
 0x128   :  { %v2444_v3 = vadd.f32 %v2443_v62, %v2442_v48  ;;  %v3141_v6 = vpack.c.bf16 %v1212_v0, %v1212_v0  ;;  %vm1013_vm12 = vcmp.ge.f32.partialorder %v731_v54, 0.0  ;;  %v1210_v9 = vsel %vm1010_vm11, %v720_v43, %v1110_v58  ;;  %v751_v44 = vpop.f32.mrf.mxu0  ;;  %v4003_v62 = vpop.f32.mrf.mxu1 }
 0x129   :  { %1708 = vst.msk [vmem:[%s4557_s3 + $0x84] sm:$0xf] %vm1674_vm2, %v3136_v61  ;;  %v2748_v7 = vsel %vm390_vm0, %v2616_v63, 0.0  ;;  %v1113_v10 = vmul.f32 0.0, %v731_v54  ;;  %v723_v11 = vadd.f32 %v3651_v52, %v3894_v53  ;;  %v2752_v5 = vsel %vm390_vm0, %v2618_v22, 0.0 }
 0x12a   :  { %v2446_v15 = vadd.f32 %v2445_v37, %v2444_v3  ;;  %v2749_v16 = vadd.f32 %v2748_v7, %v2747_v31  ;;  %1713 = vst.msk [vmem:[%s4557_s3 + $0x98] sm:$0xf] %vm1674_vm2, %v3141_v6  ;;  %v3139_v17 = vpack.c.bf16 %v1210_v9, %v1210_v9  ;;  %v2453_v59 = vsel %vm390_vm0, %v1212_v0, 0.0  ;;  %v3306_v61 = vpop.f32.mrf.mxu0 }
 0x12b   :  { %v2621_v4 = vmul.f32 %v1212_v0, %v1212_v0  ;;  %v2619_v18 = vmul.f32 %v1210_v9, %v1210_v9  ;;  %v1213_v20 = vsel %vm1013_vm12, %v731_v54, %v1113_v10  ;;  %vm1011_vm13 = vcmp.ge.f32.partialorder %v723_v11, 0.0 }
 0x12c   :  { %v2751_v23 = vadd.f32 %v2750_v38, %v2749_v16  ;;  %1711 = vst.msk [vmem:[%s4557_s3 + $0x90] sm:$0xf] %vm1674_vm2, %v3139_v17  ;;  %v2448_v53 = vadd.f32 %v2447_v2, %v2446_v15  ;;  %v3142_v25 = vpack.c.bf16 %v1213_v20, %v1213_v20  ;;  %v2449_v28 = vsel %vm390_vm0, %v1210_v9, 0.0  ;;  %v4013_v9 = vld [vmem:[%s4556_s2] ss:$0 sm:$0xff] }
 0x12d   :  { %v2754_v29 = vsel %vm390_vm0, %v2619_v18, 0.0  ;;  %v1111_v30 = vmul.f32 0.0, %v723_v11  ;;  %v744_v33 = vadd.f32 %v3914_v8, %v3651_v52  ;;  %v2622_v36 = vmul.f32 %v1213_v20, %v1213_v20  ;;  %v754_v18 = vpop.f32.mrf.mxu0 }
 0x12e   :  { %v2450_v34 = vadd.f32 %v2449_v28, %v2448_v53  ;;  %v2753_v35 = vadd.f32 %v2752_v5, %v2751_v23  ;;  %1714 = vst.msk [vmem:[%s4557_s3 + $0x9c] sm:$0xf] %vm1674_vm2, %v3142_v25  ;;  %v736_v37 = vadd.f32 %v3651_v52, %v3926_v26  ;;  %v747_v43 = vadd.f32 %v3302_v12, %v3651_v52 }
 0x12f   :  { %v1211_v38 = vsel %vm1011_vm13, %v723_v11, %v1111_v30  ;;  %vm1016_vm14 = vcmp.ge.f32.partialorder %v744_v33, 0.0  ;;  %v1116_v39 = vmul.f32 0.0, %v744_v33  ;;  %v2758_v22 = vsel %vm390_vm0, %v2621_v4, 0.0 }
 0x130   :  { %v2755_v8 = vadd.f32 %v2754_v29, %v2753_v35  ;;  %v3140_v46 = vpack.c.bf16 %v1211_v38, %v1211_v38  ;;  %v2451_v48 = vsel %vm390_vm0, %v1211_v38, 0.0  ;;  %v2620_v50 = vmul.f32 %v1211_v38, %v1211_v38 }
 0x131   :  { %v2452_v51 = vadd.f32 %v2451_v48, %v2450_v34  ;;  %v1216_v54 = vsel %vm1016_vm14, %v744_v33, %v1116_v39  ;;  %vm1014_vm15 = vcmp.ge.f32.partialorder %v736_v37, 0.0  ;;  %v1114_v55 = vmul.f32 0.0, %v736_v37  ;;  %v3309_v39 = vpop.f32.mrf.mxu0 }
 0x132   :  { %1712 = vst.msk [vmem:[%s4557_s3 + $0x94] sm:$0xf] %vm1674_vm2, %v3140_v46  ;;  %v2756_v52 = vsel %vm390_vm0, %v2620_v50, 0.0  ;;  %v3145_v26 = vpack.c.bf16 %v1216_v54, %v1216_v54  ;;  %v2625_v12 = vmul.f32 %v1216_v54, %v1216_v54  ;;  %v2455_v56 = vsel %vm390_vm0, %v1213_v20, 0.0 }
 0x133   :  { %v2454_v31 = vadd.f32 %v2453_v59, %v2452_v51  ;;  %v2757_v57 = vadd.f32 %v2756_v52, %v2755_v8  ;;  %v1214_v58 = vsel %vm1014_vm15, %v736_v37, %v1114_v55  ;;  %v2760_v63 = vsel %vm390_vm0, %v2622_v36, 0.0 }
 0x134   :  { %1717 = vst.msk [vmem:[%s4557_s3 + $0xa8] sm:$0xf] %vm1674_vm2, %v3145_v26  ;;  %v3143_v0 = vpack.c.bf16 %v1214_v58, %v1214_v58  ;;  %v2623_v2 = vmul.f32 %v1214_v58, %v1214_v58  ;;  %vm1017_vm1 = vcmp.ge.f32.partialorder %v747_v43, 0.0  ;;  %v1117_v7 = vmul.f32 0.0, %v747_v43 }
 0x135   :  { %v2759_v3 = vadd.f32 %v2758_v22, %v2757_v57  ;;  %v2456_v6 = vadd.f32 %v2455_v56, %v2454_v31  ;;  %v739_v10 = vadd.f32 %v4013_v9, %v3958_v42  ;;  %v2461_v11 = vsel %vm390_vm0, %v1216_v54, 0.0  ;;  %v4026_v42 = vpop.f32.mrf.mxu1 }
 0x136   :  { %v2766_v5 = vsel %vm390_vm0, %v2625_v12, 0.0  ;;  %1715 = vst.msk [vmem:[%s4557_s3 + $0xa0] sm:$0xf] %vm1674_vm2, %v3143_v0  ;;  %v760_v15 = vadd.f32 %v4013_v9, %v3305_v21  ;;  %v752_v16 = vadd.f32 %v4013_v9, %v751_v44  ;;  %v2457_v17 = vsel %vm390_vm0, %v1214_v58, 0.0  ;;  %v767_v58 = vpop.f32.mrf.mxu0 }
 0x137   :  { %v2761_v59 = vadd.f32 %v2760_v63, %v2759_v3  ;;  %v1217_v4 = vsel %vm1017_vm1, %v747_v43, %v1117_v7  ;;  %vm1015_vm3 = vcmp.ge.f32.partialorder %v739_v10, 0.0  ;;  %v2458_v20 = vadd.f32 %v2457_v17, %v2456_v6  ;;  %v4036_v43 = vpop.f32.mrf.mxu1 }
 0x138   :  { %v3146_v23 = vpack.c.bf16 %v1217_v4, %v1217_v4  ;;  %v1115_v53 = vmul.f32 0.0, %v739_v10  ;;  %v763_v25 = vadd.f32 %v4013_v9, %v3306_v61  ;;  %v2762_v28 = vsel %vm390_vm0, %v2623_v2, 0.0 }
 0x139   :  { %v2626_v29 = vmul.f32 %v1217_v4, %v1217_v4  ;;  %vm1020_vm4 = vcmp.ge.f32.partialorder %v760_v15, 0.0  ;;  %v1120_v21 = vmul.f32 0.0, %v760_v15  ;;  %v2763_v30 = vadd.f32 %v2762_v28, %v2761_v59  ;;  %v4051_v61 = vpop.f32.mrf.mxu1 }
 0x13a   :  { %1718 = vst.msk [vmem:[%s4557_s3 + $0xac] sm:$0xf] %vm1674_vm2, %v3146_v23  ;;  %v1215_v33 = vsel %vm1015_vm3, %v739_v10, %v1115_v53  ;;  %vm1018_vm5 = vcmp.ge.f32.partialorder %v752_v16, 0.0  ;;  %v1118_v34 = vmul.f32 0.0, %v752_v16  ;;  %vm1028_vm6 = vcmp.ge.f32.partialorder %v3718_v19, 0.0 }
 0x13b   :  { %v3144_v35 = vpack.c.bf16 %v1215_v33, %v1215_v33  ;;  %v2459_v36 = vsel %vm390_vm0, %v1215_v33, 0.0  ;;  %v2624_v37 = vmul.f32 %v1215_v33, %v1215_v33  ;;  %v1220_v38 = vsel %vm1020_vm4, %v760_v15, %v1120_v21 }
 0x13c   :  { %v2463_v44 = vsel %vm390_vm0, %v1217_v4, 0.0  ;;  %v2460_v8 = vadd.f32 %v2459_v36, %v2458_v20  ;;  %v3149_v46 = vpack.c.bf16 %v1220_v38, %v1220_v38  ;;  %vm1021_vm7 = vcmp.ge.f32.partialorder %v763_v25, 0.0  ;;  %v3310_v36 = vpop.f32.mrf.mxu0 }
 0x13d   :  { %1716 = vst.msk [vmem:[%s4557_s3 + $0xa4] sm:$0xf] %vm1674_vm2, %v3144_v35  ;;  %v2764_v48 = vsel %vm390_vm0, %v2624_v37, 0.0  ;;  %v1218_v50 = vsel %vm1018_vm5, %v752_v16, %v1118_v34  ;;  %v1121_v51 = vmul.f32 0.0, %v763_v25  ;;  %v755_v54 = vadd.f32 %v4013_v9, %v754_v18  ;;  %v4066_v18 = vpop.f32.mrf.mxu1 }
 0x13e   :  { %v2768_v55 = vsel %vm390_vm0, %v2626_v29, 0.0  ;;  %v2462_v22 = vadd.f32 %v2461_v11, %v2460_v8  ;;  %v2765_v52 = vadd.f32 %v2764_v48, %v2763_v30  ;;  %1721 = vst.msk [vmem:[%s4557_s3 + $0xb8] sm:$0xf] %vm1674_vm2, %v3149_v46  ;;  %v3147_v26 = vpack.c.bf16 %v1218_v50, %v1218_v50 }
 0x13f   :  { %v2469_v12 = vsel %vm390_vm0, %v1220_v38, 0.0  ;;  %v2629_v56 = vmul.f32 %v1220_v38, %v1220_v38  ;;  %v2627_v31 = vmul.f32 %v1218_v50, %v1218_v50  ;;  %v1221_v57 = vsel %vm1021_vm7, %v763_v25, %v1121_v51  ;;  %v4079_v8 = vpop.f32.mrf.mxu1 }
 0x140   :  { %v2767_v63 = vadd.f32 %v2766_v5, %v2765_v52  ;;  %1719 = vst.msk [vmem:[%s4557_s3 + $0xb0] sm:$0xf] %vm1674_vm2, %v3147_v26  ;;  %v2464_v0 = vadd.f32 %v2463_v44, %v2462_v22  ;;  %v3150_v2 = vpack.c.bf16 %v1221_v57, %v1221_v57  ;;  %vm1019_vm8 = vcmp.ge.f32.partialorder %v755_v54, 0.0 }
 0x141   :  { %v2465_v3 = vsel %vm390_vm0, %v1218_v50, 0.0  ;;  %v2770_v6 = vsel %vm390_vm0, %v2627_v31, 0.0  ;;  %v1119_v7 = vmul.f32 0.0, %v755_v54  ;;  %v776_v10 = vadd.f32 %v4013_v9, %v3309_v39 }
 0x142   :  { %v2466_v11 = vadd.f32 %v2465_v3, %v2464_v0  ;;  %v2769_v15 = vadd.f32 %v2768_v55, %v2767_v63  ;;  %1722 = vst.msk [vmem:[%s4557_s3 + $0xbc] sm:$0xf] %vm1674_vm2, %v3150_v2  ;;  %v1128_v5 = vmul.f32 0.0, %v3718_v19  ;;  %v768_v16 = vadd.f32 %v4013_v9, %v767_v58  ;;  %v4105_v58 = vpop.f32.mrf.mxu1 }
 0x143   :  { %v2630_v17 = vmul.f32 %v1221_v57, %v1221_v57  ;;  %v1219_v59 = vsel %vm1019_vm8, %v755_v54, %v1119_v7  ;;  %vm1024_vm9 = vcmp.ge.f32.partialorder %v776_v10, 0.0  ;;  %v1124_v4 = vmul.f32 0.0, %v776_v10 }
 0x144   :  { %v2771_v20 = vadd.f32 %v2770_v6, %v2769_v15  ;;  %v3148_v23 = vpack.c.bf16 %v1219_v59, %v1219_v59  ;;  %v2467_v53 = vsel %vm390_vm0, %v1219_v59, 0.0  ;;  %v2628_v25 = vmul.f32 %v1219_v59, %v1219_v59 }
 0x145   :  { %v2774_v28 = vsel %vm390_vm0, %v2629_v56, 0.0  ;;  %v2468_v29 = vadd.f32 %v2467_v53, %v2466_v11  ;;  %v1224_v21 = vsel %vm1024_vm9, %v776_v10, %v1124_v4  ;;  %v1228_v30 = vsel %vm1028_vm6, %v3718_v19, %v1128_v5  ;;  %v770_v10 = vpop.f32.mrf.mxu0 }
 0x146   :  { %v2471_v33 = vsel %vm390_vm0, %v1221_v57, 0.0  ;;  %1720 = vst.msk [vmem:[%s4557_s3 + $0xb4] sm:$0xf] %vm1674_vm2, %v3148_v23  ;;  %v2772_v34 = vsel %vm390_vm0, %v2628_v25, 0.0  ;;  %v3153_v35 = vpack.c.bf16 %v1224_v21, %v1224_v21  ;;  %vm1022_vm10 = vcmp.ge.f32.partialorder %v768_v16, 0.0 }
 0x147   :  { %v2470_v37 = vadd.f32 %v2469_v12, %v2468_v29  ;;  %v2773_v38 = vadd.f32 %v2772_v34, %v2771_v20  ;;  %v2633_v39 = vmul.f32 %v1224_v21, %v1224_v21  ;;  %v3157_v44 = vpack.c.bf16 %v1228_v30, %v1228_v30  ;;  %v4121_v20 = vpop.f32.mrf.mxu1 }
 0x148   :  { %v2776_v19 = vsel %vm390_vm0, %v2630_v17, 0.0  ;;  %1725 = vst.msk [vmem:[%s4557_s3 + $0xc8] sm:$0xf] %vm1674_vm2, %v3153_v35  ;;  %v2637_v46 = vmul.f32 %v1228_v30, %v1228_v30  ;;  %v1122_v48 = vmul.f32 0.0, %v768_v16  ;;  %v784_v50 = vadd.f32 %v4013_v9, %v3809_v24 }
 0x149   :  { %v2775_v51 = vadd.f32 %v2774_v28, %v2773_v38  ;;  %v4089_v54 = vsel %vm390_vm0, %v1224_v21, 0.0  ;;  %1729 = vst.msk [vmem:[%s4557_s3 + $0xd8] sm:$0xf] %vm1674_vm2, %v3157_v44  ;;  %v2472_v55 = vadd.f32 %v2471_v33, %v2470_v37  ;;  %v779_v22 = vadd.f32 %v4013_v9, %v3310_v36  ;;  %v4139_v37 = vpop.f32.mrf.mxu1 }
 0x14a   :  { %v1222_v52 = vsel %vm1022_vm10, %v768_v16, %v1122_v48  ;;  %vm1026_vm11 = vcmp.ge.f32.partialorder %v784_v50, 0.0  ;;  %v1126_v26 = vmul.f32 0.0, %v784_v50  ;;  %v795_v12 = vadd.f32 %v4013_v9, %v3826_v41 }
 0x14b   :  { %v4100_v24 = vsel %vm390_vm0, %v2633_v39, 0.0  ;;  %v4103_v56 = vsel %vm390_vm0, %v1228_v30, 0.0  ;;  %v3151_v31 = vpack.c.bf16 %v1222_v52, %v1222_v52  ;;  %v2631_v57 = vmul.f32 %v1222_v52, %v1222_v52 }
 0x14c   :  { %v4108_v63 = vsel %vm390_vm0, %v2637_v46, 0.0  ;;  %v1226_v0 = vsel %vm1026_vm11, %v784_v50, %v1126_v26  ;;  %vm1025_vm12 = vcmp.ge.f32.partialorder %v779_v22, 0.0  ;;  %v1125_v2 = vmul.f32 0.0, %v779_v22 }
 0x14d   :  { %1723 = vst.msk [vmem:[%s4557_s3 + $0xc0] sm:$0xf] %vm1674_vm2, %v3151_v31  ;;  %v2473_v41 = vsel %vm390_vm0, %v1222_v52, 0.0  ;;  %v2777_v3 = vadd.f32 %v2776_v19, %v2775_v51  ;;  %v3155_v6 = vpack.c.bf16 %v1226_v0, %v1226_v0  ;;  %v2635_v7 = vmul.f32 %v1226_v0, %v1226_v0 }
 0x14e   :  { %v2474_v11 = vadd.f32 %v2473_v41, %v2472_v55  ;;  %v1225_v15 = vsel %vm1025_vm12, %v779_v22, %v1125_v2  ;;  %vm1029_vm13 = vcmp.ge.f32.partialorder %v795_v12, 0.0  ;;  %v1129_v5 = vmul.f32 0.0, %v795_v12 }
 0x14f   :  { %v2778_v16 = vsel %vm390_vm0, %v2631_v57, 0.0  ;;  %1727 = vst.msk [vmem:[%s4557_s3 + $0xd0] sm:$0xf] %vm1674_vm2, %v3155_v6  ;;  %v2481_v17 = vsel %vm390_vm0, %v1226_v0, 0.0  ;;  %v3154_v59 = vpack.c.bf16 %v1225_v15, %v1225_v15  ;;  %v2634_v4 = vmul.f32 %v1225_v15, %v1225_v15  ;;  %v4162_v57 = vpop.f32.mrf.mxu1 }
 0x150   :  { %v1229_v23 = vsel %vm1029_vm13, %v795_v12, %v1129_v5  ;;  %v771_v53 = vadd.f32 %v4013_v9, %v770_v10  ;;  %v787_v25 = vadd.f32 %v4013_v9, %v3840_v60  ;;  %v808_v28 = vadd.f32 %v4013_v9, %v3863_v14 }
 0x151   :  { %v2779_v29 = vadd.f32 %v2778_v16, %v2777_v3  ;;  %v2786_v21 = vsel %vm390_vm0, %v2635_v7, 0.0  ;;  %1726 = vst.msk [vmem:[%s4557_s3 + $0xcc] sm:$0xf] %vm1674_vm2, %v3154_v59  ;;  %v2479_v30 = vsel %vm390_vm0, %v1225_v15, 0.0  ;;  %v3158_v33 = vpack.c.bf16 %v1229_v23, %v1229_v23  ;;  %v4175_v59 = vpop.f32.mrf.mxu1 }
 0x152   :  { %vm1023_vm14 = vcmp.ge.f32.partialorder %v771_v53, 0.0  ;;  %v1123_v34 = vmul.f32 0.0, %v771_v53  ;;  %vm1027_vm15 = vcmp.ge.f32.partialorder %v787_v25, 0.0  ;;  %v1127_v35 = vmul.f32 0.0, %v787_v25 }
 0x153   :  { %v2784_v60 = vsel %vm390_vm0, %v2634_v4, 0.0  ;;  %1730 = vst.msk [vmem:[%s4557_s3 + $0xdc] sm:$0xf] %vm1674_vm2, %v3158_v33  ;;  %v2638_v14 = vmul.f32 %v1229_v23, %v1229_v23  ;;  %vm1032_vm1 = vcmp.ge.f32.partialorder %v808_v28, 0.0  ;;  %v1132_v36 = vmul.f32 0.0, %v808_v28 }
 0x154   :  { %v1223_v38 = vsel %vm1023_vm14, %v771_v53, %v1123_v34  ;;  %v1227_v39 = vsel %vm1027_vm15, %v787_v25, %v1127_v35  ;;  %v800_v44 = vadd.f32 %v4013_v9, %v3876_v32  ;;  %v811_v19 = vadd.f32 %v4013_v9, %v3896_v40 }
 0x155   :  { %v3152_v46 = vpack.c.bf16 %v1223_v38, %v1223_v38  ;;  %v2475_v48 = vsel %vm390_vm0, %v1223_v38, 0.0  ;;  %v2632_v50 = vmul.f32 %v1223_v38, %v1223_v38  ;;  %v3156_v51 = vpack.c.bf16 %v1227_v39, %v1227_v39 }
 0x156   :  { %v2487_v55 = vsel %vm390_vm0, %v1229_v23, 0.0  ;;  %v2476_v22 = vadd.f32 %v2475_v48, %v2474_v11  ;;  %v1232_v52 = vsel %vm1032_vm1, %v808_v28, %v1132_v36  ;;  %v803_v26 = vadd.f32 %v4013_v9, %v3916_v49 }
 0x157   :  { %v4150_v12 = vsel %vm390_vm0, %v2638_v14, 0.0  ;;  %1724 = vst.msk [vmem:[%s4557_s3 + $0xc4] sm:$0xf] %vm1674_vm2, %v3152_v46  ;;  %v2780_v32 = vsel %vm390_vm0, %v2632_v50, 0.0  ;;  %1728 = vst.msk [vmem:[%s4557_s3 + $0xd4] sm:$0xf] %vm1674_vm2, %v3156_v51  ;;  %v3161_v31 = vpack.c.bf16 %v1232_v52, %v1232_v52  ;;  %v2636_v2 = vmul.f32 %v1227_v39, %v1227_v39 }
 0x158   :  { %v2483_v40 = vsel %vm390_vm0, %v1227_v39, 0.0  ;;  %v2478_v49 = vadd.f32 %v4089_v54, %v2476_v22  ;;  %v2781_v0 = vadd.f32 %v2780_v32, %v2779_v29  ;;  %vm1030_vm3 = vcmp.ge.f32.partialorder %v800_v44, 0.0 }
 0x159   :  { %1733 = vst.msk [vmem:[%s4557_s3 + $0xe8] sm:$0xf] %vm1674_vm2, %v3161_v31  ;;  %v2641_v41 = vmul.f32 %v1232_v52, %v1232_v52  ;;  %v1130_v3 = vmul.f32 0.0, %v800_v44  ;;  %vm1033_vm4 = vcmp.ge.f32.partialorder %v811_v19, 0.0  ;;  %v1133_v6 = vmul.f32 0.0, %v811_v19 }
 0x15a   :  { %v2783_v7 = vadd.f32 %v4100_v24, %v2781_v0  ;;  %v2480_v10 = vadd.f32 %v2479_v30, %v2478_v49  ;;  %v4171_v11 = vsel %vm390_vm0, %v1232_v52, 0.0  ;;  %v1131_v15 = vmul.f32 0.0, %v803_v26 }
 0x15b   :  { %v1230_v54 = vsel %vm1030_vm3, %v800_v44, %v1130_v3  ;;  %v1233_v5 = vsel %vm1033_vm4, %v811_v19, %v1133_v6  ;;  %vm1031_vm5 = vcmp.ge.f32.partialorder %v803_v26, 0.0  ;;  %v824_v16 = vadd.f32 %v4013_v9, %v3928_v27 }
 0x15c   :  { %v2482_v4 = vadd.f32 %v2481_v17, %v2480_v10  ;;  %v2785_v23 = vadd.f32 %v2784_v60, %v2783_v7  ;;  %v2788_v53 = vsel %vm390_vm0, %v2636_v2, 0.0  ;;  %v3159_v25 = vpack.c.bf16 %v1230_v54, %v1230_v54 }
 0x15d   :  { %v2798_v24 = vsel %vm390_vm0, %v2641_v41, 0.0  ;;  %v2639_v28 = vmul.f32 %v1230_v54, %v1230_v54  ;;  %v3162_v29 = vpack.c.bf16 %v1233_v5, %v1233_v5  ;;  %v816_v30 = vadd.f32 %v4013_v9, %v3948_v47  ;;  %v4191_v47 = vpop.f32.mrf.mxu1 }
 0x15e   :  { %v2484_v33 = vadd.f32 %v2483_v40, %v2482_v4  ;;  %v2787_v34 = vadd.f32 %v2786_v21, %v2785_v23  ;;  %1731 = vst.msk [vmem:[%s4557_s3 + $0xe0] sm:$0xf] %vm1674_vm2, %v3159_v25  ;;  %v2489_v27 = vsel %vm390_vm0, %v1230_v54, 0.0  ;;  %v1231_v17 = vsel %vm1031_vm5, %v803_v26, %v1131_v15 }
 0x15f   :  { %1734 = vst.msk [vmem:[%s4557_s3 + $0xec] sm:$0xf] %vm1674_vm2, %v3162_v29  ;;  %v2495_v35 = vsel %vm390_vm0, %v1233_v5, 0.0  ;;  %v2642_v60 = vmul.f32 %v1233_v5, %v1233_v5  ;;  %v3160_v14 = vpack.c.bf16 %v1231_v17, %v1231_v17  ;;  %vm1036_vm6 = vcmp.ge.f32.partialorder %v824_v16, 0.0  ;;  %v4206_v40 = vpop.f32.mrf.mxu1 }
 0x160   :  { %v2486_v21 = vadd.f32 %v4103_v56, %v2484_v33  ;;  %v2789_v36 = vadd.f32 %v2788_v53, %v2787_v34  ;;  %v2640_v38 = vmul.f32 %v1231_v17, %v1231_v17  ;;  %v1136_v39 = vmul.f32 0.0, %v824_v16 }
 0x161   :  { %v2794_v44 = vsel %vm390_vm0, %v2639_v28, 0.0  ;;  %1732 = vst.msk [vmem:[%s4557_s3 + $0xe4] sm:$0xf] %vm1674_vm2, %v3160_v14  ;;  %vm1034_vm7 = vcmp.ge.f32.partialorder %v816_v30, 0.0  ;;  %v1134_v19 = vmul.f32 0.0, %v816_v30  ;;  %v827_v46 = vadd.f32 %v4013_v9, %v3960_v1  ;;  %v4222_v15 = vpop.f32.mrf.mxu1 }
 0x162   :  { %v2791_v48 = vadd.f32 %v4108_v63, %v2789_v36  ;;  %v2488_v50 = vadd.f32 %v2487_v55, %v2486_v21  ;;  %v1236_v51 = vsel %vm1036_vm6, %v824_v16, %v1136_v39  ;;  %v819_v56 = vadd.f32 %v4013_v9, %v3976_v13 }
 0x163   :  { %v2800_v22 = vsel %vm390_vm0, %v2642_v60, 0.0  ;;  %v2491_v52 = vsel %vm390_vm0, %v1231_v17, 0.0  ;;  %v3165_v26 = vpack.c.bf16 %v1236_v51, %v1236_v51  ;;  %v1234_v32 = vsel %vm1034_vm7, %v816_v30, %v1134_v19 }
 0x164   :  { %v2490_v31 = vadd.f32 %v2489_v27, %v2488_v50  ;;  %v2793_v49 = vadd.f32 %v4150_v12, %v2791_v48  ;;  %v2796_v1 = vsel %vm390_vm0, %v2640_v38, 0.0  ;;  %v3163_v0 = vpack.c.bf16 %v1234_v32, %v1234_v32  ;;  %v4234_v27 = vpop.f32.mrf.mxu1 }
 0x165   :  { %1737 = vst.msk [vmem:[%s4557_s3 + $0xf8] sm:$0xf] %vm1674_vm2, %v3165_v26  ;;  %v2501_v13 = vsel %vm390_vm0, %v1236_v51, 0.0  ;;  %v2645_v63 = vmul.f32 %v1236_v51, %v1236_v51  ;;  %vm1037_vm8 = vcmp.ge.f32.partialorder %v827_v46, 0.0  ;;  %v1137_v55 = vmul.f32 0.0, %v827_v46 }
 0x166   :  { %v2795_v2 = vadd.f32 %v2794_v44, %v2793_v49  ;;  %v2492_v41 = vadd.f32 %v2491_v52, %v2490_v31  ;;  %1735 = vst.msk [vmem:[%s4557_s3 + $0xf0] sm:$0xf] %vm1674_vm2, %v3163_v0  ;;  %vm1035_vm9 = vcmp.ge.f32.partialorder %v819_v56, 0.0  ;;  %v1135_v12 = vmul.f32 0.0, %v819_v56  ;;  %v4251_v51 = vpop.f32.mrf.mxu1 }
 0x167   :  { %v2497_v3 = vsel %vm390_vm0, %v1234_v32, 0.0  ;;  %v2643_v6 = vmul.f32 %v1234_v32, %v1234_v32  ;;  %v1237_v7 = vsel %vm1037_vm8, %v827_v46, %v1137_v55  ;;  %v840_v10 = vadd.f32 %v4013_v9, %v3993_v45 }
 0x168   :  { %v2494_v54 = vadd.f32 %v4171_v11, %v2492_v41  ;;  %v2797_v5 = vadd.f32 %v2796_v1, %v2795_v2  ;;  %v3166_v16 = vpack.c.bf16 %v1237_v7, %v1237_v7  ;;  %v832_v4 = vadd.f32 %v4013_v9, %v4003_v62  ;;  %v4263_v2 = vpop.f32.mrf.mxu1 }
 0x169   :  { %v2646_v23 = vmul.f32 %v1237_v7, %v1237_v7  ;;  %v1235_v53 = vsel %vm1035_vm9, %v819_v56, %v1135_v12  ;;  %vm1040_vm10 = vcmp.ge.f32.partialorder %v840_v10, 0.0  ;;  %v1140_v25 = vmul.f32 0.0, %v840_v10 }
 0x16a   :  { %v2799_v28 = vadd.f32 %v2798_v24, %v2797_v5  ;;  %v2806_v29 = vsel %vm390_vm0, %v2645_v63, 0.0  ;;  %v2496_v30 = vadd.f32 %v2495_v35, %v2494_v54  ;;  %1738 = vst.msk [vmem:[%s4557_s3 + $0xfc] sm:$0xf] %vm1674_vm2, %v3166_v16  ;;  %v3164_v45 = vpack.c.bf16 %v1235_v53, %v1235_v53 }
 0x16b   :  { %v2802_v11 = vsel %vm390_vm0, %v2643_v6, 0.0  ;;  %v2503_v33 = vsel %vm390_vm0, %v1237_v7, 0.0  ;;  %v2644_v34 = vmul.f32 %v1235_v53, %v1235_v53  ;;  %v1240_v62 = vsel %vm1040_vm10, %v840_v10, %v1140_v25 }
 0x16c   :  { %v2498_v17 = vadd.f32 %v2497_v3, %v2496_v30  ;;  %v2801_v60 = vadd.f32 %v2800_v22, %v2799_v28  ;;  %1736 = vst.msk [vmem:[%s4557_s3 + $0xf4] sm:$0xf] %vm1674_vm2, %v3164_v45  ;;  %v3169_v24 = vpack.c.bf16 %v1240_v62, %v1240_v62  ;;  %vm1038_vm11 = vcmp.ge.f32.partialorder %v832_v4, 0.0 }
 0x16d   :  { %v2808_v35 = vsel %vm390_vm0, %v2646_v23, 0.0  ;;  %v2499_v14 = vsel %vm390_vm0, %v1235_v53, 0.0  ;;  %v1138_v21 = vmul.f32 0.0, %v832_v4  ;;  %v843_v36 = vadd.f32 %v4013_v9, %v4026_v42 }
 0x16e   :  { %v2803_v38 = vadd.f32 %v2802_v11, %v2801_v60  ;;  %v2500_v39 = vadd.f32 %v2499_v14, %v2498_v17  ;;  %v2804_v44 = vsel %vm390_vm0, %v2644_v34, 0.0  ;;  %1741 = vst.msk [vmem:[%s4557_s3 + $0x108] sm:$0xf] %vm1674_vm2, %v3169_v24  ;;  %v835_v19 = vadd.f32 %v4013_v9, %v4036_v43 }
 0x16f   :  { %v2649_v46 = vmul.f32 %v1240_v62, %v1240_v62  ;;  %v1238_v48 = vsel %vm1038_vm11, %v832_v4, %v1138_v21  ;;  %vm1041_vm12 = vcmp.ge.f32.partialorder %v843_v36, 0.0  ;;  %v1141_v50 = vmul.f32 0.0, %v843_v36 }
 0x170   :  { %v2502_v56 = vadd.f32 %v2501_v13, %v2500_v39  ;;  %v2805_v42 = vadd.f32 %v2804_v44, %v2803_v38  ;;  %v3167_v22 = vpack.c.bf16 %v1238_v48, %v1238_v48  ;;  %v856_v52 = vadd.f32 %v4013_v9, %v4051_v61 }
 0x171   :  { %v2647_v26 = vmul.f32 %v1238_v48, %v1238_v48  ;;  %v1241_v32 = vsel %vm1041_vm12, %v843_v36, %v1141_v50  ;;  %vm1039_vm13 = vcmp.ge.f32.partialorder %v835_v19, 0.0  ;;  %v1139_v31 = vmul.f32 0.0, %v835_v19 }
 0x172   :  { %v2807_v49 = vadd.f32 %v2806_v29, %v2805_v42  ;;  %v2509_v1 = vsel %vm390_vm0, %v1240_v62, 0.0  ;;  %1739 = vst.msk [vmem:[%s4557_s3 + $0x100] sm:$0xf] %vm1674_vm2, %v3167_v22  ;;  %v2504_v43 = vadd.f32 %v2503_v33, %v2502_v56  ;;  %v3170_v0 = vpack.c.bf16 %v1241_v32, %v1241_v32  ;;  %v4279_v29 = vpop.f32.mrf.mxu1 }
 0x173   :  { %v2814_v13 = vsel %vm390_vm0, %v2649_v46, 0.0  ;;  %v2505_v63 = vsel %vm390_vm0, %v1238_v48, 0.0  ;;  %v2810_v61 = vsel %vm390_vm0, %v2647_v26, 0.0  ;;  %v1239_v55 = vsel %vm1039_vm13, %v835_v19, %v1139_v31 }
 0x174   :  { %v2506_v41 = vadd.f32 %v2505_v63, %v2504_v43  ;;  %v2809_v12 = vadd.f32 %v2808_v35, %v2807_v49  ;;  %1742 = vst.msk [vmem:[%s4557_s3 + $0x10c] sm:$0xf] %vm1674_vm2, %v3170_v0  ;;  %v3168_v3 = vpack.c.bf16 %v1239_v55, %v1239_v55  ;;  %vm1044_vm14 = vcmp.ge.f32.partialorder %v856_v52, 0.0  ;;  %v4289_v21 = vpop.f32.mrf.mxu1 }
 0x175   :  { %v2507_v6 = vsel %vm390_vm0, %v1239_v55, 0.0  ;;  %v2648_v7 = vmul.f32 %v1239_v55, %v1239_v55  ;;  %v1144_v10 = vmul.f32 0.0, %v856_v52  ;;  %v848_v54 = vadd.f32 %v4013_v9, %v4066_v18 }
 0x176   :  { %v2811_v5 = vadd.f32 %v2810_v61, %v2809_v12  ;;  %v2650_v16 = vmul.f32 %v1241_v32, %v1241_v32  ;;  %1740 = vst.msk [vmem:[%s4557_s3 + $0x104] sm:$0xf] %vm1674_vm2, %v3168_v3  ;;  %v2508_v4 = vadd.f32 %v2507_v6, %v2506_v41  ;;  %v859_v23 = vadd.f32 %v4013_v9, %v4079_v8 }
 0x177   :  { %v2812_v53 = vsel %vm390_vm0, %v2648_v7, 0.0  ;;  %v1244_v25 = vsel %vm1044_vm14, %v856_v52, %v1144_v10  ;;  %vm1042_vm15 = vcmp.ge.f32.partialorder %v848_v54, 0.0  ;;  %v1142_v28 = vmul.f32 0.0, %v848_v54 }
 0x178   :  { %v2510_v30 = vadd.f32 %v2509_v1, %v2508_v4  ;;  %v2813_v18 = vadd.f32 %v2812_v53, %v2811_v5  ;;  %v3173_v45 = vpack.c.bf16 %v1244_v25, %v1244_v25  ;;  %v851_v11 = vadd.f32 %v4013_v9, %v4105_v58 }
 0x179   :  { %v2511_v33 = vsel %vm390_vm0, %v1241_v32, 0.0  ;;  %v1242_v34 = vsel %vm1042_vm15, %v848_v54, %v1142_v28  ;;  %vm1045_vm1 = vcmp.ge.f32.partialorder %v859_v23, 0.0  ;;  %v1145_v62 = vmul.f32 0.0, %v859_v23  ;;  %v4308_v32 = vpop.f32.mrf.mxu1 }
 0x17a   :  { %v2815_v17 = vadd.f32 %v2814_v13, %v2813_v18  ;;  %1745 = vst.msk [vmem:[%s4557_s3 + $0x118] sm:$0xf] %vm1674_vm2, %v3173_v45  ;;  %v3171_v8 = vpack.c.bf16 %v1242_v34, %v1242_v34  ;;  %v2512_v60 = vadd.f32 %v2511_v33, %v2510_v30  ;;  %v2816_v24 = vsel %vm390_vm0, %v2650_v16, 0.0 }
 0x17b   :  { %v2651_v35 = vmul.f32 %v1242_v34, %v1242_v34  ;;  %v1245_v14 = vsel %vm1045_vm1, %v859_v23, %v1145_v62  ;;  %v2513_v58 = vsel %vm390_vm0, %v1242_v34, 0.0  ;;  %vm1043_vm3 = vcmp.ge.f32.partialorder %v851_v11, 0.0  ;;  %v4318_v3 = vpop.f32.mrf.mxu1 }
 0x17c   :  { %1743 = vst.msk [vmem:[%s4557_s3 + $0x110] sm:$0xf] %vm1674_vm2, %v3171_v8  ;;  %v2817_v36 = vadd.f32 %v2816_v24, %v2815_v17  ;;  %v3174_v38 = vpack.c.bf16 %v1245_v14, %v1245_v14  ;;  %v2517_v39 = vsel %vm390_vm0, %v1244_v25, 0.0  ;;  %v2514_v44 = vadd.f32 %v2513_v58, %v2512_v60 }
 0x17d   :  { %v1143_v19 = vmul.f32 0.0, %v851_v11  ;;  %v872_v46 = vadd.f32 %v4013_v9, %v4121_v20  ;;  %v2653_v48 = vmul.f32 %v1244_v25, %v1244_v25  ;;  %v2818_v50 = vsel %vm390_vm0, %v2651_v35, 0.0 }
 0x17e   :  { %1746 = vst.msk [vmem:[%s4557_s3 + $0x11c] sm:$0xf] %vm1674_vm2, %v3174_v38  ;;  %v864_v56 = vadd.f32 %v4013_v9, %v4139_v37  ;;  %v875_v42 = vadd.f32 %v4013_v9, %v4162_v57  ;;  %v2819_v22 = vadd.f32 %v2818_v50, %v2817_v36  ;;  %v2654_v1 = vmul.f32 %v1245_v14, %v1245_v14 }
 0x17f   :  { %v1243_v52 = vsel %vm1043_vm3, %v851_v11, %v1143_v19  ;;  %vm1048_vm4 = vcmp.ge.f32.partialorder %v872_v46, 0.0  ;;  %v1148_v26 = vmul.f32 0.0, %v872_v46  ;;  %v867_v63 = vadd.f32 %v4013_v9, %v4175_v59  ;;  %v4335_v11 = vpop.f32.mrf.mxu1 }
 0x180   :  { %v3172_v20 = vpack.c.bf16 %v1243_v52, %v1243_v52  ;;  %v2515_v31 = vsel %vm390_vm0, %v1243_v52, 0.0  ;;  %v2652_v49 = vmul.f32 %v1243_v52, %v1243_v52  ;;  %vm1046_vm5 = vcmp.ge.f32.partialorder %v864_v56, 0.0 }
 0x181   :  { %v2516_v43 = vadd.f32 %v2515_v31, %v2514_v44  ;;  %v1248_v0 = vsel %vm1048_vm4, %v872_v46, %v1148_v26  ;;  %v1146_v13 = vmul.f32 0.0, %v864_v56  ;;  %vm1049_vm6 = vcmp.ge.f32.partialorder %v875_v42, 0.0  ;;  %v4347_v44 = vpop.f32.mrf.mxu1 }
 0x182   :  { %1744 = vst.msk [vmem:[%s4557_s3 + $0x114] sm:$0xf] %vm1674_vm2, %v3172_v20  ;;  %v2820_v37 = vsel %vm390_vm0, %v2652_v49, 0.0  ;;  %v3177_v57 = vpack.c.bf16 %v1248_v0, %v1248_v0  ;;  %v1149_v12 = vmul.f32 0.0, %v875_v42  ;;  %v2822_v6 = vsel %vm390_vm0, %v2653_v48, 0.0 }
 0x183   :  { %v2518_v61 = vadd.f32 %v2517_v39, %v2516_v43  ;;  %v2821_v55 = vadd.f32 %v2820_v37, %v2819_v22  ;;  %v1246_v41 = vsel %vm1046_vm5, %v864_v56, %v1146_v13  ;;  %v2519_v7 = vsel %vm390_vm0, %v1245_v14, 0.0 }
 0x184   :  { %1749 = vst.msk [vmem:[%s4557_s3 + $0x128] sm:$0xf] %vm1674_vm2, %v3177_v57  ;;  %v3175_v10 = vpack.c.bf16 %v1246_v41, %v1246_v41  ;;  %v2655_v54 = vmul.f32 %v1246_v41, %v1246_v41  ;;  %v2824_v5 = vsel %vm390_vm0, %v2654_v1, 0.0  ;;  %v1249_v4 = vsel %vm1049_vm6, %v875_v42, %v1149_v12  ;;  %v4363_v1 = vpop.f32.mrf.mxu1 }
 0x185   :  { %v2823_v59 = vadd.f32 %v2822_v6, %v2821_v55  ;;  %v2520_v16 = vadd.f32 %v2519_v7, %v2518_v61  ;;  %v2525_v23 = vsel %vm390_vm0, %v1248_v0, 0.0  ;;  %v2521_v53 = vsel %vm390_vm0, %v1246_v41, 0.0 }
 0x186   :  { %1747 = vst.msk [vmem:[%s4557_s3 + $0x120] sm:$0xf] %vm1674_vm2, %v3175_v10  ;;  %v3178_v25 = vpack.c.bf16 %v1249_v4, %v1249_v4  ;;  %vm1047_vm7 = vcmp.ge.f32.partialorder %v867_v63, 0.0  ;;  %v1147_v18 = vmul.f32 0.0, %v867_v63  ;;  %v888_v45 = vadd.f32 %v4013_v9, %v4191_v47 }
 0x187   :  { %v2522_v28 = vadd.f32 %v2521_v53, %v2520_v16  ;;  %v2825_v30 = vadd.f32 %v2824_v5, %v2823_v59  ;;  %v2657_v33 = vmul.f32 %v1248_v0, %v1248_v0  ;;  %v2826_v34 = vsel %vm390_vm0, %v2655_v54, 0.0  ;;  %v4382_v5 = vpop.f32.mrf.mxu1 }
 0x188   :  { %1750 = vst.msk [vmem:[%s4557_s3 + $0x12c] sm:$0xf] %vm1674_vm2, %v3178_v25  ;;  %v880_v62 = vadd.f32 %v4013_v9, %v4206_v40  ;;  %v891_v17 = vadd.f32 %v4013_v9, %v4222_v15  ;;  %v1247_v60 = vsel %vm1047_vm7, %v867_v63, %v1147_v18  ;;  %vm1052_vm8 = vcmp.ge.f32.partialorder %v888_v45, 0.0 }
 0x189   :  { %v2827_v8 = vadd.f32 %v2826_v34, %v2825_v30  ;;  %v1152_v47 = vmul.f32 0.0, %v888_v45  ;;  %v3176_v24 = vpack.c.bf16 %v1247_v60, %v1247_v60  ;;  %v2523_v35 = vsel %vm390_vm0, %v1247_v60, 0.0  ;;  %v4392_v34 = vpop.f32.mrf.mxu1 }
 0x18a   :  { %v2656_v14 = vmul.f32 %v1247_v60, %v1247_v60  ;;  %vm1050_vm9 = vcmp.ge.f32.partialorder %v880_v62, 0.0  ;;  %v2658_v58 = vmul.f32 %v1249_v4, %v1249_v4  ;;  %v2524_v36 = vadd.f32 %v2523_v35, %v2522_v28 }
 0x18b   :  { %v1252_v38 = vsel %vm1052_vm8, %v888_v45, %v1152_v47  ;;  %v1150_v39 = vmul.f32 0.0, %v880_v62  ;;  %1748 = vst.msk [vmem:[%s4557_s3 + $0x124] sm:$0xf] %vm1674_vm2, %v3176_v24  ;;  %vm1053_vm10 = vcmp.ge.f32.partialorder %v891_v17, 0.0  ;;  %v883_v19 = vadd.f32 %v4013_v9, %v4234_v27 }
 0x18c   :  { %v2828_v40 = vsel %vm390_vm0, %v2656_v14, 0.0  ;;  %v3181_v15 = vpack.c.bf16 %v1252_v38, %v1252_v38  ;;  %v2526_v46 = vadd.f32 %v2525_v23, %v2524_v36  ;;  %v1153_v56 = vmul.f32 0.0, %v891_v17 }
 0x18d   :  { %v2829_v48 = vadd.f32 %v2828_v40, %v2827_v8  ;;  %v1250_v50 = vsel %vm1050_vm9, %v880_v62, %v1150_v39  ;;  %v2830_v42 = vsel %vm390_vm0, %v2657_v33, 0.0  ;;  %v2527_v22 = vsel %vm390_vm0, %v1249_v4, 0.0 }
 0x18e   :  { %1753 = vst.msk [vmem:[%s4557_s3 + $0x138] sm:$0xf] %vm1674_vm2, %v3181_v15  ;;  %v3179_v52 = vpack.c.bf16 %v1250_v50, %v1250_v50  ;;  %v2659_v26 = vmul.f32 %v1250_v50, %v1250_v50  ;;  %v2832_v20 = vsel %vm390_vm0, %v2658_v58, 0.0  ;;  %v2528_v49 = vadd.f32 %v2527_v22, %v2526_v46 }
 0x18f   :  { %v2831_v31 = vadd.f32 %v2830_v42, %v2829_v48  ;;  %v1253_v27 = vsel %vm1053_vm10, %v891_v17, %v1153_v56  ;;  %v2533_v43 = vsel %vm390_vm0, %v1252_v38, 0.0  ;;  %v2529_v0 = vsel %vm390_vm0, %v1250_v50, 0.0 }
 0x190   :  { %1751 = vst.msk [vmem:[%s4557_s3 + $0x130] sm:$0xf] %vm1674_vm2, %v3179_v52  ;;  %v3182_v13 = vpack.c.bf16 %v1253_v27, %v1253_v27  ;;  %vm1051_vm11 = vcmp.ge.f32.partialorder %v883_v19, 0.0  ;;  %v2530_v37 = vadd.f32 %v2529_v0, %v2528_v49  ;;  %v1151_v63 = vmul.f32 0.0, %v883_v19 }
 0x191   :  { %v2833_v57 = vadd.f32 %v2832_v20, %v2831_v31  ;;  %v904_v61 = vadd.f32 %v4013_v9, %v4251_v51  ;;  %v2661_v55 = vmul.f32 %v1252_v38, %v1252_v38  ;;  %v2834_v41 = vsel %vm390_vm0, %v2659_v26, 0.0 }
 0x192   :  { %1754 = vst.msk [vmem:[%s4557_s3 + $0x13c] sm:$0xf] %vm1674_vm2, %v3182_v13  ;;  %v896_v12 = vadd.f32 %v4013_v9, %v4263_v2  ;;  %v907_v6 = vadd.f32 %v4013_v9, %v4279_v29  ;;  %v1251_v10 = vsel %vm1051_vm11, %v883_v19, %v1151_v63  ;;  %v2662_v4 = vmul.f32 %v1253_v27, %v1253_v27  ;;  %v4409_v19 = vpop.f32.mrf.mxu1 }
 0x193   :  { %v2835_v7 = vadd.f32 %v2834_v41, %v2833_v57  ;;  %vm1056_vm12 = vcmp.ge.f32.partialorder %v904_v61, 0.0  ;;  %v1156_v54 = vmul.f32 0.0, %v904_v61  ;;  %v3180_v51 = vpack.c.bf16 %v1251_v10, %v1251_v10 }
 0x194   :  { %v2531_v59 = vsel %vm390_vm0, %v1251_v10, 0.0  ;;  %v2660_v16 = vmul.f32 %v1251_v10, %v1251_v10  ;;  %vm1054_vm13 = vcmp.ge.f32.partialorder %v896_v12, 0.0  ;;  %v1154_v25 = vmul.f32 0.0, %v896_v12  ;;  %v4421_v0 = vpop.f32.mrf.mxu1 }
 0x195   :  { %v2532_v23 = vadd.f32 %v2531_v59, %v2530_v37  ;;  %v1256_v53 = vsel %vm1056_vm12, %v904_v61, %v1156_v54  ;;  %1752 = vst.msk [vmem:[%s4557_s3 + $0x134] sm:$0xf] %vm1674_vm2, %v3180_v51  ;;  %vm1057_vm14 = vcmp.ge.f32.partialorder %v907_v6, 0.0  ;;  %v899_v28 = vadd.f32 %v4013_v9, %v4289_v21 }
 0x196   :  { %v2836_v2 = vsel %vm390_vm0, %v2660_v16, 0.0  ;;  %v3185_v29 = vpack.c.bf16 %v1256_v53, %v1256_v53  ;;  %v1254_v45 = vsel %vm1054_vm13, %v896_v12, %v1154_v25  ;;  %v1157_v33 = vmul.f32 0.0, %v907_v6  ;;  %v4446_v25 = vld [vmem:[%s4556_s2] ss:$0 sm:$0xff] }
 0x197   :  { %v2534_v30 = vadd.f32 %v2533_v43, %v2532_v23  ;;  %v2837_v18 = vadd.f32 %v2836_v2, %v2835_v7  ;;  %v2838_v62 = vsel %vm390_vm0, %v2661_v55, 0.0  ;;  %v2535_v17 = vsel %vm390_vm0, %v1253_v27, 0.0 }
 0x198   :  { %1757 = vst.msk [vmem:[%s4557_s3 + $0x148] sm:$0xf] %vm1674_vm2, %v3185_v29  ;;  %v3183_v8 = vpack.c.bf16 %v1254_v45, %v1254_v45  ;;  %v2663_v60 = vmul.f32 %v1254_v45, %v1254_v45  ;;  %v2840_v47 = vsel %vm390_vm0, %v2662_v4, 0.0  ;;  %v1257_v35 = vsel %vm1057_vm14, %v907_v6, %v1157_v33 }
 0x199   :  { %v2839_v21 = vadd.f32 %v2838_v62, %v2837_v18  ;;  %v2536_v24 = vadd.f32 %v2535_v17, %v2534_v30  ;;  %v2541_v14 = vsel %vm390_vm0, %v1256_v53, 0.0  ;;  %v2537_v58 = vsel %vm390_vm0, %v1254_v45, 0.0 }
 0x19a   :  { %1755 = vst.msk [vmem:[%s4557_s3 + $0x140] sm:$0xf] %vm1674_vm2, %v3183_v8  ;;  %v3186_v36 = vpack.c.bf16 %v1257_v35, %v1257_v35  ;;  %vm1055_vm15 = vcmp.ge.f32.partialorder %v899_v28, 0.0  ;;  %v1155_v40 = vmul.f32 0.0, %v899_v28  ;;  %v920_v15 = vadd.f32 %v4013_v9, %v4308_v32 }
 0x19b   :  { %v2538_v38 = vadd.f32 %v2537_v58, %v2536_v24  ;;  %v2841_v39 = vadd.f32 %v2840_v47, %v2839_v21  ;;  %v2665_v46 = vmul.f32 %v1256_v53, %v1256_v53  ;;  %v2842_v48 = vsel %vm390_vm0, %v2663_v60, 0.0 }
 0x19c   :  { %1758 = vst.msk [vmem:[%s4557_s3 + $0x14c] sm:$0xf] %vm1674_vm2, %v3186_v36  ;;  %v912_v50 = vadd.f32 %v4013_v9, %v4318_v3  ;;  %v923_v56 = vadd.f32 %v4013_v9, %v4335_v11  ;;  %v1255_v22 = vsel %vm1055_vm15, %v899_v28, %v1155_v40  ;;  %vm1060_vm1 = vcmp.ge.f32.partialorder %v920_v15, 0.0 }
 0x19d   :  { %v2843_v42 = vadd.f32 %v2842_v48, %v2841_v39  ;;  %v1160_v32 = vmul.f32 0.0, %v920_v15  ;;  %v3184_v52 = vpack.c.bf16 %v1255_v22, %v1255_v22  ;;  %v2539_v26 = vsel %vm390_vm0, %v1255_v22, 0.0 }
 0x19e   :  { %v2664_v20 = vmul.f32 %v1255_v22, %v1255_v22  ;;  %vm1058_vm3 = vcmp.ge.f32.partialorder %v912_v50, 0.0  ;;  %v2666_v31 = vmul.f32 %v1257_v35, %v1257_v35  ;;  %v2540_v49 = vadd.f32 %v2539_v26, %v2538_v38 }
 0x19f   :  { %v1260_v27 = vsel %vm1060_vm1, %v920_v15, %v1160_v32  ;;  %v1158_v43 = vmul.f32 0.0, %v912_v50  ;;  %1756 = vst.msk [vmem:[%s4557_s3 + $0x144] sm:$0xf] %vm1674_vm2, %v3184_v52  ;;  %vm1061_vm4 = vcmp.ge.f32.partialorder %v923_v56, 0.0  ;;  %v915_v13 = vadd.f32 %v4013_v9, %v4347_v44  ;;  %v943_v44 = vpop.f32.mrf.mxu1 }
 0x1a0   :  { %v2844_v3 = vsel %vm390_vm0, %v2664_v20, 0.0  ;;  %v3189_v11 = vpack.c.bf16 %v1260_v27, %v1260_v27  ;;  %v2542_v37 = vadd.f32 %v2541_v14, %v2540_v49  ;;  %v1161_v61 = vmul.f32 0.0, %v923_v56 }
 0x1a1   :  { %v2845_v57 = vadd.f32 %v2844_v3, %v2843_v42  ;;  %v1258_v63 = vsel %vm1058_vm3, %v912_v50, %v1158_v43  ;;  %v2846_v55 = vsel %vm390_vm0, %v2665_v46, 0.0  ;;  %v2543_v41 = vsel %vm390_vm0, %v1257_v35, 0.0  ;;  %v3354_v17 = vpop.f32.mrf.mxu1 }
 0x1a2   :  { %1761 = vst.msk [vmem:[%s4557_s3 + $0x158] sm:$0xf] %vm1674_vm2, %v3189_v11  ;;  %v3187_v12 = vpack.c.bf16 %v1258_v63, %v1258_v63  ;;  %v2667_v6 = vmul.f32 %v1258_v63, %v1258_v63  ;;  %v2848_v7 = vsel %vm390_vm0, %v2666_v31, 0.0  ;;  %v2544_v54 = vadd.f32 %v2543_v41, %v2542_v37 }
 0x1a3   :  { %v2847_v10 = vadd.f32 %v2846_v55, %v2845_v57  ;;  %v1261_v9 = vsel %vm1061_vm4, %v923_v56, %v1161_v61  ;;  %v2549_v51 = vsel %vm390_vm0, %v1260_v27, 0.0  ;;  %v2545_v59 = vsel %vm390_vm0, %v1258_v63, 0.0  ;;  %v946_v40 = vpop.f32.mrf.mxu1 }
 0x1a4   :  { %1759 = vst.msk [vmem:[%s4557_s3 + $0x150] sm:$0xf] %vm1674_vm2, %v3187_v12  ;;  %v3190_v16 = vpack.c.bf16 %v1261_v9, %v1261_v9  ;;  %vm1059_vm5 = vcmp.ge.f32.partialorder %v915_v13, 0.0  ;;  %v2546_v4 = vadd.f32 %v2545_v59, %v2544_v54  ;;  %v1159_v53 = vmul.f32 0.0, %v915_v13 }
 0x1a5   :  { %v2849_v23 = vadd.f32 %v2848_v7, %v2847_v10  ;;  %v936_v2 = vadd.f32 %v4446_v25, %v4363_v1  ;;  %v2669_v29 = vmul.f32 %v1260_v27, %v1260_v27  ;;  %v2850_v28 = vsel %vm390_vm0, %v2667_v6, 0.0  ;;  %v3357_v43 = vpop.f32.mrf.mxu1 }
 0x1a6   :  { %1762 = vst.msk [vmem:[%s4557_s3 + $0x15c] sm:$0xf] %vm1674_vm2, %v3190_v16  ;;  %v928_v30 = vadd.f32 %v4446_v25, %v4382_v5  ;;  %v939_v18 = vadd.f32 %v4446_v25, %v4392_v34  ;;  %v1259_v33 = vsel %vm1059_vm5, %v915_v13, %v1159_v53  ;;  %v2670_v47 = vmul.f32 %v1261_v9, %v1261_v9 }
 0x1a7   :  { %v2851_v45 = vadd.f32 %v2850_v28, %v2849_v23  ;;  %vm1064_vm6 = vcmp.ge.f32.partialorder %v936_v2, 0.0  ;;  %v1164_v62 = vmul.f32 0.0, %v936_v2  ;;  %v3188_v1 = vpack.c.bf16 %v1259_v33, %v1259_v33  ;;  %v959_v54 = vpop.f32.mrf.mxu1 }
 0x1a8   :  { %v2547_v8 = vsel %vm390_vm0, %v1259_v33, 0.0  ;;  %v2668_v60 = vmul.f32 %v1259_v33, %v1259_v33  ;;  %vm1062_vm7 = vcmp.ge.f32.partialorder %v928_v30, 0.0  ;;  %v1162_v35 = vmul.f32 0.0, %v928_v30 }
 0x1a9   :  { %v2548_v21 = vadd.f32 %v2547_v8, %v2546_v4  ;;  %v1264_v24 = vsel %vm1064_vm6, %v936_v2, %v1164_v62  ;;  %1760 = vst.msk [vmem:[%s4557_s3 + $0x154] sm:$0xf] %vm1674_vm2, %v3188_v1  ;;  %vm1065_vm8 = vcmp.ge.f32.partialorder %v939_v18, 0.0  ;;  %v931_v14 = vadd.f32 %v4446_v25, %v4409_v19  ;;  %v3358_v62 = vpop.f32.mrf.mxu1 }
 0x1aa   :  { %v2852_v5 = vsel %vm390_vm0, %v2668_v60, 0.0  ;;  %v3193_v34 = vpack.c.bf16 %v1264_v24, %v1264_v24  ;;  %v1262_v38 = vsel %vm1062_vm7, %v928_v30, %v1162_v35  ;;  %v1165_v39 = vmul.f32 0.0, %v939_v18 }
 0x1ab   :  { %v2550_v58 = vadd.f32 %v2549_v51, %v2548_v21  ;;  %v2853_v36 = vadd.f32 %v2852_v5, %v2851_v45  ;;  %v2854_v15 = vsel %vm390_vm0, %v2669_v29, 0.0  ;;  %v2551_v46 = vsel %vm390_vm0, %v1261_v9, 0.0 }
 0x1ac   :  { %1765 = vst.msk [vmem:[%s4557_s3 + $0x168] sm:$0xf] %vm1674_vm2, %v3193_v34  ;;  %v3191_v48 = vpack.c.bf16 %v1262_v38, %v1262_v38  ;;  %v2671_v50 = vmul.f32 %v1262_v38, %v1262_v38  ;;  %v2856_v56 = vsel %vm390_vm0, %v2670_v47, 0.0  ;;  %v1265_v22 = vsel %vm1065_vm8, %v939_v18, %v1165_v39  ;;  %v962_v39 = vpop.f32.mrf.mxu1 }
 0x1ad   :  { %v2855_v42 = vadd.f32 %v2854_v15, %v2853_v36  ;;  %v2552_v19 = vadd.f32 %v2551_v46, %v2550_v58  ;;  %v2557_v32 = vsel %vm390_vm0, %v1264_v24, 0.0  ;;  %v2553_v52 = vsel %vm390_vm0, %v1262_v38, 0.0 }
 0x1ae   :  { %1763 = vst.msk [vmem:[%s4557_s3 + $0x160] sm:$0xf] %vm1674_vm2, %v3191_v48  ;;  %v3194_v26 = vpack.c.bf16 %v1265_v22, %v1265_v22  ;;  %vm1063_vm9 = vcmp.ge.f32.partialorder %v931_v14, 0.0  ;;  %v1163_v49 = vmul.f32 0.0, %v931_v14  ;;  %v952_v27 = vadd.f32 %v4446_v25, %v4421_v0 }
 0x1af   :  { %v2554_v20 = vadd.f32 %v2553_v52, %v2552_v19  ;;  %v2857_v31 = vadd.f32 %v2856_v56, %v2855_v42  ;;  %v2673_v3 = vmul.f32 %v1264_v24, %v1264_v24  ;;  %v2858_v11 = vsel %vm390_vm0, %v2671_v50, 0.0 }
 0x1b0   :  { %1766 = vst.msk [vmem:[%s4557_s3 + $0x16c] sm:$0xf] %vm1674_vm2, %v3194_v26  ;;  %v944_v13 = vadd.f32 %v4446_v25, %v943_v44  ;;  %v955_v37 = vadd.f32 %v4446_v25, %v3354_v17  ;;  %v1263_v63 = vsel %vm1063_vm9, %v931_v14, %v1163_v49  ;;  %vm1068_vm10 = vcmp.ge.f32.partialorder %v952_v27, 0.0 }
 0x1b1   :  { %v2859_v57 = vadd.f32 %v2858_v11, %v2857_v31  ;;  %v1168_v61 = vmul.f32 0.0, %v952_v27  ;;  %v3192_v55 = vpack.c.bf16 %v1263_v63, %v1263_v63  ;;  %v2555_v0 = vsel %vm390_vm0, %v1263_v63, 0.0 }
 0x1b2   :  { %v2672_v41 = vmul.f32 %v1263_v63, %v1263_v63  ;;  %vm1066_vm11 = vcmp.ge.f32.partialorder %v944_v13, 0.0  ;;  %v2674_v12 = vmul.f32 %v1265_v22, %v1265_v22  ;;  %v2556_v6 = vadd.f32 %v2555_v0, %v2554_v20 }
 0x1b3   :  { %v1268_v7 = vsel %vm1068_vm10, %v952_v27, %v1168_v61  ;;  %v1166_v10 = vmul.f32 0.0, %v944_v13  ;;  %1764 = vst.msk [vmem:[%s4557_s3 + $0x164] sm:$0xf] %vm1674_vm2, %v3192_v55  ;;  %vm1069_vm12 = vcmp.ge.f32.partialorder %v955_v37, 0.0  ;;  %v947_v51 = vadd.f32 %v4446_v25, %v946_v40 }
 0x1b4   :  { %v2860_v9 = vsel %vm390_vm0, %v2672_v41, 0.0  ;;  %v3197_v44 = vpack.c.bf16 %v1268_v7, %v1268_v7  ;;  %v2558_v59 = vadd.f32 %v2557_v32, %v2556_v6  ;;  %v1169_v23 = vmul.f32 0.0, %v955_v37 }
 0x1b5   :  { %v2861_v16 = vadd.f32 %v2860_v9, %v2859_v57  ;;  %v1266_v4 = vsel %vm1066_vm11, %v944_v13, %v1166_v10  ;;  %v2862_v53 = vsel %vm390_vm0, %v2673_v3, 0.0  ;;  %v2559_v2 = vsel %vm390_vm0, %v1265_v22, 0.0 }
 0x1b6   :  { %1769 = vst.msk [vmem:[%s4557_s3 + $0x178] sm:$0xf] %vm1674_vm2, %v3197_v44  ;;  %v3195_v29 = vpack.c.bf16 %v1266_v4, %v1266_v4  ;;  %v2675_v28 = vmul.f32 %v1266_v4, %v1266_v4  ;;  %v2864_v30 = vsel %vm390_vm0, %v2674_v12, 0.0  ;;  %v2560_v45 = vadd.f32 %v2559_v2, %v2558_v59 }
 0x1b7   :  { %v2863_v18 = vadd.f32 %v2862_v53, %v2861_v16  ;;  %v1269_v33 = vsel %vm1069_vm12, %v955_v37, %v1169_v23  ;;  %v2565_v17 = vsel %vm390_vm0, %v1268_v7, 0.0  ;;  %v2561_v1 = vsel %vm390_vm0, %v1266_v4, 0.0 }
 0x1b8   :  { %1767 = vst.msk [vmem:[%s4557_s3 + $0x170] sm:$0xf] %vm1674_vm2, %v3195_v29  ;;  %v3198_v8 = vpack.c.bf16 %v1269_v33, %v1269_v33  ;;  %vm1067_vm13 = vcmp.ge.f32.partialorder %v947_v51, 0.0  ;;  %v2562_v60 = vadd.f32 %v2561_v1, %v2560_v45  ;;  %v1167_v21 = vmul.f32 0.0, %v947_v51 }
 0x1b9   :  { %v2865_v47 = vadd.f32 %v2864_v30, %v2863_v18  ;;  %v968_v24 = vadd.f32 %v4446_v25, %v3357_v43  ;;  %v2677_v35 = vmul.f32 %v1268_v7, %v1268_v7  ;;  %v2866_v5 = vsel %vm390_vm0, %v2675_v28, 0.0 }
 0x1ba   :  { %1770 = vst.msk [vmem:[%s4557_s3 + $0x17c] sm:$0xf] %vm1674_vm2, %v3198_v8  ;;  %v960_v34 = vadd.f32 %v4446_v25, %v959_v54  ;;  %v971_v14 = vadd.f32 %v4446_v25, %v3358_v62  ;;  %v1267_v36 = vsel %vm1067_vm13, %v947_v51, %v1167_v21  ;;  %v2678_v48 = vmul.f32 %v1269_v33, %v1269_v33 }
 0x1bb   :  { %v2867_v58 = vadd.f32 %v2866_v5, %v2865_v47  ;;  %vm1072_vm14 = vcmp.ge.f32.partialorder %v968_v24, 0.0  ;;  %v1172_v38 = vmul.f32 0.0, %v968_v24  ;;  %v3196_v40 = vpack.c.bf16 %v1267_v36, %v1267_v36 }
 0x1bc   :  { %v2563_v15 = vsel %vm390_vm0, %v1267_v36, 0.0  ;;  %v2676_v46 = vmul.f32 %v1267_v36, %v1267_v36  ;;  %vm1070_vm15 = vcmp.ge.f32.partialorder %v960_v34, 0.0  ;;  %v1170_v42 = vmul.f32 0.0, %v960_v34 }
 0x1bd   :  { %v2564_v50 = vadd.f32 %v2563_v15, %v2562_v60  ;;  %v1272_v56 = vsel %vm1072_vm14, %v968_v24, %v1172_v38  ;;  %1768 = vst.msk [vmem:[%s4557_s3 + $0x174] sm:$0xf] %vm1674_vm2, %v3196_v40  ;;  %vm1073_vm1 = vcmp.ge.f32.partialorder %v971_v14, 0.0  ;;  %v963_v32 = vadd.f32 %v4446_v25, %v962_v39 }
 0x1be   :  { %v2868_v19 = vsel %vm390_vm0, %v2676_v46, 0.0  ;;  %v3201_v22 = vpack.c.bf16 %v1272_v56, %v1272_v56  ;;  %v1270_v20 = vsel %vm1070_vm15, %v960_v34, %v1170_v42  ;;  %v1173_v31 = vmul.f32 0.0, %v971_v14 }
 0x1bf   :  { %v2566_v52 = vadd.f32 %v2565_v17, %v2564_v50  ;;  %v2869_v26 = vadd.f32 %v2868_v19, %v2867_v58  ;;  %v2870_v49 = vsel %vm390_vm0, %v2677_v35, 0.0  ;;  %v2567_v27 = vsel %vm390_vm0, %v1269_v33, 0.0 }
 0x1c0   :  { %1773 = vst.msk [vmem:[%s4557_s3 + $0x188] sm:$0xf] %vm1674_vm2, %v3201_v22  ;;  %v3199_v43 = vpack.c.bf16 %v1270_v20, %v1270_v20  ;;  %v2679_v3 = vmul.f32 %v1270_v20, %v1270_v20  ;;  %v1273_v37 = vsel %vm1073_vm1, %v971_v14, %v1173_v31  ;;  %v2872_v25 = vsel %vm390_vm0, %v2678_v48, 0.0 }
 0x1c1   :  { %v2871_v11 = vadd.f32 %v2870_v49, %v2869_v26  ;;  %v2568_v13 = vadd.f32 %v2567_v27, %v2566_v52  ;;  %v2569_v57 = vsel %vm390_vm0, %v1270_v20, 0.0  ;;  %v3202_v63 = vpack.c.bf16 %v1273_v37, %v1273_v37 }
 0x1c2   :  { %1771 = vst.msk [vmem:[%s4557_s3 + $0x180] sm:$0xf] %vm1674_vm2, %v3199_v43  ;;  %vm1071_vm3 = vcmp.ge.f32.partialorder %v963_v32, 0.0  ;;  %v1171_v0 = vmul.f32 0.0, %v963_v32  ;;  %v2874_v41 = vsel %vm390_vm0, %v2679_v3, 0.0  ;;  %v2681_v7 = vmul.f32 %v1272_v56, %v1272_v56 }
 0x1c3   :  { %v2570_v61 = vadd.f32 %v2569_v57, %v2568_v13  ;;  %v2873_v55 = vadd.f32 %v2872_v25, %v2871_v11  ;;  %1774 = vst.msk [vmem:[%s4557_s3 + $0x18c] sm:$0xf] %vm1674_vm2, %v3202_v63  ;;  %v2573_v51 = vsel %vm390_vm0, %v1272_v56, 0.0  ;;  %v2682_v59 = vmul.f32 %v1273_v37, %v1273_v37 }
 0x1c4   :  { %v1271_v6 = vsel %vm1071_vm3, %v963_v32, %v1171_v0  ;;  %v2878_v53 = vsel %vm390_vm0, %v2681_v7, 0.0  ;;  %v2575_v2 = vsel %vm390_vm0, %v1273_v37, 0.0  ;;  %vm2890_vm4 = vcmask 254976  }
 0x1c5   :  { %v2875_v12 = vadd.f32 %v2874_v41, %v2873_v55  ;;  %v3200_v10 = vpack.c.bf16 %v1271_v6, %v1271_v6  ;;  %v2571_v54 = vsel %vm390_vm0, %v1271_v6, 0.0  ;;  %v2680_v9 = vmul.f32 %v1271_v6, %v1271_v6 }
 0x1c6   :  { %v2572_v44 = vadd.f32 %v2571_v54, %v2570_v61  ;;  %v2880_v30 = vsel %vm390_vm0, %v2682_v59, 0.0 }
 0x1c7   :  { %1772 = vst.msk [vmem:[%s4557_s3 + $0x184] sm:$0xf] %vm1674_vm2, %v3200_v10  ;;  %v2876_v16 = vsel %vm390_vm0, %v2680_v9, 0.0  ;;  %vm2888_vm2 = vcmask 1040384  }
 0x1c8   :  { %v2574_v4 = vadd.f32 %v2573_v51, %v2572_v44  ;;  %v2877_v23 = vadd.f32 %v2876_v16, %v2875_v12 }
 0x1ca   :  { %v2576_v29 = vadd.f32 %v2575_v2, %v2574_v4  ;;  %v2879_v28 = vadd.f32 %v2878_v53, %v2877_v23 }
 0x1cc   :  { %v2577_v18 = vrot.slane %v2576_v29, 4  ;;  %v2881_v45 = vadd.f32 %v2880_v30, %v2879_v28 }
 0x1ce   :  { %v2578_v33 = vadd.f32 %v2577_v18, %v2576_v29  ;;  %v2882_v62 = vrot.slane %v2881_v45, 4 }
 0x1d0   :  { %v2579_v17 = vrot.slane %v2578_v33, 2  ;;  %v2883_v1 = vadd.f32 %v2882_v62, %v2881_v45 }
 0x1d2   :  { %v2580_v8 = vadd.f32 %v2579_v17, %v2578_v33  ;;  %v2884_v60 = vrot.slane %v2883_v1, 2 }
 0x1d4   :  { %v2581_v47 = vrot.slane %v2580_v8, 1  ;;  %v2885_v21 = vadd.f32 %v2884_v60, %v2883_v1 }
 0x1d6   :  { %v2886_v24 = vrot.slane %v2885_v21, 1  ;;  %v2582_v35 = vadd.f32 %v2581_v47, %v2580_v8 }
 0x1d8   :  { %v2887_v5 = vadd.f32 %v2886_v24, %v2885_v21 }
 0x1da   :  { %v2889_v34 = vsel %vm2888_vm2, %v2582_v35, %v2887_v5 }
 0x1db   :  { %2891 = vst.msk [vmem:[%s4558_s4] sm:$0x3] %vm2890_vm4, %v2889_v34 }

// kernel: node_layer_forward.10
= control target key start
LH: loop header
LB: loop body
LE: loop exit
PB: predicated region body
PF: predicated region fallthrough
CT: control target
= control target key end

     0   :  { %s2404_s0 = inlined_call_operand.vmem [shape: s32[5], index: 0, kind: input, shape index: {}]   ;;  %s2405_s3 = inlined_call_operand.vmem [shape: s32[1,1024], index: 3, kind: input, shape index: {}]   ;;  %s2406_s4 = inlined_call_operand.vmem [shape: bf16[1024,32], index: 4, kind: input, shape index: {}]   ;;  %s2407_s5 = inlined_call_operand.vmem [shape: f32[300,32], index: 5, kind: output, shape index: {}]   ;;  %s2408_s1 = inlined_call_operand.vmem [shape: s32[5], index: 1, kind: input, shape index: {}]   ;;  %s2409_s2 = inlined_call_operand.vmem [shape: s32[5], index: 2, kind: input, shape index: {}]  }
   0x1   :  { %s10_s20 = sshll.u32 %s2404_s0, 4  ;;  %s14_s23 = sshll.u32 %s2408_s1, 4  ;;  %s11_s20 = int_to_ptr.vmem [resolvable:$true] %s10_s20  ;;  %s15_s23 = int_to_ptr.vmem [resolvable:$true] %s14_s23 }
   0x2   :  { %s1696_s24 = scalar_lea.vmem %s11_s20, 16  ;;  %p1701_p1 = scmp.lt.s32.totalorder %s11_s20, %s11_s20 }
   0x3   :  { %p1697_p0 = scmp.ne.s32.totalorder %s11_s20, %s1696_s24  ;;  %p1702_p2 = scmp.lt.s32.totalorder %s1696_s24, %s1696_s24 }
   0x5   :  { %p1703_p3 = por %p1702_p2, %p1701_p1 }
   0x7   :  { %p1704_p4 = pnand %p1703_p3, %p1697_p0 }
   0x9   :  { %1707 = shalt.err (!%p1704_p4)  }
   0xa   :  { %s1822_s25 = smov [#allocation3]   ;;  %s1708_s26 = scalar_lea.vmem %s15_s23, 16 }
   0xb   :  { %13 = dma.vmem_to_smem %s11_s20, 16, %s1822_s25, [#allocation2] }
   0xc   :  { %p1709_p5 = scmp.ne.s32.totalorder %s15_s23, %s1708_s26  ;;  %p1713_p6 = scmp.lt.s32.totalorder %s15_s23, %s15_s23 }
   0xd   :  { %p1714_p7 = scmp.lt.s32.totalorder %s1708_s26, %s1708_s26 }
   0xf   :  { %p1715_p8 = por %p1714_p7, %p1713_p6 }
  0x11   :  { %p1716_p9 = pnand %p1715_p8, %p1709_p5 }
  0x13   :  { %1719 = shalt.err (!%p1716_p9)  }
  0x14   :  { %s1823_s0 = smov [#allocation4]   ;;  %s18_s28 = sshll.u32 %s2409_s2, 4  ;;  %s19_s28 = int_to_ptr.vmem [resolvable:$true] %s18_s28 }
  0x15   :  { %17 = dma.vmem_to_smem %s15_s23, 16, %s1823_s0, [#allocation2] }
  0x16   :  { %s1720_s29 = scalar_lea.vmem %s19_s28, 16  ;;  %p1725_p11 = scmp.lt.s32.totalorder %s19_s28, %s19_s28 }
  0x17   :  { %p1721_p10 = scmp.ne.s32.totalorder %s19_s28, %s1720_s29  ;;  %p1726_p12 = scmp.lt.s32.totalorder %s1720_s29, %s1720_s29 }
  0x19   :  { %p1727_p13 = por %p1726_p12, %p1725_p11 }
  0x1b   :  { %p1728_p0 = pnand %p1727_p13, %p1721_p10 }
  0x1d   :  { %1731 = shalt.err (!%p1728_p0)  }
  0x1e   :  { %s1824_s30 = smov [#allocation5]  }
  0x1f   :  { %21 = dma.vmem_to_smem %s19_s28, 16, %s1824_s30, [#allocation2] }
  0x20   :  { %1776 = dma.done.wait [#allocation2], 48 }
  0x21   :  { %1777 = vsyncadd [#allocation2], 4294967248 }
  0x22   :  { %23 = sfence }
  0x23   :  { %s1866_s6 = smov 0   ;;  %s1868_s7 = smov 0  }
  0x24   :  { %s1870_s8 = smov 0  }
  0x25 LB: > { %s1877_s2 = sadd.s32 4294967295, %s1788_s8   ;;  %s1879_s9 = sadd.s32 1, %s1788_s8   ;;  %s1788_s8 = sphi %s1870_s8, %s2418_s8   ;;  %s1784_s7 = sphi %s1868_s7, %s2417_s7   ;;  %s1780_s6 = sphi %s1866_s6, %s2416_s6  }
  0x26   : > { %s89_s10 = sld [smem:[#allocation3 + %s1788_s8]]  ;;  %p104_p1 = scmp.ne.s32.totalorder %s1784_s7, %s1780_s6 }
  0x27   : > { %s90_s11 = sld [smem:[#allocation3 + %s1879_s9]]  ;;  %p105_p2 = scmp.eq.s32.totalorder %s1877_s2, 4 }
  0x28   : > { %p1287_p3 = scmp.ge.s32.totalorder %s1788_s8, 1  ;;  %p150_p4 = scmp.lt.s32.totalorder %s1788_s8, 6 }
  0x29   : > { %p1884_p5 = por %p105_p2, %p104_p1  ;;  %s94_s14 = sadd.s32 1, %s1784_s7 }
  0x2a   : > { %p151_p6 = pnand %p1287_p3, %p150_p4 }
  0x2b   : > { %s174_s16 = sand.u32 (!%p151_p6), 1, %s1780_s6   ;;  %s177_s17 = sld [smem:[#allocation4 + %s1877_s2]] (!%p151_p6) }
  0x2c   : > { %154 = sbr.rel (%p151_p6) target bundleno = 440 (0x1b8), region = 28  ;;  %s1288_s18 = sshll.u32 (!%p151_p6), %s174_s16, 8 }
  0x2d   : > { %s91_s13 = ssub.s32 %s89_s10, %s90_s11  ;;  %s184_s19 = sld [smem:[#allocation4 + %s1877_s2]] (!%p151_p6) }
  0x2e   : > { %p92_p7 = scmp.eq.s32.totalorder %s91_s13, 0  ;;  %s1292_s20 = sadd.s32 (!%p151_p6), 4294967295, %s1877_s2 }
  0x2f   : > { %p202_p10 = scmp.gt.s32.totalorder (!%p151_p6), %s1292_s20, 0  ;;  %s1907_s28 = sld [smem:[#allocation3 + %s1877_s2]] (!%p151_p6) }
  0x30   : > { %s1890_s15 = scalar_select %p92_p7, %s1784_s7, %s94_s14  }
  0x31   : > { %s1289_s21 = sshll.u32 %s177_s17, 1  ;;  %s2424_s20 = smov (!%p202_p10, %s1292_s20), 0 }
  0x32   : > { %p179_p8 = scmp.lt.s32.totalorder %s1289_s21, 7  ;;  %s204_s29 = sld [smem:[#allocation3 + %s2424_s20]] }
  0x33   : > { %s1290_s22 = sshll.u32 %s184_s19, 5  ;;  %p200_p11 = scmp.eq.s32.totalorder %s1877_s2, 0 }
  0x34   : > { %p186_p9 = scmp.lt.s32.totalorder %s1290_s22, 127  ;;  %s2420_s21 = smov (!%p179_p8, %s1289_s21), 7 }
  0x35   : > { %s181_s25 = scalar_lea.vmem %s2405_s3, %s2420_s21  ;;  %s1911_s30 = scalar_lea.vmem [#allocation6], %s1288_s18  }
  0x36   : > { %s2422_s22 = smov (!%p186_p9, %s1290_s22), 127 }
  0x37   : > { %s1291_s26 = sshll.u32 %s2422_s22, 2 }
  0x38   : > { %s1904_s27 = scalar_lea.vmem %s2406_s4, %s1291_s26  ;;  %p205_p12 = scmp.ne.s32.totalorder %s1907_s28, %s204_s29 }
  0x3a   : > { %p206_p13 = por %p205_p12, %p200_p11 }
  0x3b   : > { %vm210_vm0 = vcmask (%p206_p13), 261120   ;;  %v1825_v0 = vmov (%p206_p13), 0.0  }
  0x3c   : > { %209 = sbr.rel (!%p206_p13) target bundleno = 76 (0x4c), region = 32  ;;  %211 = vst.msk [vmem:[%s1911_s30] sm:$0xff] (%p206_p13), %vm210_vm0, %v1825_v0  ;;  %212 = vst.msk [vmem:[%s1911_s30 + $0x8] sm:$0xff] (%p206_p13), %vm210_vm0, %v1825_v0 }
  0x3d   : > { %213 = vst.msk [vmem:[%s1911_s30 + $0x10] sm:$0xff] (%p206_p13), %vm210_vm0, %v1825_v0  ;;  %214 = vst.msk [vmem:[%s1911_s30 + $0x18] sm:$0xff] (%p206_p13), %vm210_vm0, %v1825_v0 }
  0x3e   : > { %215 = vst.msk [vmem:[%s1911_s30 + $0x20] sm:$0xff] (%p206_p13), %vm210_vm0, %v1825_v0  ;;  %216 = vst.msk [vmem:[%s1911_s30 + $0x28] sm:$0xff] (%p206_p13), %vm210_vm0, %v1825_v0 }
  0x3f   : > { %217 = vst.msk [vmem:[%s1911_s30 + $0x30] sm:$0xff] (%p206_p13), %vm210_vm0, %v1825_v0  ;;  %218 = vst.msk [vmem:[%s1911_s30 + $0x38] sm:$0xff] (%p206_p13), %vm210_vm0, %v1825_v0 }
  0x40   : > { %219 = vst.msk [vmem:[%s1911_s30 + $0x40] sm:$0xff] (%p206_p13), %vm210_vm0, %v1825_v0  ;;  %220 = vst.msk [vmem:[%s1911_s30 + $0x48] sm:$0xff] (%p206_p13), %vm210_vm0, %v1825_v0 }
  0x41   : > { %221 = vst.msk [vmem:[%s1911_s30 + $0x50] sm:$0xff] %vm210_vm0, %v1825_v0  ;;  %222 = vst.msk [vmem:[%s1911_s30 + $0x58] sm:$0xff] %vm210_vm0, %v1825_v0 }
  0x42   : > { %223 = vst.msk [vmem:[%s1911_s30 + $0x60] sm:$0xff] %vm210_vm0, %v1825_v0  ;;  %224 = vst.msk [vmem:[%s1911_s30 + $0x68] sm:$0xff] %vm210_vm0, %v1825_v0 }
  0x43   : > { %225 = vst.msk [vmem:[%s1911_s30 + $0x70] sm:$0xff] %vm210_vm0, %v1825_v0  ;;  %226 = vst.msk [vmem:[%s1911_s30 + $0x78] sm:$0xff] %vm210_vm0, %v1825_v0 }
  0x44   : > { %227 = vst.msk [vmem:[%s1911_s30 + $0x80] sm:$0xff] %vm210_vm0, %v1825_v0  ;;  %228 = vst.msk [vmem:[%s1911_s30 + $0x88] sm:$0xff] %vm210_vm0, %v1825_v0 }
  0x45   : > { %229 = vst.msk [vmem:[%s1911_s30 + $0x90] sm:$0xff] %vm210_vm0, %v1825_v0  ;;  %230 = vst.msk [vmem:[%s1911_s30 + $0x98] sm:$0xff] %vm210_vm0, %v1825_v0 }
  0x46   : > { %231 = vst.msk [vmem:[%s1911_s30 + $0xa0] sm:$0xff] %vm210_vm0, %v1825_v0  ;;  %232 = vst.msk [vmem:[%s1911_s30 + $0xa8] sm:$0xff] %vm210_vm0, %v1825_v0 }
  0x47   : > { %233 = vst.msk [vmem:[%s1911_s30 + $0xb0] sm:$0xff] %vm210_vm0, %v1825_v0  ;;  %234 = vst.msk [vmem:[%s1911_s30 + $0xb8] sm:$0xff] %vm210_vm0, %v1825_v0 }
  0x48   : > { %235 = vst.msk [vmem:[%s1911_s30 + $0xc0] sm:$0xff] %vm210_vm0, %v1825_v0  ;;  %236 = vst.msk [vmem:[%s1911_s30 + $0xc8] sm:$0xff] %vm210_vm0, %v1825_v0 }
  0x49   : > { %237 = vst.msk [vmem:[%s1911_s30 + $0xd0] sm:$0xff] %vm210_vm0, %v1825_v0  ;;  %238 = vst.msk [vmem:[%s1911_s30 + $0xd8] sm:$0xff] %vm210_vm0, %v1825_v0 }
  0x4a   : > { %239 = vst.msk [vmem:[%s1911_s30 + $0xe0] sm:$0xff] %vm210_vm0, %v1825_v0  ;;  %240 = vst.msk [vmem:[%s1911_s30 + $0xe8] sm:$0xff] %vm210_vm0, %v1825_v0 }
  0x4b   : > { %241 = vst.msk [vmem:[%s1911_s30 + $0xf0] sm:$0xff] %vm210_vm0, %v1825_v0  ;;  %242 = vst.msk [vmem:[%s1911_s30 + $0xf8] sm:$0xff] %vm210_vm0, %v1825_v0 }
  0x4c PF: > { %s243_s6 = sld [smem:[#allocation5 + %s1877_s2]] }
  0x52   : > { %p1293_p0 = scmp.ne.s32.totalorder %s243_s6, 1 }
  0x53   : > { %s1294_s8 = sshll.u32 (!%p1293_p0), %s1907_s28, 8 }
  0x54   : > { %247 = sbr.rel (%p1293_p0) target bundleno = 382 (0x17e), region = 36 }
  0x59   : > { %v1680_v1 = vld [vmem:[%s1904_s27 + $0x78] sm:$0xff]   ;;  %v1682_v3 = vld [vmem:[%s1904_s27 + $0x70] sm:$0xff]   ;;  %v249_v4 = vlaneseq  ;;  %v1684_v6 = vld [vmem:[%s1904_s27 + $0x68] sm:$0xff]   ;;  %v1992_v14 = vstv %s1294_s8  ;;  %v1826_v30 = vmov 1.0|1.0  }
  0x5a   : > { %v1681_v2 = vld [vmem:[%s1904_s27 + $0x38] sm:$0xff]   ;;  %1459 = vmatprep.subr.bf16.mxu0 %v1680_v1  ;;  %1571 = vmatprep.subr.bf16.mxu1 %v1680_v1  ;;  %v1683_v5 = vld [vmem:[%s1904_s27 + $0x30] sm:$0xff]   ;;  %v1685_v8 = vld [vmem:[%s1904_s27 + $0x28] sm:$0xff]  }
  0x5b   : > { %1460 = vmatpush3.bf16.msra.mxu0 %v1681_v2  ;;  %1579 = vmatpush3.bf16.msra.mxu1 %v1681_v2  ;;  %v1983_v7 = vshrl.u32 %v249_v4, 7  ;;  %v1686_v9 = vld [vmem:[%s1904_s27 + $0x60] sm:$0xff]   ;;  %v1688_v13 = vld [vmem:[%s1904_s27 + $0x58] sm:$0xff]   ;;  %v1690_v21 = vld [vmem:[%s1904_s27 + $0x50] sm:$0xff]  }
  0x5c   : > { %1461 = vmatprep.subr.bf16.mxu0 %v1682_v3  ;;  %1572 = vmatprep.subr.bf16.mxu1 %v1682_v3  ;;  %v1687_v11 = vld [vmem:[%s1904_s27 + $0x20] sm:$0xff]   ;;  %v1689_v17 = vld [vmem:[%s1904_s27 + $0x18] sm:$0xff]   ;;  %v1691_v26 = vld [vmem:[%s1904_s27 + $0x10] sm:$0xff]  }
  0x5d   : > { %v251_v10 = vadd.s32 8, %v1983_v7  ;;  %v266_v12 = vadd.s32 128, %v1983_v7  ;;  %v267_v15 = vadd.s32 136, %v1983_v7  ;;  %v322_v16 = vsub.s32 1, %v1983_v7  ;;  %v315_v22 = vld [vmem:[%s181_s25] sm:$0x3] }
  0x5e   : > { %v283_v18 = vadd.s32 %v1992_v14, %v1983_v7  ;;  %v318_v25 = vsub.s32 0, %v1983_v7  ;;  %v1692_v27 = vld [vmem:[%s1904_s27 + $0x48] sm:$0xff]   ;;  %v252_v28 = vadd.s32 16, %v1983_v7  ;;  %v253_v29 = vadd.s32 24, %v1983_v7  ;;  %v1694_v35 = vld [vmem:[%s1904_s27 + $0x40] sm:$0xff]  }
  0x5f   : > { %1462 = vmatpush3.bf16.msra.mxu0 %v1683_v5  ;;  %1580 = vmatpush3.bf16.msra.mxu1 %v1683_v5  ;;  %v284_v19 = vadd.s32 %v1992_v14, %v251_v10  ;;  %v299_v20 = vadd.s32 %v1992_v14, %v266_v12  ;;  %v300_v23 = vadd.s32 %v1992_v14, %v267_v15  ;;  %v268_v31 = vadd.s32 144, %v1983_v7  ;;  %v1693_v34 = vld [vmem:[%s1904_s27 + $0x8] sm:$0xff]   ;;  %v1695_v40 = vld [vmem:[%s1904_s27] sm:$0xff]  }
  0x60   : > { %1463 = vmatprep.subr.bf16.mxu0 %v1684_v6  ;;  %1573 = vmatprep.subr.bf16.mxu1 %v1684_v6  ;;  %v2008_v24 = vrot.slane %v315_v22, %v322_v16  ;;  %v269_v32 = vadd.s32 152, %v1983_v7  ;;  %v2022_v33 = vrot.slane %v315_v22, %v318_v25  ;;  %v285_v36 = vadd.s32 %v1992_v14, %v252_v28 }
  0x61   : > { %v286_v37 = vadd.s32 %v1992_v14, %v253_v29  ;;  %v301_v38 = vadd.s32 %v1992_v14, %v268_v31  ;;  %v254_v41 = vadd.s32 32, %v1983_v7  ;;  %v255_v42 = vadd.s32 40, %v1983_v7  ;;  %v564_v29 = vld [vmem:[%s1911_s30 + $0x80] sm:$0xff] }
  0x62   : > { %vm325_vm1 = vcmp.eq.s32.totalorder %v283_v18, %v2008_v24  ;;  %vm327_vm2 = vcmp.eq.s32.totalorder %v284_v19, %v2008_v24  ;;  %vm357_vm3 = vcmp.eq.s32.totalorder %v299_v20, %v2008_v24  ;;  %vm359_vm5 = vcmp.eq.s32.totalorder %v300_v23, %v2008_v24 }
  0x63   : > { %1464 = vmatpush3.bf16.msra.mxu0 %v1685_v8  ;;  %1581 = vmatpush3.bf16.msra.mxu1 %v1685_v8  ;;  %vm1375_vm4 = vmpackc.low %vm327_vm2, %vm325_vm1  ;;  %v302_v39 = vadd.s32 %v1992_v14, %v269_v32  ;;  %vm324_vm7 = vcmp.eq.s32.totalorder %v283_v18, %v2022_v33  ;;  %vm326_vm8 = vcmp.eq.s32.totalorder %v284_v19, %v2022_v33  ;;  %v270_v43 = vadd.s32 160, %v1983_v7 }
  0x64   : > { %1465 = vmatprep.subr.bf16.mxu0 %v1686_v9  ;;  %1574 = vmatprep.subr.bf16.mxu1 %v1686_v9  ;;  %vm1407_vm6 = vmpackc.low %vm359_vm5, %vm357_vm3  ;;  %vm356_vm9 = vcmp.eq.s32.totalorder %v299_v20, %v2022_v33  ;;  %vm358_vm10 = vcmp.eq.s32.totalorder %v300_v23, %v2022_v33  ;;  %vm329_vm11 = vcmp.eq.s32.totalorder %v285_v36, %v2008_v24  ;;  %v271_v44 = vadd.s32 168, %v1983_v7 }
  0x65   : > { %1376 = vmatprep.mubr.msk.bf16.mxu0 %vm1375_vm4, %v1826_v30  ;;  %1408 = vmatprep.mubr.msk.bf16.mxu1 %vm1407_vm6, %v1826_v30  ;;  %vm331_vm12 = vcmp.eq.s32.totalorder %v286_v37, %v2008_v24  ;;  %vm1377_vm13 = vmpackc.low %vm326_vm8, %vm324_vm7  ;;  %vm361_vm14 = vcmp.eq.s32.totalorder %v301_v38, %v2008_v24  ;;  %vm363_vm15 = vcmp.eq.s32.totalorder %v302_v39, %v2008_v24  ;;  %v256_v49 = vadd.s32 48, %v1983_v7 }
  0x66   : > { %vm1409_vm0 = vmpackc.low %vm358_vm10, %vm356_vm9  ;;  %v287_v45 = vadd.s32 %v1992_v14, %v254_v41  ;;  %v288_v46 = vadd.s32 %v1992_v14, %v255_v42  ;;  %v303_v47 = vadd.s32 %v1992_v14, %v270_v43  ;;  %v304_v48 = vadd.s32 %v1992_v14, %v271_v44 }
  0x67   : > { %1466 = vmatpush3.bf16.msra.mxu0 %v1687_v11  ;;  %1582 = vmatpush3.bf16.msra.mxu1 %v1687_v11  ;;  %vm1379_vm1 = vmpackc.low %vm331_vm12, %vm329_vm11  ;;  %vm328_vm3 = vcmp.eq.s32.totalorder %v285_v36, %v2022_v33  ;;  %vm330_vm4 = vcmp.eq.s32.totalorder %v286_v37, %v2022_v33  ;;  %vm360_vm5 = vcmp.eq.s32.totalorder %v301_v38, %v2022_v33  ;;  %v257_v50 = vadd.s32 56, %v1983_v7  ;;  %v549_v38 = vld [vmem:[%s1911_s30 + $0x8] sm:$0xff] }
  0x68   : > { %1467 = vmatprep.subr.bf16.mxu0 %v1688_v13  ;;  %1575 = vmatprep.subr.bf16.mxu1 %v1688_v13  ;;  %vm1411_vm2 = vmpackc.low %vm363_vm15, %vm361_vm14  ;;  %vm362_vm6 = vcmp.eq.s32.totalorder %v302_v39, %v2022_v33  ;;  %vm333_vm7 = vcmp.eq.s32.totalorder %v287_v45, %v2008_v24  ;;  %vm335_vm8 = vcmp.eq.s32.totalorder %v288_v46, %v2008_v24  ;;  %v272_v51 = vadd.s32 176, %v1983_v7  ;;  %v565_v39 = vld [vmem:[%s1911_s30 + $0x88] sm:$0xff] }
  0x69   : > { %vm1381_vm9 = vmpackc.low %vm330_vm4, %vm328_vm3  ;;  %vm365_vm10 = vcmp.eq.s32.totalorder %v303_v47, %v2008_v24  ;;  %vm367_vm11 = vcmp.eq.s32.totalorder %v304_v48, %v2008_v24  ;;  %v273_v52 = vadd.s32 184, %v1983_v7  ;;  %v289_v53 = vadd.s32 %v1992_v14, %v256_v49  ;;  %v566_v49 = vld [vmem:[%s1911_s30 + $0x90] sm:$0xff] }
  0x6a   : > { %vm1413_vm12 = vmpackc.low %vm362_vm6, %vm360_vm5  ;;  %v290_v54 = vadd.s32 %v1992_v14, %v257_v50  ;;  %v305_v55 = vadd.s32 %v1992_v14, %v272_v51  ;;  %vm332_vm15 = vcmp.eq.s32.totalorder %v287_v45, %v2022_v33  ;;  %v258_v57 = vadd.s32 64, %v1983_v7 }
  0x6b   : > { %1468 = vmatpush3.bf16.msra.mxu0 %v1689_v17  ;;  %1583 = vmatpush3.bf16.msra.mxu1 %v1689_v17  ;;  %vm1415_vm14 = vmpackc.low %vm367_vm11, %vm365_vm10  ;;  %v306_v56 = vadd.s32 %v1992_v14, %v273_v52  ;;  %vm337_vm3 = vcmp.eq.s32.totalorder %v289_v53, %v2008_v24  ;;  %v259_v58 = vadd.s32 72, %v1983_v7  ;;  %v274_v59 = vadd.s32 192, %v1983_v7 }
  0x6c   : > { %1469 = vmatprep.subr.bf16.mxu0 %v1690_v21  ;;  %1576 = vmatprep.subr.bf16.mxu1 %v1690_v21  ;;  %vm339_vm4 = vcmp.eq.s32.totalorder %v290_v54, %v2008_v24  ;;  %vm369_vm6 = vcmp.eq.s32.totalorder %v305_v55, %v2008_v24  ;;  %v275_v60 = vadd.s32 200, %v1983_v7  ;;  %v291_v61 = vadd.s32 %v1992_v14, %v258_v57  ;;  %v551_v57 = vld [vmem:[%s1911_s30 + $0x18] sm:$0xff] }
  0x6d   : > { %v292_v62 = vadd.s32 %v1992_v14, %v259_v58  ;;  %v307_v63 = vadd.s32 %v1992_v14, %v274_v59  ;;  %vm336_vm11 = vcmp.eq.s32.totalorder %v289_v53, %v2022_v33  ;;  %v260_v1 = vadd.s32 80, %v1983_v7  ;;  %v567_v59 = vld [vmem:[%s1911_s30 + $0x98] sm:$0xff] }
  0x6e   : > { %v308_v0 = vadd.s32 %v1992_v14, %v275_v60  ;;  %v261_v2 = vadd.s32 88, %v1983_v7  ;;  %v276_v3 = vadd.s32 208, %v1983_v7  ;;  %v277_v4 = vadd.s32 216, %v1983_v7 }
  0x6f   : > { %1470 = vmatpush3.bf16.msra.mxu0 %v1691_v26  ;;  %1584 = vmatpush3.bf16.msra.mxu1 %v1691_v26  ;;  %v293_v5 = vadd.s32 %v1992_v14, %v260_v1  ;;  %v262_v10 = vadd.s32 96, %v1983_v7  ;;  %v263_v11 = vadd.s32 104, %v1983_v7  ;;  %v278_v12 = vadd.s32 224, %v1983_v7 }
  0x70   : > { %1471 = vmatprep.subr.bf16.mxu0 %v1692_v27  ;;  %1577 = vmatprep.subr.bf16.mxu1 %v1692_v27  ;;  %v294_v6 = vadd.s32 %v1992_v14, %v261_v2  ;;  %v309_v8 = vadd.s32 %v1992_v14, %v276_v3  ;;  %v310_v9 = vadd.s32 %v1992_v14, %v277_v4  ;;  %v279_v13 = vadd.s32 232, %v1983_v7  ;;  %v552_v3 = vld [vmem:[%s1911_s30 + $0x20] sm:$0xff] }
  0x71   : > { %v295_v15 = vadd.s32 %v1992_v14, %v262_v10  ;;  %v296_v16 = vadd.s32 %v1992_v14, %v263_v11  ;;  %v311_v17 = vadd.s32 %v1992_v14, %v278_v12  ;;  %v264_v19 = vadd.s32 112, %v1983_v7 }
  0x72   : > { %v312_v18 = vadd.s32 %v1992_v14, %v279_v13  ;;  %v265_v20 = vadd.s32 120, %v1983_v7  ;;  %v280_v21 = vadd.s32 240, %v1983_v7  ;;  %v281_v22 = vadd.s32 248, %v1983_v7 }
  0x73   : > { %1472 = vmatpush3.bf16.msra.mxu0 %v1693_v34  ;;  %1585 = vmatpush3.bf16.msra.mxu1 %v1693_v34  ;;  %v297_v23 = vadd.s32 %v1992_v14, %v264_v19 }
  0x74   : > { %1473 = vmatprep.subr.bf16.mxu0 %v1694_v35  ;;  %1578 = vmatprep.subr.bf16.mxu1 %v1694_v35  ;;  %v298_v25 = vadd.s32 %v1992_v14, %v265_v20  ;;  %v313_v26 = vadd.s32 %v1992_v14, %v280_v21  ;;  %v314_v27 = vadd.s32 %v1992_v14, %v281_v22 }
  0x77   : > { %1474 = vmatpush3.bf16.msra.mxu0 %v1695_v40  ;;  %1586 = vmatpush3.bf16.msra.mxu1 %v1695_v40 }
  0x7a   : > { %1378 = vmatmul.mubr.msk.bf16.vlgmr.msra.gmra.mxu0 %vm1377_vm13, %v1826_v30  ;;  %1410 = vmatmul.mubr.msk.bf16.vlgmr.msra.gmra.mxu1 %vm1409_vm0, %v1826_v30  ;;  %vm1383_vm13 = vmpackc.low %vm335_vm8, %vm333_vm7  ;;  %vm334_vm0 = vcmp.eq.s32.totalorder %v288_v46, %v2022_v33  ;;  %vm371_vm7 = vcmp.eq.s32.totalorder %v306_v56, %v2008_v24 }
  0x7b   : > { %1380 = vmatprep.mubr.msk.bf16.mxu0 %vm1379_vm1, %v1826_v30  ;;  %1412 = vmatprep.mubr.msk.bf16.mxu1 %vm1411_vm2, %v1826_v30  ;;  %vm364_vm1 = vcmp.eq.s32.totalorder %v303_v47, %v2022_v33  ;;  %vm366_vm2 = vcmp.eq.s32.totalorder %v304_v48, %v2022_v33  ;;  %vm1385_vm5 = vmpackc.low %vm334_vm0, %vm332_vm15  ;;  %vm341_vm15 = vcmp.eq.s32.totalorder %v291_v61, %v2008_v24  ;;  %v550_v47 = vld [vmem:[%s1911_s30 + $0x10] sm:$0xff] }
  0x7c   : > { %vm1417_vm8 = vmpackc.low %vm366_vm2, %vm364_vm1  ;;  %vm343_vm0 = vcmp.eq.s32.totalorder %v292_v62, %v2008_v24  ;;  %vm373_vm2 = vcmp.eq.s32.totalorder %v307_v63, %v2008_v24 }
  0x7d   : > { %vm1419_vm10 = vmpackc.low %vm371_vm7, %vm369_vm6  ;;  %vm340_vm7 = vcmp.eq.s32.totalorder %v291_v61, %v2022_v33 }
  0x82   : > { %1382 = vmatmul.mubr.msk.bf16.gmra.mxu0 %vm1381_vm9, %v1826_v30  ;;  %1414 = vmatmul.mubr.msk.bf16.gmra.mxu1 %vm1413_vm12, %v1826_v30  ;;  %vm1387_vm9 = vmpackc.low %vm339_vm4, %vm337_vm3  ;;  %vm338_vm12 = vcmp.eq.s32.totalorder %v290_v54, %v2022_v33  ;;  %vm375_vm3 = vcmp.eq.s32.totalorder %v308_v0, %v2008_v24 }
  0x83   : > { %1384 = vmatprep.mubr.msk.bf16.mxu0 %vm1383_vm13, %v1826_v30  ;;  %1416 = vmatprep.mubr.msk.bf16.mxu1 %vm1415_vm14, %v1826_v30  ;;  %vm368_vm13 = vcmp.eq.s32.totalorder %v305_v55, %v2022_v33  ;;  %vm370_vm14 = vcmp.eq.s32.totalorder %v306_v56, %v2022_v33  ;;  %vm1389_vm1 = vmpackc.low %vm338_vm12, %vm336_vm11  ;;  %vm345_vm11 = vcmp.eq.s32.totalorder %v293_v5, %v2008_v24 }
  0x84   : > { %vm1421_vm4 = vmpackc.low %vm370_vm14, %vm368_vm13  ;;  %vm347_vm12 = vcmp.eq.s32.totalorder %v294_v6, %v2008_v24  ;;  %vm377_vm14 = vcmp.eq.s32.totalorder %v309_v8, %v2008_v24 }
  0x85   : > { %vm1423_vm6 = vmpackc.low %vm375_vm3, %vm373_vm2  ;;  %vm344_vm3 = vcmp.eq.s32.totalorder %v293_v5, %v2022_v33  ;;  %v568_v5 = vld [vmem:[%s1911_s30 + $0xa0] sm:$0xff] }
  0x8a   : > { %1386 = vmatmul.mubr.msk.bf16.gmra.mxu0 %vm1385_vm5, %v1826_v30  ;;  %1418 = vmatmul.mubr.msk.bf16.gmra.mxu1 %vm1417_vm8, %v1826_v30  ;;  %vm1391_vm5 = vmpackc.low %vm343_vm0, %vm341_vm15  ;;  %vm342_vm8 = vcmp.eq.s32.totalorder %v292_v62, %v2022_v33  ;;  %vm379_vm15 = vcmp.eq.s32.totalorder %v310_v9, %v2008_v24 }
  0x8b   : > { %1388 = vmatprep.mubr.msk.bf16.mxu0 %vm1387_vm9, %v1826_v30  ;;  %1420 = vmatprep.mubr.msk.bf16.mxu1 %vm1419_vm10, %v1826_v30  ;;  %vm372_vm9 = vcmp.eq.s32.totalorder %v307_v63, %v2022_v33  ;;  %vm374_vm10 = vcmp.eq.s32.totalorder %v308_v0, %v2022_v33  ;;  %vm1393_vm13 = vmpackc.low %vm342_vm8, %vm340_vm7  ;;  %vm349_vm7 = vcmp.eq.s32.totalorder %v295_v15, %v2008_v24 }
  0x8c   : > { %vm1425_vm0 = vmpackc.low %vm374_vm10, %vm372_vm9  ;;  %vm351_vm8 = vcmp.eq.s32.totalorder %v296_v16, %v2008_v24  ;;  %vm381_vm10 = vcmp.eq.s32.totalorder %v311_v17, %v2008_v24 }
  0x8d   : > { %vm1427_vm2 = vmpackc.low %vm379_vm15, %vm377_vm14  ;;  %vm348_vm15 = vcmp.eq.s32.totalorder %v295_v15, %v2022_v33  ;;  %v553_v15 = vld [vmem:[%s1911_s30 + $0x28] sm:$0xff] }
  0x92   : > { %1390 = vmatmul.mubr.msk.bf16.gmra.mxu0 %vm1389_vm1, %v1826_v30  ;;  %1422 = vmatmul.mubr.msk.bf16.gmra.mxu1 %vm1421_vm4, %v1826_v30  ;;  %vm1395_vm1 = vmpackc.low %vm347_vm12, %vm345_vm11  ;;  %vm346_vm4 = vcmp.eq.s32.totalorder %v294_v6, %v2022_v33  ;;  %vm383_vm11 = vcmp.eq.s32.totalorder %v312_v18, %v2008_v24 }
  0x93   : > { %1392 = vmatprep.mubr.msk.bf16.mxu0 %vm1391_vm5, %v1826_v30  ;;  %1424 = vmatprep.mubr.msk.bf16.mxu1 %vm1423_vm6, %v1826_v30  ;;  %vm376_vm5 = vcmp.eq.s32.totalorder %v309_v8, %v2022_v33  ;;  %vm378_vm6 = vcmp.eq.s32.totalorder %v310_v9, %v2022_v33  ;;  %vm1397_vm9 = vmpackc.low %vm346_vm4, %vm344_vm3  ;;  %vm353_vm3 = vcmp.eq.s32.totalorder %v297_v23, %v2008_v24 }
  0x94   : > { %vm1429_vm12 = vmpackc.low %vm378_vm6, %vm376_vm5  ;;  %vm355_vm4 = vcmp.eq.s32.totalorder %v298_v25, %v2008_v24  ;;  %vm385_vm6 = vcmp.eq.s32.totalorder %v313_v26, %v2008_v24 }
  0x95   : > { %vm1431_vm14 = vmpackc.low %vm383_vm11, %vm381_vm10  ;;  %vm352_vm11 = vcmp.eq.s32.totalorder %v297_v23, %v2022_v33 }
  0x9a   : > { %1394 = vmatmul.mubr.msk.bf16.gmra.mxu0 %vm1393_vm13, %v1826_v30  ;;  %1426 = vmatmul.mubr.msk.bf16.gmra.mxu1 %vm1425_vm0, %v1826_v30  ;;  %vm1399_vm13 = vmpackc.low %vm351_vm8, %vm349_vm7  ;;  %vm350_vm0 = vcmp.eq.s32.totalorder %v296_v16, %v2022_v33  ;;  %vm387_vm7 = vcmp.eq.s32.totalorder %v314_v27, %v2008_v24  ;;  %v548_v24 = vld [vmem:[%s1911_s30] sm:$0xff] }
  0x9b   : > { %1396 = vmatprep.mubr.msk.bf16.mxu0 %vm1395_vm1, %v1826_v30  ;;  %1428 = vmatprep.mubr.msk.bf16.mxu1 %vm1427_vm2, %v1826_v30  ;;  %vm380_vm1 = vcmp.eq.s32.totalorder %v311_v17, %v2022_v33  ;;  %vm382_vm2 = vcmp.eq.s32.totalorder %v312_v18, %v2022_v33  ;;  %vm1401_vm5 = vmpackc.low %vm350_vm0, %vm348_vm15  ;;  %v569_v17 = vld [vmem:[%s1911_s30 + $0xa8] sm:$0xff] }
  0x9c   : > { %vm1433_vm8 = vmpackc.low %vm382_vm2, %vm380_vm1  ;;  %vm901_vm1 = vcmask 261120  }
  0x9d   : > { %vm1435_vm10 = vmpackc.low %vm387_vm7, %vm385_vm6 }
  0xa2   : > { %1398 = vmatmul.mubr.msk.bf16.gmra.mxu0 %vm1397_vm9, %v1826_v30  ;;  %1430 = vmatmul.mubr.msk.bf16.gmra.mxu1 %vm1429_vm12, %v1826_v30  ;;  %vm1403_vm9 = vmpackc.low %vm355_vm4, %vm353_vm3  ;;  %vm354_vm12 = vcmp.eq.s32.totalorder %v298_v25, %v2022_v33 }
  0xa3   : > { %1400 = vmatprep.mubr.msk.bf16.mxu0 %vm1399_vm13, %v1826_v30  ;;  %1432 = vmatprep.mubr.msk.bf16.mxu1 %vm1431_vm14, %v1826_v30  ;;  %vm384_vm13 = vcmp.eq.s32.totalorder %v313_v26, %v2022_v33  ;;  %vm386_vm14 = vcmp.eq.s32.totalorder %v314_v27, %v2022_v33  ;;  %vm1405_vm15 = vmpackc.low %vm354_vm12, %vm352_vm11  ;;  %v554_v26 = vld [vmem:[%s1911_s30 + $0x30] sm:$0xff] }
  0xa4   : > { %vm1437_vm0 = vmpackc.low %vm386_vm14, %vm384_vm13 }
  0xaa   : > { %1402 = vmatmul.mubr.msk.bf16.gmra.mxu0 %vm1401_vm5, %v1826_v30  ;;  %1434 = vmatmul.mubr.msk.bf16.gmra.mxu1 %vm1433_vm8, %v1826_v30 }
  0xab   : > { %1404 = vmatprep.mubr.msk.bf16.mxu0 %vm1403_vm9, %v1826_v30  ;;  %1436 = vmatprep.mubr.msk.bf16.mxu1 %vm1435_vm10, %v1826_v30 }
  0xb2   : > { %1406 = vmatmul.mubr.msk.bf16.gmra.mxu0 %vm1405_vm15, %v1826_v30  ;;  %1438 = vmatmul.mubr.msk.bf16.gmra.mxu1 %vm1437_vm0, %v1826_v30 }
 0x13a   : > { %v1475_v7 = vpop.f32.mrf.mxu0  ;;  %v1523_v14 = vpop.f32.mrf.mxu1 }
 0x13c   : > { %v1476_v28 = vpop.f32.mrf.mxu0  ;;  %v1524_v31 = vpop.f32.mrf.mxu1 }
 0x13d   : > { %v1477_v32 = vadd.f32 %v1476_v28, %v1475_v7  ;;  %v1525_v34 = vadd.f32 %v1524_v31, %v1523_v14  ;;  %v570_v7 = vld [vmem:[%s1911_s30 + $0xb0] sm:$0xff] }
 0x13e   : > { %v1478_v33 = vpop.f32.mrf.mxu0  ;;  %v1526_v35 = vpop.f32.mrf.mxu1 }
 0x13f   : > { %v869_v36 = vadd.f32 %v1477_v32, %v548_v24  ;;  %v885_v37 = vadd.f32 %v1525_v34, %v564_v29 }
 0x140   : > { %v1479_v30 = vpop.f32.mrf.mxu0  ;;  %v1527_v40 = vpop.f32.mrf.mxu1 }
 0x141   : > { %902 = vst.msk [vmem:[%s1911_s30] sm:$0xff] %vm901_vm1, %v869_v36  ;;  %918 = vst.msk [vmem:[%s1911_s30 + $0x80] sm:$0xff] %vm901_vm1, %v885_v37  ;;  %v1480_v41 = vadd.f32 %v1479_v30, %v1478_v33  ;;  %v1528_v42 = vadd.f32 %v1527_v40, %v1526_v35  ;;  %v555_v33 = vld [vmem:[%s1911_s30 + $0x38] sm:$0xff] }
 0x142   : > { %v1481_v43 = vpop.f32.mrf.mxu0  ;;  %v1529_v44 = vpop.f32.mrf.mxu1  ;;  %v571_v36 = vld [vmem:[%s1911_s30 + $0xb8] sm:$0xff] }
 0x143   : > { %v870_v45 = vadd.f32 %v1480_v41, %v549_v38  ;;  %v886_v46 = vadd.f32 %v1528_v42, %v565_v39 }
 0x144   : > { %v1482_v48 = vpop.f32.mrf.mxu0  ;;  %v1530_v50 = vpop.f32.mrf.mxu1 }
 0x145   : > { %903 = vst.msk [vmem:[%s1911_s30 + $0x8] sm:$0xff] %vm901_vm1, %v870_v45  ;;  %919 = vst.msk [vmem:[%s1911_s30 + $0x88] sm:$0xff] %vm901_vm1, %v886_v46  ;;  %v1483_v51 = vadd.f32 %v1482_v48, %v1481_v43  ;;  %v1531_v52 = vadd.f32 %v1530_v50, %v1529_v44  ;;  %v556_v43 = vld [vmem:[%s1911_s30 + $0x40] sm:$0xff] }
 0x146   : > { %v1484_v53 = vpop.f32.mrf.mxu0  ;;  %v1532_v54 = vpop.f32.mrf.mxu1  ;;  %v572_v45 = vld [vmem:[%s1911_s30 + $0xc0] sm:$0xff] }
 0x147   : > { %v871_v55 = vadd.f32 %v1483_v51, %v550_v47  ;;  %v887_v56 = vadd.f32 %v1531_v52, %v566_v49 }
 0x148   : > { %v1485_v58 = vpop.f32.mrf.mxu0  ;;  %v1533_v60 = vpop.f32.mrf.mxu1 }
 0x149   : > { %904 = vst.msk [vmem:[%s1911_s30 + $0x10] sm:$0xff] %vm901_vm1, %v871_v55  ;;  %920 = vst.msk [vmem:[%s1911_s30 + $0x90] sm:$0xff] %vm901_vm1, %v887_v56  ;;  %v1486_v61 = vadd.f32 %v1485_v58, %v1484_v53  ;;  %v1534_v62 = vadd.f32 %v1533_v60, %v1532_v54  ;;  %v557_v53 = vld [vmem:[%s1911_s30 + $0x48] sm:$0xff] }
 0x14a   : > { %v1487_v63 = vpop.f32.mrf.mxu0  ;;  %v1535_v0 = vpop.f32.mrf.mxu1  ;;  %v573_v55 = vld [vmem:[%s1911_s30 + $0xc8] sm:$0xff] }
 0x14b   : > { %v872_v1 = vadd.f32 %v1486_v61, %v551_v57  ;;  %v888_v2 = vadd.f32 %v1534_v62, %v567_v59 }
 0x14c   : > { %v1488_v4 = vpop.f32.mrf.mxu0  ;;  %v1536_v6 = vpop.f32.mrf.mxu1 }
 0x14d   : > { %905 = vst.msk [vmem:[%s1911_s30 + $0x18] sm:$0xff] %vm901_vm1, %v872_v1  ;;  %921 = vst.msk [vmem:[%s1911_s30 + $0x98] sm:$0xff] %vm901_vm1, %v888_v2  ;;  %v1489_v8 = vadd.f32 %v1488_v4, %v1487_v63  ;;  %v1537_v9 = vadd.f32 %v1536_v6, %v1535_v0  ;;  %v558_v63 = vld [vmem:[%s1911_s30 + $0x50] sm:$0xff] }
 0x14e   : > { %v1490_v10 = vpop.f32.mrf.mxu0  ;;  %v1538_v11 = vpop.f32.mrf.mxu1  ;;  %v574_v1 = vld [vmem:[%s1911_s30 + $0xd0] sm:$0xff] }
 0x14f   : > { %v873_v12 = vadd.f32 %v1489_v8, %v552_v3  ;;  %v889_v13 = vadd.f32 %v1537_v9, %v568_v5 }
 0x150   : > { %v1491_v16 = vpop.f32.mrf.mxu0  ;;  %v1539_v18 = vpop.f32.mrf.mxu1 }
 0x151   : > { %906 = vst.msk [vmem:[%s1911_s30 + $0x20] sm:$0xff] %vm901_vm1, %v873_v12  ;;  %922 = vst.msk [vmem:[%s1911_s30 + $0xa0] sm:$0xff] %vm901_vm1, %v889_v13  ;;  %v1492_v19 = vadd.f32 %v1491_v16, %v1490_v10  ;;  %v1540_v20 = vadd.f32 %v1539_v18, %v1538_v11  ;;  %v559_v10 = vld [vmem:[%s1911_s30 + $0x58] sm:$0xff] }
 0x152   : > { %v1493_v21 = vpop.f32.mrf.mxu0  ;;  %v1541_v22 = vpop.f32.mrf.mxu1  ;;  %v575_v12 = vld [vmem:[%s1911_s30 + $0xd8] sm:$0xff] }
 0x153   : > { %v874_v23 = vadd.f32 %v1492_v19, %v553_v15  ;;  %v890_v25 = vadd.f32 %v1540_v20, %v569_v17 }
 0x154   : > { %v1494_v27 = vpop.f32.mrf.mxu0  ;;  %v1542_v14 = vpop.f32.mrf.mxu1 }
 0x155   : > { %907 = vst.msk [vmem:[%s1911_s30 + $0x28] sm:$0xff] %vm901_vm1, %v874_v23  ;;  %923 = vst.msk [vmem:[%s1911_s30 + $0xa8] sm:$0xff] %vm901_vm1, %v890_v25  ;;  %v1495_v24 = vadd.f32 %v1494_v27, %v1493_v21  ;;  %v1543_v28 = vadd.f32 %v1542_v14, %v1541_v22  ;;  %v560_v21 = vld [vmem:[%s1911_s30 + $0x60] sm:$0xff] }
 0x156   : > { %v1496_v29 = vpop.f32.mrf.mxu0  ;;  %v1544_v31 = vpop.f32.mrf.mxu1  ;;  %v576_v23 = vld [vmem:[%s1911_s30 + $0xe0] sm:$0xff] }
 0x157   : > { %v875_v32 = vadd.f32 %v1495_v24, %v554_v26  ;;  %v891_v34 = vadd.f32 %v1543_v28, %v570_v7 }
 0x158   : > { %v1497_v35 = vpop.f32.mrf.mxu0  ;;  %v1545_v37 = vpop.f32.mrf.mxu1 }
 0x159   : > { %908 = vst.msk [vmem:[%s1911_s30 + $0x30] sm:$0xff] %vm901_vm1, %v875_v32  ;;  %924 = vst.msk [vmem:[%s1911_s30 + $0xb0] sm:$0xff] %vm901_vm1, %v891_v34  ;;  %v1498_v38 = vadd.f32 %v1497_v35, %v1496_v29  ;;  %v1546_v30 = vadd.f32 %v1545_v37, %v1544_v31  ;;  %v561_v29 = vld [vmem:[%s1911_s30 + $0x68] sm:$0xff] }
 0x15a   : > { %v1499_v39 = vpop.f32.mrf.mxu0  ;;  %v1547_v40 = vpop.f32.mrf.mxu1  ;;  %v577_v32 = vld [vmem:[%s1911_s30 + $0xe8] sm:$0xff] }
 0x15b   : > { %v876_v41 = vadd.f32 %v1498_v38, %v555_v33  ;;  %v892_v42 = vadd.f32 %v1546_v30, %v571_v36 }
 0x15c   : > { %v1500_v44 = vpop.f32.mrf.mxu0  ;;  %v1548_v46 = vpop.f32.mrf.mxu1 }
 0x15d   : > { %909 = vst.msk [vmem:[%s1911_s30 + $0x38] sm:$0xff] %vm901_vm1, %v876_v41  ;;  %925 = vst.msk [vmem:[%s1911_s30 + $0xb8] sm:$0xff] %vm901_vm1, %v892_v42  ;;  %v1501_v47 = vadd.f32 %v1500_v44, %v1499_v39  ;;  %v1549_v48 = vadd.f32 %v1548_v46, %v1547_v40  ;;  %v562_v39 = vld [vmem:[%s1911_s30 + $0x70] sm:$0xff] }
 0x15e   : > { %v1502_v49 = vpop.f32.mrf.mxu0  ;;  %v1550_v50 = vpop.f32.mrf.mxu1  ;;  %v578_v41 = vld [vmem:[%s1911_s30 + $0xf0] sm:$0xff] }
 0x15f   : > { %v877_v51 = vadd.f32 %v1501_v47, %v556_v43  ;;  %v893_v52 = vadd.f32 %v1549_v48, %v572_v45 }
 0x160   : > { %v1503_v54 = vpop.f32.mrf.mxu0  ;;  %v1551_v56 = vpop.f32.mrf.mxu1 }
 0x161   : > { %910 = vst.msk [vmem:[%s1911_s30 + $0x40] sm:$0xff] %vm901_vm1, %v877_v51  ;;  %926 = vst.msk [vmem:[%s1911_s30 + $0xc0] sm:$0xff] %vm901_vm1, %v893_v52  ;;  %v1504_v57 = vadd.f32 %v1503_v54, %v1502_v49  ;;  %v1552_v58 = vadd.f32 %v1551_v56, %v1550_v50  ;;  %v563_v49 = vld [vmem:[%s1911_s30 + $0x78] sm:$0xff] }
 0x162   : > { %v1505_v59 = vpop.f32.mrf.mxu0  ;;  %v1553_v60 = vpop.f32.mrf.mxu1  ;;  %v579_v51 = vld [vmem:[%s1911_s30 + $0xf8] sm:$0xff] }
 0x163   : > { %v878_v61 = vadd.f32 %v1504_v57, %v557_v53  ;;  %v894_v62 = vadd.f32 %v1552_v58, %v573_v55 }
 0x164   : > { %v1506_v0 = vpop.f32.mrf.mxu0  ;;  %v1554_v2 = vpop.f32.mrf.mxu1 }
 0x165   : > { %911 = vst.msk [vmem:[%s1911_s30 + $0x48] sm:$0xff] %vm901_vm1, %v878_v61  ;;  %927 = vst.msk [vmem:[%s1911_s30 + $0xc8] sm:$0xff] %vm901_vm1, %v894_v62  ;;  %v1507_v3 = vadd.f32 %v1506_v0, %v1505_v59  ;;  %v1555_v4 = vadd.f32 %v1554_v2, %v1553_v60 }
 0x166   : > { %v1508_v5 = vpop.f32.mrf.mxu0  ;;  %v1556_v6 = vpop.f32.mrf.mxu1 }
 0x167   : > { %v879_v8 = vadd.f32 %v1507_v3, %v558_v63  ;;  %v895_v9 = vadd.f32 %v1555_v4, %v574_v1 }
 0x168   : > { %v1509_v11 = vpop.f32.mrf.mxu0  ;;  %v1557_v13 = vpop.f32.mrf.mxu1 }
 0x169   : > { %912 = vst.msk [vmem:[%s1911_s30 + $0x50] sm:$0xff] %vm901_vm1, %v879_v8  ;;  %928 = vst.msk [vmem:[%s1911_s30 + $0xd0] sm:$0xff] %vm901_vm1, %v895_v9  ;;  %v1510_v15 = vadd.f32 %v1509_v11, %v1508_v5  ;;  %v1558_v16 = vadd.f32 %v1557_v13, %v1556_v6 }
 0x16a   : > { %v1511_v17 = vpop.f32.mrf.mxu0  ;;  %v1559_v18 = vpop.f32.mrf.mxu1 }
 0x16b   : > { %v880_v19 = vadd.f32 %v1510_v15, %v559_v10  ;;  %v896_v20 = vadd.f32 %v1558_v16, %v575_v12 }
 0x16c   : > { %v1512_v22 = vpop.f32.mrf.mxu0  ;;  %v1560_v25 = vpop.f32.mrf.mxu1 }
 0x16d   : > { %913 = vst.msk [vmem:[%s1911_s30 + $0x58] sm:$0xff] %vm901_vm1, %v880_v19  ;;  %929 = vst.msk [vmem:[%s1911_s30 + $0xd8] sm:$0xff] %vm901_vm1, %v896_v20  ;;  %v1513_v26 = vadd.f32 %v1512_v22, %v1511_v17  ;;  %v1561_v27 = vadd.f32 %v1560_v25, %v1559_v18 }
 0x16e   : > { %v1514_v7 = vpop.f32.mrf.mxu0  ;;  %v1562_v14 = vpop.f32.mrf.mxu1 }
 0x16f   : > { %v881_v24 = vadd.f32 %v1513_v26, %v560_v21  ;;  %v897_v28 = vadd.f32 %v1561_v27, %v576_v23 }
 0x170   : > { %v1515_v31 = vpop.f32.mrf.mxu0  ;;  %v1563_v34 = vpop.f32.mrf.mxu1 }
 0x171   : > { %914 = vst.msk [vmem:[%s1911_s30 + $0x60] sm:$0xff] %vm901_vm1, %v881_v24  ;;  %930 = vst.msk [vmem:[%s1911_s30 + $0xe0] sm:$0xff] %vm901_vm1, %v897_v28  ;;  %v1516_v33 = vadd.f32 %v1515_v31, %v1514_v7  ;;  %v1564_v35 = vadd.f32 %v1563_v34, %v1562_v14 }
 0x172   : > { %v1517_v36 = vpop.f32.mrf.mxu0  ;;  %v1565_v37 = vpop.f32.mrf.mxu1 }
 0x173   : > { %v882_v38 = vadd.f32 %v1516_v33, %v561_v29  ;;  %v898_v30 = vadd.f32 %v1564_v35, %v577_v32 }
 0x174   : > { %v1518_v40 = vpop.f32.mrf.mxu0  ;;  %v1566_v42 = vpop.f32.mrf.mxu1 }
 0x175   : > { %915 = vst.msk [vmem:[%s1911_s30 + $0x68] sm:$0xff] %vm901_vm1, %v882_v38  ;;  %931 = vst.msk [vmem:[%s1911_s30 + $0xe8] sm:$0xff] %vm901_vm1, %v898_v30  ;;  %v1519_v43 = vadd.f32 %v1518_v40, %v1517_v36  ;;  %v1567_v44 = vadd.f32 %v1566_v42, %v1565_v37 }
 0x176   : > { %v1520_v45 = vpop.f32.mrf.mxu0  ;;  %v1568_v46 = vpop.f32.mrf.mxu1 }
 0x177   : > { %v883_v47 = vadd.f32 %v1519_v43, %v562_v39  ;;  %v899_v48 = vadd.f32 %v1567_v44, %v578_v41 }
 0x178   : > { %v1521_v50 = vpop.f32.mrf.mxu0  ;;  %v1569_v52 = vpop.f32.mrf.mxu1 }
 0x179   : > { %916 = vst.msk [vmem:[%s1911_s30 + $0x70] sm:$0xff] %vm901_vm1, %v883_v47  ;;  %932 = vst.msk [vmem:[%s1911_s30 + $0xf0] sm:$0xff] %vm901_vm1, %v899_v48  ;;  %v1522_v53 = vadd.f32 %v1521_v50, %v1520_v45  ;;  %v1570_v54 = vadd.f32 %v1569_v52, %v1568_v46 }
 0x17b   : > { %v884_v55 = vadd.f32 %v1522_v53, %v563_v49  ;;  %v900_v56 = vadd.f32 %v1570_v54, %v579_v51 }
 0x17d   : > { %917 = vst.msk [vmem:[%s1911_s30 + $0x78] sm:$0xff] %vm901_vm1, %v884_v55  ;;  %933 = vst.msk [vmem:[%s1911_s30 + $0xf8] sm:$0xff] %vm901_vm1, %v900_v56 }
 0x17e PF: > { %940 = sbr.rel (!%p1884_p5) target bundleno = 440 (0x1b8), region = 40  ;;  %s941_s13 = sld [smem:[#allocation3 + %s1877_s2]] (%p1884_p5) }
 0x184   : > { %s1440_s14 = sshll.u32 %s941_s13, 5  ;;  %s1456_s16 = sshll.u32 %s941_s13, 8 }
 0x185   : > { %s943_s17 = ssub.s32 38, %s1440_s14  ;;  %s2272_s20 = scalar_lea.vmem %s2407_s5, %s1456_s16  }
 0x186   : > { %p944_p1 = scmp.lt.s32.totalorder %s943_s17, 32 }
 0x188   : > { %s2426_s17 = smov (!%p944_p1, %s943_s17), 32 }
 0x189   : > { %s1441_s21 = sshll.u32 %s2426_s17, 7 }
 0x18a   : > { %p1444_p2 = scmp.eq.s32.totalorder %s1441_s21, 0 }
 0x18b   : > { %s2278_s12 = sshrl.u32 (!%p1444_p2), %s2426_s17, 5 }
 0x18c   : > { %952 = sbr.rel (%p1444_p2) target bundleno = 440 (0x1b8), region = 44  ;;  %p1445_p3 = scmp.le.s32.totalorder (!%p1444_p2), %s2278_s12, 0 }
 0x191   : > { %1234 = sbr.rel (%p1445_p3) target bundleno = 423 (0x1a7), region = 123  ;;  %s2411_s2 = smov (!%p1445_p3), %s2272_s20 }
 0x192   : > { %s2412_s22 = smov (!%p1445_p3), %s1911_s30  ;;  %s2287_s23 = smov (!%p1445_p3), 0  }
 0x193   : > { %s2289_s24 = smov (!%p1445_p3), 0  }
 0x196 LB: >> { %v1077_v57 = vld [vmem:[%s1796_s22] sm:$0xff]  ;;  %v1079_v58 = vld [vmem:[%s1796_s22 + $0x8] sm:$0xff]  ;;  %v1081_v59 = vld [vmem:[%s1796_s22 + $0x10] sm:$0xff]  ;;  %s1141_s25 = sadd.s32 1, %s1800_s23  ;;  %s1071_s24 = sadd.s32 1, %s1804_s24   ;;  %s1804_s24 = sphi %s2289_s24, %s1071_s24   ;;  %s1800_s23 = sphi %s2287_s23, %s2415_s23   ;;  %s1796_s22 = sphi %s2412_s22, %s2414_s22   ;;  %s1792_s2 = sphi %s2411_s2, %s2413_s2  }
 0x197   : >> { %1078 = vst [vmem:[%s1792_s2] sm:$0xff] %v1077_v57  ;;  %1080 = vst [vmem:[%s1792_s2 + $0x8] sm:$0xff] %v1079_v58  ;;  %v1083_v60 = vld [vmem:[%s1796_s22 + $0x18] sm:$0xff]  ;;  %v1085_v61 = vld [vmem:[%s1796_s22 + $0x20] sm:$0xff]  ;;  %p1142_p4 = scmp.ge.s32.totalorder %s1141_s25, %s2278_s12  ;;  %p1070_p5 = scmp.ge.s32.totalorder %s1071_s24, %s2278_s12 }
 0x198   : >> { %1082 = vst [vmem:[%s1792_s2 + $0x10] sm:$0xff] %v1081_v59  ;;  %v1087_v62 = vld [vmem:[%s1796_s22 + $0x28] sm:$0xff]  ;;  %1084 = vst [vmem:[%s1792_s2 + $0x18] sm:$0xff] %v1083_v60  ;;  %v1089_v63 = vld [vmem:[%s1796_s22 + $0x30] sm:$0xff] }
 0x199   : >> { %1086 = vst [vmem:[%s1792_s2 + $0x20] sm:$0xff] %v1085_v61  ;;  %1088 = vst [vmem:[%s1792_s2 + $0x28] sm:$0xff] %v1087_v62  ;;  %v1091_v0 = vld [vmem:[%s1796_s22 + $0x38] sm:$0xff]  ;;  %v1093_v1 = vld [vmem:[%s1796_s22 + $0x40] sm:$0xff]  ;;  %s2428_s25 = smov (%p1142_p4, %s1141_s25), 0 }
 0x19a   : >> { %1090 = vst [vmem:[%s1792_s2 + $0x30] sm:$0xff] %v1089_v63  ;;  %1092 = vst [vmem:[%s1792_s2 + $0x38] sm:$0xff] %v1091_v0  ;;  %v1095_v2 = vld [vmem:[%s1796_s22 + $0x48] sm:$0xff]  ;;  %v1097_v3 = vld [vmem:[%s1796_s22 + $0x50] sm:$0xff]  ;;  %s1446_s26 = sshll.u32 %s2428_s25, 8  ;;  %s2415_s23 = smov %s2428_s25 }
 0x19b   : >> { %1094 = vst [vmem:[%s1792_s2 + $0x40] sm:$0xff] %v1093_v1  ;;  %v1099_v4 = vld [vmem:[%s1796_s22 + $0x58] sm:$0xff]  ;;  %1096 = vst [vmem:[%s1792_s2 + $0x48] sm:$0xff] %v1095_v2  ;;  %v1101_v5 = vld [vmem:[%s1796_s22 + $0x60] sm:$0xff]  ;;  %s2345_s0 = scalar_lea.vmem %s1911_s30, %s1446_s26 [#allocation6]   ;;  %s1147_s1 = scalar_lea.vmem %s2272_s20, %s1446_s26  }
 0x19c   : >> { %1098 = vst [vmem:[%s1792_s2 + $0x50] sm:$0xff] %v1097_v3  ;;  %1100 = vst [vmem:[%s1792_s2 + $0x58] sm:$0xff] %v1099_v4  ;;  %v1103_v6 = vld [vmem:[%s1796_s22 + $0x68] sm:$0xff]  ;;  %v1105_v8 = vld [vmem:[%s1796_s22 + $0x70] sm:$0xff] }
 0x19d   : >> { %1102 = vst [vmem:[%s1792_s2 + $0x60] sm:$0xff] %v1101_v5  ;;  %1104 = vst [vmem:[%s1792_s2 + $0x68] sm:$0xff] %v1103_v6  ;;  %v1107_v9 = vld [vmem:[%s1796_s22 + $0x78] sm:$0xff]  ;;  %v1109_v10 = vld [vmem:[%s1796_s22 + $0x80] sm:$0xff] }
 0x19e   : >> { %1106 = vst [vmem:[%s1792_s2 + $0x70] sm:$0xff] %v1105_v8  ;;  %v1111_v11 = vld [vmem:[%s1796_s22 + $0x88] sm:$0xff]  ;;  %1108 = vst [vmem:[%s1792_s2 + $0x78] sm:$0xff] %v1107_v9  ;;  %v1113_v12 = vld [vmem:[%s1796_s22 + $0x90] sm:$0xff] }
 0x19f   : >> { %1110 = vst [vmem:[%s1792_s2 + $0x80] sm:$0xff] %v1109_v10  ;;  %1112 = vst [vmem:[%s1792_s2 + $0x88] sm:$0xff] %v1111_v11  ;;  %v1115_v13 = vld [vmem:[%s1796_s22 + $0x98] sm:$0xff]  ;;  %v1117_v15 = vld [vmem:[%s1796_s22 + $0xa0] sm:$0xff] }
 0x1a0   : >> { %1114 = vst [vmem:[%s1792_s2 + $0x90] sm:$0xff] %v1113_v12  ;;  %1116 = vst [vmem:[%s1792_s2 + $0x98] sm:$0xff] %v1115_v13  ;;  %v1119_v16 = vld [vmem:[%s1796_s22 + $0xa8] sm:$0xff]  ;;  %v1121_v17 = vld [vmem:[%s1796_s22 + $0xb0] sm:$0xff] }
 0x1a1   : >> { %1118 = vst [vmem:[%s1792_s2 + $0xa0] sm:$0xff] %v1117_v15  ;;  %v1123_v18 = vld [vmem:[%s1796_s22 + $0xb8] sm:$0xff]  ;;  %1120 = vst [vmem:[%s1792_s2 + $0xa8] sm:$0xff] %v1119_v16  ;;  %v1125_v19 = vld [vmem:[%s1796_s22 + $0xc0] sm:$0xff] }
 0x1a2   : >> { %1122 = vst [vmem:[%s1792_s2 + $0xb0] sm:$0xff] %v1121_v17  ;;  %1124 = vst [vmem:[%s1792_s2 + $0xb8] sm:$0xff] %v1123_v18  ;;  %v1127_v20 = vld [vmem:[%s1796_s22 + $0xc8] sm:$0xff]  ;;  %v1129_v21 = vld [vmem:[%s1796_s22 + $0xd0] sm:$0xff]  ;;  %1073 = sbr.rel (!%p1070_p5) target bundleno = 406 (0x196), region = 129 }
 0x1a3   : >> { %1126 = vst [vmem:[%s1792_s2 + $0xc0] sm:$0xff] %v1125_v19  ;;  %1128 = vst [vmem:[%s1792_s2 + $0xc8] sm:$0xff] %v1127_v20  ;;  %v1131_v22 = vld [vmem:[%s1796_s22 + $0xd8] sm:$0xff]  ;;  %v1133_v23 = vld [vmem:[%s1796_s22 + $0xe0] sm:$0xff] }
 0x1a4   : >> { %1130 = vst [vmem:[%s1792_s2 + $0xd0] sm:$0xff] %v1129_v21  ;;  %v1135_v25 = vld [vmem:[%s1796_s22 + $0xe8] sm:$0xff]  ;;  %1132 = vst [vmem:[%s1792_s2 + $0xd8] sm:$0xff] %v1131_v22  ;;  %v1137_v26 = vld [vmem:[%s1796_s22 + $0xf0] sm:$0xff] }
 0x1a5   : >> { %1134 = vst [vmem:[%s1792_s2 + $0xe0] sm:$0xff] %v1133_v23  ;;  %1136 = vst [vmem:[%s1792_s2 + $0xe8] sm:$0xff] %v1135_v25  ;;  %v1139_v27 = vld [vmem:[%s1796_s22 + $0xf8] sm:$0xff]  ;;  %s2414_s22 = smov %s2345_s0 }
 0x1a6   : >> { %1138 = vst [vmem:[%s1792_s2 + $0xf0] sm:$0xff] %v1137_v26  ;;  %1140 = vst [vmem:[%s1792_s2 + $0xf8] sm:$0xff] %v1139_v27  ;;  %s2413_s2 = smov %s1147_s1 }
 0x1a7 PF: > { %s2386_s27 = sand.u32 31, %s2426_s17   ;;  %s1457_s28 = sshll.u32 %s2278_s12, 8 }
 0x1a8   : > { %s1152_s29 = scalar_lea.vmem %s1911_s30, %s1457_s28 [#allocation6]   ;;  %s1154_s6 = scalar_lea.vmem %s2272_s20, %s1457_s28  }
 0x1a9   : > { %p1451_p6 = scmp.le.s32.totalorder %s2386_s27, 0 }
 0x1aa   : > { %s1806_s8 = smov (!%p1451_p6), %s1154_s6   ;;  %s1810_s10 = smov (!%p1451_p6), %s1152_s29  }
 0x1ab   : > { %1248 = sbr.rel (%p1451_p6) target bundleno = 440 (0x1b8), region = 134  ;;  %s1814_s11 = smov (!%p1451_p6), 0  }
 0x1ac   : > { %s1818_s13 = smov (!%p1451_p6), 0  }
 0x1b0 LB: >> { %v1164_v7 = vld [vmem:[%s1812_s10] sm:$0xff]  ;;  %s1166_s14 = sadd.s32 1, %s1816_s11  ;;  %s1158_s13 = sadd.s32 1, %s1820_s13   ;;  %s1820_s13 = sphi %s1818_s13, %s1158_s13   ;;  %s1816_s11 = sphi %s1814_s11, %s1815_s11   ;;  %s1812_s10 = sphi %s1810_s10, %s1171_s10   ;;  %s1808_s8 = sphi %s1806_s8, %s1172_s8  }
 0x1b1   : >> { %1165 = vst [vmem:[%s1808_s8] sm:$0xff] %v1164_v7  ;;  %p1167_p7 = scmp.ge.s32.totalorder %s1166_s14, %s2386_s27  ;;  %p1157_p8 = scmp.ge.s32.totalorder %s1158_s13, %s2386_s27 }
 0x1b3   : >> { %s2430_s14 = smov (%p1167_p7, %s1166_s14), 0  ;;  %1160 = sbr.rel (!%p1157_p8) target bundleno = 432 (0x1b0), region = 140 }
 0x1b4   : >> { %s1452_s30 = sshll.u32 %s2430_s14, 3  ;;  %s1815_s11 = smov %s2430_s14  }
 0x1b5   : >> { %s1171_s10 = scalar_lea.vmem %s1152_s29, %s1452_s30 [#allocation6]   ;;  %s1172_s8 = scalar_lea.vmem %s1154_s6, %s1452_s30  }
 0x1b8 PF: > { %p26_p9 = scmp.ge.s32.totalorder %s1879_s9, 7   ;;  %s2416_s6 = smov %s1784_s7 }
 0x1b9   : > { %s2417_s7 = smov %s1890_s15  ;;  %s2418_s8 = smov %s1879_s9 }
 0x1ba   :  { %28 = sbr.rel (!%p26_p9) target bundleno = 37 (0x25), region = 151 }

// kernel: node_layer_forward.13
= control target key start
LH: loop header
LB: loop body
LE: loop exit
PB: predicated region body
PF: predicated region fallthrough
CT: control target
= control target key end

     0   :  { %v1100_v1 = vmov 0.0   ;;  %vm1101_vm0 = vmmov 0   ;;  %vm174_vm1 = vcmask 261120   ;;  %s1704_s0 = inlined_call_operand.vmem [shape: bf16[300,32], index: 0, kind: input, shape index: {}]   ;;  %s1705_s1 = inlined_call_operand.vmem [shape: bf16[32,32], index: 1, kind: input, shape index: {}]   ;;  %s1706_s2 = inlined_call_operand.vmem [shape: f32[1,32], index: 2, kind: input, shape index: {}]   ;;  %s1707_s3 = inlined_call_operand.vmem [shape: f32[300,32], index: 3, kind: output, shape index: {0}]   ;;  %s1708_s4 = inlined_call_operand.hbm [shape: f32[1,2,32], index: 4, kind: output, shape index: {1}]  }
   0x1   :  { %v1057_v0 = vld [vmem:[%s1705_s1 + $0x8] sm:$0xff]   ;;  %970 = vmatprep.subr.bf16.mxu0 %v1100_v1  ;;  %1050 = vmatprep.subr.bf16.mxu1 %v1100_v1  ;;  %v1058_v2 = vld [vmem:[%s1705_s1] sm:$0xff]   ;;  %v1064_v4 = vld [vmem:[%s1704_s0 + $0x50] sm:$0xff]  }
   0x2   :  { %971 = vmatpush3.bf16.msra.mxu0 %v1057_v0  ;;  %974 = vmatprep.mubr.msk.bf16.mxu0 %vm1101_vm0, %v1100_v1  ;;  %v1059_v3 = vld [vmem:[%s1704_s0] sm:$0xff]   ;;  %v1060_v5 = vld [vmem:[%s1704_s0 + $0x8] sm:$0xff]   ;;  %v1066_v6 = vld [vmem:[%s1704_s0 + $0x58] sm:$0xff]  }
   0x3   :  { %972 = vmatprep.subr.bf16.mxu0 %v1100_v1  ;;  %1052 = vmatpush3.bf16.msra.mxu1 %v1057_v0  ;;  %v1061_v7 = vld [vmem:[%s1704_s0 + $0x10] sm:$0xff]  }
   0x4   :  { %1051 = vmatprep.subr.bf16.mxu1 %v1100_v1  ;;  %1014 = vmatprep.mubr.msk.bf16.mxu1 %vm1101_vm0, %v1100_v1 }
   0x6   :  { %973 = vmatpush3.bf16.msra.mxu0 %v1058_v2 }
   0x7   :  { %1053 = vmatpush3.bf16.msra.mxu1 %v1058_v2 }
   0x9   :  { %975 = vmatmul.mubr.msk.bf16.vlgmr.msra.gmra.mxu0 %vm174_vm1, %v1059_v3 }
   0xa   :  { %978 = vmatprep.mubr.msk.bf16.mxu0 %vm1101_vm0, %v1100_v1  ;;  %1015 = vmatmul.mubr.msk.bf16.vlgmr.msra.gmra.mxu1 %vm174_vm1, %v1064_v4 }
   0xb   :  { %1018 = vmatprep.mubr.msk.bf16.mxu1 %vm1101_vm0, %v1100_v1 }
  0x11   :  { %979 = vmatmul.mubr.msk.bf16.gmra.mxu0 %vm174_vm1, %v1060_v5 }
  0x12   :  { %982 = vmatprep.mubr.msk.bf16.mxu0 %vm1101_vm0, %v1100_v1  ;;  %1019 = vmatmul.mubr.msk.bf16.gmra.mxu1 %vm174_vm1, %v1066_v6 }
  0x13   :  { %1022 = vmatprep.mubr.msk.bf16.mxu1 %vm1101_vm0, %v1100_v1 }
  0x14   :  { %10 = vsyncpa [#allocation3], 0  ;;  %v1068_v8 = vld [vmem:[%s1704_s0 + $0x60] sm:$0xff]   ;;  %v1062_v9 = vld [vmem:[%s1704_s0 + $0x18] sm:$0xff]   ;;  %vm886_vm3 = vcmask 1040384   ;;  %vm888_vm4 = vcmask 254976  }
  0x15   :  { %v1070_v10 = vld [vmem:[%s1704_s0 + $0x68] sm:$0xff]   ;;  %v1063_v11 = vld [vmem:[%s1704_s0 + $0x20] sm:$0xff]   ;;  %v1072_v12 = vld [vmem:[%s1704_s0 + $0x70] sm:$0xff]  }
  0x16   :  { %v1065_v13 = vld [vmem:[%s1704_s0 + $0x28] sm:$0xff]   ;;  %v1074_v14 = vld [vmem:[%s1704_s0 + $0x78] sm:$0xff]   ;;  %v1067_v15 = vld [vmem:[%s1704_s0 + $0x30] sm:$0xff]  }
  0x17   :  { %v1075_v16 = vld [vmem:[%s1704_s0 + $0x80] sm:$0xff]   ;;  %v1069_v17 = vld [vmem:[%s1704_s0 + $0x38] sm:$0xff]   ;;  %v1076_v18 = vld [vmem:[%s1704_s0 + $0x88] sm:$0xff]  }
  0x18   :  { %v1071_v19 = vld [vmem:[%s1704_s0 + $0x40] sm:$0xff]   ;;  %v1077_v20 = vld [vmem:[%s1704_s0 + $0x90] sm:$0xff]   ;;  %v1073_v21 = vld [vmem:[%s1704_s0 + $0x48] sm:$0xff]  }
  0x19   :  { %983 = vmatmul.mubr.msk.bf16.gmra.mxu0 %vm174_vm1, %v1061_v7  ;;  %v1255_v22 = vld [vmem:[%s1706_s2] ss:$0 sm:$0xff] }
  0x1a   :  { %986 = vmatprep.mubr.msk.bf16.mxu0 %vm1101_vm0, %v1100_v1  ;;  %1023 = vmatmul.mubr.msk.bf16.gmra.mxu1 %vm174_vm1, %v1068_v8 }
  0x1b   :  { %1026 = vmatprep.mubr.msk.bf16.mxu1 %vm1101_vm0, %v1100_v1 }
  0x21   :  { %987 = vmatmul.mubr.msk.bf16.gmra.mxu0 %vm174_vm1, %v1062_v9 }
  0x22   :  { %990 = vmatprep.mubr.msk.bf16.mxu0 %vm1101_vm0, %v1100_v1  ;;  %1027 = vmatmul.mubr.msk.bf16.gmra.mxu1 %vm174_vm1, %v1070_v10 }
  0x23   :  { %1030 = vmatprep.mubr.msk.bf16.mxu1 %vm1101_vm0, %v1100_v1 }
  0x29   :  { %991 = vmatmul.mubr.msk.bf16.gmra.mxu0 %vm174_vm1, %v1063_v11 }
  0x2a   :  { %994 = vmatprep.mubr.msk.bf16.mxu0 %vm1101_vm0, %v1100_v1  ;;  %1031 = vmatmul.mubr.msk.bf16.gmra.mxu1 %vm174_vm1, %v1072_v12 }
  0x2b   :  { %1034 = vmatprep.mubr.msk.bf16.mxu1 %vm1101_vm0, %v1100_v1 }
  0x31   :  { %995 = vmatmul.mubr.msk.bf16.gmra.mxu0 %vm174_vm1, %v1065_v13 }
  0x32   :  { %998 = vmatprep.mubr.msk.bf16.mxu0 %vm1101_vm0, %v1100_v1  ;;  %1035 = vmatmul.mubr.msk.bf16.gmra.mxu1 %vm174_vm1, %v1074_v14 }
  0x33   :  { %1038 = vmatprep.mubr.msk.bf16.mxu1 %vm1101_vm0, %v1100_v1 }
  0x39   :  { %999 = vmatmul.mubr.msk.bf16.gmra.mxu0 %vm174_vm1, %v1067_v15 }
  0x3a   :  { %1002 = vmatprep.mubr.msk.bf16.mxu0 %vm1101_vm0, %v1100_v1  ;;  %1039 = vmatmul.mubr.msk.bf16.gmra.mxu1 %vm174_vm1, %v1075_v16 }
  0x3b   :  { %1042 = vmatprep.mubr.msk.bf16.mxu1 %vm1101_vm0, %v1100_v1 }
  0x41   :  { %1003 = vmatmul.mubr.msk.bf16.gmra.mxu0 %vm174_vm1, %v1069_v17 }
  0x42   :  { %1006 = vmatprep.mubr.msk.bf16.mxu0 %vm1101_vm0, %v1100_v1  ;;  %1043 = vmatmul.mubr.msk.bf16.gmra.mxu1 %vm174_vm1, %v1076_v18 }
  0x43   :  { %1046 = vmatprep.mubr.msk.bf16.mxu1 %vm1101_vm0, %v1100_v1 }
  0x49   :  { %1007 = vmatmul.mubr.msk.bf16.gmra.mxu0 %vm174_vm1, %v1071_v19 }
  0x4a   :  { %1010 = vmatprep.mubr.msk.bf16.mxu0 %vm1101_vm0, %v1100_v1  ;;  %1047 = vmatmul.mubr.msk.bf16.gmra.mxu1 %vm174_vm1, %v1077_v20 }
  0x51   :  { %1011 = vmatmul.mubr.msk.bf16.gmra.mxu0 %vm174_vm1, %v1073_v21 }
  0xc9   :  { %v266_v23 = vpop.f32.mrf.mxu0 }
  0xca   :  { %v1258_v24 = vadd.f32 %v1255_v22, %v266_v23  ;;  %v346_v25 = vpop.f32.mrf.mxu1 }
  0xcb   :  { %v976_v26 = vpop.f32.mrf.mxu0  ;;  %v1261_v27 = vadd.f32 %v1255_v22, %v346_v25 }
  0xcc   :  { %417 = vst.msk [vmem:[%s1707_s3] sm:$0xff] %vm174_vm1, %v1258_v24  ;;  %v1016_v28 = vpop.f32.mrf.mxu1  ;;  %v767_v20 = vmul.f32 %v1258_v24, %v1258_v24 }
  0xcd   :  { %v269_v29 = vpop.f32.mrf.mxu0  ;;  %437 = vst.msk [vmem:[%s1707_s3 + $0xa0] sm:$0xff] %vm174_vm1, %v1261_v27 }
  0xce   :  { %v1274_v30 = vadd.f32 %v1255_v22, %v269_v29  ;;  %v349_v31 = vpop.f32.mrf.mxu1 }
  0xcf   :  { %v977_v32 = vpop.f32.mrf.mxu0  ;;  %v1277_v33 = vadd.f32 %v1255_v22, %v349_v31 }
  0xd0   :  { %418 = vst.msk [vmem:[%s1707_s3 + $0x8] sm:$0xff] %vm174_vm1, %v1274_v30  ;;  %v1017_v34 = vpop.f32.mrf.mxu1  ;;  %v768_v18 = vmul.f32 %v1274_v30, %v1274_v30  ;;  %v687_v23 = vsel %vm174_vm1, %v1274_v30, 0.0  ;;  %v686_v32 = vsel %vm174_vm1, %v1258_v24, 0.0 }
  0xd1   :  { %v274_v35 = vpop.f32.mrf.mxu0  ;;  %438 = vst.msk [vmem:[%s1707_s3 + $0xa8] sm:$0xff] %vm174_vm1, %v1277_v33 }
  0xd2   :  { %v1290_v36 = vadd.f32 %v1255_v22, %v274_v35  ;;  %v354_v37 = vpop.f32.mrf.mxu1  ;;  %v806_v34 = vsel %vm174_vm1, %v768_v18, 0.0 }
  0xd3   :  { %v980_v38 = vpop.f32.mrf.mxu0  ;;  %v1293_v39 = vadd.f32 %v1255_v22, %v354_v37 }
  0xd4   :  { %419 = vst.msk [vmem:[%s1707_s3 + $0x10] sm:$0xff] %vm174_vm1, %v1290_v36  ;;  %v1020_v40 = vpop.f32.mrf.mxu1  ;;  %v769_v25 = vmul.f32 %v1290_v36, %v1290_v36  ;;  %v689_v35 = vsel %vm174_vm1, %v1290_v36, 0.0  ;;  %v805_v38 = vsel %vm174_vm1, %v767_v20, 0.0 }
  0xd5   :  { %v277_v41 = vpop.f32.mrf.mxu0  ;;  %439 = vst.msk [vmem:[%s1707_s3 + $0xb0] sm:$0xff] %vm174_vm1, %v1293_v39  ;;  %v688_v40 = vadd.f32 %v687_v23, %v686_v32 }
  0xd6   :  { %v1306_v42 = vadd.f32 %v1255_v22, %v277_v41  ;;  %v357_v43 = vpop.f32.mrf.mxu1  ;;  %v808_v24 = vsel %vm174_vm1, %v769_v25, 0.0 }
  0xd7   :  { %v981_v44 = vpop.f32.mrf.mxu0  ;;  %v1309_v45 = vadd.f32 %v1255_v22, %v357_v43 }
  0xd8   :  { %420 = vst.msk [vmem:[%s1707_s3 + $0x18] sm:$0xff] %vm174_vm1, %v1306_v42  ;;  %v1021_v46 = vpop.f32.mrf.mxu1  ;;  %v770_v30 = vmul.f32 %v1306_v42, %v1306_v42  ;;  %v691_v36 = vsel %vm174_vm1, %v1306_v42, 0.0 }
  0xd9   :  { %v282_v47 = vpop.f32.mrf.mxu0  ;;  %440 = vst.msk [vmem:[%s1707_s3 + $0xb8] sm:$0xff] %vm174_vm1, %v1309_v45 }
  0xda   :  { %v1322_v48 = vadd.f32 %v1255_v22, %v282_v47  ;;  %v362_v49 = vpop.f32.mrf.mxu1  ;;  %v807_v47 = vadd.f32 %v806_v34, %v805_v38 }
  0xdb   :  { %v984_v50 = vpop.f32.mrf.mxu0  ;;  %v1325_v51 = vadd.f32 %v1255_v22, %v362_v49  ;;  %v690_v49 = vadd.f32 %v689_v35, %v688_v40 }
  0xdc   :  { %421 = vst.msk [vmem:[%s1707_s3 + $0x20] sm:$0xff] %vm174_vm1, %v1322_v48  ;;  %v1024_v52 = vpop.f32.mrf.mxu1  ;;  %v771_v43 = vmul.f32 %v1322_v48, %v1322_v48 }
  0xdd   :  { %v285_v53 = vpop.f32.mrf.mxu0  ;;  %441 = vst.msk [vmem:[%s1707_s3 + $0xc0] sm:$0xff] %vm174_vm1, %v1325_v51 }
  0xde   :  { %v1338_v54 = vadd.f32 %v1255_v22, %v285_v53  ;;  %v365_v55 = vpop.f32.mrf.mxu1  ;;  %v810_v53 = vsel %vm174_vm1, %v770_v30, 0.0 }
  0xdf   :  { %v985_v56 = vpop.f32.mrf.mxu0  ;;  %v1341_v57 = vadd.f32 %v1255_v22, %v365_v55  ;;  %v693_v55 = vsel %vm174_vm1, %v1322_v48, 0.0  ;;  %v812_v48 = vsel %vm174_vm1, %v771_v43, 0.0 }
  0xe0   :  { %422 = vst.msk [vmem:[%s1707_s3 + $0x28] sm:$0xff] %vm174_vm1, %v1338_v54  ;;  %v1025_v58 = vpop.f32.mrf.mxu1  ;;  %v772_v42 = vmul.f32 %v1338_v54, %v1338_v54 }
  0xe1   :  { %v290_v59 = vpop.f32.mrf.mxu0  ;;  %442 = vst.msk [vmem:[%s1707_s3 + $0xc8] sm:$0xff] %vm174_vm1, %v1341_v57  ;;  %v809_v58 = vadd.f32 %v808_v24, %v807_v47 }
  0xe2   :  { %v1354_v60 = vadd.f32 %v1255_v22, %v290_v59  ;;  %v370_v61 = vpop.f32.mrf.mxu1  ;;  %v692_v59 = vadd.f32 %v691_v36, %v690_v49 }
  0xe3   :  { %v988_v62 = vpop.f32.mrf.mxu0  ;;  %v1357_v63 = vadd.f32 %v1255_v22, %v370_v61 }
  0xe4   :  { %423 = vst.msk [vmem:[%s1707_s3 + $0x30] sm:$0xff] %vm174_vm1, %v1354_v60  ;;  %v1028_v0 = vpop.f32.mrf.mxu1  ;;  %v695_v62 = vsel %vm174_vm1, %v1338_v54, 0.0 }
  0xe5   :  { %v293_v1 = vpop.f32.mrf.mxu0  ;;  %443 = vst.msk [vmem:[%s1707_s3 + $0xd0] sm:$0xff] %vm174_vm1, %v1357_v63  ;;  %v773_v0 = vmul.f32 %v1354_v60, %v1354_v60 }
  0xe6   :  { %v1370_v2 = vadd.f32 %v1255_v22, %v293_v1  ;;  %v373_v3 = vpop.f32.mrf.mxu1 }
  0xe7   :  { %v989_v4 = vpop.f32.mrf.mxu0  ;;  %v1373_v5 = vadd.f32 %v1255_v22, %v373_v3 }
  0xe8   :  { %424 = vst.msk [vmem:[%s1707_s3 + $0x38] sm:$0xff] %vm174_vm1, %v1370_v2  ;;  %v1029_v6 = vpop.f32.mrf.mxu1  ;;  %v811_v4 = vadd.f32 %v810_v53, %v809_v58  ;;  %v774_v54 = vmul.f32 %v1370_v2, %v1370_v2 }
  0xe9   :  { %v298_v7 = vpop.f32.mrf.mxu0  ;;  %444 = vst.msk [vmem:[%s1707_s3 + $0xd8] sm:$0xff] %vm174_vm1, %v1373_v5  ;;  %v694_v6 = vadd.f32 %v693_v55, %v692_v59 }
  0xea   :  { %v1386_v8 = vadd.f32 %v1255_v22, %v298_v7  ;;  %v378_v9 = vpop.f32.mrf.mxu1  ;;  %v818_v34 = vsel %vm174_vm1, %v774_v54, 0.0 }
  0xeb   :  { %v992_v10 = vpop.f32.mrf.mxu0  ;;  %v1389_v11 = vadd.f32 %v1255_v22, %v378_v9 }
  0xec   :  { %425 = vst.msk [vmem:[%s1707_s3 + $0x40] sm:$0xff] %vm174_vm1, %v1386_v8  ;;  %v1032_v12 = vpop.f32.mrf.mxu1  ;;  %v814_v10 = vsel %vm174_vm1, %v772_v42, 0.0  ;;  %v775_v20 = vmul.f32 %v1386_v8, %v1386_v8  ;;  %v701_v35 = vsel %vm174_vm1, %v1386_v8, 0.0 }
  0xed   :  { %v301_v13 = vpop.f32.mrf.mxu0  ;;  %445 = vst.msk [vmem:[%s1707_s3 + $0xe0] sm:$0xff] %vm174_vm1, %v1389_v11  ;;  %v697_v12 = vsel %vm174_vm1, %v1354_v60, 0.0  ;;  %v816_v60 = vsel %vm174_vm1, %v773_v0, 0.0 }
  0xee   :  { %v1402_v14 = vadd.f32 %v1255_v22, %v301_v13  ;;  %v381_v15 = vpop.f32.mrf.mxu1  ;;  %v820_v8 = vsel %vm174_vm1, %v775_v20, 0.0 }
  0xef   :  { %v993_v16 = vpop.f32.mrf.mxu0  ;;  %v1405_v17 = vadd.f32 %v1255_v22, %v381_v15  ;;  %v813_v15 = vadd.f32 %v812_v48, %v811_v4 }
  0xf0   :  { %426 = vst.msk [vmem:[%s1707_s3 + $0x48] sm:$0xff] %vm174_vm1, %v1402_v14  ;;  %v1033_v19 = vpop.f32.mrf.mxu1  ;;  %v696_v16 = vadd.f32 %v695_v62, %v694_v6 }
  0xf1   :  { %v306_v21 = vpop.f32.mrf.mxu0  ;;  %446 = vst.msk [vmem:[%s1707_s3 + $0xe8] sm:$0xff] %vm174_vm1, %v1405_v17  ;;  %v699_v19 = vsel %vm174_vm1, %v1370_v2, 0.0  ;;  %v815_v25 = vadd.f32 %v814_v10, %v813_v15  ;;  %v776_v2 = vmul.f32 %v1402_v14, %v1402_v14 }
  0xf2   :  { %v1426_v26 = vadd.f32 %v1255_v22, %v306_v21  ;;  %v386_v28 = vpop.f32.mrf.mxu1 }
  0xf3   :  { %v996_v29 = vpop.f32.mrf.mxu0  ;;  %v1429_v31 = vadd.f32 %v1255_v22, %v386_v28  ;;  %v698_v28 = vadd.f32 %v697_v12, %v696_v16  ;;  %v822_v53 = vsel %vm174_vm1, %v776_v2, 0.0 }
  0xf4   :  { %427 = vst.msk [vmem:[%s1707_s3 + $0x50] sm:$0xff] %vm174_vm1, %v1426_v26  ;;  %v1036_v37 = vpop.f32.mrf.mxu1  ;;  %v777_v24 = vmul.f32 %v1426_v26, %v1426_v26  ;;  %v705_v55 = vsel %vm174_vm1, %v1426_v26, 0.0 }
  0xf5   :  { %v309_v41 = vpop.f32.mrf.mxu0  ;;  %447 = vst.msk [vmem:[%s1707_s3 + $0xf0] sm:$0xff] %vm174_vm1, %v1429_v31  ;;  %v817_v37 = vadd.f32 %v816_v60, %v815_v25  ;;  %v700_v38 = vadd.f32 %v699_v19, %v698_v28 }
  0xf6   :  { %v1455_v44 = vadd.f32 %v1255_v22, %v309_v41  ;;  %v389_v46 = vpop.f32.mrf.mxu1  ;;  %v703_v41 = vsel %vm174_vm1, %v1402_v14, 0.0  ;;  %v824_v26 = vsel %vm174_vm1, %v777_v24, 0.0 }
  0xf7   :  { %v997_v50 = vpop.f32.mrf.mxu0  ;;  %v1458_v52 = vadd.f32 %v1255_v22, %v389_v46  ;;  %v819_v46 = vadd.f32 %v818_v34, %v817_v37  ;;  %v702_v47 = vadd.f32 %v701_v35, %v700_v38 }
  0xf8   :  { %428 = vst.msk [vmem:[%s1707_s3 + $0x58] sm:$0xff] %vm174_vm1, %v1455_v44  ;;  %v1037_v56 = vpop.f32.mrf.mxu1  ;;  %v778_v14 = vmul.f32 %v1455_v44, %v1455_v44 }
  0xf9   :  { %v314_v61 = vpop.f32.mrf.mxu0  ;;  %448 = vst.msk [vmem:[%s1707_s3 + $0xf8] sm:$0xff] %vm174_vm1, %v1458_v52  ;;  %v821_v56 = vadd.f32 %v820_v8, %v819_v46  ;;  %v704_v58 = vadd.f32 %v703_v41, %v702_v47 }
  0xfa   :  { %v315_v1 = vadd.f32 %v1255_v22, %v314_v61  ;;  %v394_v3 = vpop.f32.mrf.mxu1  ;;  %v707_v61 = vsel %vm174_vm1, %v1455_v44, 0.0  ;;  %v826_v10 = vsel %vm174_vm1, %v778_v14, 0.0 }
  0xfb   :  { %v1000_v7 = vpop.f32.mrf.mxu0  ;;  %v1482_v9 = vadd.f32 %v1255_v22, %v394_v3  ;;  %v823_v3 = vadd.f32 %v822_v53, %v821_v56  ;;  %v706_v4 = vadd.f32 %v705_v55, %v704_v58 }
  0xfc   :  { %429 = vst.msk [vmem:[%s1707_s3 + $0x60] sm:$0xff] %vm174_vm1, %v315_v1  ;;  %v1040_v13 = vpop.f32.mrf.mxu1  ;;  %v779_v48 = vmul.f32 %v315_v1, %v315_v1  ;;  %v709_v12 = vsel %vm174_vm1, %v315_v1, 0.0 }
  0xfd   :  { %v317_v18 = vpop.f32.mrf.mxu0  ;;  %449 = vst.msk [vmem:[%s1707_s3 + $0x100] sm:$0xff] %vm174_vm1, %v1482_v9  ;;  %v825_v13 = vadd.f32 %v824_v26, %v823_v3  ;;  %v708_v15 = vadd.f32 %v707_v61, %v706_v4 }
  0xfe   :  { %v318_v21 = vadd.f32 %v1255_v22, %v317_v18  ;;  %v397_v23 = vpop.f32.mrf.mxu1  ;;  %v828_v18 = vsel %vm174_vm1, %v779_v48, 0.0 }
  0xff   :  { %v1001_v29 = vpop.f32.mrf.mxu0  ;;  %v1505_v32 = vadd.f32 %v1255_v22, %v397_v23  ;;  %v827_v23 = vadd.f32 %v826_v10, %v825_v13  ;;  %v710_v25 = vadd.f32 %v709_v12, %v708_v15 }
 0x100   :  { %430 = vst.msk [vmem:[%s1707_s3 + $0x68] sm:$0xff] %vm174_vm1, %v318_v21  ;;  %v1041_v30 = vpop.f32.mrf.mxu1  ;;  %v780_v54 = vmul.f32 %v318_v21, %v318_v21  ;;  %v711_v1 = vsel %vm174_vm1, %v318_v21, 0.0 }
 0x101   :  { %v322_v40 = vpop.f32.mrf.mxu0  ;;  %450 = vst.msk [vmem:[%s1707_s3 + $0x108] sm:$0xff] %vm174_vm1, %v1505_v32  ;;  %v829_v30 = vadd.f32 %v828_v18, %v827_v23  ;;  %v712_v37 = vadd.f32 %v711_v1, %v710_v25 }
 0x102   :  { %v323_v36 = vadd.f32 %v1255_v22, %v322_v40  ;;  %v402_v43 = vpop.f32.mrf.mxu1  ;;  %v830_v34 = vsel %vm174_vm1, %v780_v54, 0.0 }
 0x103   :  { %v1004_v49 = vpop.f32.mrf.mxu0  ;;  %v1528_v50 = vadd.f32 %v1255_v22, %v402_v43  ;;  %v831_v43 = vadd.f32 %v830_v34, %v829_v30  ;;  %v727_v30 = vsel %vm174_vm1, %v1277_v33, 0.0 }
 0x104   :  { %431 = vst.msk [vmem:[%s1707_s3 + $0x70] sm:$0xff] %vm174_vm1, %v323_v36  ;;  %v1044_v42 = vpop.f32.mrf.mxu1  ;;  %v781_v60 = vmul.f32 %v323_v36, %v323_v36  ;;  %v713_v35 = vsel %vm174_vm1, %v323_v36, 0.0 }
 0x105   :  { %v325_v59 = vpop.f32.mrf.mxu0  ;;  %451 = vst.msk [vmem:[%s1707_s3 + $0x110] sm:$0xff] %vm174_vm1, %v1528_v50  ;;  %v714_v46 = vadd.f32 %v713_v35, %v712_v37  ;;  %v789_v37 = vmul.f32 %v1293_v39, %v1293_v39 }
 0x106   :  { %v326_v62 = vadd.f32 %v1255_v22, %v325_v59  ;;  %v405_v0 = vpop.f32.mrf.mxu1  ;;  %v832_v40 = vsel %vm174_vm1, %v781_v60, 0.0  ;;  %v787_v60 = vmul.f32 %v1261_v27, %v1261_v27 }
 0x107   :  { %v1005_v6 = vpop.f32.mrf.mxu0  ;;  %v1549_v7 = vadd.f32 %v1255_v22, %v405_v0  ;;  %v833_v56 = vadd.f32 %v832_v40, %v831_v43  ;;  %v848_v43 = vsel %vm174_vm1, %v789_v37, 0.0 }
 0x108   :  { %432 = vst.msk [vmem:[%s1707_s3 + $0x78] sm:$0xff] %vm174_vm1, %v326_v62  ;;  %v1045_v44 = vpop.f32.mrf.mxu1  ;;  %v782_v2 = vmul.f32 %v326_v62, %v326_v62  ;;  %v715_v8 = vsel %vm174_vm1, %v326_v62, 0.0 }
 0x109   :  { %v330_v16 = vpop.f32.mrf.mxu0  ;;  %452 = vst.msk [vmem:[%s1707_s3 + $0x118] sm:$0xff] %vm174_vm1, %v1549_v7  ;;  %v716_v58 = vadd.f32 %v715_v8, %v714_v46  ;;  %v791_v46 = vmul.f32 %v1325_v51, %v1325_v51 }
 0x10a   :  { %v331_v19 = vadd.f32 %v1255_v22, %v330_v16  ;;  %v410_v20 = vpop.f32.mrf.mxu1  ;;  %v834_v53 = vsel %vm174_vm1, %v782_v2, 0.0 }
 0x10b   :  { %v1008_v28 = vpop.f32.mrf.mxu0  ;;  %v1566_v29 = vadd.f32 %v1255_v22, %v410_v20  ;;  %v835_v62 = vadd.f32 %v834_v53, %v833_v56 }
 0x10c   :  { %433 = vst.msk [vmem:[%s1707_s3 + $0x80] sm:$0xff] %vm174_vm1, %v331_v19  ;;  %v1048_v21 = vpop.f32.mrf.mxu1  ;;  %v783_v41 = vmul.f32 %v331_v19, %v331_v19  ;;  %v717_v55 = vsel %vm174_vm1, %v331_v19, 0.0  ;;  %v725_v28 = vsel %vm174_vm1, %v1261_v27, 0.0  ;;  %v729_v27 = vsel %vm174_vm1, %v1293_v39, 0.0 }
 0x10d   :  { %v333_v38 = vpop.f32.mrf.mxu0  ;;  %453 = vst.msk [vmem:[%s1707_s3 + $0x120] sm:$0xff] %vm174_vm1, %v1566_v29  ;;  %v718_v0 = vadd.f32 %v717_v55, %v716_v58  ;;  %v844_v21 = vsel %vm174_vm1, %v787_v60, 0.0  ;;  %v733_v39 = vsel %vm174_vm1, %v1325_v51, 0.0  ;;  %v852_v58 = vsel %vm174_vm1, %v791_v46, 0.0 }
 0x10e   :  { %v334_v24 = vadd.f32 %v1255_v22, %v333_v38  ;;  %v413_v36 = vpop.f32.mrf.mxu1  ;;  %v836_v26 = vsel %vm174_vm1, %v783_v41, 0.0  ;;  %v790_v41 = vmul.f32 %v1309_v45, %v1309_v45  ;;  %v737_v51 = vsel %vm174_vm1, %v1357_v63, 0.0 }
 0x10f   :  { %v1009_v47 = vpop.f32.mrf.mxu0  ;;  %v1583_v49 = vadd.f32 %v1255_v22, %v413_v36  ;;  %v837_v12 = vadd.f32 %v836_v26, %v835_v62  ;;  %v794_v62 = vmul.f32 %v1373_v5, %v1373_v5 }
 0x110   :  { %434 = vst.msk [vmem:[%s1707_s3 + $0x88] sm:$0xff] %vm174_vm1, %v334_v24  ;;  %v784_v14 = vmul.f32 %v334_v24, %v334_v24  ;;  %v1049_v42 = vpop.f32.mrf.mxu1  ;;  %v719_v61 = vsel %vm174_vm1, %v334_v24, 0.0  ;;  %v850_v55 = vsel %vm174_vm1, %v790_v41, 0.0  ;;  %v801_v41 = vmul.f32 %v1528_v50, %v1528_v50 }
 0x111   :  { %v338_v59 = vpop.f32.mrf.mxu0  ;;  %454 = vst.msk [vmem:[%s1707_s3 + $0x128] sm:$0xff] %vm174_vm1, %v1583_v49  ;;  %v720_v54 = vadd.f32 %v719_v61, %v718_v0 }
 0x112   :  { %v339_v48 = vadd.f32 %v1255_v22, %v338_v59  ;;  %v838_v4 = vsel %vm174_vm1, %v784_v14, 0.0  ;;  %v792_v14 = vmul.f32 %v1341_v57, %v1341_v57  ;;  %v793_v59 = vmul.f32 %v1357_v63, %v1357_v63 }
 0x113   :  { %v1012_v3 = vpop.f32.mrf.mxu0  ;;  %v839_v16 = vadd.f32 %v838_v4, %v837_v12  ;;  %v741_v63 = vsel %vm174_vm1, %v1389_v11, 0.0 }
 0x114   :  { %435 = vst.msk [vmem:[%s1707_s3 + $0x90] sm:$0xff] %vm174_vm1, %v339_v48  ;;  %v721_v6 = vsel %vm174_vm1, %v339_v48, 0.0  ;;  %v785_v10 = vmul.f32 %v339_v48, %v339_v48  ;;  %v854_v48 = vsel %vm174_vm1, %v792_v14, 0.0  ;;  %v856_v4 = vsel %vm174_vm1, %v793_v59, 0.0 }
 0x115   :  { %v341_v44 = vpop.f32.mrf.mxu0  ;;  %v722_v18 = vadd.f32 %v721_v6, %v720_v54  ;;  %v795_v6 = vmul.f32 %v1389_v11, %v1389_v11  ;;  %v745_v11 = vsel %vm174_vm1, %v1429_v31, 0.0 }
 0x116   :  { %v840_v13 = vsel %vm174_vm1, %v785_v10, 0.0  ;;  %v342_v15 = vadd.f32 %v1255_v22, %v341_v44  ;;  %v788_v22 = vmul.f32 %v1277_v33, %v1277_v33  ;;  %v731_v33 = vsel %vm174_vm1, %v1309_v45, 0.0 }
 0x117   :  { %v1013_v1 = vpop.f32.mrf.mxu0  ;;  %v841_v23 = vadd.f32 %v840_v13, %v839_v16  ;;  %v735_v45 = vsel %vm174_vm1, %v1341_v57, 0.0  ;;  %v739_v57 = vsel %vm174_vm1, %v1373_v5, 0.0  ;;  %v456_v10 = vlaneseq }
 0x118   :  { %436 = vst.msk [vmem:[%s1707_s3 + $0x98] sm:$0xff] %vm174_vm1, %v342_v15  ;;  %v723_v19 = vsel %vm174_vm1, %v342_v15, 0.0  ;;  %v786_v20 = vmul.f32 %v342_v15, %v342_v15  ;;  %v846_v8 = vsel %vm174_vm1, %v788_v22, 0.0  ;;  %v858_v44 = vsel %vm174_vm1, %v794_v62, 0.0  ;;  %s1102_s3 = smov [#allocation2]  }
 0x119   :  { %v724_v25 = vadd.f32 %v723_v19, %v722_v18  ;;  %v796_v13 = vmul.f32 %v1405_v17, %v1405_v17  ;;  %v860_v18 = vsel %vm174_vm1, %v795_v6, 0.0  ;;  %v743_v5 = vsel %vm174_vm1, %v1405_v17, 0.0  ;;  %s898_s1 = sshll.u32 %s1102_s3, 4  ;;  %s899_s1 = int_to_ptr.vmem [resolvable:$true] %s898_s1 }
 0x11a   :  { %v842_v34 = vsel %vm174_vm1, %v786_v20, 0.0  ;;  %v797_v1 = vmul.f32 %v1429_v31, %v1429_v31  ;;  %v457_v60 = vshrl.u32 %v456_v10, 7  ;;  %v747_v17 = vsel %vm174_vm1, %v1458_v52, 0.0  ;;  %s1078_s21 = scalar_lea.vmem %s899_s1, 32  ;;  %p1083_p1 = scmp.lt.s32.totalorder %s899_s1, %s899_s1 }
 0x11b   :  { %v726_v35 = vadd.f32 %v725_v28, %v724_v25  ;;  %v843_v2 = vadd.f32 %v842_v34, %v841_v23  ;;  %v862_v23 = vsel %vm174_vm1, %v796_v13, 0.0  ;;  %v798_v25 = vmul.f32 %v1458_v52, %v1458_v52  ;;  %p1079_p0 = scmp.ne.s32.totalorder %s899_s1, %s1078_s21  ;;  %p1084_p2 = scmp.lt.s32.totalorder %s1078_s21, %s1078_s21 }
 0x11c   :  { %v864_v34 = vsel %vm174_vm1, %v797_v1, 0.0  ;;  %v749_v31 = vsel %vm174_vm1, %v1482_v9, 0.0  ;;  %v751_v52 = vsel %vm174_vm1, %v1505_v32, 0.0 }
 0x11d   :  { %v728_v38 = vadd.f32 %v727_v30, %v726_v35  ;;  %v845_v40 = vadd.f32 %v844_v21, %v843_v2  ;;  %v799_v35 = vmul.f32 %v1482_v9, %v1482_v9  ;;  %v494_v2 = vadd.s32 296, %v457_v60  ;;  %p1085_p3 = por %p1084_p2, %p1083_p1 }
 0x11e   :  { %v866_v37 = vsel %vm174_vm1, %v798_v25, 0.0  ;;  %v753_v9 = vsel %vm174_vm1, %v1528_v50, 0.0  ;;  %v757_v50 = vsel %vm174_vm1, %v1566_v29, 0.0 }
 0x11f   :  { %v730_v24 = vadd.f32 %v729_v27, %v728_v38  ;;  %v847_v36 = vadd.f32 %v846_v8, %v845_v40  ;;  %v800_v38 = vmul.f32 %v1505_v32, %v1505_v32  ;;  %v868_v27 = vsel %vm174_vm1, %v799_v35, 0.0  ;;  %p1086_p4 = pnand %p1085_p3, %p1079_p0 }
 0x120   :  { %vm571_vm2 = vcmp.lt.s32.totalorder %v494_v2, 300  ;;  %v872_v32 = vsel %vm174_vm1, %v801_v41, 0.0 }
 0x121   :  { %v732_v47 = vadd.f32 %v731_v33, %v730_v24  ;;  %v849_v53 = vadd.f32 %v848_v43, %v847_v36  ;;  %v870_v43 = vsel %vm174_vm1, %v800_v38, 0.0  ;;  %v802_v33 = vmul.f32 %v1549_v7, %v1549_v7 }
 0x123   :  { %v734_v42 = vadd.f32 %v733_v39, %v732_v47  ;;  %v851_v56 = vadd.f32 %v850_v55, %v849_v53  ;;  %v685_v53 = vsel %vm571_vm2, %v1583_v49, 0.0  ;;  %v755_v55 = vsel %vm174_vm1, %v1549_v7, 0.0 }
 0x124   :  { %v803_v39 = vmul.f32 %v1566_v29, %v1566_v29 }
 0x125   :  { %v853_v26 = vadd.f32 %v852_v58, %v851_v56  ;;  %v736_v61 = vadd.f32 %v735_v45, %v734_v42  ;;  %v874_v56 = vsel %vm174_vm1, %v802_v33, 0.0  ;;  %v804_v58 = vmul.f32 %v685_v53, %v685_v53 }
 0x126   :  { %v876_v49 = vsel %vm174_vm1, %v803_v39, 0.0 }
 0x127   :  { %v738_v0 = vadd.f32 %v737_v51, %v736_v61  ;;  %v855_v3 = vadd.f32 %v854_v48, %v853_v26  ;;  %v759_v26 = vsel %vm174_vm1, %v685_v53, 0.0  ;;  %v878_v7 = vsel %vm174_vm1, %v804_v58, 0.0 }
 0x129   :  { %v740_v12 = vadd.f32 %v739_v57, %v738_v0  ;;  %v857_v54 = vadd.f32 %v856_v4, %v855_v3 }
 0x12b   :  { %v742_v15 = vadd.f32 %v741_v63, %v740_v12  ;;  %v859_v16 = vadd.f32 %v858_v44, %v857_v54 }
 0x12d   :  { %v744_v19 = vadd.f32 %v743_v5, %v742_v15  ;;  %v861_v20 = vadd.f32 %v860_v18, %v859_v16 }
 0x12f   :  { %v746_v28 = vadd.f32 %v745_v11, %v744_v19  ;;  %v863_v22 = vadd.f32 %v862_v23, %v861_v20 }
 0x131   :  { %v865_v21 = vadd.f32 %v864_v34, %v863_v22  ;;  %v748_v30 = vadd.f32 %v747_v17, %v746_v28 }
 0x133   :  { %v867_v40 = vadd.f32 %v866_v37, %v865_v21  ;;  %v750_v8 = vadd.f32 %v749_v31, %v748_v30 }
 0x135   :  { %v869_v24 = vadd.f32 %v868_v27, %v867_v40  ;;  %v752_v36 = vadd.f32 %v751_v52, %v750_v8 }
 0x137   :  { %v871_v46 = vadd.f32 %v870_v43, %v869_v24  ;;  %v754_v47 = vadd.f32 %v753_v9, %v752_v36 }
 0x139   :  { %v873_v14 = vadd.f32 %v872_v32, %v871_v46  ;;  %v756_v42 = vadd.f32 %v755_v55, %v754_v47 }
 0x13b   :  { %v875_v45 = vadd.f32 %v874_v56, %v873_v14  ;;  %v758_v59 = vadd.f32 %v757_v50, %v756_v42 }
 0x13d   :  { %v877_v61 = vadd.f32 %v876_v49, %v875_v45  ;;  %v760_v48 = vadd.f32 %v759_v26, %v758_v59 }
 0x13f   :  { %v761_v51 = vrot.slane %v760_v48, 4  ;;  %v879_v62 = vadd.f32 %v878_v7, %v877_v61 }
 0x141   :  { %v762_v0 = vadd.f32 %v761_v51, %v760_v48  ;;  %v880_v3 = vrot.slane %v879_v62, 4 }
 0x143   :  { %v763_v4 = vrot.slane %v762_v0, 2  ;;  %v881_v57 = vadd.f32 %v880_v3, %v879_v62 }
 0x145   :  { %v764_v6 = vadd.f32 %v763_v4, %v762_v0  ;;  %v882_v10 = vrot.slane %v881_v57, 2 }
 0x147   :  { %v765_v29 = vrot.slane %v764_v6, 1  ;;  %v883_v12 = vadd.f32 %v882_v10, %v881_v57 }
 0x149   :  { %v884_v54 = vrot.slane %v883_v12, 1  ;;  %v766_v44 = vadd.f32 %v765_v29, %v764_v6 }
 0x14b   :  { %v885_v63 = vadd.f32 %v884_v54, %v883_v12 }
 0x14d   :  { %v887_v13 = vsel %vm886_vm3, %v766_v44, %v885_v63 }
 0x14e   :  { %889 = vst.msk [vmem:[#allocation2] sm:$0x3] %vm888_vm4, %v887_v13 }
 0x14f   :  { %1089 = shalt.err (!%p1086_p4)
}
 0x150   :  { %901 = dma.vmem_to_hbm [thread:$0]  %s899_s1, 32, %s1708_s4, [#allocation3]  }
 0x151   :  { %1098 = dma.done.wait [#allocation3], 32  }
 0x152   :  { %1099 = vsyncadd [#allocation3], 4294967264 }
 0x153   :  { %907 = vsyncpa [#allocation3], 1 }

// kernel: node_layer_forward.12
= control target key start
LH: loop header
LB: loop body
LE: loop exit
PB: predicated region body
PF: predicated region fallthrough
CT: control target
= control target key end

     0   :  { %v1409_v0 = vmov 0.0   ;;  %vm1410_vm0 = vmmov 0   ;;  %vm173_vm1 = vcmask 261120   ;;  %vm682_vm4 = vcmask 257024   ;;  %s2010_s1 = inlined_call_operand.vmem [shape: bf16[32,32], index: 1, kind: input, shape index: {}]   ;;  %s2011_s0 = inlined_call_operand.vmem [shape: bf16[300,32], index: 0, kind: input, shape index: {}]   ;;  %s2012_s2 = inlined_call_operand.vmem [shape: f32[1,32], index: 2, kind: input, shape index: {}]   ;;  %s2013_s3 = inlined_call_operand.vmem [shape: bf16[300,32], index: 3, kind: output, shape index: {0}]   ;;  %s2014_s4 = inlined_call_operand.vmem [shape: f32[1,2,32], index: 4, kind: output, shape index: {1}]  }
   0x1   :  { %1302 = vmatprep.subr.bf16.mxu0 %v1409_v0  ;;  %v1388_v1 = vld [vmem:[%s2010_s1 + $0x8] sm:$0xff]   ;;  %1306 = vmatprep.mubr.msk.bf16.mxu0 %vm1410_vm0, %v1409_v0  ;;  %v1389_v2 = vld [vmem:[%s2010_s1] sm:$0xff]   ;;  %v1395_v4 = vld [vmem:[%s2011_s0 + $0x50] sm:$0xff]  }
   0x2   :  { %1382 = vmatprep.subr.bf16.mxu1 %v1409_v0  ;;  %1346 = vmatprep.mubr.msk.bf16.mxu1 %vm1410_vm0, %v1409_v0  ;;  %v1390_v3 = vld [vmem:[%s2011_s0] sm:$0xff]   ;;  %v1391_v5 = vld [vmem:[%s2011_s0 + $0x8] sm:$0xff]   ;;  %v1397_v6 = vld [vmem:[%s2011_s0 + $0x58] sm:$0xff]  }
   0x3   :  { %1303 = vmatpush3.bf16.msra.mxu0 %v1388_v1  ;;  %1384 = vmatpush3.bf16.msra.mxu1 %v1388_v1  ;;  %v1392_v7 = vld [vmem:[%s2011_s0 + $0x10] sm:$0xff]   ;;  %v1399_v8 = vld [vmem:[%s2011_s0 + $0x60] sm:$0xff]   ;;  %v1393_v9 = vld [vmem:[%s2011_s0 + $0x18] sm:$0xff]  }
   0x4   :  { %1304 = vmatprep.subr.bf16.mxu0 %v1409_v0  ;;  %1383 = vmatprep.subr.bf16.mxu1 %v1409_v0  ;;  %v1401_v10 = vld [vmem:[%s2011_s0 + $0x68] sm:$0xff]   ;;  %v1394_v11 = vld [vmem:[%s2011_s0 + $0x20] sm:$0xff]   ;;  %v1403_v12 = vld [vmem:[%s2011_s0 + $0x70] sm:$0xff]  }
   0x5   :  { %v1396_v13 = vld [vmem:[%s2011_s0 + $0x28] sm:$0xff]   ;;  %v1405_v14 = vld [vmem:[%s2011_s0 + $0x78] sm:$0xff]   ;;  %v1398_v15 = vld [vmem:[%s2011_s0 + $0x30] sm:$0xff]  }
   0x6   :  { %v1406_v16 = vld [vmem:[%s2011_s0 + $0x80] sm:$0xff]   ;;  %v1400_v17 = vld [vmem:[%s2011_s0 + $0x38] sm:$0xff]   ;;  %v1407_v18 = vld [vmem:[%s2011_s0 + $0x88] sm:$0xff]  }
   0x7   :  { %1305 = vmatpush3.bf16.msra.mxu0 %v1389_v2  ;;  %1385 = vmatpush3.bf16.msra.mxu1 %v1389_v2  ;;  %v1402_v19 = vld [vmem:[%s2011_s0 + $0x40] sm:$0xff]   ;;  %v1408_v20 = vld [vmem:[%s2011_s0 + $0x90] sm:$0xff]   ;;  %v1404_v21 = vld [vmem:[%s2011_s0 + $0x48] sm:$0xff]  }
   0x8   :  { %v1563_v22 = vld [vmem:[%s2012_s2] ss:$0 sm:$0xff] }
   0xa   :  { %1307 = vmatmul.mubr.msk.bf16.vlgmr.msra.gmra.mxu0 %vm173_vm1, %v1390_v3  ;;  %1347 = vmatmul.mubr.msk.bf16.vlgmr.msra.gmra.mxu1 %vm173_vm1, %v1395_v4 }
   0xb   :  { %1310 = vmatprep.mubr.msk.bf16.mxu0 %vm1410_vm0, %v1409_v0  ;;  %1350 = vmatprep.mubr.msk.bf16.mxu1 %vm1410_vm0, %v1409_v0 }
  0x12   :  { %1311 = vmatmul.mubr.msk.bf16.gmra.mxu0 %vm173_vm1, %v1391_v5  ;;  %1351 = vmatmul.mubr.msk.bf16.gmra.mxu1 %vm173_vm1, %v1397_v6 }
  0x13   :  { %1314 = vmatprep.mubr.msk.bf16.mxu0 %vm1410_vm0, %v1409_v0  ;;  %1354 = vmatprep.mubr.msk.bf16.mxu1 %vm1410_vm0, %v1409_v0 }
  0x1a   :  { %1315 = vmatmul.mubr.msk.bf16.gmra.mxu0 %vm173_vm1, %v1392_v7  ;;  %1355 = vmatmul.mubr.msk.bf16.gmra.mxu1 %vm173_vm1, %v1399_v8 }
  0x1b   :  { %1318 = vmatprep.mubr.msk.bf16.mxu0 %vm1410_vm0, %v1409_v0  ;;  %1358 = vmatprep.mubr.msk.bf16.mxu1 %vm1410_vm0, %v1409_v0 }
  0x22   :  { %1319 = vmatmul.mubr.msk.bf16.gmra.mxu0 %vm173_vm1, %v1393_v9  ;;  %1359 = vmatmul.mubr.msk.bf16.gmra.mxu1 %vm173_vm1, %v1401_v10 }
  0x23   :  { %1322 = vmatprep.mubr.msk.bf16.mxu0 %vm1410_vm0, %v1409_v0  ;;  %1362 = vmatprep.mubr.msk.bf16.mxu1 %vm1410_vm0, %v1409_v0 }
  0x2a   :  { %1323 = vmatmul.mubr.msk.bf16.gmra.mxu0 %vm173_vm1, %v1394_v11  ;;  %1363 = vmatmul.mubr.msk.bf16.gmra.mxu1 %vm173_vm1, %v1403_v12 }
  0x2b   :  { %1326 = vmatprep.mubr.msk.bf16.mxu0 %vm1410_vm0, %v1409_v0  ;;  %1366 = vmatprep.mubr.msk.bf16.mxu1 %vm1410_vm0, %v1409_v0 }
  0x32   :  { %1327 = vmatmul.mubr.msk.bf16.gmra.mxu0 %vm173_vm1, %v1396_v13  ;;  %1367 = vmatmul.mubr.msk.bf16.gmra.mxu1 %vm173_vm1, %v1405_v14 }
  0x33   :  { %1330 = vmatprep.mubr.msk.bf16.mxu0 %vm1410_vm0, %v1409_v0  ;;  %1370 = vmatprep.mubr.msk.bf16.mxu1 %vm1410_vm0, %v1409_v0 }
  0x3a   :  { %1331 = vmatmul.mubr.msk.bf16.gmra.mxu0 %vm173_vm1, %v1398_v15  ;;  %1371 = vmatmul.mubr.msk.bf16.gmra.mxu1 %vm173_vm1, %v1406_v16 }
  0x3b   :  { %1334 = vmatprep.mubr.msk.bf16.mxu0 %vm1410_vm0, %v1409_v0  ;;  %1374 = vmatprep.mubr.msk.bf16.mxu1 %vm1410_vm0, %v1409_v0 }
  0x42   :  { %1335 = vmatmul.mubr.msk.bf16.gmra.mxu0 %vm173_vm1, %v1400_v17  ;;  %1375 = vmatmul.mubr.msk.bf16.gmra.mxu1 %vm173_vm1, %v1407_v18 }
  0x43   :  { %1338 = vmatprep.mubr.msk.bf16.mxu0 %vm1410_vm0, %v1409_v0  ;;  %1378 = vmatprep.mubr.msk.bf16.mxu1 %vm1410_vm0, %v1409_v0 }
  0x4a   :  { %1339 = vmatmul.mubr.msk.bf16.gmra.mxu0 %vm173_vm1, %v1402_v19  ;;  %1379 = vmatmul.mubr.msk.bf16.gmra.mxu1 %vm173_vm1, %v1408_v20 }
  0x4b   :  { %1342 = vmatprep.mubr.msk.bf16.mxu0 %vm1410_vm0, %v1409_v0 }
  0x52   :  { %1343 = vmatmul.mubr.msk.bf16.gmra.mxu0 %vm173_vm1, %v1404_v21 }
  0xca   :  { %v265_v23 = vpop.f32.mrf.mxu0  ;;  %v345_v24 = vpop.f32.mrf.mxu1 }
  0xcb   :  { %v266_v25 = vadd.f32 %v1563_v22, %v265_v23  ;;  %v346_v26 = vadd.f32 %v1563_v22, %v345_v24 }
  0xcc   :  { %v1308_v27 = vpop.f32.mrf.mxu0  ;;  %v1348_v28 = vpop.f32.mrf.mxu1 }
  0xcd   :  { %vm416_vm2 = vcmp.ge.f32.partialorder %v266_v25, 0.0  ;;  %v454_v29 = vmul.f32 0.0, %v266_v25  ;;  %vm436_vm3 = vcmp.ge.f32.partialorder %v346_v26, 0.0  ;;  %v474_v30 = vmul.f32 0.0, %v346_v26 }
  0xce   :  { %v268_v31 = vpop.f32.mrf.mxu0  ;;  %v348_v32 = vpop.f32.mrf.mxu1 }
  0xcf   :  { %v1567_v33 = vsel %vm416_vm2, %v266_v25, %v454_v29  ;;  %v269_v34 = vadd.f32 %v1563_v22, %v268_v31  ;;  %v1570_v35 = vsel %vm436_vm3, %v346_v26, %v474_v30  ;;  %v349_v36 = vadd.f32 %v1563_v22, %v348_v32 }
  0xd0   :  { %v1243_v37 = vpack.c.bf16 %v1567_v33, %v1567_v33  ;;  %v1309_v38 = vpop.f32.mrf.mxu0  ;;  %v1263_v39 = vpack.c.bf16 %v1570_v35, %v1570_v35  ;;  %v1349_v40 = vpop.f32.mrf.mxu1  ;;  %v1033_v24 = vmul.f32 %v1567_v33, %v1567_v33  ;;  %v952_v32 = vsel %vm173_vm1, %v1567_v33, 0.0 }
  0xd1   :  { %vm417_vm5 = vcmp.ge.f32.partialorder %v269_v34, 0.0  ;;  %v455_v41 = vmul.f32 0.0, %v269_v34  ;;  %vm437_vm6 = vcmp.ge.f32.partialorder %v349_v36, 0.0  ;;  %v475_v43 = vmul.f32 0.0, %v349_v36 }
  0xd2   :  { %683 = vst.msk [vmem:[%s2013_s3] sm:$0xf] %vm682_vm4, %v1243_v37  ;;  %v273_v42 = vpop.f32.mrf.mxu0  ;;  %703 = vst.msk [vmem:[%s2013_s3 + $0x50] sm:$0xf] %vm682_vm4, %v1263_v39  ;;  %v353_v44 = vpop.f32.mrf.mxu1 }
  0xd3   :  { %v493_v45 = vsel %vm417_vm5, %v269_v34, %v455_v41  ;;  %v274_v46 = vadd.f32 %v1563_v22, %v273_v42  ;;  %v354_v47 = vadd.f32 %v1563_v22, %v353_v44  ;;  %v1587_v50 = vsel %vm437_vm6, %v349_v36, %v475_v43 }
  0xd4   :  { %v1244_v48 = vpack.c.bf16 %v493_v45, %v493_v45  ;;  %v1312_v49 = vpop.f32.mrf.mxu0  ;;  %v1352_v51 = vpop.f32.mrf.mxu1  ;;  %v1264_v53 = vpack.c.bf16 %v1587_v50, %v1587_v50  ;;  %v1034_v20 = vmul.f32 %v493_v45, %v493_v45  ;;  %v953_v25 = vsel %vm173_vm1, %v493_v45, 0.0 }
  0xd5   :  { %vm418_vm7 = vcmp.ge.f32.partialorder %v274_v46, 0.0  ;;  %v456_v52 = vmul.f32 0.0, %v274_v46  ;;  %vm438_vm8 = vcmp.ge.f32.partialorder %v354_v47, 0.0  ;;  %v476_v58 = vmul.f32 0.0, %v354_v47 }
  0xd6   :  { %684 = vst.msk [vmem:[%s2013_s3 + $0x4] sm:$0xf] %vm682_vm4, %v1244_v48  ;;  %v276_v54 = vpop.f32.mrf.mxu0  ;;  %v356_v55 = vpop.f32.mrf.mxu1  ;;  %704 = vst.msk [vmem:[%s2013_s3 + $0x54] sm:$0xf] %vm682_vm4, %v1264_v53  ;;  %v1072_v39 = vsel %vm173_vm1, %v1034_v20, 0.0  ;;  %v1071_v42 = vsel %vm173_vm1, %v1033_v24, 0.0  ;;  %v954_v43 = vadd.f32 %v953_v25, %v952_v32 }
  0xd7   :  { %v494_v56 = vsel %vm418_vm7, %v274_v46, %v456_v52  ;;  %v277_v57 = vadd.f32 %v1563_v22, %v276_v54  ;;  %v1600_v63 = vsel %vm438_vm8, %v354_v47, %v476_v58  ;;  %v357_v5 = vadd.f32 %v1563_v22, %v356_v55 }
  0xd8   :  { %v1245_v59 = vpack.c.bf16 %v494_v56, %v494_v56  ;;  %v1313_v60 = vpop.f32.mrf.mxu0  ;;  %v1353_v61 = vpop.f32.mrf.mxu1  ;;  %v1265_v1 = vpack.c.bf16 %v1600_v63, %v1600_v63  ;;  %v1035_v28 = vmul.f32 %v494_v56, %v494_v56  ;;  %v955_v44 = vsel %vm173_vm1, %v494_v56, 0.0 }
  0xd9   :  { %vm419_vm9 = vcmp.ge.f32.partialorder %v277_v57, 0.0  ;;  %v457_v62 = vmul.f32 0.0, %v277_v57  ;;  %vm439_vm11 = vcmp.ge.f32.partialorder %v357_v5, 0.0  ;;  %v477_v11 = vmul.f32 0.0, %v357_v5 }
  0xda   :  { %685 = vst.msk [vmem:[%s2013_s3 + $0x8] sm:$0xf] %vm682_vm4, %v1245_v59  ;;  %v281_v0 = vpop.f32.mrf.mxu0  ;;  %v361_v2 = vpop.f32.mrf.mxu1  ;;  %705 = vst.msk [vmem:[%s2013_s3 + $0x58] sm:$0xf] %vm682_vm4, %v1265_v1  ;;  %v1074_v47 = vsel %vm173_vm1, %v1035_v28, 0.0  ;;  %v1073_v52 = vadd.f32 %v1072_v39, %v1071_v42  ;;  %v956_v60 = vadd.f32 %v955_v44, %v954_v43 }
  0xdb   :  { %v495_v3 = vsel %vm419_vm9, %v277_v57, %v457_v62  ;;  %v282_v4 = vadd.f32 %v1563_v22, %v281_v0  ;;  %v362_v12 = vadd.f32 %v1563_v22, %v361_v2  ;;  %v1624_v18 = vsel %vm439_vm11, %v357_v5, %v477_v11 }
  0xdc   :  { %v1246_v6 = vpack.c.bf16 %v495_v3, %v495_v3  ;;  %v1316_v7 = vpop.f32.mrf.mxu0  ;;  %v1356_v8 = vpop.f32.mrf.mxu1  ;;  %v1266_v23 = vpack.c.bf16 %v1624_v18, %v1624_v18  ;;  %v1036_v48 = vmul.f32 %v495_v3, %v495_v3  ;;  %v957_v53 = vsel %vm173_vm1, %v495_v3, 0.0 }
  0xdd   :  { %vm420_vm10 = vcmp.ge.f32.partialorder %v282_v4, 0.0  ;;  %v458_v9 = vmul.f32 0.0, %v282_v4  ;;  %vm440_vm13 = vcmp.ge.f32.partialorder %v362_v12, 0.0  ;;  %v478_v31 = vmul.f32 0.0, %v362_v12 }
  0xde   :  { %686 = vst.msk [vmem:[%s2013_s3 + $0xc] sm:$0xf] %vm682_vm4, %v1246_v6  ;;  %v284_v10 = vpop.f32.mrf.mxu0  ;;  %v364_v13 = vpop.f32.mrf.mxu1  ;;  %706 = vst.msk [vmem:[%s2013_s3 + $0x5c] sm:$0xf] %vm682_vm4, %v1266_v23  ;;  %v1075_v61 = vadd.f32 %v1074_v47, %v1073_v52  ;;  %v1076_v2 = vsel %vm173_vm1, %v1036_v48, 0.0  ;;  %v958_v6 = vadd.f32 %v957_v53, %v956_v60 }
  0xdf   :  { %v1619_v14 = vsel %vm420_vm10, %v282_v4, %v458_v9  ;;  %v285_v15 = vadd.f32 %v1563_v22, %v284_v10  ;;  %v365_v37 = vadd.f32 %v1563_v22, %v364_v13  ;;  %v1648_v41 = vsel %vm440_vm13, %v362_v12, %v478_v31 }
  0xe0   :  { %v1247_v16 = vpack.c.bf16 %v1619_v14, %v1619_v14  ;;  %v1317_v17 = vpop.f32.mrf.mxu0  ;;  %v1357_v19 = vpop.f32.mrf.mxu1  ;;  %v1267_v45 = vpack.c.bf16 %v1648_v41, %v1648_v41  ;;  %v1037_v57 = vmul.f32 %v1619_v14, %v1619_v14  ;;  %v959_v7 = vsel %vm173_vm1, %v1619_v14, 0.0 }
  0xe1   :  { %vm421_vm12 = vcmp.ge.f32.partialorder %v285_v15, 0.0  ;;  %v459_v21 = vmul.f32 0.0, %v285_v15  ;;  %vm441_vm15 = vcmp.ge.f32.partialorder %v365_v37, 0.0  ;;  %v479_v59 = vmul.f32 0.0, %v365_v37 }
  0xe2   :  { %687 = vst.msk [vmem:[%s2013_s3 + $0x10] sm:$0xf] %vm682_vm4, %v1247_v16  ;;  %v289_v26 = vpop.f32.mrf.mxu0  ;;  %v369_v27 = vpop.f32.mrf.mxu1  ;;  %707 = vst.msk [vmem:[%s2013_s3 + $0x60] sm:$0xf] %vm682_vm4, %v1267_v45  ;;  %v1078_v12 = vsel %vm173_vm1, %v1037_v57, 0.0  ;;  %v1077_v16 = vadd.f32 %v1076_v2, %v1075_v61  ;;  %v960_v25 = vadd.f32 %v959_v7, %v958_v6 }
  0xe3   :  { %v1635_v29 = vsel %vm421_vm12, %v285_v15, %v459_v21  ;;  %v290_v30 = vadd.f32 %v1563_v22, %v289_v26  ;;  %v370_v0 = vadd.f32 %v1563_v22, %v369_v27  ;;  %v1676_v5 = vsel %vm441_vm15, %v365_v37, %v479_v59 }
  0xe4   :  { %v1248_v34 = vpack.c.bf16 %v1635_v29, %v1635_v29  ;;  %v1320_v36 = vpop.f32.mrf.mxu0  ;;  %v1360_v38 = vpop.f32.mrf.mxu1  ;;  %v1268_v10 = vpack.c.bf16 %v1676_v5, %v1676_v5  ;;  %v1038_v13 = vmul.f32 %v1635_v29, %v1635_v29  ;;  %v961_v21 = vsel %vm173_vm1, %v1635_v29, 0.0 }
  0xe5   :  { %vm422_vm14 = vcmp.ge.f32.partialorder %v290_v30, 0.0  ;;  %v460_v40 = vmul.f32 0.0, %v290_v30  ;;  %vm442_vm3 = vcmp.ge.f32.partialorder %v370_v0, 0.0  ;;  %v480_v17 = vmul.f32 0.0, %v370_v0 }
  0xe6   :  { %688 = vst.msk [vmem:[%s2013_s3 + $0x14] sm:$0xf] %vm682_vm4, %v1248_v34  ;;  %v292_v33 = vpop.f32.mrf.mxu0  ;;  %v372_v46 = vpop.f32.mrf.mxu1  ;;  %708 = vst.msk [vmem:[%s2013_s3 + $0x64] sm:$0xf] %vm682_vm4, %v1268_v10  ;;  %v1079_v26 = vadd.f32 %v1078_v12, %v1077_v16  ;;  %v1080_v32 = vsel %vm173_vm1, %v1038_v13, 0.0  ;;  %v962_v37 = vadd.f32 %v961_v21, %v960_v25 }
  0xe7   :  { %v498_v49 = vsel %vm422_vm14, %v290_v30, %v460_v40  ;;  %v293_v51 = vadd.f32 %v1563_v22, %v292_v33  ;;  %v373_v19 = vadd.f32 %v1563_v22, %v372_v46  ;;  %v1699_v36 = vsel %vm442_vm3, %v370_v0, %v480_v17 }
  0xe8   :  { %v1249_v54 = vpack.c.bf16 %v498_v49, %v498_v49  ;;  %v1321_v55 = vpop.f32.mrf.mxu0  ;;  %v1361_v56 = vpop.f32.mrf.mxu1  ;;  %v1039_v27 = vmul.f32 %v498_v49, %v498_v49  ;;  %v1269_v39 = vpack.c.bf16 %v1699_v36, %v1699_v36  ;;  %v963_v42 = vsel %vm173_vm1, %v498_v49, 0.0 }
  0xe9   :  { %vm423_vm0 = vcmp.ge.f32.partialorder %v293_v51, 0.0  ;;  %v461_v58 = vmul.f32 0.0, %v293_v51  ;;  %vm443_vm6 = vcmp.ge.f32.partialorder %v373_v19, 0.0  ;;  %v481_v33 = vmul.f32 0.0, %v373_v19 }
  0xea   :  { %689 = vst.msk [vmem:[%s2013_s3 + $0x18] sm:$0xf] %vm682_vm4, %v1249_v54  ;;  %v297_v62 = vpop.f32.mrf.mxu0  ;;  %v1672_v1 = vpop.f32.mrf.mxu1  ;;  %v1081_v45 = vadd.f32 %v1080_v32, %v1079_v26  ;;  %v1082_v46 = vsel %vm173_vm1, %v1039_v27, 0.0  ;;  %709 = vst.msk [vmem:[%s2013_s3 + $0x68] sm:$0xf] %vm682_vm4, %v1269_v39  ;;  %v964_v55 = vadd.f32 %v963_v42, %v962_v37 }
  0xeb   :  { %v499_v3 = vsel %vm423_vm0, %v293_v51, %v461_v58  ;;  %v298_v4 = vadd.f32 %v1563_v22, %v297_v62  ;;  %v1718_v54 = vsel %vm443_vm6, %v373_v19, %v481_v33  ;;  %v378_v2 = vadd.f32 %v1563_v22, %v1672_v1 }
  0xec   :  { %v1250_v8 = vpack.c.bf16 %v499_v3, %v499_v3  ;;  %v1324_v9 = vpop.f32.mrf.mxu0  ;;  %v1364_v11 = vpop.f32.mrf.mxu1  ;;  %v1040_v38 = vmul.f32 %v499_v3, %v499_v3  ;;  %v965_v47 = vsel %vm173_vm1, %v499_v3, 0.0  ;;  %v1270_v59 = vpack.c.bf16 %v1718_v54, %v1718_v54 }
  0xed   :  { %vm424_vm2 = vcmp.ge.f32.partialorder %v298_v4, 0.0  ;;  %v462_v15 = vmul.f32 0.0, %v298_v4  ;;  %v1083_v3 = vadd.f32 %v1082_v46, %v1081_v45  ;;  %vm444_vm9 = vcmp.ge.f32.partialorder %v378_v2, 0.0 }
  0xee   :  { %690 = vst.msk [vmem:[%s2013_s3 + $0x1c] sm:$0xf] %vm682_vm4, %v1250_v8  ;;  %v300_v14 = vpop.f32.mrf.mxu0  ;;  %v380_v20 = vpop.f32.mrf.mxu1  ;;  %v1084_v56 = vsel %vm173_vm1, %v1040_v38, 0.0  ;;  %710 = vst.msk [vmem:[%s2013_s3 + $0x6c] sm:$0xf] %vm682_vm4, %v1270_v59  ;;  %v482_v13 = vmul.f32 0.0, %v378_v2 }
  0xef   :  { %v500_v23 = vsel %vm424_vm2, %v298_v4, %v462_v15  ;;  %v301_v24 = vadd.f32 %v1563_v22, %v300_v14  ;;  %v966_v4 = vadd.f32 %v965_v47, %v964_v55  ;;  %v1085_v11 = vadd.f32 %v1084_v56, %v1083_v3 }
  0xf0   :  { %v1251_v28 = vpack.c.bf16 %v500_v23, %v500_v23  ;;  %v1325_v30 = vpop.f32.mrf.mxu0  ;;  %v1365_v31 = vpop.f32.mrf.mxu1  ;;  %v1041_v53 = vmul.f32 %v500_v23, %v500_v23  ;;  %v967_v57 = vsel %vm173_vm1, %v500_v23, 0.0  ;;  %v381_v15 = vadd.f32 %v1563_v22, %v380_v20 }
  0xf1   :  { %vm425_vm5 = vcmp.ge.f32.partialorder %v301_v24, 0.0  ;;  %v463_v34 = vmul.f32 0.0, %v301_v24  ;;  %v968_v12 = vadd.f32 %v967_v57, %v966_v4  ;;  %v1747_v27 = vsel %vm444_vm9, %v378_v2, %v482_v13 }
  0xf2   :  { %691 = vst.msk [vmem:[%s2013_s3 + $0x20] sm:$0xf] %vm682_vm4, %v1251_v28  ;;  %v305_v29 = vpop.f32.mrf.mxu0  ;;  %v1707_v40 = vpop.f32.mrf.mxu1  ;;  %v1086_v9 = vsel %vm173_vm1, %v1041_v53, 0.0  ;;  %v1271_v20 = vpack.c.bf16 %v1747_v27, %v1747_v27  ;;  %vm445_vm11 = vcmp.ge.f32.partialorder %v381_v15, 0.0  ;;  %v483_v42 = vmul.f32 0.0, %v381_v15 }
  0xf3   :  { %v501_v43 = vsel %vm425_vm5, %v301_v24, %v463_v34  ;;  %v306_v44 = vadd.f32 %v1563_v22, %v305_v29  ;;  %v1087_v23 = vadd.f32 %v1086_v9, %v1085_v11  ;;  %v386_v46 = vadd.f32 %v1563_v22, %v1707_v40 }
  0xf4   :  { %v1252_v48 = vpack.c.bf16 %v501_v43, %v501_v43  ;;  %v1328_v51 = vpop.f32.mrf.mxu0  ;;  %v1368_v52 = vpop.f32.mrf.mxu1  ;;  %v1042_v61 = vmul.f32 %v501_v43, %v501_v43  ;;  %v969_v14 = vsel %vm173_vm1, %v501_v43, 0.0  ;;  %711 = vst.msk [vmem:[%s2013_s3 + $0x70] sm:$0xf] %vm682_vm4, %v1271_v20 }
  0xf5   :  { %vm426_vm7 = vcmp.ge.f32.partialorder %v306_v44, 0.0  ;;  %v464_v49 = vmul.f32 0.0, %v306_v44  ;;  %v970_v31 = vadd.f32 %v969_v14, %v968_v12  ;;  %v1768_v52 = vsel %vm445_vm11, %v381_v15, %v483_v42 }
  0xf6   :  { %692 = vst.msk [vmem:[%s2013_s3 + $0x24] sm:$0xf] %vm682_vm4, %v1252_v48  ;;  %v308_v58 = vpop.f32.mrf.mxu0  ;;  %v388_v60 = vpop.f32.mrf.mxu1  ;;  %v1088_v17 = vsel %vm173_vm1, %v1042_v61, 0.0  ;;  %v1272_v56 = vpack.c.bf16 %v1768_v52, %v1768_v52  ;;  %vm446_vm13 = vcmp.ge.f32.partialorder %v386_v46, 0.0 }
  0xf7   :  { %v502_v62 = vsel %vm426_vm7, %v306_v44, %v464_v49  ;;  %v309_v0 = vadd.f32 %v1563_v22, %v308_v58  ;;  %v1089_v32 = vadd.f32 %v1088_v17, %v1087_v23  ;;  %v389_v40 = vadd.f32 %v1563_v22, %v388_v60 }
  0xf8   :  { %v1253_v6 = vpack.c.bf16 %v502_v62, %v502_v62  ;;  %v1329_v7 = vpop.f32.mrf.mxu0  ;;  %v1369_v8 = vpop.f32.mrf.mxu1  ;;  %v1043_v24 = vmul.f32 %v502_v62, %v502_v62  ;;  %v971_v38 = vsel %vm173_vm1, %v502_v62, 0.0  ;;  %712 = vst.msk [vmem:[%s2013_s3 + $0x74] sm:$0xf] %vm682_vm4, %v1272_v56 }
  0xf9   :  { %vm427_vm8 = vcmp.ge.f32.partialorder %v309_v0, 0.0  ;;  %v465_v10 = vmul.f32 0.0, %v309_v0  ;;  %v972_v53 = vadd.f32 %v971_v38, %v970_v31  ;;  %v485_v11 = vmul.f32 0.0, %v389_v40 }
  0xfa   :  { %693 = vst.msk [vmem:[%s2013_s3 + $0x28] sm:$0xf] %vm682_vm4, %v1253_v6  ;;  %v313_v1 = vpop.f32.mrf.mxu0  ;;  %v1741_v16 = vpop.f32.mrf.mxu1  ;;  %v1090_v43 = vsel %vm173_vm1, %v1043_v24, 0.0  ;;  %v484_v6 = vmul.f32 0.0, %v386_v46  ;;  %vm447_vm15 = vcmp.ge.f32.partialorder %v389_v40, 0.0 }
  0xfb   :  { %v503_v19 = vsel %vm427_vm8, %v309_v0, %v465_v10  ;;  %v314_v21 = vadd.f32 %v1563_v22, %v313_v1  ;;  %v1091_v61 = vadd.f32 %v1090_v43, %v1089_v32  ;;  %v1809_v32 = vsel %vm447_vm15, %v389_v40, %v485_v11 }
  0xfc   :  { %v1254_v25 = vpack.c.bf16 %v503_v19, %v503_v19  ;;  %v1332_v26 = vpop.f32.mrf.mxu0  ;;  %v1372_v28 = vpop.f32.mrf.mxu1  ;;  %v973_v44 = vsel %vm173_vm1, %v503_v19, 0.0  ;;  %v1044_v48 = vmul.f32 %v503_v19, %v503_v19  ;;  %v1794_v15 = vsel %vm446_vm13, %v386_v46, %v484_v6 }
  0xfd   :  { %vm428_vm10 = vcmp.ge.f32.partialorder %v314_v21, 0.0  ;;  %v466_v30 = vmul.f32 0.0, %v314_v21  ;;  %v974_v62 = vadd.f32 %v973_v44, %v972_v53  ;;  %v1273_v23 = vpack.c.bf16 %v1794_v15, %v1794_v15 }
  0xfe   :  { %694 = vst.msk [vmem:[%s2013_s3 + $0x2c] sm:$0xf] %vm682_vm4, %v1254_v25  ;;  %v316_v34 = vpop.f32.mrf.mxu0  ;;  %v1755_v37 = vpop.f32.mrf.mxu1  ;;  %v1092_v4 = vsel %vm173_vm1, %v1044_v48, 0.0  ;;  %v1274_v43 = vpack.c.bf16 %v1809_v32, %v1809_v32  ;;  %vm1152_vm13 = vcmask 1040384  }
  0xff   :  { %v504_v29 = vsel %vm428_vm10, %v314_v21, %v466_v30  ;;  %v317_v39 = vadd.f32 %v1563_v22, %v316_v34  ;;  %v1093_v14 = vadd.f32 %v1092_v4, %v1091_v61  ;;  %713 = vst.msk [vmem:[%s2013_s3 + $0x78] sm:$0xf] %vm682_vm4, %v1273_v23  ;;  %v394_v34 = vadd.f32 %v1563_v22, %v1741_v16 }
 0x100   :  { %v1255_v33 = vpack.c.bf16 %v504_v29, %v504_v29  ;;  %v1333_v45 = vpop.f32.mrf.mxu0  ;;  %v1373_v47 = vpop.f32.mrf.mxu1  ;;  %v1045_v49 = vmul.f32 %v504_v29, %v504_v29  ;;  %v975_v7 = vsel %vm173_vm1, %v504_v29, 0.0  ;;  %714 = vst.msk [vmem:[%s2013_s3 + $0x7c] sm:$0xf] %vm682_vm4, %v1274_v43  ;;  %v397_v4 = vadd.f32 %v1563_v22, %v1755_v37 }
 0x101   :  { %vm429_vm12 = vcmp.ge.f32.partialorder %v317_v39, 0.0  ;;  %v467_v51 = vmul.f32 0.0, %v317_v39  ;;  %v976_v25 = vadd.f32 %v975_v7, %v974_v62  ;;  %vm448_vm3 = vcmp.ge.f32.partialorder %v394_v34, 0.0 }
 0x102   :  { %695 = vst.msk [vmem:[%s2013_s3 + $0x30] sm:$0xf] %vm682_vm4, %v1255_v33  ;;  %v321_v55 = vpop.f32.mrf.mxu0  ;;  %v1777_v57 = vpop.f32.mrf.mxu1  ;;  %v1094_v8 = vsel %vm173_vm1, %v1045_v49, 0.0  ;;  %vm449_vm6 = vcmp.ge.f32.partialorder %v397_v4, 0.0 }
 0x103   :  { %v505_v58 = vsel %vm429_vm12, %v317_v39, %v467_v51  ;;  %v322_v59 = vadd.f32 %v1563_v22, %v321_v55  ;;  %v1095_v30 = vadd.f32 %v1094_v8, %v1093_v14  ;;  %v486_v55 = vmul.f32 0.0, %v394_v34 }
 0x104   :  { %v1256_v0 = vpack.c.bf16 %v505_v58, %v505_v58  ;;  %v1336_v2 = vpop.f32.mrf.mxu0  ;;  %v1376_v3 = vpop.f32.mrf.mxu1  ;;  %v1046_v9 = vmul.f32 %v505_v58, %v505_v58  ;;  %v977_v26 = vsel %vm173_vm1, %v505_v58, 0.0  ;;  %v402_v37 = vadd.f32 %v1563_v22, %v1777_v57 }
 0x105   :  { %vm430_vm14 = vcmp.ge.f32.partialorder %v322_v59, 0.0  ;;  %v468_v60 = vmul.f32 0.0, %v322_v59  ;;  %v978_v44 = vadd.f32 %v977_v26, %v976_v25  ;;  %v1837_v8 = vsel %vm448_vm3, %v394_v34, %v486_v55 }
 0x106   :  { %696 = vst.msk [vmem:[%s2013_s3 + $0x34] sm:$0xf] %vm682_vm4, %v1256_v0  ;;  %v324_v10 = vpop.f32.mrf.mxu0  ;;  %v1791_v12 = vpop.f32.mrf.mxu1  ;;  %v1096_v20 = vsel %vm173_vm1, %v1046_v9, 0.0  ;;  %v1275_v11 = vpack.c.bf16 %v1837_v8, %v1837_v8  ;;  %v487_v26 = vmul.f32 0.0, %v397_v4  ;;  %vm450_vm8 = vcmp.ge.f32.partialorder %v402_v37, 0.0 }
 0x107   :  { %v506_v1 = vsel %vm430_vm14, %v322_v59, %v468_v60  ;;  %v325_v13 = vadd.f32 %v1563_v22, %v324_v10  ;;  %v1097_v51 = vadd.f32 %v1096_v20, %v1095_v30  ;;  %v488_v20 = vmul.f32 0.0, %v402_v37 }
 0x108   :  { %v1257_v17 = vpack.c.bf16 %v506_v1, %v506_v1  ;;  %v1047_v19 = vmul.f32 %v506_v1, %v506_v1  ;;  %v1337_v21 = vpop.f32.mrf.mxu0  ;;  %v1377_v24 = vpop.f32.mrf.mxu1  ;;  %v979_v29 = vsel %vm173_vm1, %v506_v1, 0.0  ;;  %715 = vst.msk [vmem:[%s2013_s3 + $0x80] sm:$0xf] %vm682_vm4, %v1275_v11  ;;  %vm1154_vm14 = vcmask 254976  }
 0x109   :  { %vm431_vm0 = vcmp.ge.f32.partialorder %v325_v13, 0.0  ;;  %v469_v28 = vmul.f32 0.0, %v325_v13  ;;  %v980_v53 = vadd.f32 %v979_v29, %v978_v44  ;;  %v1860_v29 = vsel %vm449_vm6, %v397_v4, %v487_v26 }
 0x10a   :  { %697 = vst.msk [vmem:[%s2013_s3 + $0x38] sm:$0xf] %vm682_vm4, %v1257_v17  ;;  %v329_v31 = vpop.f32.mrf.mxu0  ;;  %v1813_v38 = vpop.f32.mrf.mxu1  ;;  %v1098_v33 = vsel %vm173_vm1, %v1047_v19, 0.0  ;;  %v991_v4 = vsel %vm173_vm1, %v1570_v35, 0.0  ;;  %v997_v26 = vsel %vm173_vm1, %v1624_v18, 0.0 }
 0x10b   :  { %v507_v39 = vsel %vm431_vm0, %v325_v13, %v469_v28  ;;  %v330_v42 = vadd.f32 %v1563_v22, %v329_v31  ;;  %v1099_v40 = vadd.f32 %v1098_v33, %v1097_v51  ;;  %v1053_v51 = vmul.f32 %v1570_v35, %v1570_v35 }
 0x10c   :  { %v1258_v45 = vpack.c.bf16 %v507_v39, %v507_v39  ;;  %v1048_v46 = vmul.f32 %v507_v39, %v507_v39  ;;  %v1340_v47 = vpop.f32.mrf.mxu0  ;;  %v1380_v48 = vpop.f32.mrf.mxu1  ;;  %v981_v58 = vsel %vm173_vm1, %v507_v39, 0.0  ;;  %v405_v39 = vadd.f32 %v1563_v22, %v1791_v12 }
 0x10d   :  { %vm432_vm2 = vcmp.ge.f32.partialorder %v330_v42, 0.0  ;;  %v470_v16 = vmul.f32 0.0, %v330_v42  ;;  %v982_v9 = vadd.f32 %v981_v58, %v980_v53  ;;  %v1110_v35 = vsel %vm173_vm1, %v1053_v51, 0.0 }
 0x10e   :  { %698 = vst.msk [vmem:[%s2013_s3 + $0x3c] sm:$0xf] %vm682_vm4, %v1258_v45  ;;  %v332_v49 = vpop.f32.mrf.mxu0  ;;  %v1828_v56 = vpop.f32.mrf.mxu1  ;;  %v1100_v62 = vsel %vm173_vm1, %v1048_v46, 0.0  ;;  %v1276_v45 = vpack.c.bf16 %v1860_v29, %v1860_v29  ;;  %vm451_vm10 = vcmp.ge.f32.partialorder %v405_v39, 0.0  ;;  %v1060_v51 = vmul.f32 %v1718_v54, %v1718_v54 }
 0x10f   :  { %v508_v59 = vsel %vm432_vm2, %v330_v42, %v470_v16  ;;  %v333_v61 = vadd.f32 %v1563_v22, %v332_v49  ;;  %v1101_v1 = vadd.f32 %v1100_v62, %v1099_v40  ;;  %v1879_v16 = vsel %vm450_vm8, %v402_v37, %v488_v20 }
 0x110   :  { %v1259_v0 = vpack.c.bf16 %v508_v59, %v508_v59  ;;  %v983_v2 = vsel %vm173_vm1, %v508_v59, 0.0  ;;  %v1341_v3 = vpop.f32.mrf.mxu0  ;;  %v1381_v60 = vpop.f32.mrf.mxu1  ;;  %v1049_v6 = vmul.f32 %v508_v59, %v508_v59  ;;  %716 = vst.msk [vmem:[%s2013_s3 + $0x84] sm:$0xf] %vm682_vm4, %v1276_v45  ;;  %v1277_v40 = vpack.c.bf16 %v1879_v16, %v1879_v16 }
 0x111   :  { %vm433_vm5 = vcmp.ge.f32.partialorder %v333_v61, 0.0  ;;  %v471_v7 = vmul.f32 0.0, %v333_v61  ;;  %v984_v17 = vadd.f32 %v983_v2, %v982_v9  ;;  %v489_v2 = vmul.f32 0.0, %v405_v39 }
 0x112   :  { %699 = vst.msk [vmem:[%s2013_s3 + $0x40] sm:$0xf] %vm682_vm4, %v1259_v0  ;;  %v337_v10 = vpop.f32.mrf.mxu0  ;;  %v1102_v24 = vsel %vm173_vm1, %v1049_v6, 0.0  ;;  %717 = vst.msk [vmem:[%s2013_s3 + $0x88] sm:$0xf] %vm682_vm4, %v1277_v40  ;;  %v410_v3 = vadd.f32 %v1563_v22, %v1813_v38  ;;  %v1054_v60 = vmul.f32 %v1587_v50, %v1587_v50  ;;  %v1055_v9 = vmul.f32 %v1600_v63, %v1600_v63 }
 0x113   :  { %v509_v13 = vsel %vm433_vm5, %v333_v61, %v471_v7  ;;  %v338_v14 = vadd.f32 %v1563_v22, %v337_v10  ;;  %v1103_v46 = vadd.f32 %v1102_v24, %v1101_v1  ;;  %v413_v7 = vadd.f32 %v1563_v22, %v1828_v56 }
 0x114   :  { %v1260_v19 = vpack.c.bf16 %v509_v13, %v509_v13  ;;  %v1050_v21 = vmul.f32 %v509_v13, %v509_v13  ;;  %v1344_v23 = vpop.f32.mrf.mxu0  ;;  %v985_v57 = vsel %vm173_vm1, %v509_v13, 0.0  ;;  %v1903_v11 = vsel %vm451_vm10, %v405_v39, %v489_v2 }
 0x115   :  { %vm434_vm7 = vcmp.ge.f32.partialorder %v338_v14, 0.0  ;;  %v472_v25 = vmul.f32 0.0, %v338_v14  ;;  %v986_v47 = vadd.f32 %v985_v57, %v984_v17  ;;  %v993_v37 = vsel %vm173_vm1, %v1587_v50, 0.0 }
 0x116   :  { %700 = vst.msk [vmem:[%s2013_s3 + $0x44] sm:$0xf] %vm682_vm4, %v1260_v19  ;;  %v1104_v28 = vsel %vm173_vm1, %v1050_v21, 0.0  ;;  %v340_v30 = vpop.f32.mrf.mxu0  ;;  %v1278_v1 = vpack.c.bf16 %v1903_v11, %v1903_v11  ;;  %vm452_vm11 = vcmp.ge.f32.partialorder %v410_v3, 0.0  ;;  %v490_v17 = vmul.f32 0.0, %v410_v3 }
 0x117   :  { %v510_v31 = vsel %vm434_vm7, %v338_v14, %v472_v25  ;;  %v341_v34 = vadd.f32 %v1563_v22, %v340_v30  ;;  %v1105_v53 = vadd.f32 %v1104_v28, %v1103_v46  ;;  %vm453_vm12 = vcmp.ge.f32.partialorder %v413_v7, 0.0 }
 0x118   :  { %v1261_v42 = vpack.c.bf16 %v510_v31, %v510_v31  ;;  %v987_v43 = vsel %vm173_vm1, %v510_v31, 0.0  ;;  %v1051_v44 = vmul.f32 %v510_v31, %v510_v31  ;;  %v1345_v33 = vpop.f32.mrf.mxu0  ;;  %v1112_v22 = vsel %vm173_vm1, %v1054_v60, 0.0  ;;  %718 = vst.msk [vmem:[%s2013_s3 + $0x8c] sm:$0xf] %vm682_vm4, %v1278_v1 }
 0x119   :  { %vm435_vm9 = vcmp.ge.f32.partialorder %v341_v34, 0.0  ;;  %v473_v48 = vmul.f32 0.0, %v341_v34  ;;  %v988_v49 = vadd.f32 %v987_v43, %v986_v47  ;;  %v995_v56 = vsel %vm173_vm1, %v1600_v63, 0.0 }
 0x11a   :  { %701 = vst.msk [vmem:[%s2013_s3 + $0x48] sm:$0xf] %vm682_vm4, %v1261_v42  ;;  %v1106_v12 = vsel %vm173_vm1, %v1051_v44, 0.0  ;;  %v1056_v19 = vmul.f32 %v1624_v18, %v1624_v18  ;;  %v491_v50 = vmul.f32 0.0, %v413_v7  ;;  %v1114_v21 = vsel %vm173_vm1, %v1055_v9, 0.0 }
 0x11b   :  { %v511_v55 = vsel %vm435_vm9, %v341_v34, %v473_v48  ;;  %v1107_v62 = vadd.f32 %v1106_v12, %v1105_v53  ;;  %v1920_v25 = vsel %vm452_vm11, %v410_v3, %v490_v17  ;;  %v1057_v63 = vmul.f32 %v1648_v41, %v1648_v41 }
 0x11c   :  { %v1262_v58 = vpack.c.bf16 %v511_v55, %v511_v55  ;;  %v989_v59 = vsel %vm173_vm1, %v511_v55, 0.0  ;;  %v1052_v61 = vmul.f32 %v511_v55, %v511_v55  ;;  %v1279_v57 = vpack.c.bf16 %v1920_v25, %v1920_v25 }
 0x11d   :  { %v990_v0 = vadd.f32 %v989_v59, %v988_v49  ;;  %v1928_v28 = vsel %vm453_vm12, %v413_v7, %v491_v50  ;;  %v1116_v34 = vsel %vm173_vm1, %v1056_v19, 0.0  ;;  %v999_v39 = vsel %vm173_vm1, %v1648_v41, 0.0 }
 0x11e   :  { %702 = vst.msk [vmem:[%s2013_s3 + $0x4c] sm:$0xf] %vm682_vm4, %v1262_v58  ;;  %v1108_v6 = vsel %vm173_vm1, %v1052_v61, 0.0  ;;  %v1280_v31 = vpack.c.bf16 %v1928_v28, %v1928_v28  ;;  %v1058_v18 = vmul.f32 %v1676_v5, %v1676_v5  ;;  %719 = vst.msk [vmem:[%s2013_s3 + $0x90] sm:$0xf] %vm682_vm4, %v1279_v57  ;;  %v1118_v44 = vsel %vm173_vm1, %v1057_v63, 0.0 }
 0x11f   :  { %v992_v38 = vadd.f32 %v991_v4, %v990_v0  ;;  %v1109_v10 = vadd.f32 %v1108_v6, %v1107_v62  ;;  %v1001_v41 = vsel %vm173_vm1, %v1676_v5, 0.0  ;;  %v1059_v33 = vmul.f32 %v1699_v36, %v1699_v36 }
 0x120   :  { %720 = vst.msk [vmem:[%s2013_s3 + $0x94] sm:$0xf] %vm682_vm4, %v1280_v31  ;;  %v1120_v47 = vsel %vm173_vm1, %v1058_v18, 0.0  ;;  %v1003_v48 = vsel %vm173_vm1, %v1699_v36, 0.0  ;;  %v1005_v5 = vsel %vm173_vm1, %v1718_v54, 0.0  ;;  %v1061_v55 = vmul.f32 %v1747_v27, %v1747_v27 }
 0x121   :  { %v994_v13 = vadd.f32 %v993_v37, %v992_v38  ;;  %v1111_v14 = vadd.f32 %v1110_v35, %v1109_v10  ;;  %v1122_v49 = vsel %vm173_vm1, %v1059_v33, 0.0  ;;  %v722_v40 = vlaneseq }
 0x122   :  { %v1124_v61 = vsel %vm173_vm1, %v1060_v51, 0.0  ;;  %v1007_v36 = vsel %vm173_vm1, %v1747_v27, 0.0  ;;  %v1062_v62 = vmul.f32 %v1768_v52, %v1768_v52  ;;  %v1126_v3 = vsel %vm173_vm1, %v1061_v55, 0.0 }
 0x123   :  { %v996_v23 = vadd.f32 %v995_v56, %v994_v13  ;;  %v1113_v24 = vadd.f32 %v1112_v22, %v1111_v14  ;;  %v1009_v54 = vsel %vm173_vm1, %v1768_v52, 0.0  ;;  %v1063_v4 = vmul.f32 %v1794_v15, %v1794_v15 }
 0x124   :  { %v723_v60 = vshrl.u32 %v722_v40, 7  ;;  %v1128_v9 = vsel %vm173_vm1, %v1062_v62, 0.0  ;;  %v1011_v27 = vsel %vm173_vm1, %v1794_v15, 0.0  ;;  %v1064_v38 = vmul.f32 %v1809_v32, %v1809_v32 }
 0x125   :  { %v998_v30 = vadd.f32 %v997_v26, %v996_v23  ;;  %v1115_v20 = vadd.f32 %v1114_v21, %v1113_v24  ;;  %v1130_v37 = vsel %vm173_vm1, %v1063_v4, 0.0  ;;  %v1013_v52 = vsel %vm173_vm1, %v1809_v32, 0.0 }
 0x126   :  { %v1065_v1 = vmul.f32 %v1837_v8, %v1837_v8  ;;  %v760_v13 = vadd.s32 296, %v723_v60  ;;  %v1132_v22 = vsel %vm173_vm1, %v1064_v38, 0.0  ;;  %v1015_v15 = vsel %vm173_vm1, %v1837_v8, 0.0 }
 0x127   :  { %v1000_v42 = vadd.f32 %v999_v39, %v998_v30  ;;  %v1117_v43 = vadd.f32 %v1116_v34, %v1115_v20  ;;  %v1066_v56 = vmul.f32 %v1860_v29, %v1860_v29  ;;  %v1017_v32 = vsel %vm173_vm1, %v1860_v29, 0.0 }
 0x128   :  { %v1134_v21 = vsel %vm173_vm1, %v1065_v1, 0.0  ;;  %v1067_v23 = vmul.f32 %v1879_v16, %v1879_v16  ;;  %vm837_vm4 = vcmp.lt.s32.totalorder %v760_v13, 300  ;;  %v1019_v8 = vsel %vm173_vm1, %v1879_v16, 0.0 }
 0x129   :  { %v1119_v45 = vadd.f32 %v1118_v44, %v1117_v43  ;;  %v1002_v46 = vadd.f32 %v1001_v41, %v1000_v42  ;;  %v1136_v63 = vsel %vm173_vm1, %v1066_v56, 0.0  ;;  %v1068_v57 = vmul.f32 %v1903_v11, %v1903_v11 }
 0x12a   :  { %v951_v31 = vsel %vm837_vm4, %v1928_v28, 0.0  ;;  %v1138_v29 = vsel %vm173_vm1, %v1067_v23, 0.0  ;;  %v1021_v34 = vsel %vm173_vm1, %v1903_v11, 0.0  ;;  %v1069_v39 = vmul.f32 %v1920_v25, %v1920_v25 }
 0x12b   :  { %v1004_v12 = vadd.f32 %v1003_v48, %v1002_v46  ;;  %v1121_v53 = vadd.f32 %v1120_v47, %v1119_v45  ;;  %v1140_v43 = vsel %vm173_vm1, %v1068_v57, 0.0  ;;  %v1023_v16 = vsel %vm173_vm1, %v1920_v25, 0.0 }
 0x12c   :  { %v1070_v44 = vmul.f32 %v951_v31, %v951_v31  ;;  %v1142_v28 = vsel %vm173_vm1, %v1069_v39, 0.0  ;;  %v1025_v45 = vsel %vm173_vm1, %v951_v31, 0.0 }
 0x12d   :  { %v1006_v58 = vadd.f32 %v1005_v5, %v1004_v12  ;;  %v1123_v59 = vadd.f32 %v1122_v49, %v1121_v53 }
 0x12e   :  { %v1144_v11 = vsel %vm173_vm1, %v1070_v44, 0.0 }
 0x12f   :  { %v1008_v0 = vadd.f32 %v1007_v36, %v1006_v58  ;;  %v1125_v2 = vadd.f32 %v1124_v61, %v1123_v59 }
 0x131   :  { %v1010_v6 = vadd.f32 %v1009_v54, %v1008_v0  ;;  %v1127_v7 = vadd.f32 %v1126_v3, %v1125_v2 }
 0x133   :  { %v1012_v10 = vadd.f32 %v1011_v27, %v1010_v6  ;;  %v1129_v35 = vadd.f32 %v1128_v9, %v1127_v7 }
 0x135   :  { %v1131_v14 = vadd.f32 %v1130_v37, %v1129_v35  ;;  %v1014_v17 = vadd.f32 %v1013_v52, %v1012_v10 }
 0x137   :  { %v1133_v19 = vadd.f32 %v1132_v22, %v1131_v14  ;;  %v1016_v50 = vadd.f32 %v1015_v15, %v1014_v17 }
 0x139   :  { %v1135_v24 = vadd.f32 %v1134_v21, %v1133_v19  ;;  %v1018_v26 = vadd.f32 %v1017_v32, %v1016_v50 }
 0x13b   :  { %v1137_v30 = vadd.f32 %v1136_v63, %v1135_v24  ;;  %v1020_v20 = vadd.f32 %v1019_v8, %v1018_v26 }
 0x13d   :  { %v1139_v18 = vadd.f32 %v1138_v29, %v1137_v30  ;;  %v1022_v42 = vadd.f32 %v1021_v34, %v1020_v20 }
 0x13f   :  { %v1141_v41 = vadd.f32 %v1140_v43, %v1139_v18  ;;  %v1024_v33 = vadd.f32 %v1023_v16, %v1022_v42 }
 0x141   :  { %v1143_v46 = vadd.f32 %v1142_v28, %v1141_v41  ;;  %v1026_v47 = vadd.f32 %v1025_v45, %v1024_v33 }
 0x143   :  { %v1027_v48 = vrot.slane %v1026_v47, 4  ;;  %v1145_v51 = vadd.f32 %v1144_v11, %v1143_v46 }
 0x145   :  { %v1028_v12 = vadd.f32 %v1027_v48, %v1026_v47  ;;  %v1146_v53 = vrot.slane %v1145_v51, 4 }
 0x147   :  { %v1029_v49 = vrot.slane %v1028_v12, 2  ;;  %v1147_v5 = vadd.f32 %v1146_v53, %v1145_v51 }
 0x149   :  { %v1030_v55 = vadd.f32 %v1029_v49, %v1028_v12  ;;  %v1148_v40 = vrot.slane %v1147_v5, 2 }
 0x14b   :  { %v1031_v25 = vrot.slane %v1030_v55, 1  ;;  %v1149_v58 = vadd.f32 %v1148_v40, %v1147_v5 }
 0x14d   :  { %v1150_v59 = vrot.slane %v1149_v58, 1  ;;  %v1032_v61 = vadd.f32 %v1031_v25, %v1030_v55 }
 0x14f   :  { %v1151_v36 = vadd.f32 %v1150_v59, %v1149_v58 }
 0x151   :  { %v1153_v62 = vsel %vm1152_vm13, %v1032_v61, %v1151_v36 }
 0x152   :  { %1155 = vst.msk [vmem:[%s2014_s4] sm:$0x3] %vm1154_vm14, %v1153_v62 }

// kernel: node_layer_forward.11
= control target key start
LH: loop header
LB: loop body
LE: loop exit
PB: predicated region body
PF: predicated region fallthrough
CT: control target
= control target key end

     0   :  { %v1991_v0 = vmov 0.0   ;;  %vm1992_vm0 = vmmov 0   ;;  %vm556_vm1 = vcmask 130048   ;;  %vm212_vm2 = vcmask 261120   ;;  %s2729_s3 = inlined_call_operand.vmem [shape: bf16[32,32], index: 3, kind: input, shape index: {}]   ;;  %s2730_s2 = inlined_call_operand.vmem [shape: bf16[16,32], index: 2, kind: input, shape index: {}]   ;;  %s2731_s0 = inlined_call_operand.vmem [shape: bf16[300,16], index: 0, kind: input, shape index: {}]   ;;  %s2732_s1 = inlined_call_operand.vmem [shape: bf16[300,32], index: 1, kind: input, shape index: {}]   ;;  %s2733_s4 = inlined_call_operand.vmem [shape: f32[1,32], index: 4, kind: input, shape index: {}]   ;;  %s2734_s5 = inlined_call_operand.vmem [shape: bf16[300,32], index: 5, kind: output, shape index: {0}]   ;;  %s2735_s6 = inlined_call_operand.vmem [shape: f32[1,2,32], index: 6, kind: output, shape index: {1}]  }
   0x1   :  { %1789 = vmatprep.subr.bf16.mxu0 %v1991_v0  ;;  %1869 = vmatprep.subr.bf16.mxu1 %v1991_v0  ;;  %v1949_v1 = vld [vmem:[%s2729_s3 + $0x8] sm:$0xff]   ;;  %v1950_v2 = vld [vmem:[%s2730_s2] sm:$0xff]   ;;  %v1956_v8 = vld [vmem:[%s2731_s0 + $0x10] sm:$0xff]   ;;  %vm1110_vm4 = vcmask 257024  }
   0x2   :  { %1871 = vmatprep.mubr.msk.bf16.mxu1 %vm1992_vm0, %v1991_v0  ;;  %1793 = vmatprep.mubr.msk.bf16.mxu0 %vm1992_vm0, %v1991_v0  ;;  %v1951_v3 = vld [vmem:[%s2731_s0] sm:$0xff]   ;;  %v1954_v6 = vld [vmem:[%s2731_s0 + $0x8] sm:$0xff]   ;;  %v1957_v9 = vld [vmem:[%s2732_s1 + $0x10] sm:$0xff]  }
   0x3   :  { %1790 = vmatpush3.bf16.msra.mxu0 %v1949_v1  ;;  %1870 = vmatpush3.bf16.msra.mxu1 %v1950_v2  ;;  %v1952_v4 = vld [vmem:[%s2729_s3] sm:$0xff]   ;;  %v1955_v7 = vld [vmem:[%s2732_s1 + $0x8] sm:$0xff]   ;;  %v1958_v10 = vld [vmem:[%s2731_s0 + $0x18] sm:$0xff]  }
   0x4   :  { %1791 = vmatprep.subr.bf16.mxu0 %v1991_v0  ;;  %v1953_v5 = vld [vmem:[%s2732_s1] sm:$0xff]   ;;  %v1959_v11 = vld [vmem:[%s2732_s1 + $0x18] sm:$0xff]   ;;  %v1962_v14 = vld [vmem:[%s2731_s0 + $0x28] sm:$0xff]  }
   0x5   :  { %v1960_v12 = vld [vmem:[%s2731_s0 + $0x20] sm:$0xff]   ;;  %v1963_v15 = vld [vmem:[%s2732_s1 + $0x28] sm:$0xff]   ;;  %v1964_v16 = vld [vmem:[%s2731_s0 + $0x30] sm:$0xff]  }
   0x6   :  { %1872 = vmatmul.mubr.msk.bf16.vlgmr.msra.gmra.mxu1 %vm556_vm1, %v1951_v3  ;;  %v1961_v13 = vld [vmem:[%s2732_s1 + $0x20] sm:$0xff]   ;;  %v1965_v17 = vld [vmem:[%s2732_s1 + $0x30] sm:$0xff]   ;;  %v1966_v18 = vld [vmem:[%s2731_s0 + $0x38] sm:$0xff]  }
   0x7   :  { %1792 = vmatpush3.bf16.msra.mxu0 %v1952_v4  ;;  %1875 = vmatprep.mubr.msk.bf16.mxu1 %vm1992_vm0, %v1991_v0  ;;  %v1967_v19 = vld [vmem:[%s2732_s1 + $0x38] sm:$0xff]   ;;  %v1968_v20 = vld [vmem:[%s2731_s0 + $0x40] sm:$0xff]   ;;  %v1970_v22 = vld [vmem:[%s2731_s0 + $0x48] sm:$0xff]  }
   0x8   :  { %v1969_v21 = vld [vmem:[%s2732_s1 + $0x40] sm:$0xff]   ;;  %v1971_v23 = vld [vmem:[%s2732_s1 + $0x48] sm:$0xff]   ;;  %v1972_v24 = vld [vmem:[%s2731_s0 + $0x50] sm:$0xff]  }
   0x9   :  { %v1973_v25 = vld [vmem:[%s2732_s1 + $0x50] sm:$0xff]   ;;  %v1974_v26 = vld [vmem:[%s2731_s0 + $0x58] sm:$0xff]   ;;  %v1976_v28 = vld [vmem:[%s2731_s0 + $0x60] sm:$0xff]  }
   0xa   :  { %1794 = vmatmul.mubr.msk.bf16.vlgmr.msra.gmra.mxu0 %vm212_vm2, %v1953_v5  ;;  %v1975_v27 = vld [vmem:[%s2732_s1 + $0x58] sm:$0xff]   ;;  %v1977_v29 = vld [vmem:[%s2732_s1 + $0x60] sm:$0xff]   ;;  %v1978_v30 = vld [vmem:[%s2731_s0 + $0x68] sm:$0xff]  }
   0xb   :  { %1797 = vmatprep.mubr.msk.bf16.mxu0 %vm1992_vm0, %v1991_v0  ;;  %v1979_v31 = vld [vmem:[%s2732_s1 + $0x68] sm:$0xff]   ;;  %v1980_v32 = vld [vmem:[%s2731_s0 + $0x70] sm:$0xff]   ;;  %v1982_v34 = vld [vmem:[%s2731_s0 + $0x78] sm:$0xff]  }
   0xc   :  { %v1981_v33 = vld [vmem:[%s2732_s1 + $0x70] sm:$0xff]   ;;  %v1983_v35 = vld [vmem:[%s2732_s1 + $0x78] sm:$0xff]   ;;  %v1984_v36 = vld [vmem:[%s2731_s0 + $0x80] sm:$0xff]  }
   0xd   :  { %v1985_v37 = vld [vmem:[%s2732_s1 + $0x80] sm:$0xff]   ;;  %v1986_v38 = vld [vmem:[%s2731_s0 + $0x88] sm:$0xff]   ;;  %v1988_v40 = vld [vmem:[%s2731_s0 + $0x90] sm:$0xff]  }
   0xe   :  { %1876 = vmatmul.mubr.msk.bf16.gmra.mxu1 %vm556_vm1, %v1954_v6  ;;  %v1987_v39 = vld [vmem:[%s2732_s1 + $0x88] sm:$0xff]   ;;  %v1989_v41 = vld [vmem:[%s2732_s1 + $0x90] sm:$0xff]   ;;  %v2271_v45 = vld [vmem:[%s2733_s4] ss:$0 sm:$0xff] }
   0xf   :  { %1879 = vmatprep.mubr.msk.bf16.mxu1 %vm1992_vm0, %v1991_v0 }
  0x12   :  { %1798 = vmatmul.mubr.msk.bf16.gmra.mxu0 %vm212_vm2, %v1955_v7 }
  0x13   :  { %1801 = vmatprep.mubr.msk.bf16.mxu0 %vm1992_vm0, %v1991_v0 }
  0x16   :  { %1880 = vmatmul.mubr.msk.bf16.gmra.mxu1 %vm556_vm1, %v1956_v8 }
  0x17   :  { %1883 = vmatprep.mubr.msk.bf16.mxu1 %vm1992_vm0, %v1991_v0 }
  0x1a   :  { %1802 = vmatmul.mubr.msk.bf16.gmra.mxu0 %vm212_vm2, %v1957_v9 }
  0x1b   :  { %1805 = vmatprep.mubr.msk.bf16.mxu0 %vm1992_vm0, %v1991_v0 }
  0x1e   :  { %1884 = vmatmul.mubr.msk.bf16.gmra.mxu1 %vm556_vm1, %v1958_v10 }
  0x1f   :  { %1887 = vmatprep.mubr.msk.bf16.mxu1 %vm1992_vm0, %v1991_v0 }
  0x22   :  { %1806 = vmatmul.mubr.msk.bf16.gmra.mxu0 %vm212_vm2, %v1959_v11 }
  0x23   :  { %1809 = vmatprep.mubr.msk.bf16.mxu0 %vm1992_vm0, %v1991_v0 }
  0x26   :  { %1888 = vmatmul.mubr.msk.bf16.gmra.mxu1 %vm556_vm1, %v1960_v12 }
  0x27   :  { %1891 = vmatprep.mubr.msk.bf16.mxu1 %vm1992_vm0, %v1991_v0 }
  0x2a   :  { %1810 = vmatmul.mubr.msk.bf16.gmra.mxu0 %vm212_vm2, %v1961_v13 }
  0x2b   :  { %1813 = vmatprep.mubr.msk.bf16.mxu0 %vm1992_vm0, %v1991_v0 }
  0x2e   :  { %1892 = vmatmul.mubr.msk.bf16.gmra.mxu1 %vm556_vm1, %v1962_v14 }
  0x2f   :  { %1895 = vmatprep.mubr.msk.bf16.mxu1 %vm1992_vm0, %v1991_v0 }
  0x32   :  { %1814 = vmatmul.mubr.msk.bf16.gmra.mxu0 %vm212_vm2, %v1963_v15 }
  0x33   :  { %1817 = vmatprep.mubr.msk.bf16.mxu0 %vm1992_vm0, %v1991_v0 }
  0x36   :  { %1896 = vmatmul.mubr.msk.bf16.gmra.mxu1 %vm556_vm1, %v1964_v16 }
  0x37   :  { %1899 = vmatprep.mubr.msk.bf16.mxu1 %vm1992_vm0, %v1991_v0 }
  0x3a   :  { %1818 = vmatmul.mubr.msk.bf16.gmra.mxu0 %vm212_vm2, %v1965_v17 }
  0x3b   :  { %1821 = vmatprep.mubr.msk.bf16.mxu0 %vm1992_vm0, %v1991_v0 }
  0x3e   :  { %1900 = vmatmul.mubr.msk.bf16.gmra.mxu1 %vm556_vm1, %v1966_v18 }
  0x3f   :  { %1903 = vmatprep.mubr.msk.bf16.mxu1 %vm1992_vm0, %v1991_v0 }
  0x42   :  { %1822 = vmatmul.mubr.msk.bf16.gmra.mxu0 %vm212_vm2, %v1967_v19 }
  0x43   :  { %1825 = vmatprep.mubr.msk.bf16.mxu0 %vm1992_vm0, %v1991_v0 }
  0x46   :  { %1904 = vmatmul.mubr.msk.bf16.gmra.mxu1 %vm556_vm1, %v1968_v20 }
  0x47   :  { %1907 = vmatprep.mubr.msk.bf16.mxu1 %vm1992_vm0, %v1991_v0 }
  0x4a   :  { %1826 = vmatmul.mubr.msk.bf16.gmra.mxu0 %vm212_vm2, %v1969_v21 }
  0x4b   :  { %1829 = vmatprep.mubr.msk.bf16.mxu0 %vm1992_vm0, %v1991_v0 }
  0x4e   :  { %1908 = vmatmul.mubr.msk.bf16.gmra.mxu1 %vm556_vm1, %v1970_v22 }
  0x4f   :  { %1911 = vmatprep.mubr.msk.bf16.mxu1 %vm1992_vm0, %v1991_v0 }
  0x52   :  { %1830 = vmatmul.mubr.msk.bf16.gmra.mxu0 %vm212_vm2, %v1971_v23 }
  0x53   :  { %1833 = vmatprep.mubr.msk.bf16.mxu0 %vm1992_vm0, %v1991_v0 }
  0x56   :  { %1912 = vmatmul.mubr.msk.bf16.gmra.mxu1 %vm556_vm1, %v1972_v24 }
  0x57   :  { %1915 = vmatprep.mubr.msk.bf16.mxu1 %vm1992_vm0, %v1991_v0 }
  0x5a   :  { %1834 = vmatmul.mubr.msk.bf16.gmra.mxu0 %vm212_vm2, %v1973_v25 }
  0x5b   :  { %1837 = vmatprep.mubr.msk.bf16.mxu0 %vm1992_vm0, %v1991_v0 }
  0x5e   :  { %1916 = vmatmul.mubr.msk.bf16.gmra.mxu1 %vm556_vm1, %v1974_v26 }
  0x5f   :  { %1919 = vmatprep.mubr.msk.bf16.mxu1 %vm1992_vm0, %v1991_v0 }
  0x62   :  { %1838 = vmatmul.mubr.msk.bf16.gmra.mxu0 %vm212_vm2, %v1975_v27 }
  0x63   :  { %1841 = vmatprep.mubr.msk.bf16.mxu0 %vm1992_vm0, %v1991_v0 }
  0x66   :  { %1920 = vmatmul.mubr.msk.bf16.gmra.mxu1 %vm556_vm1, %v1976_v28 }
  0x67   :  { %1923 = vmatprep.mubr.msk.bf16.mxu1 %vm1992_vm0, %v1991_v0 }
  0x6a   :  { %1842 = vmatmul.mubr.msk.bf16.gmra.mxu0 %vm212_vm2, %v1977_v29 }
  0x6b   :  { %1845 = vmatprep.mubr.msk.bf16.mxu0 %vm1992_vm0, %v1991_v0 }
  0x6e   :  { %1924 = vmatmul.mubr.msk.bf16.gmra.mxu1 %vm556_vm1, %v1978_v30 }
  0x6f   :  { %1927 = vmatprep.mubr.msk.bf16.mxu1 %vm1992_vm0, %v1991_v0 }
  0x72   :  { %1846 = vmatmul.mubr.msk.bf16.gmra.mxu0 %vm212_vm2, %v1979_v31 }
  0x73   :  { %1849 = vmatprep.mubr.msk.bf16.mxu0 %vm1992_vm0, %v1991_v0 }
  0x76   :  { %1928 = vmatmul.mubr.msk.bf16.gmra.mxu1 %vm556_vm1, %v1980_v32 }
  0x77   :  { %1931 = vmatprep.mubr.msk.bf16.mxu1 %vm1992_vm0, %v1991_v0 }
  0x7a   :  { %1850 = vmatmul.mubr.msk.bf16.gmra.mxu0 %vm212_vm2, %v1981_v33 }
  0x7b   :  { %1853 = vmatprep.mubr.msk.bf16.mxu0 %vm1992_vm0, %v1991_v0 }
  0x7e   :  { %1932 = vmatmul.mubr.msk.bf16.gmra.mxu1 %vm556_vm1, %v1982_v34 }
  0x7f   :  { %1935 = vmatprep.mubr.msk.bf16.mxu1 %vm1992_vm0, %v1991_v0 }
  0x82   :  { %1854 = vmatmul.mubr.msk.bf16.gmra.mxu0 %vm212_vm2, %v1983_v35 }
  0x83   :  { %1857 = vmatprep.mubr.msk.bf16.mxu0 %vm1992_vm0, %v1991_v0 }
  0x86   :  { %1936 = vmatmul.mubr.msk.bf16.gmra.mxu1 %vm556_vm1, %v1984_v36 }
  0x87   :  { %1939 = vmatprep.mubr.msk.bf16.mxu1 %vm1992_vm0, %v1991_v0 }
  0x8a   :  { %1858 = vmatmul.mubr.msk.bf16.gmra.mxu0 %vm212_vm2, %v1985_v37 }
  0x8b   :  { %1861 = vmatprep.mubr.msk.bf16.mxu0 %vm1992_vm0, %v1991_v0 }
  0x8e   :  { %1940 = vmatmul.mubr.msk.bf16.gmra.mxu1 %vm556_vm1, %v1986_v38 }
  0x8f   :  { %1943 = vmatprep.mubr.msk.bf16.mxu1 %vm1992_vm0, %v1991_v0 }
  0x92   :  { %1862 = vmatmul.mubr.msk.bf16.gmra.mxu0 %vm212_vm2, %v1987_v39 }
  0x93   :  { %1865 = vmatprep.mubr.msk.bf16.mxu0 %vm1992_vm0, %v1991_v0 }
  0x96   :  { %1944 = vmatmul.mubr.msk.bf16.gmra.mxu1 %vm556_vm1, %v1988_v40 }
  0x9a   :  { %1866 = vmatmul.mubr.msk.bf16.gmra.mxu0 %vm212_vm2, %v1989_v41 }
  0xc6   :  { %v648_v42 = vpop.f32.mrf.mxu1 }
  0xc8   :  { %v1873_v43 = vpop.f32.mrf.mxu1 }
  0xca   :  { %v304_v44 = vpop.f32.mrf.mxu0  ;;  %v651_v47 = vpop.f32.mrf.mxu1 }
  0xcb   :  { %v649_v46 = vadd.f32 %v648_v42, %v304_v44 }
  0xcc   :  { %v1795_v48 = vpop.f32.mrf.mxu0  ;;  %v1874_v50 = vpop.f32.mrf.mxu1 }
  0xcd   :  { %v806_v49 = vadd.f32 %v2271_v45, %v649_v46 }
  0xce   :  { %v307_v51 = vpop.f32.mrf.mxu0  ;;  %v656_v54 = vpop.f32.mrf.mxu1 }
  0xcf   :  { %vm844_vm3 = vcmp.ge.f32.partialorder %v806_v49, 0.0  ;;  %v882_v52 = vmul.f32 0.0, %v806_v49  ;;  %v652_v53 = vadd.f32 %v651_v47, %v307_v51 }
  0xd0   :  { %v1796_v55 = vpop.f32.mrf.mxu0  ;;  %v1877_v58 = vpop.f32.mrf.mxu1 }
  0xd1   :  { %v920_v56 = vsel %vm844_vm3, %v806_v49, %v882_v52  ;;  %v807_v57 = vadd.f32 %v2271_v45, %v652_v53 }
  0xd2   :  { %v1710_v59 = vpack.c.bf16 %v920_v56, %v920_v56  ;;  %v312_v60 = vpop.f32.mrf.mxu0  ;;  %v659_v63 = vpop.f32.mrf.mxu1  ;;  %v1461_v0 = vmul.f32 %v920_v56, %v920_v56  ;;  %v1380_v5 = vsel %vm212_vm2, %v920_v56, 0.0 }
  0xd3   :  { %vm845_vm5 = vcmp.ge.f32.partialorder %v807_v57, 0.0  ;;  %v883_v61 = vmul.f32 0.0, %v807_v57  ;;  %v657_v62 = vadd.f32 %v656_v54, %v312_v60 }
  0xd4   :  { %1111 = vst.msk [vmem:[%s2734_s5] sm:$0xf] %vm1110_vm4, %v1710_v59  ;;  %v1799_v1 = vpop.f32.mrf.mxu0  ;;  %v1878_v4 = vpop.f32.mrf.mxu1  ;;  %v1499_v14 = vsel %vm212_vm2, %v1461_v0, 0.0 }
  0xd5   :  { %v921_v2 = vsel %vm845_vm5, %v807_v57, %v883_v61  ;;  %v808_v3 = vadd.f32 %v2271_v45, %v657_v62 }
  0xd6   :  { %v1711_v6 = vpack.c.bf16 %v921_v2, %v921_v2  ;;  %v1381_v7 = vsel %vm212_vm2, %v921_v2, 0.0  ;;  %v1462_v8 = vmul.f32 %v921_v2, %v921_v2  ;;  %v315_v9 = vpop.f32.mrf.mxu0  ;;  %v664_v13 = vpop.f32.mrf.mxu1 }
  0xd7   :  { %v1382_v10 = vadd.f32 %v1381_v7, %v1380_v5  ;;  %vm846_vm6 = vcmp.ge.f32.partialorder %v808_v3, 0.0  ;;  %v884_v11 = vmul.f32 0.0, %v808_v3  ;;  %v660_v12 = vadd.f32 %v659_v63, %v315_v9 }
  0xd8   :  { %1112 = vst.msk [vmem:[%s2734_s5 + $0x4] sm:$0xf] %vm1110_vm4, %v1711_v6  ;;  %v1500_v15 = vsel %vm212_vm2, %v1462_v8, 0.0  ;;  %v1800_v16 = vpop.f32.mrf.mxu0  ;;  %v1881_v20 = vpop.f32.mrf.mxu1 }
  0xd9   :  { %v1501_v17 = vadd.f32 %v1500_v15, %v1499_v14  ;;  %v922_v18 = vsel %vm846_vm6, %v808_v3, %v884_v11  ;;  %v809_v19 = vadd.f32 %v2271_v45, %v660_v12 }
  0xda   :  { %v1712_v21 = vpack.c.bf16 %v922_v18, %v922_v18  ;;  %v1383_v22 = vsel %vm212_vm2, %v922_v18, 0.0  ;;  %v1463_v23 = vmul.f32 %v922_v18, %v922_v18  ;;  %v320_v24 = vpop.f32.mrf.mxu0  ;;  %v667_v28 = vpop.f32.mrf.mxu1 }
  0xdb   :  { %v1384_v25 = vadd.f32 %v1383_v22, %v1382_v10  ;;  %vm847_vm7 = vcmp.ge.f32.partialorder %v809_v19, 0.0  ;;  %v885_v26 = vmul.f32 0.0, %v809_v19  ;;  %v665_v27 = vadd.f32 %v664_v13, %v320_v24 }
  0xdc   :  { %1113 = vst.msk [vmem:[%s2734_s5 + $0x8] sm:$0xf] %vm1110_vm4, %v1712_v21  ;;  %v1502_v29 = vsel %vm212_vm2, %v1463_v23, 0.0  ;;  %v1803_v30 = vpop.f32.mrf.mxu0  ;;  %v1882_v34 = vpop.f32.mrf.mxu1 }
  0xdd   :  { %v1503_v31 = vadd.f32 %v1502_v29, %v1501_v17  ;;  %v923_v32 = vsel %vm847_vm7, %v809_v19, %v885_v26  ;;  %v810_v33 = vadd.f32 %v2271_v45, %v665_v27 }
  0xde   :  { %v1713_v35 = vpack.c.bf16 %v923_v32, %v923_v32  ;;  %v1385_v36 = vsel %vm212_vm2, %v923_v32, 0.0  ;;  %v1464_v37 = vmul.f32 %v923_v32, %v923_v32  ;;  %v323_v38 = vpop.f32.mrf.mxu0  ;;  %v672_v42 = vpop.f32.mrf.mxu1 }
  0xdf   :  { %v1386_v39 = vadd.f32 %v1385_v36, %v1384_v25  ;;  %vm848_vm8 = vcmp.ge.f32.partialorder %v810_v33, 0.0  ;;  %v886_v40 = vmul.f32 0.0, %v810_v33  ;;  %v668_v41 = vadd.f32 %v667_v28, %v323_v38 }
  0xe0   :  { %1114 = vst.msk [vmem:[%s2734_s5 + $0xc] sm:$0xf] %vm1110_vm4, %v1713_v35  ;;  %v1504_v43 = vsel %vm212_vm2, %v1464_v37, 0.0  ;;  %v1804_v44 = vpop.f32.mrf.mxu0  ;;  %v1885_v49 = vpop.f32.mrf.mxu1 }
  0xe1   :  { %v1505_v46 = vadd.f32 %v1504_v43, %v1503_v31  ;;  %v924_v47 = vsel %vm848_vm8, %v810_v33, %v886_v40  ;;  %v811_v48 = vadd.f32 %v2271_v45, %v668_v41 }
  0xe2   :  { %v1714_v50 = vpack.c.bf16 %v924_v47, %v924_v47  ;;  %v1387_v51 = vsel %vm212_vm2, %v924_v47, 0.0  ;;  %v1465_v52 = vmul.f32 %v924_v47, %v924_v47  ;;  %v328_v53 = vpop.f32.mrf.mxu0  ;;  %v675_v57 = vpop.f32.mrf.mxu1 }
  0xe3   :  { %v1388_v54 = vadd.f32 %v1387_v51, %v1386_v39  ;;  %vm849_vm9 = vcmp.ge.f32.partialorder %v811_v48, 0.0  ;;  %v887_v55 = vmul.f32 0.0, %v811_v48  ;;  %v673_v56 = vadd.f32 %v672_v42, %v328_v53 }
  0xe4   :  { %1115 = vst.msk [vmem:[%s2734_s5 + $0x10] sm:$0xf] %vm1110_vm4, %v1714_v50  ;;  %v1506_v58 = vsel %vm212_vm2, %v1465_v52, 0.0  ;;  %v1807_v59 = vpop.f32.mrf.mxu0  ;;  %v1886_v63 = vpop.f32.mrf.mxu1 }
  0xe5   :  { %v1507_v60 = vadd.f32 %v1506_v58, %v1505_v46  ;;  %v925_v61 = vsel %vm849_vm9, %v811_v48, %v887_v55  ;;  %v812_v62 = vadd.f32 %v2271_v45, %v673_v56 }
  0xe6   :  { %v1715_v0 = vpack.c.bf16 %v925_v61, %v925_v61  ;;  %v1389_v1 = vsel %vm212_vm2, %v925_v61, 0.0  ;;  %v1466_v2 = vmul.f32 %v925_v61, %v925_v61  ;;  %v331_v3 = vpop.f32.mrf.mxu0  ;;  %v680_v7 = vpop.f32.mrf.mxu1 }
  0xe7   :  { %v1390_v4 = vadd.f32 %v1389_v1, %v1388_v54  ;;  %vm850_vm10 = vcmp.ge.f32.partialorder %v812_v62, 0.0  ;;  %v888_v5 = vmul.f32 0.0, %v812_v62  ;;  %v676_v6 = vadd.f32 %v675_v57, %v331_v3 }
  0xe8   :  { %1116 = vst.msk [vmem:[%s2734_s5 + $0x14] sm:$0xf] %vm1110_vm4, %v1715_v0  ;;  %v1508_v8 = vsel %vm212_vm2, %v1466_v2, 0.0  ;;  %v1808_v9 = vpop.f32.mrf.mxu0  ;;  %v1889_v13 = vpop.f32.mrf.mxu1 }
  0xe9   :  { %v2316_v10 = vadd.f32 %v1508_v8, %v1507_v60  ;;  %v2318_v11 = vsel %vm850_vm10, %v812_v62, %v888_v5  ;;  %v813_v12 = vadd.f32 %v2271_v45, %v676_v6 }
  0xea   :  { %v1716_v14 = vpack.c.bf16 %v2318_v11, %v2318_v11  ;;  %v1391_v15 = vsel %vm212_vm2, %v2318_v11, 0.0  ;;  %v336_v16 = vpop.f32.mrf.mxu0  ;;  %v683_v20 = vpop.f32.mrf.mxu1 }
  0xeb   :  { %v2325_v17 = vadd.f32 %v1391_v15, %v1390_v4  ;;  %vm851_vm11 = vcmp.ge.f32.partialorder %v813_v12, 0.0  ;;  %v889_v18 = vmul.f32 0.0, %v813_v12  ;;  %v681_v19 = vadd.f32 %v680_v7, %v336_v16 }
  0xec   :  { %1117 = vst.msk [vmem:[%s2734_s5 + $0x18] sm:$0xf] %vm1110_vm4, %v1716_v14  ;;  %v1811_v21 = vpop.f32.mrf.mxu0  ;;  %v1890_v24 = vpop.f32.mrf.mxu1 }
  0xed   :  { %v2331_v22 = vsel %vm851_vm11, %v813_v12, %v889_v18  ;;  %v814_v23 = vadd.f32 %v2271_v45, %v681_v19 }
  0xee   :  { %v1717_v25 = vpack.c.bf16 %v2331_v22, %v2331_v22  ;;  %v339_v26 = vpop.f32.mrf.mxu0  ;;  %v688_v29 = vpop.f32.mrf.mxu1 }
  0xef   :  { %vm852_vm12 = vcmp.ge.f32.partialorder %v814_v23, 0.0  ;;  %v890_v27 = vmul.f32 0.0, %v814_v23  ;;  %v684_v28 = vadd.f32 %v683_v20, %v339_v26 }
  0xf0   :  { %1118 = vst.msk [vmem:[%s2734_s5 + $0x1c] sm:$0xf] %vm1110_vm4, %v1717_v25  ;;  %v1812_v30 = vpop.f32.mrf.mxu0  ;;  %v1893_v33 = vpop.f32.mrf.mxu1 }
  0xf1   :  { %v2340_v31 = vsel %vm852_vm12, %v814_v23, %v890_v27  ;;  %v815_v32 = vadd.f32 %v2271_v45, %v684_v28 }
  0xf2   :  { %v1718_v34 = vpack.c.bf16 %v2340_v31, %v2340_v31  ;;  %v344_v35 = vpop.f32.mrf.mxu0  ;;  %v691_v38 = vpop.f32.mrf.mxu1 }
  0xf3   :  { %vm853_vm13 = vcmp.ge.f32.partialorder %v815_v32, 0.0  ;;  %v891_v36 = vmul.f32 0.0, %v815_v32  ;;  %v689_v37 = vadd.f32 %v688_v29, %v344_v35 }
  0xf4   :  { %1119 = vst.msk [vmem:[%s2734_s5 + $0x20] sm:$0xf] %vm1110_vm4, %v1718_v34  ;;  %v1815_v39 = vpop.f32.mrf.mxu0  ;;  %v1894_v42 = vpop.f32.mrf.mxu1 }
  0xf5   :  { %v2349_v40 = vsel %vm853_vm13, %v815_v32, %v891_v36  ;;  %v816_v41 = vadd.f32 %v2271_v45, %v689_v37 }
  0xf6   :  { %v1719_v43 = vpack.c.bf16 %v2349_v40, %v2349_v40  ;;  %v347_v44 = vpop.f32.mrf.mxu0  ;;  %v696_v48 = vpop.f32.mrf.mxu1 }
  0xf7   :  { %vm854_vm14 = vcmp.ge.f32.partialorder %v816_v41, 0.0  ;;  %v892_v46 = vmul.f32 0.0, %v816_v41  ;;  %v692_v47 = vadd.f32 %v691_v38, %v347_v44 }
  0xf8   :  { %1120 = vst.msk [vmem:[%s2734_s5 + $0x24] sm:$0xf] %vm1110_vm4, %v1719_v43  ;;  %v1816_v49 = vpop.f32.mrf.mxu0  ;;  %v1897_v52 = vpop.f32.mrf.mxu1 }
  0xf9   :  { %v2358_v50 = vsel %vm854_vm14, %v816_v41, %v892_v46  ;;  %v817_v51 = vadd.f32 %v2271_v45, %v692_v47 }
  0xfa   :  { %v1720_v53 = vpack.c.bf16 %v2358_v50, %v2358_v50  ;;  %v352_v54 = vpop.f32.mrf.mxu0  ;;  %v699_v57 = vpop.f32.mrf.mxu1 }
  0xfb   :  { %vm855_vm15 = vcmp.ge.f32.partialorder %v817_v51, 0.0  ;;  %v893_v55 = vmul.f32 0.0, %v817_v51  ;;  %v697_v56 = vadd.f32 %v696_v48, %v352_v54 }
  0xfc   :  { %1121 = vst.msk [vmem:[%s2734_s5 + $0x28] sm:$0xf] %vm1110_vm4, %v1720_v53  ;;  %v1819_v58 = vpop.f32.mrf.mxu0  ;;  %v1898_v61 = vpop.f32.mrf.mxu1 }
  0xfd   :  { %v2367_v59 = vsel %vm855_vm15, %v817_v51, %v893_v55  ;;  %v818_v60 = vadd.f32 %v2271_v45, %v697_v56 }
  0xfe   :  { %v1721_v62 = vpack.c.bf16 %v2367_v59, %v2367_v59  ;;  %v355_v63 = vpop.f32.mrf.mxu0  ;;  %v704_v2 = vpop.f32.mrf.mxu1 }
  0xff   :  { %vm856_vm0 = vcmp.ge.f32.partialorder %v818_v60, 0.0  ;;  %v894_v0 = vmul.f32 0.0, %v818_v60  ;;  %v700_v1 = vadd.f32 %v699_v57, %v355_v63 }
 0x100   :  { %1122 = vst.msk [vmem:[%s2734_s5 + $0x2c] sm:$0xf] %vm1110_vm4, %v1721_v62  ;;  %v1820_v3 = vpop.f32.mrf.mxu0  ;;  %v1901_v6 = vpop.f32.mrf.mxu1 }
 0x101   :  { %v2376_v4 = vsel %vm856_vm0, %v818_v60, %v894_v0  ;;  %v819_v5 = vadd.f32 %v2271_v45, %v700_v1 }
 0x102   :  { %v1722_v7 = vpack.c.bf16 %v2376_v4, %v2376_v4  ;;  %v360_v8 = vpop.f32.mrf.mxu0  ;;  %v707_v13 = vpop.f32.mrf.mxu1 }
 0x103   :  { %vm857_vm1 = vcmp.ge.f32.partialorder %v819_v5, 0.0  ;;  %v895_v9 = vmul.f32 0.0, %v819_v5  ;;  %v705_v12 = vadd.f32 %v704_v2, %v360_v8 }
 0x104   :  { %1123 = vst.msk [vmem:[%s2734_s5 + $0x30] sm:$0xf] %vm1110_vm4, %v1722_v7  ;;  %v1823_v14 = vpop.f32.mrf.mxu0  ;;  %v1902_v18 = vpop.f32.mrf.mxu1 }
 0x105   :  { %v2385_v15 = vsel %vm857_vm1, %v819_v5, %v895_v9  ;;  %v820_v16 = vadd.f32 %v2271_v45, %v705_v12 }
 0x106   :  { %v1723_v19 = vpack.c.bf16 %v2385_v15, %v2385_v15  ;;  %v363_v20 = vpop.f32.mrf.mxu0  ;;  %v712_v24 = vpop.f32.mrf.mxu1 }
 0x107   :  { %vm858_vm3 = vcmp.ge.f32.partialorder %v820_v16, 0.0  ;;  %v896_v21 = vmul.f32 0.0, %v820_v16  ;;  %v708_v23 = vadd.f32 %v707_v13, %v363_v20  ;;  %v1467_v20 = vmul.f32 %v2318_v11, %v2318_v11 }
 0x108   :  { %1124 = vst.msk [vmem:[%s2734_s5 + $0x34] sm:$0xf] %vm1110_vm4, %v1723_v19  ;;  %v1824_v25 = vpop.f32.mrf.mxu0  ;;  %v1905_v28 = vpop.f32.mrf.mxu1 }
 0x109   :  { %v2394_v26 = vsel %vm858_vm3, %v820_v16, %v896_v21  ;;  %v821_v27 = vadd.f32 %v2271_v45, %v708_v23  ;;  %v1468_v28 = vmul.f32 %v2331_v22, %v2331_v22 }
 0x10a   :  { %v1724_v29 = vpack.c.bf16 %v2394_v26, %v2394_v26  ;;  %v368_v30 = vpop.f32.mrf.mxu0  ;;  %v715_v34 = vpop.f32.mrf.mxu1 }
 0x10b   :  { %vm859_vm5 = vcmp.ge.f32.partialorder %v821_v27, 0.0  ;;  %v897_v32 = vmul.f32 0.0, %v821_v27  ;;  %v713_v33 = vadd.f32 %v712_v24, %v368_v30 }
 0x10c   :  { %1125 = vst.msk [vmem:[%s2734_s5 + $0x38] sm:$0xf] %vm1110_vm4, %v1724_v29  ;;  %v1827_v35 = vpop.f32.mrf.mxu0  ;;  %v1906_v38 = vpop.f32.mrf.mxu1 }
 0x10d   :  { %v2403_v36 = vsel %vm859_vm5, %v821_v27, %v897_v32  ;;  %v822_v37 = vadd.f32 %v2271_v45, %v713_v33  ;;  %v1510_v33 = vsel %vm212_vm2, %v1467_v20, 0.0  ;;  %v1469_v38 = vmul.f32 %v2340_v31, %v2340_v31 }
 0x10e   :  { %v1725_v39 = vpack.c.bf16 %v2403_v36, %v2403_v36  ;;  %v371_v41 = vpop.f32.mrf.mxu0  ;;  %v720_v44 = vpop.f32.mrf.mxu1 }
 0x10f   :  { %vm860_vm6 = vcmp.ge.f32.partialorder %v822_v37, 0.0  ;;  %v898_v42 = vmul.f32 0.0, %v822_v37  ;;  %v716_v43 = vadd.f32 %v715_v34, %v371_v41  ;;  %v1393_v34 = vsel %vm212_vm2, %v2331_v22, 0.0 }
 0x110   :  { %1126 = vst.msk [vmem:[%s2734_s5 + $0x3c] sm:$0xf] %vm1110_vm4, %v1725_v39  ;;  %v1828_v46 = vpop.f32.mrf.mxu0  ;;  %v1909_v49 = vpop.f32.mrf.mxu1  ;;  %v1395_v22 = vsel %vm212_vm2, %v2340_v31, 0.0  ;;  %v1514_v31 = vsel %vm212_vm2, %v1469_v38, 0.0 }
 0x111   :  { %v2412_v47 = vsel %vm860_vm6, %v822_v37, %v898_v42  ;;  %v823_v48 = vadd.f32 %v2271_v45, %v716_v43  ;;  %v1512_v43 = vsel %vm212_vm2, %v1468_v28, 0.0  ;;  %v1470_v46 = vmul.f32 %v2349_v40, %v2349_v40 }
 0x112   :  { %v1726_v51 = vpack.c.bf16 %v2412_v47, %v2412_v47  ;;  %v376_v52 = vpop.f32.mrf.mxu0  ;;  %v723_v55 = vpop.f32.mrf.mxu1 }
 0x113   :  { %vm861_vm7 = vcmp.ge.f32.partialorder %v823_v48, 0.0  ;;  %v899_v53 = vmul.f32 0.0, %v823_v48  ;;  %v721_v54 = vadd.f32 %v720_v44, %v376_v52  ;;  %v1511_v52 = vadd.f32 %v1510_v33, %v2316_v10 }
 0x114   :  { %1127 = vst.msk [vmem:[%s2734_s5 + $0x40] sm:$0xf] %vm1110_vm4, %v1726_v51  ;;  %v1831_v56 = vpop.f32.mrf.mxu0  ;;  %v1910_v60 = vpop.f32.mrf.mxu1  ;;  %v1397_v10 = vsel %vm212_vm2, %v2349_v40, 0.0  ;;  %v1399_v40 = vsel %vm212_vm2, %v2358_v50, 0.0 }
 0x115   :  { %v2421_v57 = vsel %vm861_vm7, %v823_v48, %v899_v53  ;;  %v824_v58 = vadd.f32 %v2271_v45, %v721_v54  ;;  %v1394_v53 = vadd.f32 %v1393_v34, %v2325_v17  ;;  %v1471_v54 = vmul.f32 %v2358_v50, %v2358_v50 }
 0x116   :  { %v1727_v61 = vpack.c.bf16 %v2421_v57, %v2421_v57  ;;  %v379_v62 = vpop.f32.mrf.mxu0  ;;  %v728_v1 = vpop.f32.mrf.mxu1 }
 0x117   :  { %vm862_vm8 = vcmp.ge.f32.partialorder %v824_v58, 0.0  ;;  %v900_v63 = vmul.f32 0.0, %v824_v58  ;;  %v724_v0 = vadd.f32 %v723_v55, %v379_v62  ;;  %v1513_v62 = vadd.f32 %v1512_v43, %v1511_v52 }
 0x118   :  { %1128 = vst.msk [vmem:[%s2734_s5 + $0x44] sm:$0xf] %vm1110_vm4, %v1727_v61  ;;  %v1832_v2 = vpop.f32.mrf.mxu0  ;;  %v1913_v6 = vpop.f32.mrf.mxu1  ;;  %v1405_v43 = vsel %vm212_vm2, %v2385_v15, 0.0 }
 0x119   :  { %v2430_v3 = vsel %vm862_vm8, %v824_v58, %v900_v63  ;;  %v825_v5 = vadd.f32 %v2271_v45, %v724_v0  ;;  %v1396_v63 = vadd.f32 %v1395_v22, %v1394_v53  ;;  %v1516_v0 = vsel %vm212_vm2, %v1470_v46, 0.0 }
 0x11a   :  { %v1728_v7 = vpack.c.bf16 %v2430_v3, %v2430_v3  ;;  %v384_v8 = vpop.f32.mrf.mxu0  ;;  %v731_v13 = vpop.f32.mrf.mxu1  ;;  %v1475_v22 = vmul.f32 %v2394_v26, %v2394_v26 }
 0x11b   :  { %vm863_vm9 = vcmp.ge.f32.partialorder %v825_v5, 0.0  ;;  %v901_v9 = vmul.f32 0.0, %v825_v5  ;;  %v729_v12 = vadd.f32 %v728_v1, %v384_v8  ;;  %v1472_v1 = vmul.f32 %v2367_v59, %v2367_v59 }
 0x11c   :  { %1129 = vst.msk [vmem:[%s2734_s5 + $0x48] sm:$0xf] %vm1110_vm4, %v1728_v7  ;;  %v1835_v14 = vpop.f32.mrf.mxu0  ;;  %v1914_v19 = vpop.f32.mrf.mxu1  ;;  %v1515_v7 = vadd.f32 %v1514_v31, %v1513_v62  ;;  %v1518_v8 = vsel %vm212_vm2, %v1471_v54, 0.0  ;;  %v1398_v20 = vadd.f32 %v1397_v10, %v1396_v63  ;;  %v1477_v63 = vmul.f32 %v2412_v47, %v2412_v47 }
 0x11d   :  { %v2439_v16 = vsel %vm863_vm9, %v825_v5, %v901_v9  ;;  %v826_v18 = vadd.f32 %v2271_v45, %v729_v12 }
 0x11e   :  { %v1729_v21 = vpack.c.bf16 %v2439_v16, %v2439_v16  ;;  %v387_v23 = vpop.f32.mrf.mxu0  ;;  %v736_v27 = vpop.f32.mrf.mxu1 }
 0x11f   :  { %vm864_vm10 = vcmp.ge.f32.partialorder %v826_v18, 0.0  ;;  %v902_v24 = vmul.f32 0.0, %v826_v18  ;;  %v732_v25 = vadd.f32 %v731_v13, %v387_v23  ;;  %v1473_v13 = vmul.f32 %v2376_v4, %v2376_v4 }
 0x120   :  { %1130 = vst.msk [vmem:[%s2734_s5 + $0x4c] sm:$0xf] %vm1110_vm4, %v1729_v21  ;;  %v1836_v29 = vpop.f32.mrf.mxu0  ;;  %v1917_v32 = vpop.f32.mrf.mxu1  ;;  %v1517_v21 = vadd.f32 %v1516_v0, %v1515_v7  ;;  %v1401_v23 = vsel %vm212_vm2, %v2367_v59, 0.0  ;;  %v1403_v59 = vsel %vm212_vm2, %v2376_v4, 0.0 }
 0x121   :  { %v2452_v30 = vsel %vm864_vm10, %v826_v18, %v902_v24  ;;  %v827_v11 = vadd.f32 %v2271_v45, %v732_v25  ;;  %v1520_v24 = vsel %vm212_vm2, %v1472_v1, 0.0  ;;  %v1474_v25 = vmul.f32 %v2385_v15, %v2385_v15 }
 0x122   :  { %v1730_v35 = vpack.c.bf16 %v2452_v30, %v2452_v30  ;;  %v392_v37 = vpop.f32.mrf.mxu0  ;;  %v739_v42 = vpop.f32.mrf.mxu1  ;;  %v1519_v32 = vadd.f32 %v1518_v8, %v1517_v21  ;;  %v1476_v15 = vmul.f32 %v2403_v36, %v2403_v36  ;;  %v1413_v21 = vsel %vm212_vm2, %v2421_v57, 0.0 }
 0x123   :  { %vm865_vm11 = vcmp.ge.f32.partialorder %v827_v11, 0.0  ;;  %v903_v39 = vmul.f32 0.0, %v827_v11  ;;  %v737_v41 = vadd.f32 %v736_v27, %v392_v37 }
 0x124   :  { %1131 = vst.msk [vmem:[%s2734_s5 + $0x50] sm:$0xf] %vm1110_vm4, %v1730_v35  ;;  %v1839_v44 = vpop.f32.mrf.mxu0  ;;  %v1918_v51 = vpop.f32.mrf.mxu1  ;;  %v1522_v35 = vsel %vm212_vm2, %v1473_v13, 0.0  ;;  %v1528_v7 = vsel %vm212_vm2, %v1476_v15, 0.0 }
 0x125   :  { %v2471_v48 = vsel %vm865_vm11, %v827_v11, %v903_v39  ;;  %v828_v49 = vadd.f32 %v2271_v45, %v737_v41  ;;  %v1400_v11 = vadd.f32 %v1399_v40, %v1398_v20  ;;  %v1524_v44 = vsel %vm212_vm2, %v1474_v25, 0.0 }
 0x126   :  { %v1731_v55 = vpack.c.bf16 %v2471_v48, %v2471_v48  ;;  %v395_v56 = vpop.f32.mrf.mxu0  ;;  %v744_v61 = vpop.f32.mrf.mxu1  ;;  %v1411_v40 = vsel %vm212_vm2, %v2412_v47, 0.0  ;;  %v1530_v20 = vsel %vm212_vm2, %v1477_v63, 0.0  ;;  %v1482_v15 = vmul.f32 %v2471_v48, %v2471_v48 }
 0x127   :  { %vm866_vm12 = vcmp.ge.f32.partialorder %v828_v49, 0.0  ;;  %v904_v58 = vmul.f32 0.0, %v828_v49  ;;  %v740_v60 = vadd.f32 %v739_v42, %v395_v56  ;;  %v1402_v41 = vadd.f32 %v1401_v23, %v1400_v11 }
 0x128   :  { %1132 = vst.msk [vmem:[%s2734_s5 + $0x54] sm:$0xf] %vm1110_vm4, %v1731_v55  ;;  %v1840_v17 = vpop.f32.mrf.mxu0  ;;  %v1921_v6 = vpop.f32.mrf.mxu1  ;;  %v1521_v42 = vadd.f32 %v1520_v24, %v1519_v32  ;;  %v1407_v56 = vsel %vm212_vm2, %v2394_v26, 0.0  ;;  %v1409_v26 = vsel %vm212_vm2, %v2403_v36, 0.0  ;;  %v1479_v23 = vmul.f32 %v2430_v3, %v2430_v3 }
 0x129   :  { %v2490_v2 = vsel %vm866_vm12, %v828_v49, %v904_v58  ;;  %v829_v5 = vadd.f32 %v2271_v45, %v740_v60  ;;  %v1404_v52 = vadd.f32 %v1403_v59, %v1402_v41  ;;  %v1526_v17 = vsel %vm212_vm2, %v1475_v22, 0.0 }
 0x12a   :  { %v1732_v9 = vpack.c.bf16 %v2490_v2, %v2490_v2  ;;  %v400_v12 = vpop.f32.mrf.mxu0  ;;  %v747_v19 = vpop.f32.mrf.mxu1  ;;  %v1523_v53 = vadd.f32 %v1522_v35, %v1521_v42  ;;  %v1480_v11 = vmul.f32 %v2439_v16, %v2439_v16  ;;  %v1534_v42 = vsel %vm212_vm2, %v1479_v23, 0.0 }
 0x12b   :  { %vm867_vm13 = vcmp.ge.f32.partialorder %v829_v5, 0.0  ;;  %v905_v14 = vmul.f32 0.0, %v829_v5  ;;  %v745_v18 = vadd.f32 %v744_v61, %v400_v12  ;;  %v1406_v61 = vadd.f32 %v1405_v43, %v1404_v52 }
 0x12c   :  { %1133 = vst.msk [vmem:[%s2734_s5 + $0x58] sm:$0xf] %vm1110_vm4, %v1732_v9  ;;  %v1843_v50 = vpop.f32.mrf.mxu0  ;;  %v1922_v29 = vpop.f32.mrf.mxu1  ;;  %v1525_v62 = vadd.f32 %v1524_v44, %v1523_v53  ;;  %v1478_v12 = vmul.f32 %v2421_v57, %v2421_v57  ;;  %v1481_v43 = vmul.f32 %v2452_v30, %v2452_v30 }
 0x12d   :  { %v2509_v27 = vsel %vm867_vm13, %v829_v5, %v905_v14  ;;  %v830_v28 = vadd.f32 %v2271_v45, %v745_v18  ;;  %v1408_v6 = vadd.f32 %v1407_v56, %v1406_v61 }
 0x12e   :  { %v1733_v33 = vpack.c.bf16 %v2509_v27, %v2509_v27  ;;  %v403_v34 = vpop.f32.mrf.mxu0  ;;  %v752_v39 = vpop.f32.mrf.mxu1  ;;  %v1527_v18 = vadd.f32 %v1526_v17, %v1525_v62  ;;  %v1538_v61 = vsel %vm212_vm2, %v1481_v43, 0.0  ;;  %v1483_v62 = vmul.f32 %v2490_v2, %v2490_v2 }
 0x12f   :  { %vm868_vm14 = vcmp.ge.f32.partialorder %v830_v28, 0.0  ;;  %v906_v37 = vmul.f32 0.0, %v830_v28  ;;  %v748_v38 = vadd.f32 %v747_v19, %v403_v34  ;;  %v1410_v19 = vadd.f32 %v1409_v26, %v1408_v6 }
 0x130   :  { %1134 = vst.msk [vmem:[%s2734_s5 + $0x5c] sm:$0xf] %vm1110_vm4, %v1733_v33  ;;  %v1844_v4 = vpop.f32.mrf.mxu0  ;;  %v1925_v51 = vpop.f32.mrf.mxu1  ;;  %v1532_v33 = vsel %vm212_vm2, %v1478_v12, 0.0 }
 0x131   :  { %v2526_v46 = vsel %vm868_vm14, %v830_v28, %v906_v37  ;;  %v831_v49 = vadd.f32 %v2271_v45, %v748_v38  ;;  %v1529_v28 = vadd.f32 %v1528_v7, %v1527_v18  ;;  %v1412_v29 = vadd.f32 %v1411_v40, %v1410_v19 }
 0x132   :  { %v1734_v54 = vpack.c.bf16 %v2526_v46, %v2526_v46  ;;  %v408_v55 = vpop.f32.mrf.mxu0  ;;  %v755_v60 = vpop.f32.mrf.mxu1  ;;  %v1536_v51 = vsel %vm212_vm2, %v1480_v11, 0.0  ;;  %v1540_v7 = vsel %vm212_vm2, %v1482_v15, 0.0  ;;  %v1484_v18 = vmul.f32 %v2509_v27, %v2509_v27 }
 0x133   :  { %vm869_vm15 = vcmp.ge.f32.partialorder %v831_v49, 0.0  ;;  %v907_v31 = vmul.f32 0.0, %v831_v49  ;;  %v753_v58 = vadd.f32 %v752_v39, %v408_v55  ;;  %v1531_v37 = vadd.f32 %v1530_v20, %v1529_v28 }
 0x134   :  { %1135 = vst.msk [vmem:[%s2734_s5 + $0x60] sm:$0xf] %vm1110_vm4, %v1734_v54  ;;  %v1847_v10 = vpop.f32.mrf.mxu0  ;;  %v1926_v5 = vpop.f32.mrf.mxu1  ;;  %v1414_v38 = vadd.f32 %v1413_v21, %v1412_v29  ;;  %v1415_v39 = vsel %vm212_vm2, %v2430_v3, 0.0  ;;  %v1417_v3 = vsel %vm212_vm2, %v2439_v16, 0.0  ;;  %v1425_v28 = vsel %vm212_vm2, %v2509_v27, 0.0 }
 0x135   :  { %v2544_v0 = vsel %vm869_vm15, %v831_v49, %v907_v31  ;;  %v832_v1 = vadd.f32 %v2271_v45, %v753_v58  ;;  %v1533_v49 = vadd.f32 %v1532_v33, %v1531_v37  ;;  %v1427_v27 = vsel %vm212_vm2, %v2526_v46, 0.0 }
 0x136   :  { %v1735_v8 = vpack.c.bf16 %v2544_v0, %v2544_v0  ;;  %v411_v9 = vpop.f32.mrf.mxu0  ;;  %v760_v14 = vpop.f32.mrf.mxu1  ;;  %v1416_v31 = vadd.f32 %v1415_v39, %v1414_v38  ;;  %v1429_v43 = vsel %vm212_vm2, %v2544_v0, 0.0  ;;  %vm1580_vm15 = vcmask 1040384  }
 0x137   :  { %vm870_vm0 = vcmp.ge.f32.partialorder %v832_v1, 0.0  ;;  %v908_v36 = vmul.f32 0.0, %v832_v1  ;;  %v756_v13 = vadd.f32 %v755_v60, %v411_v9  ;;  %v1535_v58 = vadd.f32 %v1534_v42, %v1533_v49 }
 0x138   :  { %1136 = vst.msk [vmem:[%s2734_s5 + $0x64] sm:$0xf] %vm1110_vm4, %v1735_v8  ;;  %v1848_v47 = vpop.f32.mrf.mxu0  ;;  %v1929_v25 = vpop.f32.mrf.mxu1  ;;  %v1419_v60 = vsel %vm212_vm2, %v2452_v30, 0.0  ;;  %v1418_v26 = vadd.f32 %v1417_v3, %v1416_v31  ;;  %v1421_v30 = vsel %vm212_vm2, %v2471_v48, 0.0 }
 0x139   :  { %v2563_v50 = vsel %vm870_vm0, %v832_v1, %v908_v36  ;;  %v833_v24 = vadd.f32 %v2271_v45, %v756_v13  ;;  %v1537_v1 = vadd.f32 %v1536_v51, %v1535_v58  ;;  %v1423_v13 = vsel %vm212_vm2, %v2490_v2, 0.0 }
 0x13a   :  { %v1736_v32 = vpack.c.bf16 %v2563_v50, %v2563_v50  ;;  %v416_v59 = vpop.f32.mrf.mxu0  ;;  %v763_v35 = vpop.f32.mrf.mxu1  ;;  %v1420_v12 = vadd.f32 %v1419_v60, %v1418_v26  ;;  %v1485_v2 = vmul.f32 %v2526_v46, %v2526_v46  ;;  %v1487_v49 = vmul.f32 %v2563_v50, %v2563_v50 }
 0x13b   :  { %vm871_vm1 = vcmp.ge.f32.partialorder %v833_v24, 0.0  ;;  %v909_v57 = vmul.f32 0.0, %v833_v24  ;;  %v761_v34 = vadd.f32 %v760_v14, %v416_v59  ;;  %v1539_v36 = vadd.f32 %v1538_v61, %v1537_v1 }
 0x13c   :  { %1137 = vst.msk [vmem:[%s2734_s5 + $0x68] sm:$0xf] %vm1110_vm4, %v1736_v32  ;;  %v1851_v41 = vpop.f32.mrf.mxu0  ;;  %v1930_v22 = vpop.f32.mrf.mxu1  ;;  %v1542_v14 = vsel %vm212_vm2, %v1483_v62, 0.0  ;;  %v1422_v21 = vadd.f32 %v1421_v30, %v1420_v12  ;;  %v1546_v42 = vsel %vm212_vm2, %v1485_v2, 0.0  ;;  %vm1582_vm0 = vcmask 254976  }
 0x13d   :  { %v2580_v4 = vsel %vm871_vm1, %v833_v24, %v909_v57  ;;  %v834_v44 = vadd.f32 %v2271_v45, %v761_v34  ;;  %v1541_v23 = vadd.f32 %v1540_v7, %v1539_v36  ;;  %v1486_v57 = vmul.f32 %v2544_v0, %v2544_v0 }
 0x13e   :  { %v1737_v52 = vpack.c.bf16 %v2580_v4, %v2580_v4  ;;  %v419_v53 = vpop.f32.mrf.mxu0  ;;  %v768_v56 = vpop.f32.mrf.mxu1  ;;  %v1424_v59 = vadd.f32 %v1423_v13, %v1422_v21 }
 0x13f   :  { %vm872_vm3 = vcmp.ge.f32.partialorder %v834_v44, 0.0  ;;  %v910_v54 = vmul.f32 0.0, %v834_v44  ;;  %v764_v55 = vadd.f32 %v763_v35, %v419_v53  ;;  %v1543_v33 = vadd.f32 %v1542_v14, %v1541_v23 }
 0x140   :  { %1138 = vst.msk [vmem:[%s2734_s5 + $0x6c] sm:$0xf] %vm1110_vm4, %v1737_v52  ;;  %v1852_v16 = vpop.f32.mrf.mxu0  ;;  %v1933_v17 = vpop.f32.mrf.mxu1  ;;  %v1544_v35 = vsel %vm212_vm2, %v1484_v18, 0.0  ;;  %v1426_v41 = vadd.f32 %v1425_v28, %v1424_v59  ;;  %v1548_v15 = vsel %vm212_vm2, %v1486_v57, 0.0 }
 0x141   :  { %v2599_v63 = vsel %vm872_vm3, %v834_v44, %v910_v54  ;;  %v835_v10 = vadd.f32 %v2271_v45, %v764_v55  ;;  %v1545_v52 = vadd.f32 %v1544_v35, %v1543_v33  ;;  %v1431_v54 = vsel %vm212_vm2, %v2563_v50, 0.0 }
 0x142   :  { %v1738_v5 = vpack.c.bf16 %v2599_v63, %v2599_v63  ;;  %v424_v6 = vpop.f32.mrf.mxu0  ;;  %v771_v9 = vpop.f32.mrf.mxu1  ;;  %v1428_v53 = vadd.f32 %v1427_v27, %v1426_v41  ;;  %v1488_v55 = vmul.f32 %v2580_v4, %v2580_v4  ;;  %v1489_v61 = vmul.f32 %v2599_v63, %v2599_v63 }
 0x143   :  { %vm873_vm5 = vcmp.ge.f32.partialorder %v835_v10, 0.0  ;;  %v911_v40 = vmul.f32 0.0, %v835_v10  ;;  %v769_v8 = vadd.f32 %v768_v56, %v424_v6  ;;  %v1547_v60 = vadd.f32 %v1546_v42, %v1545_v52 }
 0x144   :  { %1139 = vst.msk [vmem:[%s2734_s5 + $0x70] sm:$0xf] %vm1110_vm4, %v1738_v5  ;;  %v1855_v48 = vpop.f32.mrf.mxu0  ;;  %v1934_v47 = vpop.f32.mrf.mxu1  ;;  %v1430_v16 = vadd.f32 %v1429_v43, %v1428_v53  ;;  %v1550_v17 = vsel %vm212_vm2, %v1487_v49, 0.0  ;;  %v1433_v6 = vsel %vm212_vm2, %v2580_v4, 0.0  ;;  %v1554_v4 = vsel %vm212_vm2, %v1489_v61, 0.0 }
 0x145   :  { %v2616_v19 = vsel %vm873_vm5, %v835_v10, %v911_v40  ;;  %v836_v20 = vadd.f32 %v2271_v45, %v769_v8  ;;  %v1549_v30 = vadd.f32 %v1548_v15, %v1547_v60  ;;  %v1552_v40 = vsel %vm212_vm2, %v1488_v55, 0.0 }
 0x146   :  { %v1739_v24 = vpack.c.bf16 %v2616_v19, %v2616_v19  ;;  %v427_v25 = vpop.f32.mrf.mxu0  ;;  %v776_v32 = vpop.f32.mrf.mxu1  ;;  %v1432_v5 = vadd.f32 %v1431_v54, %v1430_v16  ;;  %v1490_v8 = vmul.f32 %v2616_v19, %v2616_v19  ;;  %v1435_v48 = vsel %vm212_vm2, %v2599_v63, 0.0 }
 0x147   :  { %vm874_vm6 = vcmp.ge.f32.partialorder %v836_v20, 0.0  ;;  %v912_v29 = vmul.f32 0.0, %v836_v20  ;;  %v772_v11 = vadd.f32 %v771_v9, %v427_v25  ;;  %v1551_v13 = vadd.f32 %v1550_v17, %v1549_v30 }
 0x148   :  { %1140 = vst.msk [vmem:[%s2734_s5 + $0x74] sm:$0xf] %vm1110_vm4, %v1739_v24  ;;  %v1856_v34 = vpop.f32.mrf.mxu0  ;;  %v1937_v39 = vpop.f32.mrf.mxu1  ;;  %v1434_v2 = vadd.f32 %v1433_v6, %v1432_v5  ;;  %v1150_v25 = vlaneseq  ;;  %v1556_v28 = vsel %vm212_vm2, %v1490_v8, 0.0 }
 0x149   :  { %v2634_v37 = vsel %vm874_vm6, %v836_v20, %v912_v29  ;;  %v837_v38 = vadd.f32 %v2271_v45, %v772_v11  ;;  %v1553_v24 = vadd.f32 %v1552_v40, %v1551_v13 }
 0x14a   :  { %v1740_v44 = vpack.c.bf16 %v2634_v37, %v2634_v37  ;;  %v432_v22 = vpop.f32.mrf.mxu0  ;;  %v779_v51 = vpop.f32.mrf.mxu1  ;;  %v1491_v20 = vmul.f32 %v2634_v37, %v2634_v37  ;;  %v1439_v34 = vsel %vm212_vm2, %v2634_v37, 0.0 }
 0x14b   :  { %vm875_vm7 = vcmp.ge.f32.partialorder %v837_v38, 0.0  ;;  %v913_v46 = vmul.f32 0.0, %v837_v38  ;;  %v777_v3 = vadd.f32 %v776_v32, %v432_v22  ;;  %v2682_v32 = vld [vmem:[%s2733_s4] ss:$0 sm:$0xff]  ;;  %v1555_v57 = vadd.f32 %v1554_v4, %v1553_v24 }
 0x14c   :  { %1141 = vst.msk [vmem:[%s2734_s5 + $0x78] sm:$0xf] %vm1110_vm4, %v1740_v44  ;;  %v1859_v0 = vpop.f32.mrf.mxu0  ;;  %v1938_v58 = vpop.f32.mrf.mxu1 }
 0x14d   :  { %v951_v56 = vsel %vm875_vm7, %v837_v38, %v913_v46  ;;  %v838_v31 = vadd.f32 %v2271_v45, %v777_v3  ;;  %v1558_v38 = vsel %vm212_vm2, %v1491_v20, 0.0  ;;  %v1557_v44 = vadd.f32 %v1556_v28, %v1555_v57 }
 0x14e   :  { %v1741_v62 = vpack.c.bf16 %v951_v56, %v951_v56  ;;  %v435_v10 = vpop.f32.mrf.mxu0  ;;  %v784_v50 = vpop.f32.mrf.mxu1  ;;  %v1492_v29 = vmul.f32 %v951_v56, %v951_v56  ;;  %v1151_v46 = vshrl.u32 %v1150_v25, 7  ;;  %v1441_v37 = vsel %vm212_vm2, %v951_v56, 0.0 }
 0x14f   :  { %vm876_vm8 = vcmp.ge.f32.partialorder %v838_v31, 0.0  ;;  %v914_v26 = vmul.f32 0.0, %v838_v31  ;;  %v780_v1 = vadd.f32 %v779_v51, %v435_v10  ;;  %v1559_v0 = vadd.f32 %v1558_v38, %v1557_v44 }
 0x150   :  { %1142 = vst.msk [vmem:[%s2734_s5 + $0x7c] sm:$0xf] %vm1110_vm4, %v1741_v62  ;;  %v1860_v7 = vpop.f32.mrf.mxu0  ;;  %v1941_v36 = vpop.f32.mrf.mxu1  ;;  %v1560_v3 = vsel %vm212_vm2, %v1492_v29, 0.0 }
 0x151   :  { %v952_v9 = vsel %vm876_vm8, %v838_v31, %v914_v26  ;;  %v839_v12 = vadd.f32 %v2271_v45, %v780_v1  ;;  %v1437_v45 = vsel %vm212_vm2, %v2616_v19, 0.0  ;;  %v1436_v19 = vadd.f32 %v1435_v48, %v1434_v2 }
 0x152   :  { %v1742_v14 = vpack.c.bf16 %v952_v9, %v952_v9  ;;  %v440_v18 = vpop.f32.mrf.mxu0  ;;  %v787_v23 = vpop.f32.mrf.mxu1  ;;  %v1493_v22 = vmul.f32 %v952_v9, %v952_v9  ;;  %v1443_v58 = vsel %vm212_vm2, %v952_v9, 0.0  ;;  %v1561_v10 = vadd.f32 %v1560_v3, %v1559_v0 }
 0x153   :  { %vm877_vm9 = vcmp.ge.f32.partialorder %v839_v12, 0.0  ;;  %v915_v47 = vmul.f32 0.0, %v839_v12  ;;  %v785_v21 = vadd.f32 %v784_v50, %v440_v18  ;;  %v1438_v43 = vadd.f32 %v1437_v45, %v1436_v19 }
 0x154   :  { %1143 = vst.msk [vmem:[%s2734_s5 + $0x80] sm:$0xf] %vm1110_vm4, %v1742_v14  ;;  %v1863_v63 = vpop.f32.mrf.mxu0  ;;  %v1942_v33 = vpop.f32.mrf.mxu1  ;;  %v1562_v56 = vsel %vm212_vm2, %v1493_v22, 0.0  ;;  %v1188_v26 = vadd.s32 296, %v1151_v46 }
 0x155   :  { %v953_v11 = vsel %vm877_vm9, %v839_v12, %v915_v47  ;;  %v840_v59 = vadd.f32 %v2682_v32, %v785_v21  ;;  %v1440_v15 = vadd.f32 %v1439_v34, %v1438_v43  ;;  %v1563_v4 = vadd.f32 %v1562_v56, %v1561_v10 }
 0x156   :  { %v1743_v35 = vpack.c.bf16 %v953_v11, %v953_v11  ;;  %v443_v27 = vpop.f32.mrf.mxu0  ;;  %v792_v42 = vpop.f32.mrf.mxu1  ;;  %v1494_v54 = vmul.f32 %v953_v11, %v953_v11  ;;  %v1445_v1 = vsel %vm212_vm2, %v953_v11, 0.0  ;;  %vm1265_vm13 = vcmp.lt.s32.totalorder %v1188_v26, 300 }
 0x157   :  { %vm878_vm10 = vcmp.ge.f32.partialorder %v840_v59, 0.0  ;;  %v916_v39 = vmul.f32 0.0, %v840_v59  ;;  %v788_v41 = vadd.f32 %v787_v23, %v443_v27  ;;  %v1442_v62 = vadd.f32 %v1441_v37, %v1440_v15 }
 0x158   :  { %1144 = vst.msk [vmem:[%s2734_s5 + $0x84] sm:$0xf] %vm1110_vm4, %v1743_v35  ;;  %v1864_v49 = vpop.f32.mrf.mxu0  ;;  %v1945_v53 = vpop.f32.mrf.mxu1  ;;  %v1564_v40 = vsel %vm212_vm2, %v1494_v54, 0.0 }
 0x159   :  { %v954_v51 = vsel %vm878_vm10, %v840_v59, %v916_v39  ;;  %v841_v52 = vadd.f32 %v2682_v32, %v788_v41  ;;  %v1444_v7 = vadd.f32 %v1443_v58, %v1442_v62  ;;  %v1565_v2 = vadd.f32 %v1564_v40, %v1563_v4 }
 0x15a   :  { %v1744_v55 = vpack.c.bf16 %v954_v51, %v954_v51  ;;  %v448_v31 = vpop.f32.mrf.mxu0  ;;  %v795_v61 = vpop.f32.mrf.mxu1  ;;  %v1495_v50 = vmul.f32 %v954_v51, %v954_v51  ;;  %v1447_v8 = vsel %vm212_vm2, %v954_v51, 0.0 }
 0x15b   :  { %vm879_vm11 = vcmp.ge.f32.partialorder %v841_v52, 0.0  ;;  %v917_v60 = vmul.f32 0.0, %v841_v52  ;;  %v793_v16 = vadd.f32 %v792_v42, %v448_v31  ;;  %v1446_v14 = vadd.f32 %v1445_v1, %v1444_v7 }
 0x15c   :  { %1145 = vst.msk [vmem:[%s2734_s5 + $0x88] sm:$0xf] %vm1110_vm4, %v1744_v55  ;;  %v1867_v17 = vpop.f32.mrf.mxu0  ;;  %v1946_v6 = vpop.f32.mrf.mxu1  ;;  %v1566_v20 = vsel %vm212_vm2, %v1495_v50, 0.0 }
 0x15d   :  { %v955_v30 = vsel %vm879_vm11, %v841_v52, %v917_v60  ;;  %v842_v5 = vadd.f32 %v2682_v32, %v793_v16  ;;  %v1448_v24 = vadd.f32 %v1447_v8, %v1446_v14  ;;  %v1567_v11 = vadd.f32 %v1566_v20, %v1565_v2 }
 0x15e   :  { %v1745_v9 = vpack.c.bf16 %v955_v30, %v955_v30  ;;  %v451_v12 = vpop.f32.mrf.mxu0  ;;  %v1496_v36 = vmul.f32 %v955_v30, %v955_v30  ;;  %v1449_v47 = vsel %vm212_vm2, %v955_v30, 0.0 }
 0x15f   :  { %vm880_vm12 = vcmp.ge.f32.partialorder %v842_v5, 0.0  ;;  %v918_v13 = vmul.f32 0.0, %v842_v5  ;;  %v796_v48 = vadd.f32 %v795_v61, %v451_v12  ;;  %v1450_v59 = vadd.f32 %v1449_v47, %v1448_v24 }
 0x160   :  { %1146 = vst.msk [vmem:[%s2734_s5 + $0x8c] sm:$0xf] %vm1110_vm4, %v1745_v9  ;;  %v1868_v18 = vpop.f32.mrf.mxu0  ;;  %v1568_v25 = vsel %vm212_vm2, %v1496_v36, 0.0 }
 0x161   :  { %v956_v21 = vsel %vm880_vm12, %v842_v5, %v918_v13  ;;  %v843_v23 = vadd.f32 %v2682_v32, %v796_v48  ;;  %v1569_v19 = vadd.f32 %v1568_v25, %v1567_v11 }
 0x162   :  { %v1746_v45 = vpack.c.bf16 %v956_v21, %v956_v21  ;;  %v1497_v63 = vmul.f32 %v956_v21, %v956_v21  ;;  %v1451_v28 = vsel %vm212_vm2, %v956_v21, 0.0 }
 0x163   :  { %vm881_vm14 = vcmp.ge.f32.partialorder %v843_v23, 0.0  ;;  %v919_v29 = vmul.f32 0.0, %v843_v23  ;;  %v1452_v57 = vadd.f32 %v1451_v28, %v1450_v59 }
 0x164   :  { %1147 = vst.msk [vmem:[%s2734_s5 + $0x90] sm:$0xf] %vm1110_vm4, %v1746_v45  ;;  %v1570_v33 = vsel %vm212_vm2, %v1497_v63, 0.0 }
 0x165   :  { %v957_v32 = vsel %vm881_vm14, %v843_v23, %v919_v29  ;;  %v1571_v39 = vadd.f32 %v1570_v33, %v1569_v19 }
 0x166   :  { %v1747_v34 = vpack.c.bf16 %v957_v32, %v957_v32  ;;  %v1379_v35 = vsel %vm1265_vm13, %v957_v32, 0.0 }
 0x167   :  { %v1453_v27 = vsel %vm212_vm2, %v1379_v35, 0.0  ;;  %v1498_v38 = vmul.f32 %v1379_v35, %v1379_v35 }
 0x168   :  { %1148 = vst.msk [vmem:[%s2734_s5 + $0x94] sm:$0xf] %vm1110_vm4, %v1747_v34  ;;  %v1454_v41 = vadd.f32 %v1453_v27, %v1452_v57 }
 0x169   :  { %v1572_v42 = vsel %vm212_vm2, %v1498_v38, 0.0 }
 0x16a   :  { %v1455_v43 = vrot.slane %v1454_v41, 4  ;;  %v1573_v44 = vadd.f32 %v1572_v42, %v1571_v39 }
 0x16c   :  { %v1456_v22 = vadd.f32 %v1455_v43, %v1454_v41  ;;  %v1574_v49 = vrot.slane %v1573_v44, 4 }
 0x16e   :  { %v1457_v46 = vrot.slane %v1456_v22, 2  ;;  %v1575_v37 = vadd.f32 %v1574_v49, %v1573_v44 }
 0x170   :  { %v1458_v3 = vadd.f32 %v1457_v46, %v1456_v22  ;;  %v1576_v51 = vrot.slane %v1575_v37, 2 }
 0x172   :  { %v1459_v52 = vrot.slane %v1458_v3, 1  ;;  %v1577_v53 = vadd.f32 %v1576_v51, %v1575_v37 }
 0x174   :  { %v1578_v15 = vrot.slane %v1577_v53, 1  ;;  %v1460_v0 = vadd.f32 %v1459_v52, %v1458_v3 }
 0x176   :  { %v1579_v54 = vadd.f32 %v1578_v15, %v1577_v53 }
 0x178   :  { %v1581_v55 = vsel %vm1580_vm15, %v1460_v0, %v1579_v54 }
 0x179   :  { %1583 = vst.msk [vmem:[%s2735_s6] sm:$0x3] %vm1582_vm0, %v1581_v55 }

</bundles_post_ra>
